<compile_context>
chip_gen: v6e
topology: v6e:2x2x1
jax: 0.10.0
libtpu: 0.0.40
codegen_flags: <defaults>
</compile_context>

<pallas_src>
import functools

import jax
import jax.numpy as jnp
from jax import lax
from jax.experimental import pallas as pl
from jax.experimental.pallas import tpu as pltpu

LANE = 128  # TPU lane width; all channel axes are padded to this.


def _group_norm(yf, bsz, gamma, beta, gm, gm_t, n, eps=1e-5):
    """GroupNorm over a (bsz*H*W, C) f32 tile with per-sample statistics.

    gm   : (C, G) one-hot channel->group matrix (zero rows for padded channels)
    gm_t : (G, C) transpose (zero columns for padded channels)
    n    : elements per (sample, group) = H*W*channels_per_group (real channels)
    """
    bm, c = yf.shape
    hw = bm // bsz
    y3 = yf.reshape(bsz, hw, c)
    s1 = jnp.sum(y3, axis=1)                                   # (B, C)
    s2 = jnp.sum(y3 * y3, axis=1)                              # (B, C)
    # Two fused (2B, C) x (C, G) / (2B, G) x (G, C) matmuls instead of four M=1.
    sg = jnp.dot(jnp.concatenate([s1, s2], axis=0), gm,
                 preferred_element_type=jnp.float32)           # (2B, G)
    mean_g = sg[:bsz] / n
    var_g = sg[bsz:] / n - mean_g * mean_g
    inv_g = lax.rsqrt(var_g + eps)
    sc = jnp.dot(jnp.concatenate([mean_g, inv_g], axis=0), gm_t,
                 preferred_element_type=jnp.float32)           # (2B, C)
    mean_c = sc[:bsz].reshape(bsz, 1, c)
    inv_c = sc[bsz:].reshape(bsz, 1, c)
    yn = (y3 - mean_c) * inv_c * gamma + beta
    return yn.reshape(bm, c)


def _bottleneck_kernel(x_ref,
                       w1_ref, b1_ref, g1_ref, be1_ref, gm1_ref, gm1t_ref,
                       w2_ref, b2_ref, g2_ref, be2_ref,
                       w3_ref, b3_ref, g3_ref, be3_ref, gm3_ref, gm3t_ref,
                       o_ref, pad_ref, *, H, W, n1, n3):
    bsz = x_ref.shape[0]
    C = x_ref.shape[-1]            # lane-padded channel width (128)
    C1 = w1_ref.shape[-1]          # lane-padded planes//4 width (128)

    xf = x_ref[...].astype(jnp.float32).reshape(bsz * H * W, C)

    # ---- conv1 (1x1) + GroupNorm + ReLU --------------------------------
    y = jnp.dot(xf.astype(jnp.bfloat16), w1_ref[...],
                preferred_element_type=jnp.float32) + b1_ref[...]
    y = _group_norm(y, bsz, g1_ref[...], be1_ref[...],
                    gm1_ref[...], gm1t_ref[...], n1)
    y = jnp.maximum(y, 0.0)

    # ---- conv2 (3x3, pad=1, stride=1): padded scratch -> im2col -> 1 matmul
    y4 = y.reshape(bsz, H, W, C1)
    # Re-zero only the 1-element border each step (interior is overwritten).
    # Not "once under program_id==0": with a "parallel" batch axis each
    # megacore owns its own scratch instance, so step 0 may not run on it.
    zh = jnp.zeros((bsz, 1, W + 2, C1), jnp.float32)
    zw = jnp.zeros((bsz, H, 1, C1), jnp.float32)
    pad_ref[:, 0:1, :, :] = zh
    pad_ref[:, H + 1:H + 2, :, :] = zh
    pad_ref[:, 1:H + 1, 0:1, :] = zw
    pad_ref[:, 1:H + 1, W + 1:W + 2, :] = zw
    pad_ref[:, 1:H + 1, 1:W + 1, :] = y4
    cols = [pad_ref[:, ky:ky + H, kx:kx + W, :]
            for ky in range(3) for kx in range(3)]
    patch = jnp.concatenate(cols, axis=-1).reshape(bsz * H * W, 9 * C1)
    y = jnp.dot(patch.astype(jnp.bfloat16), w2_ref[...],
                preferred_element_type=jnp.float32) + b2_ref[...]
    y = _group_norm(y, bsz, g2_ref[...], be2_ref[...],
                    gm1_ref[...], gm1t_ref[...], n1)
    y = jnp.maximum(y, 0.0)

    # ---- conv3 (1x1) + GroupNorm + ReLU --------------------------------
    y = jnp.dot(y.astype(jnp.bfloat16), w3_ref[...],
                preferred_element_type=jnp.float32) + b3_ref[...]
    y = _group_norm(y, bsz, g3_ref[...], be3_ref[...],
                    gm3_ref[...], gm3t_ref[...], n3)
    y = jnp.maximum(y, 0.0)

    # ---- identity residual + ReLU (stride == 1, in_planes == planes) ---
    out = jnp.maximum(xf + y, 0.0)
    o_ref[...] = out.reshape(bsz, H, W, C).astype(o_ref.dtype)


def _pad_to(a, axis, size):
    pad = [(0, 0)] * a.ndim
    pad[axis] = (0, size - a.shape[axis])
    return jnp.pad(a, pad)


def _group_onehot(c_real, num_groups):
    """(LANE, G) one-hot channel->group matrix; padded channels map nowhere."""
    cg = c_real // num_groups
    ci = jnp.arange(LANE)
    gm = (ci[:, None] // cg) == jnp.arange(num_groups)[None, :]
    gm = (gm & (ci[:, None] < c_real)).astype(jnp.float32)
    return gm, gm.T


def bottleneck_block(x_nchw, torch_params, num_groups, batch_block=1):
    """BottleneckBlock forward (norm_fn='group', stride=1), NCHW in / NCHW out."""
    (w1_t, b1, g1, be1, w2_t, b2, g2, be2, w3_t, b3, g3, be3) = torch_params
    N, Cin, H, W = x_nchw.shape
    C1 = w1_t.shape[0]
    P = w3_t.shape[0]
    assert Cin == P, "identity shortcut requires in_planes == planes (stride=1)"
    assert N % batch_block == 0
    assert max(Cin, C1, P) <= LANE  # TODO(synk): lane-tile channels > 128

    # --- lane-dense (128-wide) parameter layouts; bf16 MXU operands ---------
    w1 = _pad_to(_pad_to(jnp.transpose(w1_t[:, :, 0, 0]), 0, LANE), 1,
                 LANE).astype(jnp.bfloat16)                          # (128, 128)
    w2 = jnp.transpose(w2_t, (2, 3, 1, 0))                           # (3,3,Ci,Co)
    w2 = _pad_to(_pad_to(w2, 2, LANE), 3, LANE)
    w2 = w2.reshape(9 * LANE, LANE).astype(jnp.bfloat16)             # (1152, 128)
    w3 = _pad_to(_pad_to(jnp.transpose(w3_t[:, :, 0, 0]), 0, LANE), 1,
                 LANE).astype(jnp.bfloat16)                          # (128, 128)

    def vec(v):
        return _pad_to(v.astype(jnp.float32).reshape(1, -1), 1, LANE)

    gm1, gm1t = _group_onehot(C1, num_groups)
    gm3, gm3t = _group_onehot(P, num_groups)
    n1 = float(H * W * (C1 // num_groups))
    n3 = float(H * W * (P // num_groups))

    params = (w1, vec(b1), vec(g1), vec(be1), gm1, gm1t,
              w2, vec(b2), vec(g2), vec(be2),
              w3, vec(b3), vec(g3), vec(be3), gm3, gm3t)

    x_pad = _pad_to(jnp.transpose(x_nchw, (0, 2, 3, 1)), 3, LANE)    # NHWC, 128

    kernel = functools.partial(_bottleneck_kernel, H=H, W=W, n1=n1, n3=n3)

    def full_spec(p):
        return pl.BlockSpec(p.shape, lambda n, _nd=p.ndim: (0,) * _nd)

    bb = batch_block
    in_specs = [pl.BlockSpec((bb, H, W, LANE), lambda n: (n, 0, 0, 0))]
    in_specs += [full_spec(p) for p in params]
    out_spec = pl.BlockSpec((bb, H, W, LANE), lambda n: (n, 0, 0, 0))

    out = pl.pallas_call(
        kernel,
        out_shape=jax.ShapeDtypeStruct((N, H, W, LANE), x_pad.dtype),
        grid_spec=pltpu.PrefetchScalarGridSpec(
            num_scalar_prefetch=0,
            grid=(N // bb,),
            in_specs=in_specs,
            out_specs=out_spec,
            scratch_shapes=[pltpu.VMEM((bb, H + 2, W + 2, LANE), jnp.float32)],
        ),
        compiler_params=pltpu.CompilerParams(
            dimension_semantics=("parallel",),      # batch axis: megacore-safe
            vmem_limit_bytes=48 * 1024 * 1024,      # ample; < v7x 64 MiB physical
        ),
    )(x_pad, *params)

    return jnp.transpose(out[..., :P], (0, 3, 1, 2))    # strip pad, back to NCHW


# ---------------- pure-JAX reference (NCHW, matches PyTorch semantics) -------

def _conv2d_nchw(x, w, b, stride=1, padding=0):
    y = lax.conv_general_dilated(
        x, w, window_strides=(stride, stride),
        padding=[(padding, padding), (padding, padding)],
        dimension_numbers=("NCHW", "OIHW", "NCHW"),
        precision=lax.Precision.HIGHEST)
    return y + b.reshape(1, -1, 1, 1)


def _group_norm_nchw(x, gamma, beta, num_groups, eps=1e-5):
    N, C, H, W = x.shape
    xr = x.reshape(N, num_groups, -1)
    mean = jnp.mean(xr, axis=2, keepdims=True)
    var = jnp.var(xr, axis=2, keepdims=True)
    xn = ((xr - mean) / jnp.sqrt(var + eps)).reshape(N, C, H, W)
    return xn * gamma.reshape(1, C, 1, 1) + beta.reshape(1, C, 1, 1)


def reference_forward(x, tp, num_groups):
    (w1, b1, g1, be1, w2, b2, g2, be2, w3, b3, g3, be3) = tp
    y = jax.nn.relu(_group_norm_nchw(_conv2d_nchw(x, w1, b1), g1, be1, num_groups))
    y = jax.nn.relu(_group_norm_nchw(_conv2d_nchw(y, w2, b2, padding=1), g2, be2, num_groups))
    y = jax.nn.relu(_group_norm_nchw(_conv2d_nchw(y, w3, b3), g3, be3, num_groups))
    return jax.nn.relu(x + y)


if __name__ == "__main__":
    N, in_planes, H, W = 4, 32, 16, 16
    planes = 32                      # stride=1 => identity shortcut
    C1 = planes // 4                 # 8
    G = planes // 8                  # 4 groups

    key = jax.random.PRNGKey(0)
    ks = jax.random.split(key, 13)

    # Deterministic synthetic parameters (PyTorch layouts).
    w1_t = 0.1 * jax.random.normal(ks[0], (C1, in_planes, 1, 1), jnp.float32)
    b1_t = 0.05 * jax.random.normal(ks[1], (C1,), jnp.float32)
    g1 = 1.0 + 0.1 * jax.random.normal(ks[2], (C1,), jnp.float32)
    be1 = 0.1 * jax.random.normal(ks[3], (C1,), jnp.float32)

    w2_t = 0.1 * jax.random.normal(ks[4], (C1, C1, 3, 3), jnp.float32)
    b2_t = 0.05 * jax.random.normal(ks[5], (C1,), jnp.float32)
    g2 = 1.0 + 0.1 * jax.random.normal(ks[6], (C1,), jnp.float32)
    be2 = 0.1 * jax.random.normal(ks[7], (C1,), jnp.float32)

    w3_t = 0.1 * jax.random.normal(ks[8], (planes, C1, 1, 1), jnp.float32)
    b3_t = 0.05 * jax.random.normal(ks[9], (planes,), jnp.float32)
    g3 = 1.0 + 0.1 * jax.random.normal(ks[10], (planes,), jnp.float32)
    be3 = 0.1 * jax.random.normal(ks[11], (planes,), jnp.float32)

    x_nchw = jax.random.normal(ks[12], (N, in_planes, H, W), jnp.float32)

    torch_params = (w1_t, b1_t, g1, be1, w2_t, b2_t, g2, be2,
                    w3_t, b3_t, g3, be3)

    run = jax.jit(lambda xx, tp: bottleneck_block(xx, tp, G, batch_block=2))
    out = jax.block_until_ready(run(x_nchw, torch_params))

    ref = reference_forward(x_nchw, torch_params, G)
    err = float(jnp.max(jnp.abs(out - ref)))
    # Kernel uses bf16 MXU operands with f32 accumulation; reference is pure
    # f32 (HIGHEST precision), so allow a bf16-level tolerance.
    assert err < 5e-2, f"max abs err {err}"
    print("KERNEL_OK")
</pallas_src>

<mosaic_0001>
module attributes {stable_mosaic.version = 11 : i64} {
  func.func @_bottleneck_kernel(%arg0: i32, %arg1: memref<2x16x16x128xf32, #tpu.memory_space<vmem>>, %arg2: memref<128x128xbf16, #tpu.memory_space<vmem>>, %arg3: memref<1x128xf32, #tpu.memory_space<vmem>>, %arg4: memref<1x128xf32, #tpu.memory_space<vmem>>, %arg5: memref<1x128xf32, #tpu.memory_space<vmem>>, %arg6: memref<128x4xf32, #tpu.memory_space<vmem>>, %arg7: memref<4x128xf32, #tpu.memory_space<vmem>>, %arg8: memref<1152x128xbf16, #tpu.memory_space<vmem>>, %arg9: memref<1x128xf32, #tpu.memory_space<vmem>>, %arg10: memref<1x128xf32, #tpu.memory_space<vmem>>, %arg11: memref<1x128xf32, #tpu.memory_space<vmem>>, %arg12: memref<128x128xbf16, #tpu.memory_space<vmem>>, %arg13: memref<1x128xf32, #tpu.memory_space<vmem>>, %arg14: memref<1x128xf32, #tpu.memory_space<vmem>>, %arg15: memref<1x128xf32, #tpu.memory_space<vmem>>, %arg16: memref<128x4xf32, #tpu.memory_space<vmem>>, %arg17: memref<4x128xf32, #tpu.memory_space<vmem>>, %arg18: memref<2x16x16x128xf32, #tpu.memory_space<vmem>>, %arg19: memref<2x18x18x128xf32, #tpu.memory_space<vmem>>) attributes {dimension_semantics = [#tpu.dimension_semantics<parallel>], iteration_bounds = array<i64: 2>, scalar_prefetch = 0 : i64, scratch_operands = 1 : i64, tpu.core_type = #tpu.core_type<tc>, window_params = [{transform_indices = @transform_0, window_bounds = array<i64: 2, 16, 16, 128>}, {pipeline_mode = #tpu.pipeline_mode<synchronous>, transform_indices = @transform_1, window_bounds = array<i64: 128, 128>}, {pipeline_mode = #tpu.pipeline_mode<synchronous>, transform_indices = @transform_2, window_bounds = array<i64: 1, 128>}, {pipeline_mode = #tpu.pipeline_mode<synchronous>, transform_indices = @transform_3, window_bounds = array<i64: 1, 128>}, {pipeline_mode = #tpu.pipeline_mode<synchronous>, transform_indices = @transform_4, window_bounds = array<i64: 1, 128>}, {pipeline_mode = #tpu.pipeline_mode<synchronous>, transform_indices = @transform_5, window_bounds = array<i64: 128, 4>}, {pipeline_mode = #tpu.pipeline_mode<synchronous>, transform_indices = @transform_6, window_bounds = array<i64: 4, 128>}, {pipeline_mode = #tpu.pipeline_mode<synchronous>, transform_indices = @transform_7, window_bounds = array<i64: 1152, 128>}, {pipeline_mode = #tpu.pipeline_mode<synchronous>, transform_indices = @transform_8, window_bounds = array<i64: 1, 128>}, {pipeline_mode = #tpu.pipeline_mode<synchronous>, transform_indices = @transform_9, window_bounds = array<i64: 1, 128>}, {pipeline_mode = #tpu.pipeline_mode<synchronous>, transform_indices = @transform_10, window_bounds = array<i64: 1, 128>}, {pipeline_mode = #tpu.pipeline_mode<synchronous>, transform_indices = @transform_11, window_bounds = array<i64: 128, 128>}, {pipeline_mode = #tpu.pipeline_mode<synchronous>, transform_indices = @transform_12, window_bounds = array<i64: 1, 128>}, {pipeline_mode = #tpu.pipeline_mode<synchronous>, transform_indices = @transform_13, window_bounds = array<i64: 1, 128>}, {pipeline_mode = #tpu.pipeline_mode<synchronous>, transform_indices = @transform_14, window_bounds = array<i64: 1, 128>}, {pipeline_mode = #tpu.pipeline_mode<synchronous>, transform_indices = @transform_15, window_bounds = array<i64: 128, 4>}, {pipeline_mode = #tpu.pipeline_mode<synchronous>, transform_indices = @transform_16, window_bounds = array<i64: 4, 128>}, {transform_indices = @transform_17, window_bounds = array<i64: 2, 16, 16, 128>}]} {
    %c0 = arith.constant 0 : index
    %c0_0 = arith.constant 0 : index
    %c0_1 = arith.constant 0 : index
    %c0_2 = arith.constant 0 : index
    %0 = vector.load %arg1[%c0, %c0_0, %c0_1, %c0_2] : memref<2x16x16x128xf32, #tpu.memory_space<vmem>>, vector<2x16x16x128xf32>
    %1 = vector.shape_cast %0 : vector<2x16x16x128xf32> to vector<512x128xf32>
    %2 = arith.truncf %1 : vector<512x128xf32> to vector<512x128xbf16>
    %c0_3 = arith.constant 0 : index
    %c0_4 = arith.constant 0 : index
    %3 = vector.load %arg2[%c0_3, %c0_4] : memref<128x128xbf16, #tpu.memory_space<vmem>>, vector<128x128xbf16>
    %cst = arith.constant dense<0.000000e+00> : vector<512x128xf32>
    %4 = tpu.matmul %2, %3, %cst {dimension_numbers = #tpu.dot_dimension_numbers<[1], [0], [0], [1], [0, 0, 1, 1], [], []>} : vector<512x128xbf16>, vector<128x128xbf16>, vector<512x128xf32> -> vector<512x128xf32>
    %c0_5 = arith.constant 0 : index
    %c0_6 = arith.constant 0 : index
    %5 = vector.load %arg3[%c0_5, %c0_6] : memref<1x128xf32, #tpu.memory_space<vmem>>, vector<1x128xf32>
    %6 = vector.broadcast %5 : vector<1x128xf32> to vector<512x128xf32>
    %7 = arith.addf %4, %6 : vector<512x128xf32>
    %c0_7 = arith.constant 0 : index
    %c0_8 = arith.constant 0 : index
    %8 = vector.load %arg4[%c0_7, %c0_8] : memref<1x128xf32, #tpu.memory_space<vmem>>, vector<1x128xf32>
    %c0_9 = arith.constant 0 : index
    %c0_10 = arith.constant 0 : index
    %9 = vector.load %arg5[%c0_9, %c0_10] : memref<1x128xf32, #tpu.memory_space<vmem>>, vector<1x128xf32>
    %c0_11 = arith.constant 0 : index
    %c0_12 = arith.constant 0 : index
    %10 = vector.load %arg6[%c0_11, %c0_12] : memref<128x4xf32, #tpu.memory_space<vmem>>, vector<128x4xf32>
    %c0_13 = arith.constant 0 : index
    %c0_14 = arith.constant 0 : index
    %11 = vector.load %arg7[%c0_13, %c0_14] : memref<4x128xf32, #tpu.memory_space<vmem>>, vector<4x128xf32>
    %12 = vector.shape_cast %7 : vector<512x128xf32> to vector<2x256x128xf32>
    %cst_15 = arith.constant dense<0.000000e+00> : vector<2x128xf32>
    %13 = vector.multi_reduction <add>, %12, %cst_15 [1] : vector<2x256x128xf32> to vector<2x128xf32>
    %14 = arith.mulf %12, %12 : vector<2x256x128xf32>
    %cst_16 = arith.constant dense<0.000000e+00> : vector<2x128xf32>
    %15 = vector.multi_reduction <add>, %14, %cst_16 [1] : vector<2x256x128xf32> to vector<2x128xf32>
    %16 = tpu.concatenate %13, %15 in 0 : vector<2x128xf32>, vector<2x128xf32> -> vector<4x128xf32>
    %cst_17 = arith.constant dense<0.000000e+00> : vector<4x4xf32>
    %17 = tpu.matmul %16, %10, %cst_17 {dimension_numbers = #tpu.dot_dimension_numbers<[1], [0], [0], [1], [0, 0, 1, 1], [], []>} : vector<4x128xf32>, vector<128x4xf32>, vector<4x4xf32> -> vector<4x4xf32>
    %18 = vector.extract_strided_slice %17 {offsets = [0, 0], sizes = [2, 4], strides = [1, 1]} : vector<4x4xf32> to vector<2x4xf32>
    %cst_18 = arith.constant 5.120000e+02 : f32
    %19 = vector.broadcast %cst_18 : f32 to vector<2x4xf32>
    %20 = arith.divf %18, %19 : vector<2x4xf32>
    %21 = vector.extract_strided_slice %17 {offsets = [2, 0], sizes = [2, 4], strides = [1, 1]} : vector<4x4xf32> to vector<2x4xf32>
    %cst_19 = arith.constant 5.120000e+02 : f32
    %22 = vector.broadcast %cst_19 : f32 to vector<2x4xf32>
    %23 = arith.divf %21, %22 : vector<2x4xf32>
    %24 = arith.mulf %20, %20 : vector<2x4xf32>
    %25 = arith.subf %23, %24 : vector<2x4xf32>
    %cst_20 = arith.constant 9.99999974E-6 : f32
    %26 = vector.broadcast %cst_20 : f32 to vector<2x4xf32>
    %27 = arith.addf %25, %26 : vector<2x4xf32>
    %28 = math.rsqrt %27 : vector<2x4xf32>
    %29 = tpu.concatenate %20, %28 in 0 : vector<2x4xf32>, vector<2x4xf32> -> vector<4x4xf32>
    %cst_21 = arith.constant dense<0.000000e+00> : vector<4x128xf32>
    %30 = tpu.matmul %29, %11, %cst_21 {dimension_numbers = #tpu.dot_dimension_numbers<[1], [0], [0], [1], [0, 0, 1, 1], [], []>} : vector<4x4xf32>, vector<4x128xf32>, vector<4x128xf32> -> vector<4x128xf32>
    %31 = vector.extract_strided_slice %30 {offsets = [0, 0], sizes = [2, 128], strides = [1, 1]} : vector<4x128xf32> to vector<2x128xf32>
    %32 = vector.shape_cast %31 : vector<2x128xf32> to vector<2x1x128xf32>
    %33 = vector.extract_strided_slice %30 {offsets = [2, 0], sizes = [2, 128], strides = [1, 1]} : vector<4x128xf32> to vector<2x128xf32>
    %34 = vector.shape_cast %33 : vector<2x128xf32> to vector<2x1x128xf32>
    %35 = vector.broadcast %32 : vector<2x1x128xf32> to vector<2x256x128xf32>
    %36 = arith.subf %12, %35 : vector<2x256x128xf32>
    %37 = vector.broadcast %34 : vector<2x1x128xf32> to vector<2x256x128xf32>
    %38 = arith.mulf %36, %37 : vector<2x256x128xf32>
    %39 = vector.shape_cast %8 : vector<1x128xf32> to vector<1x1x128xf32>
    %40 = vector.broadcast %39 : vector<1x1x128xf32> to vector<2x256x128xf32>
    %41 = arith.mulf %38, %40 : vector<2x256x128xf32>
    %42 = vector.shape_cast %9 : vector<1x128xf32> to vector<1x1x128xf32>
    %43 = vector.broadcast %42 : vector<1x1x128xf32> to vector<2x256x128xf32>
    %44 = arith.addf %41, %43 : vector<2x256x128xf32>
    %45 = vector.shape_cast %44 : vector<2x256x128xf32> to vector<512x128xf32>
    %cst_22 = arith.constant 0.000000e+00 : f32
    %46 = vector.broadcast %cst_22 : f32 to vector<512x128xf32>
    %47 = arith.maximumf %45, %46 : vector<512x128xf32>
    %48 = vector.shape_cast %47 : vector<512x128xf32> to vector<2x16x16x128xf32>
    %cst_23 = arith.constant 0.000000e+00 : f32
    %49 = vector.broadcast %cst_23 : f32 to vector<2x1x18x128xf32>
    %cst_24 = arith.constant 0.000000e+00 : f32
    %50 = vector.broadcast %cst_24 : f32 to vector<2x16x1x128xf32>
    %c0_25 = arith.constant 0 : index
    %c0_26 = arith.constant 0 : index
    %c0_27 = arith.constant 0 : index
    %c0_28 = arith.constant 0 : index
    %51 = vector.load %arg19[%c0_25, %c0_26, %c0_27, %c0_28] : memref<2x18x18x128xf32, #tpu.memory_space<vmem>>, vector<2x1x18x128xf32>
    tpu.vector_store %arg19[%c0_25, %c0_26, %c0_27, %c0_28], %49 {strides = array<i32>} : memref<2x18x18x128xf32, #tpu.memory_space<vmem>>, vector<2x1x18x128xf32>,
    %c0_29 = arith.constant 0 : index
    %c17 = arith.constant 17 : index
    %c0_30 = arith.constant 0 : index
    %c0_31 = arith.constant 0 : index
    %52 = vector.load %arg19[%c0_29, %c17, %c0_30, %c0_31] : memref<2x18x18x128xf32, #tpu.memory_space<vmem>>, vector<2x1x18x128xf32>
    tpu.vector_store %arg19[%c0_29, %c17, %c0_30, %c0_31], %49 {strides = array<i32>} : memref<2x18x18x128xf32, #tpu.memory_space<vmem>>, vector<2x1x18x128xf32>,
    %c0_32 = arith.constant 0 : index
    %c1 = arith.constant 1 : index
    %c0_33 = arith.constant 0 : index
    %c0_34 = arith.constant 0 : index
    %53 = vector.load %arg19[%c0_32, %c1, %c0_33, %c0_34] : memref<2x18x18x128xf32, #tpu.memory_space<vmem>>, vector<2x16x1x128xf32>
    tpu.vector_store %arg19[%c0_32, %c1, %c0_33, %c0_34], %50 {strides = array<i32>} : memref<2x18x18x128xf32, #tpu.memory_space<vmem>>, vector<2x16x1x128xf32>,
    %c0_35 = arith.constant 0 : index
    %c1_36 = arith.constant 1 : index
    %c17_37 = arith.constant 17 : index
    %c0_38 = arith.constant 0 : index
    %54 = vector.load %arg19[%c0_35, %c1_36, %c17_37, %c0_38] : memref<2x18x18x128xf32, #tpu.memory_space<vmem>>, vector<2x16x1x128xf32>
    tpu.vector_store %arg19[%c0_35, %c1_36, %c17_37, %c0_38], %50 {strides = array<i32>} : memref<2x18x18x128xf32, #tpu.memory_space<vmem>>, vector<2x16x1x128xf32>,
    %c0_39 = arith.constant 0 : index
    %c1_40 = arith.constant 1 : index
    %c1_41 = arith.constant 1 : index
    %c0_42 = arith.constant 0 : index
    %55 = vector.load %arg19[%c0_39, %c1_40, %c1_41, %c0_42] : memref<2x18x18x128xf32, #tpu.memory_space<vmem>>, vector<2x16x16x128xf32>
    tpu.vector_store %arg19[%c0_39, %c1_40, %c1_41, %c0_42], %48 {strides = array<i32>} : memref<2x18x18x128xf32, #tpu.memory_space<vmem>>, vector<2x16x16x128xf32>,
    %c0_43 = arith.constant 0 : index
    %c0_44 = arith.constant 0 : index
    %c0_45 = arith.constant 0 : index
    %c0_46 = arith.constant 0 : index
    %56 = vector.load %arg19[%c0_43, %c0_44, %c0_45, %c0_46] : memref<2x18x18x128xf32, #tpu.memory_space<vmem>>, vector<2x16x16x128xf32>
    %c0_47 = arith.constant 0 : index
    %c0_48 = arith.constant 0 : index
    %c1_49 = arith.constant 1 : index
    %c0_50 = arith.constant 0 : index
    %57 = vector.load %arg19[%c0_47, %c0_48, %c1_49, %c0_50] : memref<2x18x18x128xf32, #tpu.memory_space<vmem>>, vector<2x16x16x128xf32>
    %c0_51 = arith.constant 0 : index
    %c0_52 = arith.constant 0 : index
    %c2 = arith.constant 2 : index
    %c0_53 = arith.constant 0 : index
    %58 = vector.load %arg19[%c0_51, %c0_52, %c2, %c0_53] : memref<2x18x18x128xf32, #tpu.memory_space<vmem>>, vector<2x16x16x128xf32>
    %c0_54 = arith.constant 0 : index
    %c1_55 = arith.constant 1 : index
    %c0_56 = arith.constant 0 : index
    %c0_57 = arith.constant 0 : index
    %59 = vector.load %arg19[%c0_54, %c1_55, %c0_56, %c0_57] : memref<2x18x18x128xf32, #tpu.memory_space<vmem>>, vector<2x16x16x128xf32>
    %c0_58 = arith.constant 0 : index
    %c1_59 = arith.constant 1 : index
    %c1_60 = arith.constant 1 : index
    %c0_61 = arith.constant 0 : index
    %60 = vector.load %arg19[%c0_58, %c1_59, %c1_60, %c0_61] : memref<2x18x18x128xf32, #tpu.memory_space<vmem>>, vector<2x16x16x128xf32>
    %c0_62 = arith.constant 0 : index
    %c1_63 = arith.constant 1 : index
    %c2_64 = arith.constant 2 : index
    %c0_65 = arith.constant 0 : index
    %61 = vector.load %arg19[%c0_62, %c1_63, %c2_64, %c0_65] : memref<2x18x18x128xf32, #tpu.memory_space<vmem>>, vector<2x16x16x128xf32>
    %c0_66 = arith.constant 0 : index
    %c2_67 = arith.constant 2 : index
    %c0_68 = arith.constant 0 : index
    %c0_69 = arith.constant 0 : index
    %62 = vector.load %arg19[%c0_66, %c2_67, %c0_68, %c0_69] : memref<2x18x18x128xf32, #tpu.memory_space<vmem>>, vector<2x16x16x128xf32>
    %c0_70 = arith.constant 0 : index
    %c2_71 = arith.constant 2 : index
    %c1_72 = arith.constant 1 : index
    %c0_73 = arith.constant 0 : index
    %63 = vector.load %arg19[%c0_70, %c2_71, %c1_72, %c0_73] : memref<2x18x18x128xf32, #tpu.memory_space<vmem>>, vector<2x16x16x128xf32>
    %c0_74 = arith.constant 0 : index
    %c2_75 = arith.constant 2 : index
    %c2_76 = arith.constant 2 : index
    %c0_77 = arith.constant 0 : index
    %64 = vector.load %arg19[%c0_74, %c2_75, %c2_76, %c0_77] : memref<2x18x18x128xf32, #tpu.memory_space<vmem>>, vector<2x16x16x128xf32>
    %65 = tpu.concatenate %56, %57, %58, %59, %60, %61, %62, %63, %64 in 3 : vector<2x16x16x128xf32>, vector<2x16x16x128xf32>, vector<2x16x16x128xf32>, vector<2x16x16x128xf32>, vector<2x16x16x128xf32>, vector<2x16x16x128xf32>, vector<2x16x16x128xf32>, vector<2x16x16x128xf32>, vector<2x16x16x128xf32> -> vector<2x16x16x1152xf32>
    %66 = vector.shape_cast %65 : vector<2x16x16x1152xf32> to vector<512x1152xf32>
    %67 = arith.truncf %66 : vector<512x1152xf32> to vector<512x1152xbf16>
    %c0_78 = arith.constant 0 : index
    %c0_79 = arith.constant 0 : index
    %68 = vector.load %arg8[%c0_78, %c0_79] : memref<1152x128xbf16, #tpu.memory_space<vmem>>, vector<1152x128xbf16>
    %cst_80 = arith.constant dense<0.000000e+00> : vector<512x128xf32>
    %69 = tpu.matmul %67, %68, %cst_80 {dimension_numbers = #tpu.dot_dimension_numbers<[1], [0], [0], [1], [0, 0, 1, 1], [], []>} : vector<512x1152xbf16>, vector<1152x128xbf16>, vector<512x128xf32> -> vector<512x128xf32>
    %c0_81 = arith.constant 0 : index
    %c0_82 = arith.constant 0 : index
    %70 = vector.load %arg9[%c0_81, %c0_82] : memref<1x128xf32, #tpu.memory_space<vmem>>, vector<1x128xf32>
    %71 = vector.broadcast %70 : vector<1x128xf32> to vector<512x128xf32>
    %72 = arith.addf %69, %71 : vector<512x128xf32>
    %c0_83 = arith.constant 0 : index
    %c0_84 = arith.constant 0 : index
    %73 = vector.load %arg10[%c0_83, %c0_84] : memref<1x128xf32, #tpu.memory_space<vmem>>, vector<1x128xf32>
    %c0_85 = arith.constant 0 : index
    %c0_86 = arith.constant 0 : index
    %74 = vector.load %arg11[%c0_85, %c0_86] : memref<1x128xf32, #tpu.memory_space<vmem>>, vector<1x128xf32>
    %c0_87 = arith.constant 0 : index
    %c0_88 = arith.constant 0 : index
    %75 = vector.load %arg6[%c0_87, %c0_88] : memref<128x4xf32, #tpu.memory_space<vmem>>, vector<128x4xf32>
    %c0_89 = arith.constant 0 : index
    %c0_90 = arith.constant 0 : index
    %76 = vector.load %arg7[%c0_89, %c0_90] : memref<4x128xf32, #tpu.memory_space<vmem>>, vector<4x128xf32>
    %77 = vector.shape_cast %72 : vector<512x128xf32> to vector<2x256x128xf32>
    %cst_91 = arith.constant dense<0.000000e+00> : vector<2x128xf32>
    %78 = vector.multi_reduction <add>, %77, %cst_91 [1] : vector<2x256x128xf32> to vector<2x128xf32>
    %79 = arith.mulf %77, %77 : vector<2x256x128xf32>
    %cst_92 = arith.constant dense<0.000000e+00> : vector<2x128xf32>
    %80 = vector.multi_reduction <add>, %79, %cst_92 [1] : vector<2x256x128xf32> to vector<2x128xf32>
    %81 = tpu.concatenate %78, %80 in 0 : vector<2x128xf32>, vector<2x128xf32> -> vector<4x128xf32>
    %cst_93 = arith.constant dense<0.000000e+00> : vector<4x4xf32>
    %82 = tpu.matmul %81, %75, %cst_93 {dimension_numbers = #tpu.dot_dimension_numbers<[1], [0], [0], [1], [0, 0, 1, 1], [], []>} : vector<4x128xf32>, vector<128x4xf32>, vector<4x4xf32> -> vector<4x4xf32>
    %83 = vector.extract_strided_slice %82 {offsets = [0, 0], sizes = [2, 4], strides = [1, 1]} : vector<4x4xf32> to vector<2x4xf32>
    %cst_94 = arith.constant 5.120000e+02 : f32
    %84 = vector.broadcast %cst_94 : f32 to vector<2x4xf32>
    %85 = arith.divf %83, %84 : vector<2x4xf32>
    %86 = vector.extract_strided_slice %82 {offsets = [2, 0], sizes = [2, 4], strides = [1, 1]} : vector<4x4xf32> to vector<2x4xf32>
    %cst_95 = arith.constant 5.120000e+02 : f32
    %87 = vector.broadcast %cst_95 : f32 to vector<2x4xf32>
    %88 = arith.divf %86, %87 : vector<2x4xf32>
    %89 = arith.mulf %85, %85 : vector<2x4xf32>
    %90 = arith.subf %88, %89 : vector<2x4xf32>
    %cst_96 = arith.constant 9.99999974E-6 : f32
    %91 = vector.broadcast %cst_96 : f32 to vector<2x4xf32>
    %92 = arith.addf %90, %91 : vector<2x4xf32>
    %93 = math.rsqrt %92 : vector<2x4xf32>
    %94 = tpu.concatenate %85, %93 in 0 : vector<2x4xf32>, vector<2x4xf32> -> vector<4x4xf32>
    %cst_97 = arith.constant dense<0.000000e+00> : vector<4x128xf32>
    %95 = tpu.matmul %94, %76, %cst_97 {dimension_numbers = #tpu.dot_dimension_numbers<[1], [0], [0], [1], [0, 0, 1, 1], [], []>} : vector<4x4xf32>, vector<4x128xf32>, vector<4x128xf32> -> vector<4x128xf32>
    %96 = vector.extract_strided_slice %95 {offsets = [0, 0], sizes = [2, 128], strides = [1, 1]} : vector<4x128xf32> to vector<2x128xf32>
    %97 = vector.shape_cast %96 : vector<2x128xf32> to vector<2x1x128xf32>
    %98 = vector.extract_strided_slice %95 {offsets = [2, 0], sizes = [2, 128], strides = [1, 1]} : vector<4x128xf32> to vector<2x128xf32>
    %99 = vector.shape_cast %98 : vector<2x128xf32> to vector<2x1x128xf32>
    %100 = vector.broadcast %97 : vector<2x1x128xf32> to vector<2x256x128xf32>
    %101 = arith.subf %77, %100 : vector<2x256x128xf32>
    %102 = vector.broadcast %99 : vector<2x1x128xf32> to vector<2x256x128xf32>
    %103 = arith.mulf %101, %102 : vector<2x256x128xf32>
    %104 = vector.shape_cast %73 : vector<1x128xf32> to vector<1x1x128xf32>
    %105 = vector.broadcast %104 : vector<1x1x128xf32> to vector<2x256x128xf32>
    %106 = arith.mulf %103, %105 : vector<2x256x128xf32>
    %107 = vector.shape_cast %74 : vector<1x128xf32> to vector<1x1x128xf32>
    %108 = vector.broadcast %107 : vector<1x1x128xf32> to vector<2x256x128xf32>
    %109 = arith.addf %106, %108 : vector<2x256x128xf32>
    %110 = vector.shape_cast %109 : vector<2x256x128xf32> to vector<512x128xf32>
    %cst_98 = arith.constant 0.000000e+00 : f32
    %111 = vector.broadcast %cst_98 : f32 to vector<512x128xf32>
    %112 = arith.maximumf %110, %111 : vector<512x128xf32>
    %113 = arith.truncf %112 : vector<512x128xf32> to vector<512x128xbf16>
    %c0_99 = arith.constant 0 : index
    %c0_100 = arith.constant 0 : index
    %114 = vector.load %arg12[%c0_99, %c0_100] : memref<128x128xbf16, #tpu.memory_space<vmem>>, vector<128x128xbf16>
    %cst_101 = arith.constant dense<0.000000e+00> : vector<512x128xf32>
    %115 = tpu.matmul %113, %114, %cst_101 {dimension_numbers = #tpu.dot_dimension_numbers<[1], [0], [0], [1], [0, 0, 1, 1], [], []>} : vector<512x128xbf16>, vector<128x128xbf16>, vector<512x128xf32> -> vector<512x128xf32>
    %c0_102 = arith.constant 0 : index
    %c0_103 = arith.constant 0 : index
    %116 = vector.load %arg13[%c0_102, %c0_103] : memref<1x128xf32, #tpu.memory_space<vmem>>, vector<1x128xf32>
    %117 = vector.broadcast %116 : vector<1x128xf32> to vector<512x128xf32>
    %118 = arith.addf %115, %117 : vector<512x128xf32>
    %c0_104 = arith.constant 0 : index
    %c0_105 = arith.constant 0 : index
    %119 = vector.load %arg14[%c0_104, %c0_105] : memref<1x128xf32, #tpu.memory_space<vmem>>, vector<1x128xf32>
    %c0_106 = arith.constant 0 : index
    %c0_107 = arith.constant 0 : index
    %120 = vector.load %arg15[%c0_106, %c0_107] : memref<1x128xf32, #tpu.memory_space<vmem>>, vector<1x128xf32>
    %c0_108 = arith.constant 0 : index
    %c0_109 = arith.constant 0 : index
    %121 = vector.load %arg16[%c0_108, %c0_109] : memref<128x4xf32, #tpu.memory_space<vmem>>, vector<128x4xf32>
    %c0_110 = arith.constant 0 : index
    %c0_111 = arith.constant 0 : index
    %122 = vector.load %arg17[%c0_110, %c0_111] : memref<4x128xf32, #tpu.memory_space<vmem>>, vector<4x128xf32>
    %123 = vector.shape_cast %118 : vector<512x128xf32> to vector<2x256x128xf32>
    %cst_112 = arith.constant dense<0.000000e+00> : vector<2x128xf32>
    %124 = vector.multi_reduction <add>, %123, %cst_112 [1] : vector<2x256x128xf32> to vector<2x128xf32>
    %125 = arith.mulf %123, %123 : vector<2x256x128xf32>
    %cst_113 = arith.constant dense<0.000000e+00> : vector<2x128xf32>
    %126 = vector.multi_reduction <add>, %125, %cst_113 [1] : vector<2x256x128xf32> to vector<2x128xf32>
    %127 = tpu.concatenate %124, %126 in 0 : vector<2x128xf32>, vector<2x128xf32> -> vector<4x128xf32>
    %cst_114 = arith.constant dense<0.000000e+00> : vector<4x4xf32>
    %128 = tpu.matmul %127, %121, %cst_114 {dimension_numbers = #tpu.dot_dimension_numbers<[1], [0], [0], [1], [0, 0, 1, 1], [], []>} : vector<4x128xf32>, vector<128x4xf32>, vector<4x4xf32> -> vector<4x4xf32>
    %129 = vector.extract_strided_slice %128 {offsets = [0, 0], sizes = [2, 4], strides = [1, 1]} : vector<4x4xf32> to vector<2x4xf32>
    %cst_115 = arith.constant 2.048000e+03 : f32
    %130 = vector.broadcast %cst_115 : f32 to vector<2x4xf32>
    %131 = arith.divf %129, %130 : vector<2x4xf32>
    %132 = vector.extract_strided_slice %128 {offsets = [2, 0], sizes = [2, 4], strides = [1, 1]} : vector<4x4xf32> to vector<2x4xf32>
    %cst_116 = arith.constant 2.048000e+03 : f32
    %133 = vector.broadcast %cst_116 : f32 to vector<2x4xf32>
    %134 = arith.divf %132, %133 : vector<2x4xf32>
    %135 = arith.mulf %131, %131 : vector<2x4xf32>
    %136 = arith.subf %134, %135 : vector<2x4xf32>
    %cst_117 = arith.constant 9.99999974E-6 : f32
    %137 = vector.broadcast %cst_117 : f32 to vector<2x4xf32>
    %138 = arith.addf %136, %137 : vector<2x4xf32>
    %139 = math.rsqrt %138 : vector<2x4xf32>
    %140 = tpu.concatenate %131, %139 in 0 : vector<2x4xf32>, vector<2x4xf32> -> vector<4x4xf32>
    %cst_118 = arith.constant dense<0.000000e+00> : vector<4x128xf32>
    %141 = tpu.matmul %140, %122, %cst_118 {dimension_numbers = #tpu.dot_dimension_numbers<[1], [0], [0], [1], [0, 0, 1, 1], [], []>} : vector<4x4xf32>, vector<4x128xf32>, vector<4x128xf32> -> vector<4x128xf32>
    %142 = vector.extract_strided_slice %141 {offsets = [0, 0], sizes = [2, 128], strides = [1, 1]} : vector<4x128xf32> to vector<2x128xf32>
    %143 = vector.shape_cast %142 : vector<2x128xf32> to vector<2x1x128xf32>
    %144 = vector.extract_strided_slice %141 {offsets = [2, 0], sizes = [2, 128], strides = [1, 1]} : vector<4x128xf32> to vector<2x128xf32>
    %145 = vector.shape_cast %144 : vector<2x128xf32> to vector<2x1x128xf32>
    %146 = vector.broadcast %143 : vector<2x1x128xf32> to vector<2x256x128xf32>
    %147 = arith.subf %123, %146 : vector<2x256x128xf32>
    %148 = vector.broadcast %145 : vector<2x1x128xf32> to vector<2x256x128xf32>
    %149 = arith.mulf %147, %148 : vector<2x256x128xf32>
    %150 = vector.shape_cast %119 : vector<1x128xf32> to vector<1x1x128xf32>
    %151 = vector.broadcast %150 : vector<1x1x128xf32> to vector<2x256x128xf32>
    %152 = arith.mulf %149, %151 : vector<2x256x128xf32>
    %153 = vector.shape_cast %120 : vector<1x128xf32> to vector<1x1x128xf32>
    %154 = vector.broadcast %153 : vector<1x1x128xf32> to vector<2x256x128xf32>
    %155 = arith.addf %152, %154 : vector<2x256x128xf32>
    %156 = vector.shape_cast %155 : vector<2x256x128xf32> to vector<512x128xf32>
    %cst_119 = arith.constant 0.000000e+00 : f32
    %157 = vector.broadcast %cst_119 : f32 to vector<512x128xf32>
    %158 = arith.maximumf %156, %157 : vector<512x128xf32>
    %159 = arith.addf %1, %158 : vector<512x128xf32>
    %cst_120 = arith.constant 0.000000e+00 : f32
    %160 = vector.broadcast %cst_120 : f32 to vector<512x128xf32>
    %161 = arith.maximumf %159, %160 : vector<512x128xf32>
    %162 = vector.shape_cast %161 : vector<512x128xf32> to vector<2x16x16x128xf32>
    %c0_121 = arith.constant 0 : index
    %c0_122 = arith.constant 0 : index
    %c0_123 = arith.constant 0 : index
    %c0_124 = arith.constant 0 : index
    %163 = vector.load %arg18[%c0_121, %c0_122, %c0_123, %c0_124] : memref<2x16x16x128xf32, #tpu.memory_space<vmem>>, vector<2x16x16x128xf32>
    tpu.vector_store %arg18[%c0_121, %c0_122, %c0_123, %c0_124], %162 {strides = array<i32>} : memref<2x16x16x128xf32, #tpu.memory_space<vmem>>, vector<2x16x16x128xf32>,
    return
  }
  func.func @transform_0(%arg0: i32) -> (i32, i32, i32, i32) {
    %c0_i32 = arith.constant 0 : i32
    %c0_i32_0 = arith.constant 0 : i32
    %c0_i32_1 = arith.constant 0 : i32
    %c0_i32_2 = arith.constant 0 : i32
    return %arg0, %c0_i32, %c0_i32_0, %c0_i32_1 : i32, i32, i32, i32
  }
  func.func @transform_1(%arg0: i32) -> (i32, i32) {
    %c0_i32 = arith.constant 0 : i32
    %c0_i32_0 = arith.constant 0 : i32
    %c0_i32_1 = arith.constant 0 : i32
    return %c0_i32, %c0_i32_0 : i32, i32
  }
  func.func @transform_2(%arg0: i32) -> (i32, i32) {
    %c0_i32 = arith.constant 0 : i32
    %c0_i32_0 = arith.constant 0 : i32
    %c0_i32_1 = arith.constant 0 : i32
    return %c0_i32, %c0_i32_0 : i32, i32
  }
  func.func @transform_3(%arg0: i32) -> (i32, i32) {
    %c0_i32 = arith.constant 0 : i32
    %c0_i32_0 = arith.constant 0 : i32
    %c0_i32_1 = arith.constant 0 : i32
    return %c0_i32, %c0_i32_0 : i32, i32
  }
  func.func @transform_4(%arg0: i32) -> (i32, i32) {
    %c0_i32 = arith.constant 0 : i32
    %c0_i32_0 = arith.constant 0 : i32
    %c0_i32_1 = arith.constant 0 : i32
    return %c0_i32, %c0_i32_0 : i32, i32
  }
  func.func @transform_5(%arg0: i32) -> (i32, i32) {
    %c0_i32 = arith.constant 0 : i32
    %c0_i32_0 = arith.constant 0 : i32
    %c0_i32_1 = arith.constant 0 : i32
    return %c0_i32, %c0_i32_0 : i32, i32
  }
  func.func @transform_6(%arg0: i32) -> (i32, i32) {
    %c0_i32 = arith.constant 0 : i32
    %c0_i32_0 = arith.constant 0 : i32
    %c0_i32_1 = arith.constant 0 : i32
    return %c0_i32, %c0_i32_0 : i32, i32
  }
  func.func @transform_7(%arg0: i32) -> (i32, i32) {
    %c0_i32 = arith.constant 0 : i32
    %c0_i32_0 = arith.constant 0 : i32
    %c0_i32_1 = arith.constant 0 : i32
    return %c0_i32, %c0_i32_0 : i32, i32
  }
  func.func @transform_8(%arg0: i32) -> (i32, i32) {
    %c0_i32 = arith.constant 0 : i32
    %c0_i32_0 = arith.constant 0 : i32
    %c0_i32_1 = arith.constant 0 : i32
    return %c0_i32, %c0_i32_0 : i32, i32
  }
  func.func @transform_9(%arg0: i32) -> (i32, i32) {
    %c0_i32 = arith.constant 0 : i32
    %c0_i32_0 = arith.constant 0 : i32
    %c0_i32_1 = arith.constant 0 : i32
    return %c0_i32, %c0_i32_0 : i32, i32
  }
  func.func @transform_10(%arg0: i32) -> (i32, i32) {
    %c0_i32 = arith.constant 0 : i32
    %c0_i32_0 = arith.constant 0 : i32
    %c0_i32_1 = arith.constant 0 : i32
    return %c0_i32, %c0_i32_0 : i32, i32
  }
  func.func @transform_11(%arg0: i32) -> (i32, i32) {
    %c0_i32 = arith.constant 0 : i32
    %c0_i32_0 = arith.constant 0 : i32
    %c0_i32_1 = arith.constant 0 : i32
    return %c0_i32, %c0_i32_0 : i32, i32
  }
  func.func @transform_12(%arg0: i32) -> (i32, i32) {
    %c0_i32 = arith.constant 0 : i32
    %c0_i32_0 = arith.constant 0 : i32
    %c0_i32_1 = arith.constant 0 : i32
    return %c0_i32, %c0_i32_0 : i32, i32
  }
  func.func @transform_13(%arg0: i32) -> (i32, i32) {
    %c0_i32 = arith.constant 0 : i32
    %c0_i32_0 = arith.constant 0 : i32
    %c0_i32_1 = arith.constant 0 : i32
    return %c0_i32, %c0_i32_0 : i32, i32
  }
  func.func @transform_14(%arg0: i32) -> (i32, i32) {
    %c0_i32 = arith.constant 0 : i32
    %c0_i32_0 = arith.constant 0 : i32
    %c0_i32_1 = arith.constant 0 : i32
    return %c0_i32, %c0_i32_0 : i32, i32
  }
  func.func @transform_15(%arg0: i32) -> (i32, i32) {
    %c0_i32 = arith.constant 0 : i32
    %c0_i32_0 = arith.constant 0 : i32
    %c0_i32_1 = arith.constant 0 : i32
    return %c0_i32, %c0_i32_0 : i32, i32
  }
  func.func @transform_16(%arg0: i32) -> (i32, i32) {
    %c0_i32 = arith.constant 0 : i32
    %c0_i32_0 = arith.constant 0 : i32
    %c0_i32_1 = arith.constant 0 : i32
    return %c0_i32, %c0_i32_0 : i32, i32
  }
  func.func @transform_17(%arg0: i32) -> (i32, i32, i32, i32) {
    %c0_i32 = arith.constant 0 : i32
    %c0_i32_0 = arith.constant 0 : i32
    %c0_i32_1 = arith.constant 0 : i32
    %c0_i32_2 = arith.constant 0 : i32
    return %arg0, %c0_i32, %c0_i32_0, %c0_i32_1 : i32, i32, i32, i32
  }
}

</mosaic_0001>

<bundles_post_ra>
// kernel: _lambda_.1
= control target key start
LH: loop header
LB: loop body
LE: loop exit
PB: predicated region body
PF: predicated region fallthrough
CT: control target
= control target key end

     0   :  { %s7964_s24 = smov 0   ;;  %s14117_s0 = inlined_call_operand.vmem [shape: f32[4,16,16,128], index: 0, kind: input, shape index: {}]   ;;  %s14118_s1 = inlined_call_operand.vmem [shape: bf16[128,128], index: 1, kind: input, shape index: {}]   ;;  %s14119_s2 = inlined_call_operand.vmem [shape: f32[1,128], index: 2, kind: input, shape index: {}]   ;;  %s14120_s3 = inlined_call_operand.vmem [shape: f32[1,128], index: 3, kind: input, shape index: {}]   ;;  %s14121_s4 = inlined_call_operand.vmem [shape: f32[1,128], index: 4, kind: input, shape index: {}]   ;;  %s14122_s5 = inlined_call_operand.vmem [shape: f32[128,4], index: 5, kind: input, shape index: {}]   ;;  %s14123_s6 = inlined_call_operand.vmem [shape: f32[4,128], index: 6, kind: input, shape index: {}]   ;;  %s14124_s7 = inlined_call_operand.vmem [shape: bf16[1152,128], index: 7, kind: input, shape index: {}]   ;;  %s14125_s8 = inlined_call_operand.vmem [shape: f32[1,128], index: 8, kind: input, shape index: {}]   ;;  %s14126_s9 = inlined_call_operand.vmem [shape: f32[1,128], index: 9, kind: input, shape index: {}]   ;;  %s14127_s10 = inlined_call_operand.vmem [shape: f32[1,128], index: 10, kind: input, shape index: {}]   ;;  %s14128_s11 = inlined_call_operand.vmem [shape: bf16[128,128], index: 11, kind: input, shape index: {}]   ;;  %s14129_s12 = inlined_call_operand.vmem [shape: f32[1,128], index: 12, kind: input, shape index: {}]   ;;  %s14130_s13 = inlined_call_operand.vmem [shape: f32[1,128], index: 13, kind: input, shape index: {}]   ;;  %s14131_s14 = inlined_call_operand.vmem [shape: f32[1,128], index: 14, kind: input, shape index: {}]   ;;  %s14132_s15 = inlined_call_operand.vmem [shape: f32[128,4], index: 15, kind: input, shape index: {}]   ;;  %s14133_s16 = inlined_call_operand.vmem [shape: f32[4,128], index: 16, kind: input, shape index: {}]   ;;  %s14134_s17 = inlined_call_operand.vmem [shape: f32[4,16,16,128], index: 17, kind: output, shape index: {}]  }
   0x1   :  { %14362 = sst [smem:[#allocation37_spill]] %s14117_s0 }
   0x2   :  { %14363 = sst [smem:[#allocation38_spill]] %s14118_s1 }
   0x3 LB: > { %s7014_s25 = sadd.s32 4294967295, %s7868_s24   ;;  %p7018_p0 = scmp.ge.s32.totalorder %s7868_s24, 1  ;;  %s7868_s24 = sphi %s7964_s24, %s27_s24  }
   0x4   : > { %p489_p1 = scmp.lt.s32.totalorder %s7868_s24, 3 }
   0x6   : > { %p490_p2 = pnand %p7018_p0, %p489_p1 }
   0x8   : > { %493 = sbr.rel (%p490_p2) target bundleno = 3130 (0xc3a), region = 88 }
   0xd   : > { %s14364_s28 = sld [smem:[#allocation38_spill]]  ;;  %s7019_s29 = sshll.u32 %s7014_s25, 1  ;;  %vm7871_vm0 = vmmov 0   ;;  %vm1247_vm1 = vcmask 1041409   ;;  %vm1252_vm2 = vcmask 1043459   ;;  %vm1255_vm3 = vcmask 1041408  }
   0xe   : > { %p544_p3 = scmp.lt.s32.totalorder %s7019_s29, 3  ;;  %s14365_s22 = sld [smem:[#allocation37_spill]]  ;;  %vm1341_vm4 = vcmask 1043456   ;;  %vm1337_vm5 = vcmask 31744  }
  0x10   : > { %s15212_s29 = smov (!%p544_p3, %s7019_s29), 3 }
  0x11   : > { %s7130_s1 = sshll.u32 %s15212_s29, 8 }
  0x12   : > { %s13964_s30 = scalar_lea.vmem %s14134_s17, %s7130_s1 }
  0x13   : > { %v7697_v0 = vld [vmem:[%s14364_s28 + $0x38] sm:$0xff]   ;;  %v7698_v1 = vld [vmem:[%s14364_s28 + $0x30] sm:$0xff]   ;;  %v7699_v2 = vld [vmem:[%s14364_s28 + $0x28] sm:$0xff]  }
  0x14   : > { %7309 = vmatprep.subr.bf16.mxu0 %v7697_v0  ;;  %7669 = vmatprep.subr.bf16.mxu1 %v7697_v0  ;;  %s7989_s23 = scalar_lea.vmem %s14365_s22, %s7130_s1  ;;  %v7700_v3 = vld [vmem:[%s14364_s28 + $0x20] sm:$0xff]   ;;  %v7701_v7 = vld [vmem:[%s14364_s28 + $0x18] sm:$0xff]   ;;  %v7702_v8 = vld [vmem:[%s14364_s28 + $0x10] sm:$0xff]  }
  0x15   : > { %7310 = vmatpush3.bf16.msra.mxu0 %v7697_v0  ;;  %7677 = vmatpush3.bf16.msra.mxu1 %v7697_v0  ;;  %v558_v4 = vld [vmem:[%s7989_s23] sm:$0xff]  ;;  %v559_v5 = vld [vmem:[%s7989_s23 + $0x8] sm:$0xff]  ;;  %v560_v14 = vld [vmem:[%s7989_s23 + $0x10] sm:$0xff] }
  0x16   : > { %7311 = vmatprep.subr.bf16.mxu0 %v7698_v1  ;;  %7670 = vmatprep.subr.bf16.mxu1 %v7698_v1  ;;  %v622_v6 = vpack.c.bf16 %v559_v5, %v558_v4  ;;  %v7703_v9 = vld [vmem:[%s14364_s28 + $0x8] sm:$0xff]   ;;  %v602_v10 = vld [vmem:[%s7989_s23 + $0x160] sm:$0xff]  ;;  %v561_v15 = vld [vmem:[%s7989_s23 + $0x18] sm:$0xff] }
  0x17   : > { %v603_v11 = vld [vmem:[%s7989_s23 + $0x168] sm:$0xff]  ;;  %v7704_v12 = vld [vmem:[%s14364_s28] sm:$0xff]   ;;  %v604_v18 = vld [vmem:[%s7989_s23 + $0x170] sm:$0xff]  ;;  %v623_v22 = vpack.c.bf16 %v561_v15, %v560_v14 }
  0x18   : > { %7325 = vmatprep.mubr.bf16.mxu0 %v622_v6  ;;  %v644_v13 = vpack.c.bf16 %v603_v11, %v602_v10  ;;  %v562_v16 = vld [vmem:[%s7989_s23 + $0x20] sm:$0xff]  ;;  %v563_v17 = vld [vmem:[%s7989_s23 + $0x28] sm:$0xff]  ;;  %v605_v19 = vld [vmem:[%s7989_s23 + $0x178] sm:$0xff] }
  0x19   : > { %7312 = vmatpush3.bf16.msra.mxu0 %v7698_v1  ;;  %7678 = vmatpush3.bf16.msra.mxu1 %v7698_v1  ;;  %v606_v20 = vld [vmem:[%s7989_s23 + $0x180] sm:$0xff]  ;;  %v607_v21 = vld [vmem:[%s7989_s23 + $0x188] sm:$0xff]  ;;  %v624_v23 = vpack.c.bf16 %v563_v17, %v562_v16  ;;  %v645_v24 = vpack.c.bf16 %v605_v19, %v604_v18  ;;  %v564_v26 = vld [vmem:[%s7989_s23 + $0x30] sm:$0xff] }
  0x1a   : > { %7313 = vmatprep.subr.bf16.mxu0 %v7699_v2  ;;  %7671 = vmatprep.subr.bf16.mxu1 %v7699_v2  ;;  %v646_v25 = vpack.c.bf16 %v607_v21, %v606_v20  ;;  %v565_v27 = vld [vmem:[%s7989_s23 + $0x38] sm:$0xff]  ;;  %v566_v28 = vld [vmem:[%s7989_s23 + $0x40] sm:$0xff]  ;;  %v567_v29 = vld [vmem:[%s7989_s23 + $0x48] sm:$0xff] }
  0x1b   : > { %7369 = vmatprep.mubr.bf16.mxu1 %v644_v13  ;;  %v608_v30 = vld [vmem:[%s7989_s23 + $0x190] sm:$0xff]  ;;  %v609_v31 = vld [vmem:[%s7989_s23 + $0x198] sm:$0xff]  ;;  %v610_v32 = vld [vmem:[%s7989_s23 + $0x1a0] sm:$0xff]  ;;  %v625_v34 = vpack.c.bf16 %v565_v27, %v564_v26  ;;  %v626_v35 = vpack.c.bf16 %v567_v29, %v566_v28 }
  0x1c   : > { %v611_v33 = vld [vmem:[%s7989_s23 + $0x1a8] sm:$0xff]  ;;  %v647_v36 = vpack.c.bf16 %v609_v31, %v608_v30  ;;  %v568_v38 = vld [vmem:[%s7989_s23 + $0x50] sm:$0xff]  ;;  %v569_v39 = vld [vmem:[%s7989_s23 + $0x58] sm:$0xff] }
  0x1d   : > { %7314 = vmatpush3.bf16.msra.mxu0 %v7699_v2  ;;  %7679 = vmatpush3.bf16.msra.mxu1 %v7699_v2  ;;  %v648_v37 = vpack.c.bf16 %v611_v33, %v610_v32  ;;  %v570_v40 = vld [vmem:[%s7989_s23 + $0x60] sm:$0xff]  ;;  %v571_v41 = vld [vmem:[%s7989_s23 + $0x68] sm:$0xff]  ;;  %v612_v42 = vld [vmem:[%s7989_s23 + $0x1b0] sm:$0xff]  ;;  %v627_v46 = vpack.c.bf16 %v569_v39, %v568_v38 }
  0x1e   : > { %7315 = vmatprep.subr.bf16.mxu0 %v7700_v3  ;;  %7672 = vmatprep.subr.bf16.mxu1 %v7700_v3  ;;  %v613_v43 = vld [vmem:[%s7989_s23 + $0x1b8] sm:$0xff]  ;;  %v614_v44 = vld [vmem:[%s7989_s23 + $0x1c0] sm:$0xff]  ;;  %v615_v45 = vld [vmem:[%s7989_s23 + $0x1c8] sm:$0xff]  ;;  %v628_v47 = vpack.c.bf16 %v571_v41, %v570_v40  ;;  %v14136_v40 = vmov 0.0  }
  0x1f   : > { %v649_v48 = vpack.c.bf16 %v613_v43, %v612_v42  ;;  %v650_v49 = vpack.c.bf16 %v615_v45, %v614_v44  ;;  %v572_v50 = vld [vmem:[%s7989_s23 + $0x70] sm:$0xff]  ;;  %v573_v51 = vld [vmem:[%s7989_s23 + $0x78] sm:$0xff]  ;;  %v574_v52 = vld [vmem:[%s7989_s23 + $0x80] sm:$0xff]  ;;  %1792 = vst [vmem:[#allocation2] sm:$0xff] %v14136_v40 }
  0x20   : > { %v575_v53 = vld [vmem:[%s7989_s23 + $0x88] sm:$0xff]  ;;  %v616_v54 = vld [vmem:[%s7989_s23 + $0x1d0] sm:$0xff]  ;;  %v617_v55 = vld [vmem:[%s7989_s23 + $0x1d8] sm:$0xff]  ;;  %v629_v58 = vpack.c.bf16 %v573_v51, %v572_v50  ;;  %1793 = vst [vmem:[#allocation2 + $0x8] sm:$0xff] %v14136_v40 }
  0x21   : > { %7316 = vmatpush3.bf16.msra.mxu0 %v7700_v3  ;;  %7680 = vmatpush3.bf16.msra.mxu1 %v7700_v3  ;;  %v618_v56 = vld [vmem:[%s7989_s23 + $0x1e0] sm:$0xff]  ;;  %v619_v57 = vld [vmem:[%s7989_s23 + $0x1e8] sm:$0xff]  ;;  %v630_v59 = vpack.c.bf16 %v575_v53, %v574_v52  ;;  %v651_v60 = vpack.c.bf16 %v617_v55, %v616_v54  ;;  %v576_v62 = vld [vmem:[%s7989_s23 + $0x90] sm:$0xff]  ;;  %1794 = vst [vmem:[#allocation2 + $0x10] sm:$0x3] %v14136_v40 }
  0x22   : > { %7317 = vmatprep.subr.bf16.mxu0 %v7701_v7  ;;  %7673 = vmatprep.subr.bf16.mxu1 %v7701_v7  ;;  %v652_v61 = vpack.c.bf16 %v619_v57, %v618_v56  ;;  %v577_v63 = vld [vmem:[%s7989_s23 + $0x98] sm:$0xff]  ;;  %v578_v0 = vld [vmem:[%s7989_s23 + $0xa0] sm:$0xff]  ;;  %v579_v1 = vld [vmem:[%s7989_s23 + $0xa8] sm:$0xff]  ;;  %1795 = vst [vmem:[#allocation2 + $0x1b0] sm:$0xff] %v14136_v40 }
  0x23   : > { %v620_v2 = vld [vmem:[%s7989_s23 + $0x1f0] sm:$0xff]  ;;  %v621_v3 = vld [vmem:[%s7989_s23 + $0x1f8] sm:$0xff]  ;;  %v631_v4 = vpack.c.bf16 %v577_v63, %v576_v62  ;;  %v632_v5 = vpack.c.bf16 %v579_v1, %v578_v0  ;;  %v583_v10 = vld [vmem:[%s7989_s23 + $0xc8] sm:$0xff]  ;;  %1796 = vst [vmem:[#allocation2 + $0x1b8] sm:$0xff] %v14136_v40 }
  0x24   : > { %v653_v6 = vpack.c.bf16 %v621_v3, %v620_v2  ;;  %v584_v13 = vld [vmem:[%s7989_s23 + $0xd0] sm:$0xff]  ;;  %v585_v14 = vld [vmem:[%s7989_s23 + $0xd8] sm:$0xff]  ;;  %v586_v15 = vld [vmem:[%s7989_s23 + $0xe0] sm:$0xff]  ;;  %1797 = vst [vmem:[#allocation2 + $0x1c0] sm:$0x3] %v14136_v40 }
  0x25   : > { %7318 = vmatpush3.bf16.msra.mxu0 %v7701_v7  ;;  %7681 = vmatpush3.bf16.msra.mxu1 %v7701_v7  ;;  %v580_v7 = vld [vmem:[%s7989_s23 + $0xb0] sm:$0xff]  ;;  %v587_v16 = vld [vmem:[%s7989_s23 + $0xe8] sm:$0xff]  ;;  %v635_v17 = vpack.c.bf16 %v585_v14, %v584_v13  ;;  %v589_v20 = vld [vmem:[%s7989_s23 + $0xf8] sm:$0xff]  ;;  %1799 = vst [vmem:[#allocation2 + $0x198] sm:$0xff] %v14136_v40 }
  0x26   : > { %7319 = vmatprep.subr.bf16.mxu0 %v7702_v8  ;;  %7674 = vmatprep.subr.bf16.mxu1 %v7702_v8  ;;  %v636_v18 = vpack.c.bf16 %v587_v16, %v586_v15  ;;  %v588_v19 = vld [vmem:[%s7989_s23 + $0xf0] sm:$0xff]  ;;  %v590_v21 = vld [vmem:[%s7989_s23 + $0x100] sm:$0xff]  ;;  %v593_v26 = vld [vmem:[%s7989_s23 + $0x118] sm:$0xff]  ;;  %1800 = vst [vmem:[#allocation2 + $0x1a0] sm:$0xff] %v14136_v40 }
  0x27   : > { %v594_v27 = vld [vmem:[%s7989_s23 + $0x120] sm:$0xff]  ;;  %v595_v28 = vld [vmem:[%s7989_s23 + $0x128] sm:$0xff]  ;;  %v596_v31 = vld [vmem:[%s7989_s23 + $0x130] sm:$0xff]  ;;  %1801 = vst [vmem:[#allocation2 + $0x1a8] sm:$0x3] %v14136_v40 }
  0x28   : > { %v640_v30 = vpack.c.bf16 %v595_v28, %v594_v27  ;;  %v597_v32 = vld [vmem:[%s7989_s23 + $0x138] sm:$0xff]  ;;  %v598_v33 = vld [vmem:[%s7989_s23 + $0x140] sm:$0xff]  ;;  %1802 = vst [vmem:[#allocation2 + $0x348] sm:$0xff] %v14136_v40  ;;  %1803 = vst [vmem:[#allocation2 + $0x350] sm:$0xff] %v14136_v40 }
  0x29   : > { %7320 = vmatpush3.bf16.msra.mxu0 %v7702_v8  ;;  %7682 = vmatpush3.bf16.msra.mxu1 %v7702_v8  ;;  %v581_v8 = vld [vmem:[%s7989_s23 + $0xb8] sm:$0xff]  ;;  %1804 = vst [vmem:[#allocation2 + $0x358] sm:$0x3] %v14136_v40  ;;  %1806 = vst [vmem:[#allocation2 + $0x18] sm:$0x1] %v14136_v40  ;;  %v1030_v42 = vld [vmem:[%s14122_s5 + $0x70] sm:$0xff] }
  0x2a   : > { %7321 = vmatprep.subr.bf16.mxu0 %v7703_v9  ;;  %7675 = vmatprep.subr.bf16.mxu1 %v7703_v9  ;;  %v633_v11 = vpack.c.bf16 %v581_v8, %v580_v7  ;;  %v601_v38 = vld [vmem:[%s7989_s23 + $0x158] sm:$0xff]  ;;  %1807 = vst [vmem:[#allocation2 + $0x30] sm:$0x1] %v14136_v40  ;;  %1808 = vst [vmem:[#allocation2 + $0x48] sm:$0x1] %v14136_v40  ;;  %v1029_v43 = vld [vmem:[%s14122_s5 + $0x68] sm:$0xff] }
  0x2b   : > { %1809 = vst [vmem:[#allocation2 + $0x60] sm:$0x1] %v14136_v40  ;;  %1810 = vst [vmem:[#allocation2 + $0x78] sm:$0x1] %v14136_v40  ;;  %v1031_v41 = vld [vmem:[%s14122_s5 + $0x78] sm:$0xff]  ;;  %v1028_v44 = vld [vmem:[%s14122_s5 + $0x60] sm:$0xff] }
  0x2c   : > { %1811 = vst [vmem:[#allocation2 + $0x90] sm:$0x1] %v14136_v40  ;;  %1812 = vst [vmem:[#allocation2 + $0xa8] sm:$0x1] %v14136_v40  ;;  %v1025_v51 = vld [vmem:[%s14122_s5 + $0x48] sm:$0xff]  ;;  %v1024_v54 = vld [vmem:[%s14122_s5 + $0x40] sm:$0xff] }
  0x2d   : > { %7322 = vmatpush3.bf16.msra.mxu0 %v7703_v9  ;;  %7683 = vmatpush3.bf16.msra.mxu1 %v7703_v9  ;;  %v582_v9 = vld [vmem:[%s7989_s23 + $0xc0] sm:$0xff]  ;;  %1813 = vst [vmem:[#allocation2 + $0xc0] sm:$0x1] %v14136_v40  ;;  %1814 = vst [vmem:[#allocation2 + $0xd8] sm:$0x1] %v14136_v40  ;;  %v1022_v0 = vld [vmem:[%s14122_s5 + $0x30] sm:$0xff] }
  0x2e   : > { %7323 = vmatprep.subr.bf16.mxu0 %v7704_v12  ;;  %7676 = vmatprep.subr.bf16.mxu1 %v7704_v12  ;;  %1815 = vst [vmem:[#allocation2 + $0xf0] sm:$0x1] %v14136_v40  ;;  %1816 = vst [vmem:[#allocation2 + $0x108] sm:$0x1] %v14136_v40 }
  0x2f   : > { %1817 = vst [vmem:[#allocation2 + $0x120] sm:$0x1] %v14136_v40  ;;  %1818 = vst [vmem:[#allocation2 + $0x138] sm:$0x1] %v14136_v40 }
  0x30   : > { %1819 = vst [vmem:[#allocation2 + $0x150] sm:$0x1] %v14136_v40  ;;  %1820 = vst [vmem:[#allocation2 + $0x168] sm:$0x1] %v14136_v40 }
  0x31   : > { %7324 = vmatpush3.bf16.msra.mxu0 %v7704_v12  ;;  %7684 = vmatpush3.bf16.msra.mxu1 %v7704_v12  ;;  %v634_v12 = vpack.c.bf16 %v583_v10, %v582_v9  ;;  %1821 = vst [vmem:[#allocation2 + $0x180] sm:$0x1] %v14136_v40  ;;  %1822 = vst [vmem:[#allocation2 + $0x1c8] sm:$0x1] %v14136_v40  ;;  %v1020_v10 = vld [vmem:[%s14122_s5 + $0x20] sm:$0xff] }
  0x32   : > { %7389 = vmatprep.subr.mxu1 %v14136_v40  ;;  %1823 = vst [vmem:[#allocation2 + $0x1e0] sm:$0x1] %v14136_v40  ;;  %1824 = vst [vmem:[#allocation2 + $0x1f8] sm:$0x1] %v14136_v40 }
  0x33   : > { %1825 = vst [vmem:[#allocation2 + $0x210] sm:$0x1] %v14136_v40  ;;  %1826 = vst [vmem:[#allocation2 + $0x228] sm:$0x1] %v14136_v40 }
  0x34   : > { %7326 = vmatmul.mubr.bf16.vlgmr.msra.gmra.mxu0 %v623_v22  ;;  %7370 = vmatmul.mubr.bf16.vlgmr.msra.gmra.mxu1 %v645_v24  ;;  %v591_v22 = vld [vmem:[%s7989_s23 + $0x108] sm:$0xff]  ;;  %1827 = vst [vmem:[#allocation2 + $0x240] sm:$0x1] %v14136_v40  ;;  %1828 = vst [vmem:[#allocation2 + $0x258] sm:$0x1] %v14136_v40 }
  0x35   : > { %7329 = vmatprep.mubr.bf16.mxu0 %v624_v23  ;;  %7373 = vmatprep.mubr.bf16.mxu1 %v646_v25  ;;  %v637_v23 = vpack.c.bf16 %v589_v20, %v588_v19  ;;  %v638_v24 = vpack.c.bf16 %v591_v22, %v590_v21  ;;  %v592_v25 = vld [vmem:[%s7989_s23 + $0x110] sm:$0xff]  ;;  %1829 = vst [vmem:[#allocation2 + $0x270] sm:$0x1] %v14136_v40  ;;  %1830 = vst [vmem:[#allocation2 + $0x288] sm:$0x1] %v14136_v40 }
  0x36   : > { %v639_v29 = vpack.c.bf16 %v593_v26, %v592_v25  ;;  %1831 = vst [vmem:[#allocation2 + $0x2a0] sm:$0x1] %v14136_v40  ;;  %1832 = vst [vmem:[#allocation2 + $0x2b8] sm:$0x1] %v14136_v40  ;;  %7390 = vmatpush3.msra.mxu1 %v1031_v41  ;;  %v1018_v19 = vld [vmem:[%s14122_s5 + $0x10] sm:$0xff] }
  0x37   : > { %1833 = vst [vmem:[#allocation2 + $0x2d0] sm:$0x1] %v14136_v40  ;;  %1834 = vst [vmem:[#allocation2 + $0x2e8] sm:$0x1] %v14136_v40  ;;  %7391 = vmatprep.subr.mxu1 %v14136_v40 }
  0x38   : > { %1835 = vst [vmem:[#allocation2 + $0x300] sm:$0x1] %v14136_v40  ;;  %1836 = vst [vmem:[#allocation2 + $0x318] sm:$0x1] %v14136_v40  ;;  %7392 = vmatpush3.msra.mxu1 %v1030_v42 }
  0x39   : > { %1837 = vst [vmem:[#allocation2 + $0x330] sm:$0x1] %v14136_v40  ;;  %1838 = vst [vmem:[#allocation2 + $0x29] sm:$0x1] %v14136_v40  ;;  %7393 = vmatprep.subr.mxu1 %v14136_v40 }
  0x3a   : > { %1839 = vst [vmem:[#allocation2 + $0x41] sm:$0x1] %v14136_v40  ;;  %1840 = vst [vmem:[#allocation2 + $0x59] sm:$0x1] %v14136_v40  ;;  %7394 = vmatpush3.msra.mxu1 %v1029_v43 }
  0x3b   : > { %1841 = vst [vmem:[#allocation2 + $0x71] sm:$0x1] %v14136_v40  ;;  %1842 = vst [vmem:[#allocation2 + $0x89] sm:$0x1] %v14136_v40  ;;  %7395 = vmatprep.subr.mxu1 %v14136_v40 }
  0x3c   : > { %7330 = vmatmul.mubr.bf16.gmra.mxu0 %v625_v34  ;;  %7374 = vmatmul.mubr.bf16.gmra.mxu1 %v647_v36  ;;  %v599_v34 = vld [vmem:[%s7989_s23 + $0x148] sm:$0xff]  ;;  %1843 = vst [vmem:[#allocation2 + $0xa1] sm:$0x1] %v14136_v40  ;;  %1844 = vst [vmem:[#allocation2 + $0xb9] sm:$0x1] %v14136_v40 }
  0x3d   : > { %7333 = vmatprep.mubr.bf16.mxu0 %v626_v35  ;;  %7377 = vmatprep.mubr.bf16.mxu1 %v648_v37  ;;  %v641_v35 = vpack.c.bf16 %v597_v32, %v596_v31  ;;  %v642_v36 = vpack.c.bf16 %v599_v34, %v598_v33  ;;  %v600_v37 = vld [vmem:[%s7989_s23 + $0x150] sm:$0xff]  ;;  %1845 = vst [vmem:[#allocation2 + $0xd1] sm:$0x1] %v14136_v40  ;;  %1846 = vst [vmem:[#allocation2 + $0xe9] sm:$0x1] %v14136_v40 }
  0x3e   : > { %v643_v39 = vpack.c.bf16 %v601_v38, %v600_v37  ;;  %1847 = vst [vmem:[#allocation2 + $0x101] sm:$0x1] %v14136_v40  ;;  %1848 = vst [vmem:[#allocation2 + $0x119] sm:$0x1] %v14136_v40  ;;  %7396 = vmatpush3.msra.mxu1 %v1028_v44 }
  0x3f   : > { %1849 = vst [vmem:[#allocation2 + $0x131] sm:$0x1] %v14136_v40  ;;  %1850 = vst [vmem:[#allocation2 + $0x149] sm:$0x1] %v14136_v40  ;;  %7397 = vmatprep.subr.mxu1 %v14136_v40 }
  0x40   : > { %1851 = vst [vmem:[#allocation2 + $0x161] sm:$0x1] %v14136_v40  ;;  %1852 = vst [vmem:[#allocation2 + $0x179] sm:$0x1] %v14136_v40 }
  0x41   : > { %1853 = vst [vmem:[#allocation2 + $0x191] sm:$0x1] %v14136_v40  ;;  %1854 = vst [vmem:[#allocation2 + $0x1d9] sm:$0x1] %v14136_v40 }
  0x42   : > { %1855 = vst [vmem:[#allocation2 + $0x1f1] sm:$0x1] %v14136_v40  ;;  %1856 = vst [vmem:[#allocation2 + $0x209] sm:$0x1] %v14136_v40 }
  0x43   : > { %1857 = vst [vmem:[#allocation2 + $0x221] sm:$0x1] %v14136_v40  ;;  %1858 = vst [vmem:[#allocation2 + $0x239] sm:$0x1] %v14136_v40 }
  0x44   : > { %7334 = vmatmul.mubr.bf16.gmra.mxu0 %v627_v46  ;;  %7378 = vmatmul.mubr.bf16.gmra.mxu1 %v649_v48  ;;  %1859 = vst [vmem:[#allocation2 + $0x251] sm:$0x1] %v14136_v40  ;;  %1860 = vst [vmem:[#allocation2 + $0x269] sm:$0x1] %v14136_v40  ;;  %v1027_v46 = vld [vmem:[%s14122_s5 + $0x58] sm:$0xff]  ;;  %v1026_v48 = vld [vmem:[%s14122_s5 + $0x50] sm:$0xff] }
  0x45   : > { %7337 = vmatprep.mubr.bf16.mxu0 %v628_v47  ;;  %7381 = vmatprep.mubr.bf16.mxu1 %v650_v49  ;;  %1861 = vst [vmem:[#allocation2 + $0x281] sm:$0x1] %v14136_v40  ;;  %1862 = vst [vmem:[#allocation2 + $0x299] sm:$0x1] %v14136_v40  ;;  %v8173_v49 = vld [vmem:[%s14119_s2] ss:$0 sm:$0xff] }
  0x46   : > { %1863 = vst [vmem:[#allocation2 + $0x2b1] sm:$0x1] %v14136_v40  ;;  %1864 = vst [vmem:[#allocation2 + $0x2c9] sm:$0x1] %v14136_v40  ;;  %7398 = vmatpush3.msra.mxu1 %v1027_v46 }
  0x47   : > { %1865 = vst [vmem:[#allocation2 + $0x2e1] sm:$0x1] %v14136_v40  ;;  %1866 = vst [vmem:[#allocation2 + $0x2f9] sm:$0x1] %v14136_v40  ;;  %7399 = vmatprep.subr.mxu1 %v14136_v40 }
  0x48   : > { %1867 = vst [vmem:[#allocation2 + $0x311] sm:$0x1] %v14136_v40  ;;  %1868 = vst [vmem:[#allocation2 + $0x329] sm:$0x1] %v14136_v40  ;;  %7400 = vmatpush3.msra.mxu1 %v1026_v48 }
  0x49   : > { %1869 = vst [vmem:[#allocation2 + $0x341] sm:$0x1] %v14136_v40  ;;  %7401 = vmatprep.subr.mxu1 %v14136_v40 }
  0x4a   : > { %7402 = vmatpush3.msra.mxu1 %v1025_v51 }
  0x4b   : > { %7403 = vmatprep.subr.mxu1 %v14136_v40 }
  0x4c   : > { %7338 = vmatmul.mubr.bf16.gmra.mxu0 %v629_v58  ;;  %7382 = vmatmul.mubr.bf16.gmra.mxu1 %v651_v60  ;;  %v1023_v58 = vld [vmem:[%s14122_s5 + $0x38] sm:$0xff] }
  0x4d   : > { %7341 = vmatprep.mubr.bf16.mxu0 %v630_v59  ;;  %7385 = vmatprep.mubr.bf16.mxu1 %v652_v61 }
  0x4e   : > { %7404 = vmatpush3.msra.mxu1 %v1024_v54 }
  0x4f   : > { %7405 = vmatprep.subr.mxu1 %v14136_v40 }
  0x50   : > { %7406 = vmatpush3.msra.mxu1 %v1023_v58 }
  0x51   : > { %7407 = vmatprep.subr.mxu1 %v14136_v40 }
  0x52   : > { %7408 = vmatpush3.msra.mxu1 %v1022_v0 }
  0x53   : > { %7409 = vmatprep.subr.mxu1 %v14136_v40 }
  0x54   : > { %7342 = vmatmul.mubr.bf16.gmra.mxu0 %v631_v4  ;;  %7386 = vmatmul.mubr.bf16.gmra.mxu1 %v653_v6  ;;  %v1021_v6 = vld [vmem:[%s14122_s5 + $0x28] sm:$0xff] }
  0x55   : > { %7345 = vmatprep.mubr.bf16.mxu0 %v632_v5  ;;  %7410 = vmatpush3.msra.mxu1 %v1021_v6 }
  0x56   : > { %7411 = vmatprep.subr.mxu1 %v14136_v40  ;;  %7421 = vmatprep.mubr.msk.f32.mxu1 %vm7871_vm0, %v14136_v40 }
  0x57   : > { %7412 = vmatpush3.msra.mxu1 %v1020_v10 }
  0x58   : > { %7413 = vmatprep.subr.mxu1 %v14136_v40 }
  0x5c   : > { %7346 = vmatmul.mubr.bf16.gmra.mxu0 %v633_v11 }
  0x5d   : > { %7349 = vmatprep.mubr.bf16.mxu0 %v634_v12  ;;  %v1019_v12 = vld [vmem:[%s14122_s5 + $0x18] sm:$0xff] }
  0x5e   : > { %7414 = vmatpush3.msra.mxu1 %v1019_v12 }
  0x5f   : > { %7415 = vmatprep.subr.mxu1 %v14136_v40 }
  0x60   : > { %7416 = vmatpush3.msra.mxu1 %v1018_v19 }
  0x61   : > { %7417 = vmatprep.subr.mxu1 %v14136_v40 }
  0x64   : > { %7350 = vmatmul.mubr.bf16.gmra.mxu0 %v635_v17 }
  0x65   : > { %7353 = vmatprep.mubr.bf16.mxu0 %v636_v18 }
  0x6c   : > { %7354 = vmatmul.mubr.bf16.gmra.mxu0 %v637_v23 }
  0x6d   : > { %7357 = vmatprep.mubr.bf16.mxu0 %v638_v24  ;;  %v1017_v24 = vld [vmem:[%s14122_s5 + $0x8] sm:$0xff] }
  0x6e   : > { %7418 = vmatpush3.msra.mxu1 %v1017_v24 }
  0x6f   : > { %7419 = vmatprep.subr.mxu1 %v14136_v40 }
  0x74   : > { %7358 = vmatmul.mubr.bf16.gmra.mxu0 %v639_v29  ;;  %v1016_v29 = vld [vmem:[%s14122_s5] sm:$0xff] }
  0x75   : > { %7361 = vmatprep.mubr.bf16.mxu0 %v640_v30  ;;  %7420 = vmatpush3.msra.mxu1 %v1016_v29 }
  0x76   : > { %7424 = vmatprep.subr.mxu1 %v14136_v40 }
  0x7c   : > { %7362 = vmatmul.mubr.bf16.gmra.mxu0 %v641_v35 }
  0x7d   : > { %7365 = vmatprep.mubr.bf16.mxu0 %v642_v36 }
  0x84   : > { %7366 = vmatmul.mubr.bf16.gmra.mxu0 %v643_v39 }
  0xf4   : > { %v7327_v45 = vpop.f32.mrf.mxu0 }
  0xf5   : > { %v8187_v55 = vadd.f32 %v7327_v45, %v8173_v49 }
  0xf6   : > { %v759_v47 = vpop.f32.mrf.mxu0 }
  0xf7   : > { %v8180_v52 = vadd.f32 %v8173_v49, %v759_v47  ;;  %v1109_v1 = vmul.f32 %v8187_v55, %v8187_v55 }
  0xf8   : > { %v7328_v50 = vpop.f32.mrf.mxu0 }
  0xf9   : > { %v1107_v59 = vmul.f32 %v8180_v52, %v8180_v52  ;;  %v8199_v60 = vadd.f32 %v7328_v50, %v8173_v49 }
  0xfa   : > { %v762_v53 = vpop.f32.mrf.mxu0 }
  0xfb   : > { %v8190_v56 = vadd.f32 %v8173_v49, %v762_v53  ;;  %v1110_v7 = vmul.f32 %v8199_v60, %v8199_v60 }
  0xfc   : > { %v7331_v57 = vpop.f32.mrf.mxu0 }
  0xfd   : > { %v1033_v61 = vadd.f32 %v8190_v56, %v8180_v52  ;;  %v1108_v62 = vmul.f32 %v8190_v56, %v8190_v56  ;;  %v8236_v17 = vadd.f32 %v7331_v57, %v8173_v49 }
  0xfe   : > { %v775_v63 = vpop.f32.mrf.mxu0 }
  0xff   : > { %v1034_v2 = vadd.f32 %v1033_v61, %v8187_v55  ;;  %v1171_v3 = vadd.f32 %v1108_v62, %v1107_v59  ;;  %v8213_v4 = vadd.f32 %v8173_v49, %v775_v63  ;;  %v1113_v26 = vmul.f32 %v8236_v17, %v8236_v17 }
 0x100   : > { %v7332_v5 = vpop.f32.mrf.mxu0 }
 0x101   : > { %v1172_v8 = vadd.f32 %v1171_v3, %v1109_v1  ;;  %v1035_v9 = vadd.f32 %v1034_v2, %v8199_v60  ;;  %v1111_v14 = vmul.f32 %v8213_v4, %v8213_v4  ;;  %v8254_v27 = vadd.f32 %v7332_v5, %v8173_v49 }
 0x102   : > { %v778_v11 = vpop.f32.mrf.mxu0 }
 0x103   : > { %v1036_v13 = vadd.f32 %v1035_v9, %v8213_v4  ;;  %v1173_v15 = vadd.f32 %v1172_v8, %v1110_v7  ;;  %v8233_v16 = vadd.f32 %v8173_v49, %v778_v11  ;;  %v1114_v33 = vmul.f32 %v8254_v27, %v8254_v27 }
 0x104   : > { %v7335_v18 = vpop.f32.mrf.mxu0 }
 0x105   : > { %v1174_v20 = vadd.f32 %v1173_v15, %v1111_v14  ;;  %v1112_v21 = vmul.f32 %v8233_v16, %v8233_v16  ;;  %v1037_v22 = vadd.f32 %v1036_v13, %v8233_v16  ;;  %v8278_v47 = vadd.f32 %v7335_v18, %v8173_v49  ;;  %v8305_v13 = vpop.f32.mrf.mxu1 }
 0x106   : > { %v791_v23 = vpop.f32.mrf.mxu0 }
 0x107   : > { %v1175_v25 = vadd.f32 %v1174_v20, %v1112_v21  ;;  %v1038_v30 = vadd.f32 %v1037_v22, %v8236_v17  ;;  %v8265_v34 = vadd.f32 %v8173_v49, %v791_v23  ;;  %v1117_v54 = vmul.f32 %v8278_v47, %v8278_v47  ;;  %v8315_v21 = vpop.f32.mrf.mxu1 }
 0x108   : > { %v7336_v28 = vpop.f32.mrf.mxu0 }
 0x109   : > { %v1176_v31 = vadd.f32 %v1175_v25, %v1113_v26  ;;  %v1039_v36 = vadd.f32 %v1038_v30, %v8254_v27  ;;  %v1115_v41 = vmul.f32 %v8265_v34, %v8265_v34  ;;  %v8284_v57 = vadd.f32 %v7336_v28, %v8173_v49  ;;  %v8327_v29 = vpop.f32.mrf.mxu1 }
 0x10a   : > { %v794_v32 = vpop.f32.mrf.mxu0 }
 0x10b   : > { %v1177_v37 = vadd.f32 %v1176_v31, %v1114_v33  ;;  %v8270_v38 = vadd.f32 %v8173_v49, %v794_v32  ;;  %v1040_v43 = vadd.f32 %v1039_v36, %v8265_v34  ;;  %v1118_v63 = vmul.f32 %v8284_v57, %v8284_v57 }
 0x10c   : > { %v7339_v35 = vpop.f32.mrf.mxu0 }
 0x10d   : > { %v1178_v44 = vadd.f32 %v1177_v37, %v1115_v41  ;;  %v1116_v45 = vmul.f32 %v8270_v38, %v8270_v38  ;;  %v1041_v50 = vadd.f32 %v1040_v43, %v8270_v38  ;;  %v8308_v14 = vadd.f32 %v7339_v35, %v8173_v49 }
 0x10e   : > { %v807_v39 = vpop.f32.mrf.mxu0 }
 0x10f   : > { %v1179_v51 = vadd.f32 %v1178_v44, %v1116_v45  ;;  %v1042_v59 = vadd.f32 %v1041_v50, %v8278_v47  ;;  %v8290_v0 = vadd.f32 %v8173_v49, %v807_v39  ;;  %v1121_v22 = vmul.f32 %v8308_v14, %v8308_v14  ;;  %v8342_v39 = vpop.f32.mrf.mxu1 }
 0x110   : > { %v7340_v42 = vpop.f32.mrf.mxu0 }
 0x111   : > { %v1180_v61 = vadd.f32 %v1179_v51, %v1117_v54  ;;  %v1043_v2 = vadd.f32 %v1042_v59, %v8284_v57  ;;  %v1119_v7 = vmul.f32 %v8290_v0, %v8290_v0  ;;  %v8320_v23 = vadd.f32 %v7340_v42, %v8173_v49  ;;  %v8353_v50 = vpop.f32.mrf.mxu1 }
 0x112   : > { %v810_v46 = vpop.f32.mrf.mxu0 }
 0x113   : > { %v1181_v3 = vadd.f32 %v1180_v61, %v1118_v63  ;;  %v8296_v5 = vadd.f32 %v8173_v49, %v810_v46  ;;  %v1044_v9 = vadd.f32 %v1043_v2, %v8290_v0  ;;  %v1122_v30 = vmul.f32 %v8320_v23, %v8320_v23 }
 0x114   : > { %v7343_v48 = vpop.f32.mrf.mxu0 }
 0x115   : > { %v1182_v10 = vadd.f32 %v1181_v3, %v1119_v7  ;;  %v1120_v11 = vmul.f32 %v8296_v5, %v8296_v5  ;;  %v1045_v18 = vadd.f32 %v1044_v9, %v8296_v5  ;;  %v8356_v51 = vadd.f32 %v7343_v48, %v8173_v49 }
 0x116   : > { %v823_v53 = vpop.f32.mrf.mxu0 }
 0x117   : > { %v1183_v19 = vadd.f32 %v1182_v10, %v1120_v11  ;;  %v1046_v25 = vadd.f32 %v1045_v18, %v8308_v14  ;;  %v8332_v31 = vadd.f32 %v8173_v49, %v823_v53  ;;  %v1125_v63 = vmul.f32 %v8356_v51, %v8356_v51 }
 0x118   : > { %v7344_v58 = vpop.f32.mrf.mxu0 }
 0x119   : > { %v1184_v26 = vadd.f32 %v1183_v19, %v1121_v22  ;;  %v1047_v33 = vadd.f32 %v1046_v25, %v8320_v23  ;;  %v1123_v41 = vmul.f32 %v8332_v31, %v8332_v31  ;;  %v8364_v2 = vadd.f32 %v7344_v58, %v8173_v49 }
 0x11a   : > { %v826_v62 = vpop.f32.mrf.mxu0 }
 0x11b   : > { %v1185_v35 = vadd.f32 %v1184_v26, %v1122_v30  ;;  %v8338_v36 = vadd.f32 %v8173_v49, %v826_v62  ;;  %v1048_v43 = vadd.f32 %v1047_v33, %v8332_v31  ;;  %v8359_v62 = vpop.f32.mrf.mxu1  ;;  %v1126_v58 = vmul.f32 %v8364_v2, %v8364_v2 }
 0x11c   : > { %v8292_v1 = vpop.f32.mrf.mxu0 }
 0x11d   : > { %v1186_v44 = vadd.f32 %v1185_v35, %v1123_v41  ;;  %v1124_v45 = vmul.f32 %v8338_v36, %v8338_v36  ;;  %v1049_v54 = vadd.f32 %v1048_v43, %v8338_v36  ;;  %v8370_v11 = vpop.f32.mrf.mxu1 }
 0x11e   : > { %v839_v6 = vpop.f32.mrf.mxu0 }
 0x11f   : > { %v1187_v59 = vadd.f32 %v1186_v44, %v1124_v45  ;;  %v1050_v48 = vadd.f32 %v1049_v54, %v8356_v51  ;;  %v8381_v22 = vadd.f32 %v8173_v49, %v839_v6  ;;  %v8396_v45 = vpop.f32.mrf.mxu1 }
 0x120   : > { %v8300_v8 = vpop.f32.mrf.mxu0 }
 0x121   : > { %v1188_v9 = vadd.f32 %v1187_v59, %v1125_v63  ;;  %v1051_v41 = vadd.f32 %v1050_v48, %v8364_v2  ;;  %v8415_v40 = vpop.f32.mrf.mxu1 }
 0x122   : > { %v842_v12 = vpop.f32.mrf.mxu0 }
 0x123   : > { %v1189_v43 = vadd.f32 %v1188_v9, %v1126_v58  ;;  %v8394_v44 = vadd.f32 %v8173_v49, %v842_v12 }
 0x124   : > { %v8310_v15 = vpop.f32.mrf.mxu0 }
 0x125   : > { %14370 = vst [vmem:[#allocation7_spill] sm:$0xff] %v8394_v44 }
 0x126   : > { %v8313_v20 = vpop.f32.mrf.mxu0 }
 0x128   : > { %v8322_v24 = vpop.f32.mrf.mxu0 }
 0x12a   : > { %v8325_v28 = vpop.f32.mrf.mxu0 }
 0x12c   : > { %v8334_v32 = vpop.f32.mrf.mxu0 }
 0x12e   : > { %v8340_v37 = vpop.f32.mrf.mxu0 }
 0x130   : > { %v8346_v42 = vpop.f32.mrf.mxu0 }
 0x132   : > { %v8351_v46 = vpop.f32.mrf.mxu0 }
 0x134   : > { %v7359_v53 = vpop.f32.mrf.mxu0 }
 0x135   : > { %v8373_v18 = vadd.f32 %v7359_v53, %v8173_v49 }
 0x136   : > { %v887_v61 = vpop.f32.mrf.mxu0 }
 0x137   : > { %v8367_v7 = vadd.f32 %v8173_v49, %v887_v61  ;;  %14367 = vst [vmem:[#allocation4_spill] sm:$0xff] %v8373_v18  ;;  %v1141_v53 = vmul.f32 %v8373_v18, %v8373_v18  ;;  %v1127_v61 = vmul.f32 %v8381_v22, %v8381_v22 }
 0x138   : > { %v7360_v3 = vpop.f32.mrf.mxu0 }
 0x139   : > { %14366 = vst [vmem:[#allocation3_spill] sm:$0xff] %v8367_v7  ;;  %v1139_v26 = vmul.f32 %v8367_v7, %v8367_v7  ;;  %v8386_v30 = vadd.f32 %v7360_v3, %v8173_v49  ;;  %v1190_v58 = vadd.f32 %v1189_v43, %v1127_v61 }
 0x13a   : > { %v890_v10 = vpop.f32.mrf.mxu0 }
 0x13b   : > { %v8376_v19 = vadd.f32 %v8173_v49, %v890_v10  ;;  %14369 = vst [vmem:[#allocation6_spill] sm:$0xff] %v8386_v30  ;;  %v1142_v12 = vmul.f32 %v8386_v30, %v8386_v30  ;;  %v1052_v10 = vadd.f32 %v1051_v41, %v8381_v22  ;;  %v8425_v41 = vadd.f32 %v8292_v1, %v8173_v49 }
 0x13c   : > { %v7363_v25 = vpop.f32.mrf.mxu0 }
 0x13d   : > { %14368 = vst [vmem:[#allocation5_spill] sm:$0xff] %v8376_v19  ;;  %v1070_v33 = vadd.f32 %v8376_v19, %v8367_v7  ;;  %v1140_v35 = vmul.f32 %v8376_v19, %v8376_v19 }
 0x13e   : > { %v903_v6 = vpop.f32.mrf.mxu0 }
 0x13f   : > { %v1071_v54 = vadd.f32 %v1070_v33, %v8373_v18  ;;  %v1208_v59 = vadd.f32 %v1140_v35, %v1139_v26  ;;  %v8404_v63 = vadd.f32 %v8173_v49, %v903_v6  ;;  %v1128_v33 = vmul.f32 %v8394_v44, %v8394_v44 }
 0x140   : > { %v7364_v3 = vpop.f32.mrf.mxu0  ;;  %v8413_v26 = vadd.f32 %v7363_v25, %v8173_v49 }
 0x141   : > { %14371 = vst [vmem:[#allocation8_spill] sm:$0xff] %v8404_v63  ;;  %v1209_v48 = vadd.f32 %v1208_v59, %v1141_v53  ;;  %v1072_v9 = vadd.f32 %v1071_v54, %v8386_v30  ;;  %v1143_v18 = vmul.f32 %v8404_v63, %v8404_v63  ;;  %v8428_v25 = vadd.f32 %v7364_v3, %v8173_v49 }
 0x142   : > { %14372 = vst [vmem:[#allocation9_spill] sm:$0xff] %v8413_v26  ;;  %v906_v35 = vpop.f32.mrf.mxu0  ;;  %v1145_v1 = vmul.f32 %v8413_v26, %v8413_v26 }
 0x143   : > { %v1073_v6 = vadd.f32 %v1072_v9, %v8404_v63  ;;  %v1210_v53 = vadd.f32 %v1209_v48, %v1142_v12  ;;  %v8421_v54 = vadd.f32 %v8173_v49, %v906_v35  ;;  %v1053_v63 = vadd.f32 %v1052_v10, %v8394_v44  ;;  %v8434_v35 = vpop.f32.mrf.mxu1 }
 0x144   : > { %v7367_v43 = vpop.f32.mrf.mxu0  ;;  %v1191_v12 = vadd.f32 %v1190_v58, %v1128_v33  ;;  %v1146_v58 = vmul.f32 %v8428_v25, %v8428_v25 }
 0x145   : > { %14373 = vst [vmem:[#allocation10_spill] sm:$0xff] %v8421_v54  ;;  %v1211_v59 = vadd.f32 %v1210_v53, %v1143_v18  ;;  %v1074_v61 = vadd.f32 %v1073_v6, %v8421_v54  ;;  %v1144_v9 = vmul.f32 %v8421_v54, %v8421_v54  ;;  %v1129_v6 = vmul.f32 %v8425_v41, %v8425_v41 }
 0x146   : > { %v919_v48 = vpop.f32.mrf.mxu0  ;;  %v8446_v53 = vadd.f32 %v8300_v8, %v8173_v49 }
 0x147   : > { %v1075_v30 = vadd.f32 %v1074_v61, %v8413_v26  ;;  %v1212_v18 = vadd.f32 %v1211_v59, %v1144_v9  ;;  %v8440_v3 = vadd.f32 %v8173_v49, %v919_v48  ;;  %v1054_v61 = vadd.f32 %v1053_v63, %v8425_v41  ;;  %v8455_v26 = vpop.f32.mrf.mxu1 }
 0x148   : > { %v7368_v10 = vpop.f32.mrf.mxu0  ;;  %v1192_v59 = vadd.f32 %v1191_v12, %v1129_v6  ;;  %v8453_v9 = vadd.f32 %v7367_v43, %v8173_v49  ;;  %v8467_v63 = vadd.f32 %v8173_v49, %v8313_v20  ;;  %v8482_v20 = vadd.f32 %v8173_v49, %v8325_v28 }
 0x149   : > { %v1213_v33 = vadd.f32 %v1212_v18, %v1145_v1  ;;  %v1076_v54 = vadd.f32 %v1075_v30, %v8428_v25  ;;  %v1147_v8 = vmul.f32 %v8440_v3, %v8440_v3  ;;  %v1130_v30 = vmul.f32 %v8446_v53, %v8446_v53 }
 0x14a   : > { %14374 = vst [vmem:[#allocation11_spill] sm:$0xff] %v8453_v9  ;;  %v922_v48 = vpop.f32.mrf.mxu0  ;;  %v8470_v12 = vadd.f32 %v7368_v10, %v8173_v49  ;;  %v1055_v18 = vadd.f32 %v1054_v61, %v8446_v53  ;;  %v1131_v61 = vmul.f32 %v8467_v63, %v8467_v63 }
 0x14b   : > { %v1077_v19 = vadd.f32 %v1076_v54, %v8440_v3  ;;  %v1214_v7 = vadd.f32 %v1213_v33, %v1146_v58  ;;  %v8461_v44 = vadd.f32 %v8173_v49, %v922_v48  ;;  %v1193_v6 = vadd.f32 %v1192_v59, %v1130_v30  ;;  %v970_v33 = vpop.f32.mrf.mxu1 }
 0x14c   : > { %v8478_v58 = vadd.f32 %v8173_v49, %v8315_v21  ;;  %v8489_v48 = vadd.f32 %v8173_v49, %v8342_v39  ;;  %v1150_v21 = vmul.f32 %v8470_v12, %v8470_v12  ;;  %v8499_v30 = vadd.f32 %v8305_v13, %v8173_v49 }
 0x14d   : > { %v1215_v43 = vadd.f32 %v1214_v7, %v1147_v8  ;;  %v1078_v54 = vadd.f32 %v1077_v19, %v8461_v44  ;;  %v1148_v1 = vmul.f32 %v8461_v44, %v8461_v44  ;;  %v1149_v7 = vmul.f32 %v8453_v9, %v8453_v9  ;;  %v8503_v39 = vpop.f32.mrf.mxu1 }
 0x14e   : > { %14375 = vst [vmem:[#allocation12_spill] sm:$0xff] %v8478_v58  ;;  %14376 = vst [vmem:[#allocation13_spill] sm:$0xff] %v8489_v48  ;;  %v1056_v8 = vadd.f32 %v1055_v18, %v8467_v63  ;;  %v8514_v13 = vadd.f32 %v8310_v15, %v8173_v49  ;;  %v8525_v15 = vadd.f32 %v8173_v49, %v8359_v62 }
 0x14f   : > { %v1079_v19 = vadd.f32 %v1078_v54, %v8453_v9  ;;  %v1216_v10 = vadd.f32 %v1215_v43, %v1148_v1  ;;  %14377 = vst [vmem:[#allocation14_spill] sm:$0xff] %v8499_v30  ;;  %v1151_v43 = vmul.f32 %v8478_v58, %v8478_v58  ;;  %v1194_v54 = vadd.f32 %v1193_v6, %v1131_v61 }
 0x150   : > { %v1132_v1 = vmul.f32 %v8482_v20, %v8482_v20  ;;  %v1057_v61 = vadd.f32 %v1056_v8, %v8482_v20  ;;  %14379 = vst [vmem:[#allocation16_spill] sm:$0xff] %v8525_v15  ;;  %v1133_v8 = vmul.f32 %v8514_v13, %v8514_v13 }
 0x151   : > { %v1217_v59 = vadd.f32 %v1216_v10, %v1149_v7  ;;  %v1080_v28 = vadd.f32 %v1079_v19, %v8470_v12  ;;  %v8510_v19 = vadd.f32 %v8327_v29, %v8173_v49  ;;  %v1152_v10 = vmul.f32 %v8489_v48, %v8489_v48 }
 0x152   : > { %v1058_v62 = vadd.f32 %v1057_v61, %v8514_v13 }
 0x153   : > { %v1081_v9 = vadd.f32 %v1080_v28, %v8478_v58  ;;  %v1218_v7 = vadd.f32 %v1217_v59, %v1150_v21  ;;  %14378 = vst [vmem:[#allocation15_spill] sm:$0xff] %v8510_v19  ;;  %v1153_v28 = vmul.f32 %v8499_v30, %v8499_v30  ;;  %v983_v21 = vpop.f32.mrf.mxu1  ;;  %v1195_v59 = vadd.f32 %v1194_v54, %v1132_v1 }
 0x154   : > { %v8537_v54 = vadd.f32 %v8322_v24, %v8173_v49  ;;  %v8550_v24 = vadd.f32 %v8370_v11, %v8173_v49  ;;  %v8566_v11 = vadd.f32 %v8173_v49, %v8434_v35  ;;  %v8579_v35 = vadd.f32 %v8173_v49, %v970_v33 }
 0x155   : > { %v1082_v18 = vadd.f32 %v1081_v9, %v8489_v48  ;;  %v1219_v6 = vadd.f32 %v1218_v7, %v1151_v43  ;;  %v1154_v9 = vmul.f32 %v8510_v19, %v8510_v19  ;;  %v8531_v43 = vadd.f32 %v8173_v49, %v8396_v45 }
 0x156   : > { %14382 = vst [vmem:[#allocation19_spill] sm:$0xff] %v8550_v24  ;;  %v1134_v61 = vmul.f32 %v8537_v54, %v8537_v54  ;;  %14383 = vst [vmem:[#allocation20_spill] sm:$0xff] %v8566_v11  ;;  %v8593_v33 = vadd.f32 %v8455_v26, %v8173_v49 }
 0x157   : > { %v1083_v29 = vadd.f32 %v1082_v18, %v8499_v30  ;;  %v1220_v58 = vadd.f32 %v1219_v6, %v1152_v10  ;;  %14380 = vst [vmem:[#allocation17_spill] sm:$0xff] %v8531_v43  ;;  %v8543_v18 = vadd.f32 %v8353_v50, %v8173_v49  ;;  %v7384_v10 = vpop.f32.mrf.mxu1  ;;  %v1196_v6 = vadd.f32 %v1195_v59, %v1133_v8 }
 0x158   : > { %v1155_v30 = vmul.f32 %v8525_v15, %v8525_v15  ;;  %v8558_v50 = vadd.f32 %v8173_v49, %v8340_v37  ;;  %14384 = vst [vmem:[#allocation21_spill] sm:$0xff] %v8579_v35  ;;  %14386 = vst [vmem:[#allocation23_spill] sm:$0xff] %v8593_v33 }
 0x159   : > { %v1221_v1 = vadd.f32 %v1220_v58, %v1153_v28  ;;  %v1084_v7 = vadd.f32 %v1083_v29, %v8510_v19  ;;  %14381 = vst [vmem:[#allocation18_spill] sm:$0xff] %v8543_v18  ;;  %v1156_v58 = vmul.f32 %v8531_v43, %v8531_v43  ;;  %v1059_v29 = vadd.f32 %v1058_v62, %v8537_v54  ;;  %v986_v8 = vpop.f32.mrf.mxu1 }
 0x15a   : > { %v1135_v62 = vmul.f32 %v8558_v50, %v8558_v50  ;;  %v14423_v19 = vmov 0  }
 0x15b   : > { %v1085_v45 = vadd.f32 %v1084_v7, %v8525_v15  ;;  %v1222_v48 = vadd.f32 %v1221_v1, %v1154_v9  ;;  %v1157_v9 = vmul.f32 %v8543_v18, %v8543_v18  ;;  %v1197_v1 = vadd.f32 %v1196_v6, %v1134_v61  ;;  %v7387_v61 = vpop.f32.mrf.mxu1 }
 0x15c   : > { %v8570_v7 = vadd.f32 %v8173_v49, %v8351_v46  ;;  %v1060_v6 = vadd.f32 %v1059_v29, %v8558_v50  ;;  %v8584_v46 = vadd.f32 %v8415_v40, %v8173_v49  ;;  %v8597_v29 = vadd.f32 %v8334_v32, %v8173_v49 }
 0x15d   : > { %v1223_v28 = vadd.f32 %v1222_v48, %v1155_v30  ;;  %v1086_v59 = vadd.f32 %v1085_v45, %v8531_v43  ;;  %v1158_v30 = vmul.f32 %v8550_v24, %v8550_v24 }
 0x15e   : > { %14385 = vst [vmem:[#allocation22_spill] sm:$0xff] %v8584_v46  ;;  %v1061_v26 = vadd.f32 %v1060_v6, %v8570_v7 }
 0x15f   : > { %v1087_v37 = vadd.f32 %v1086_v59, %v8543_v18  ;;  %v1224_v48 = vadd.f32 %v1223_v28, %v1156_v58  ;;  %v1159_v58 = vmul.f32 %v8566_v11, %v8566_v11  ;;  %v1198_v28 = vadd.f32 %v1197_v1, %v1135_v62 }
 0x160   : > { %v1136_v59 = vmul.f32 %v8570_v7, %v8570_v7  ;;  %v1160_v1 = vmul.f32 %v8579_v35, %v8579_v35  ;;  %v1161_v62 = vmul.f32 %v8584_v46, %v8584_v46 }
 0x161   : > { %v1225_v45 = vadd.f32 %v1224_v48, %v1157_v9  ;;  %v1088_v43 = vadd.f32 %v1087_v37, %v8550_v24 }
 0x163   : > { %v1089_v9 = vadd.f32 %v1088_v43, %v8566_v11  ;;  %v1226_v37 = vadd.f32 %v1225_v45, %v1158_v30  ;;  %v8605_v43 = vadd.f32 %v8173_v49, %v983_v21  ;;  %v999_v30 = vpop.f32.mrf.mxu1  ;;  %v1199_v45 = vadd.f32 %v1198_v28, %v1136_v59 }
 0x164   : > { %v8618_v21 = vadd.f32 %v8346_v42, %v8173_v49  ;;  %v8623_v28 = vadd.f32 %v8503_v39, %v8173_v49  ;;  %v8630_v42 = vadd.f32 %v7384_v10, %v8173_v49 }
 0x165   : > { %v1227_v40 = vadd.f32 %v1226_v37, %v1159_v58  ;;  %v1090_v48 = vadd.f32 %v1089_v9, %v8579_v35  ;;  %14387 = vst [vmem:[#allocation24_spill] sm:$0xff] %v8605_v43  ;;  %v1162_v58 = vmul.f32 %v8593_v33, %v8593_v33  ;;  %v8612_v9 = vadd.f32 %v8173_v49, %v986_v8 }
 0x166   : > { %v1137_v37 = vmul.f32 %v8597_v29, %v8597_v29  ;;  %14389 = vst [vmem:[#allocation26_spill] sm:$0xff] %v8623_v28  ;;  %v1163_v59 = vmul.f32 %v8605_v43, %v8605_v43  ;;  %v1062_v8 = vadd.f32 %v1061_v26, %v8597_v29  ;;  %14390 = vst [vmem:[#allocation27_spill] sm:$0xff] %v8630_v42 }
 0x167   : > { %v1091_v11 = vadd.f32 %v1090_v48, %v8584_v46  ;;  %v1228_v32 = vadd.f32 %v1227_v40, %v1160_v1  ;;  %14388 = vst [vmem:[#allocation25_spill] sm:$0xff] %v8612_v9  ;;  %v7388_v40 = vpop.f32.mrf.mxu1  ;;  %v8640_v26 = vadd.f32 %v8173_v49, %v999_v30 }
 0x168   : > { %v1200_v48 = vadd.f32 %v1199_v45, %v1137_v37 }
 0x169   : > { %v1229_v35 = vadd.f32 %v1228_v32, %v1161_v62  ;;  %v1092_v6 = vadd.f32 %v1091_v11, %v8593_v33  ;;  %v1138_v11 = vmul.f32 %v8618_v21, %v8618_v21  ;;  %v1164_v32 = vmul.f32 %v8612_v9, %v8612_v9  ;;  %14391 = vst [vmem:[#allocation28_spill] sm:$0xff] %v8640_v26  ;;  %v1002_v45 = vpop.f32.mrf.mxu1 }
 0x16a   : > { %v1165_v33 = vmul.f32 %v8623_v28, %v8623_v28  ;;  %v1167_v30 = vmul.f32 %v8640_v26, %v8640_v26 }
 0x16b   : > { %v1093_v1 = vadd.f32 %v1092_v6, %v8605_v43  ;;  %v1230_v46 = vadd.f32 %v1229_v35, %v1162_v58  ;;  %v1063_v35 = vadd.f32 %v1062_v8, %v8618_v21  ;;  %v1201_v10 = vadd.f32 %v1200_v48, %v1138_v11 }
 0x16d   : > { %v1231_v62 = vadd.f32 %v1230_v46, %v1163_v59  ;;  %v1094_v39 = vadd.f32 %v1093_v1, %v8612_v9  ;;  %v1166_v46 = vmul.f32 %v8630_v42, %v8630_v42  ;;  %v8648_v1 = vadd.f32 %v8173_v49, %v1002_v45 }
 0x16e   : > { %v8651_v9 = vadd.f32 %v7387_v61, %v8173_v49  ;;  %v1064_v8 = vrot.slane %v1063_v35, 4  ;;  %v1202_v48 = vrot.slane %v1201_v10, 4 }
 0x16f   : > { %v1095_v58 = vadd.f32 %v1094_v39, %v8623_v28  ;;  %v1232_v37 = vadd.f32 %v1231_v62, %v1164_v32  ;;  %14392 = vst [vmem:[#allocation29_spill] sm:$0xff] %v8648_v1  ;;  %v8657_v32 = vadd.f32 %v7388_v40, %v8173_v49  ;;  %v1168_v45 = vmul.f32 %v8648_v1, %v8648_v1 }
 0x170   : > { %14393 = vst [vmem:[#allocation30_spill] sm:$0xff] %v8651_v9  ;;  %v1169_v61 = vmul.f32 %v8651_v9, %v8651_v9 }
 0x171   : > { %v1233_v6 = vadd.f32 %v1232_v37, %v1165_v33  ;;  %v1096_v59 = vadd.f32 %v1095_v58, %v8630_v42  ;;  %v1065_v58 = vadd.f32 %v1064_v8, %v1063_v35  ;;  %v1203_v37 = vadd.f32 %v1202_v48, %v1201_v10 }
 0x173   : > { %v1097_v11 = vadd.f32 %v1096_v59, %v8640_v26  ;;  %v1234_v62 = vadd.f32 %v1233_v6, %v1166_v46  ;;  %v1170_v46 = vmul.f32 %v8657_v32, %v8657_v32  ;;  %v1066_v40 = vrot.slane %v1065_v58, 2 }
 0x174   : > { %v1204_v59 = vrot.slane %v1203_v37, 2 }
 0x175   : > { %v1235_v39 = vadd.f32 %v1234_v62, %v1167_v30  ;;  %v1098_v33 = vadd.f32 %v1097_v11, %v8648_v1  ;;  %v1067_v26 = vadd.f32 %v1066_v40, %v1065_v58  ;;  %v7719_v40 = vld [vmem:[%s14124_s7 + $0x90] sm:$0xff]  }
 0x176   : > { %v1205_v35 = vadd.f32 %v1204_v59, %v1203_v37  ;;  %v7713_v37 = vld [vmem:[%s14124_s7 + $0xa8] sm:$0xff]   ;;  %v14425_v15 = vld [vmem:[#allocation29_spill] sm:$0xff] }
 0x177   : > { %v1099_v42 = vadd.f32 %v1098_v33, %v8651_v9  ;;  %v1236_v28 = vadd.f32 %v1235_v39, %v1168_v45  ;;  %v1068_v48 = vrot.slane %v1067_v26, 1  ;;  %v7721_v59 = vld [vmem:[%s14124_s7 + $0x88] sm:$0xff]  }
 0x178   : > { %v1206_v33 = vrot.slane %v1205_v35, 1 }
 0x179   : > { %v1100_v6 = vadd.f32 %v1099_v42, %v8657_v32  ;;  %v1237_v49 = vadd.f32 %v1236_v28, %v1169_v61  ;;  %v1069_v28 = vadd.f32 %v1068_v48, %v1067_v26  ;;  %v14189_v26 = vmov 0  }
 0x17a   : > { %v1207_v42 = vadd.f32 %v1206_v33, %v1205_v35  ;;  %3671 = vmatprep.subr.bf16.mxu0 %v14189_v26 }
 0x17b   : > { %v1101_v30 = vrot.slane %v1100_v6, 4  ;;  %v1238_v11 = vadd.f32 %v1237_v49, %v1170_v46  ;;  %v7717_v49 = vld [vmem:[%s14124_s7 + $0x98] sm:$0xff]  }
 0x17d   : > { %v1102_v62 = vadd.f32 %v1101_v30, %v1100_v6  ;;  %v1239_v1 = vrot.slane %v1238_v11, 4  ;;  %v7715_v6 = vld [vmem:[%s14124_s7 + $0xa0] sm:$0xff]  }
 0x17e   : > { %v7723_v30 = vld [vmem:[%s14124_s7 + $0x80] sm:$0xff]  }
 0x17f   : > { %v1103_v43 = vrot.slane %v1102_v62, 2  ;;  %v1240_v24 = vadd.f32 %v1239_v1, %v1238_v11  ;;  %v7725_v11 = vld [vmem:[%s14124_s7 + $0xf8] sm:$0xff]  }
 0x181   : > { %v1104_v10 = vadd.f32 %v1103_v43, %v1102_v62  ;;  %v1241_v8 = vrot.slane %v1240_v24, 2  ;;  %v14394_v43 = vmov 0.0  }
 0x183   : > { %v1105_v39 = vrot.slane %v1104_v10, 1  ;;  %v1242_v45 = vadd.f32 %v1241_v8, %v1240_v24  ;;  %v1032_v24 = vld [vmem:[%s14123_s6] sm:$0xf] }
 0x185   : > { %v1106_v9 = vadd.f32 %v1105_v39, %v1104_v10  ;;  %v1243_v18 = vrot.slane %v1242_v45, 1 }
 0x187   : > { %v1244_v61 = vadd.f32 %v1243_v18, %v1242_v45  ;;  %v1248_v46 = vsel %vm1247_vm1, %v1106_v9, %v1069_v28  ;;  %v7709_v18 = vld [vmem:[%s14124_s7 + $0xb8] sm:$0xff]   ;;  %v7711_v9 = vld [vmem:[%s14124_s7 + $0xb0] sm:$0xff]  }
 0x188   : > { %3672 = vmatpush1.bf16.msra.mxu0 %v7709_v18  ;;  %v7705_v45 = vld [vmem:[%s14124_s7 + $0x38] sm:$0xff]   ;;  %v7716_v18 = vld [vmem:[%s14124_s7] sm:$0xff]  }
 0x189   : > { %v1253_v58 = vsel %vm1252_vm2, %v1244_v61, %v1207_v42  ;;  %3673 = vmatprep.subr.bf16.mxu0 %v14189_v26  ;;  %v7706_v61 = vld [vmem:[%s14124_s7 + $0x30] sm:$0xff]  }
 0x18a   : > { %v1256_v1 = vsel %vm1255_vm3, %v1248_v46, %v1253_v58  ;;  %v7707_v46 = vld [vmem:[%s14124_s7 + $0x28] sm:$0xff]   ;;  %v7708_v58 = vld [vmem:[%s14124_s7 + $0x20] sm:$0xff]  }
 0x18b   : > { %7422 = vmatmul.mubr.f32.vlgmr.msra.gmra.mxu1 %v1256_v1  ;;  %v7710_v1 = vld [vmem:[%s14124_s7 + $0x18] sm:$0xff]  }
 0x18c   : > { %7426 = vmatprep.mubr.msk.f32.mxu1 %vm7871_vm0, %v14394_v43  ;;  %7425 = vmatpush3.msk.msra.mxu1 %vm1341_vm4, %v1032_v24  ;;  %v7712_v43 = vld [vmem:[%s14124_s7 + $0x10] sm:$0xff]   ;;  %v7714_v24 = vld [vmem:[%s14124_s7 + $0x8] sm:$0xff]  }
 0x18d   : > { %3382 = vmatprep.subr.bf16.mxu1 %v14189_v26  ;;  %3674 = vmatpush1.bf16.msra.mxu0 %v7711_v9  ;;  %v7718_v9 = vld [vmem:[%s14124_s7 + $0x78] sm:$0xff]  }
 0x18e   : > { %3675 = vmatprep.subr.bf16.mxu0 %v14189_v26 }
 0x191   : > { %3676 = vmatpush1.bf16.msra.mxu0 %v7713_v37  ;;  %v7720_v37 = vld [vmem:[%s14124_s7 + $0x70] sm:$0xff]  }
 0x192   : > { %3677 = vmatprep.subr.bf16.mxu0 %v14189_v26 }
 0x195   : > { %3678 = vmatpush1.bf16.msra.mxu0 %v7715_v6  ;;  %v7722_v6 = vld [vmem:[%s14124_s7 + $0x68] sm:$0xff]  }
 0x196   : > { %3679 = vmatprep.subr.bf16.mxu0 %v14189_v26 }
 0x199   : > { %3680 = vmatpush1.bf16.msra.mxu0 %v7717_v49  ;;  %v7724_v49 = vld [vmem:[%s14124_s7 + $0x60] sm:$0xff]  }
 0x19a   : > { %3681 = vmatprep.subr.bf16.mxu0 %v14189_v26 }
 0x19d   : > { %3682 = vmatpush1.bf16.msra.mxu0 %v7719_v40  ;;  %v7726_v40 = vld [vmem:[%s14124_s7 + $0x58] sm:$0xff]  }
 0x19e   : > { %3683 = vmatprep.subr.bf16.mxu0 %v14189_v26 }
 0x1a1   : > { %3684 = vmatpush1.bf16.msra.mxu0 %v7721_v59  ;;  %v7727_v59 = vld [vmem:[%s14124_s7 + $0xf0] sm:$0xff]  }
 0x1a2   : > { %3685 = vmatprep.subr.bf16.mxu0 %v14189_v26 }
 0x1a5   : > { %3686 = vmatpush1.bf16.msra.mxu0 %v7723_v30  ;;  %v7728_v30 = vld [vmem:[%s14124_s7 + $0x50] sm:$0xff]  }
 0x1a6   : > { %3687 = vmatprep.subr.bf16.mxu0 %v14189_v26 }
 0x1a9   : > { %3688 = vmatpush2.bf16.msra.mxu0 %v7725_v11  ;;  %v7729_v11 = vld [vmem:[%s14124_s7 + $0xe8] sm:$0xff]  }
 0x1aa   : > { %3689 = vmatprep.subr.bf16.mxu0 %v14189_v26 }
 0x1ad   : > { %3690 = vmatpush2.bf16.msra.mxu0 %v7727_v59 }
 0x1ae   : > { %3691 = vmatprep.subr.bf16.mxu0 %v14189_v26 }
 0x1b1   : > { %3692 = vmatpush2.bf16.msra.mxu0 %v7729_v11 }
 0x1b2   : > { %3693 = vmatprep.subr.bf16.mxu0 %v14189_v26 }
 0x24b   : > { %v1323_v62 = vpop.f32.mrf.mxu1 }
 0x24c   : > { %v1328_v35 = vmul.f32 0.001953125, %v1323_v62  ;;  %v7730_v62 = vld [vmem:[%s14124_s7 + $0x48] sm:$0xff]  }
 0x24d   : > { %v7423_v10 = vpop.f32.mrf.mxu1 }
 0x24e   : > { %v1329_v8 = vmul.f32 %v1328_v35, %v1328_v35  ;;  %v7732_v10 = vld [vmem:[%s14124_s7 + $0x40] sm:$0xff]  }
 0x250   : > { %v1331_v48 = vrot.slane %v1329_v8, 6  ;;  %v1998_v8 = vld [vmem:[#allocation2 + $0x1] sm:$0xff] }
 0x252   : > { %v1333_v39 = vsub.f32 %v1328_v35, %v1331_v48  ;;  %v1999_v48 = vld [vmem:[#allocation2 + $0x9] sm:$0xff] }
 0x254   : > { %v1334_v33 = vadd.f32 1e-05, %v1333_v39  ;;  %v2512_v39 = vpack.c.bf16 %v1999_v48, %v1998_v8  ;;  %v8832_v8 = vld [vmem:[#allocation2 + $0xa] sm:$0xff]  ;;  %v7740_v48 = vld [vmem:[%s14124_s7 + $0x120] sm:$0xff]  }
 0x255   : > { %14399 = vst [vmem:[#allocation35_spill] sm:$0xff] %v8832_v8 }
 0x256   : > { %7785 = vrsqrt.f32 %v1334_v33  ;;  %v7733_v33 = vld [vmem:[%s14124_s7 + $0xd8] sm:$0xff]  }
 0x263   : > { %v7786_v28 = vpop.eup %7785 }
 0x264   : > { %v1336_v42 = vsel %vm1255_vm3, %v1328_v35, %v7786_v28  ;;  %v7731_v35 = vld [vmem:[%s14124_s7 + $0xe0] sm:$0xff]  }
 0x265   : > { %7427 = vmatmul.mubr.msk.f32.vlgmr.msra.gmra.mxu1 %vm1337_vm5, %v1336_v42  ;;  %3694 = vmatpush2.bf16.msra.mxu0 %v7731_v35  ;;  %v7734_v42 = vld [vmem:[%s14124_s7 + $0xd0] sm:$0xff]  }
 0x266   : > { %3383 = vmatpush1.bf16.msra.mxu1 %v7705_v45  ;;  %3695 = vmatprep.subr.bf16.mxu0 %v14189_v26  ;;  %v7791_v45 = vld [vmem:[#allocation2] sm:$0xff] }
 0x267   : > { %3384 = vmatprep.subr.bf16.mxu1 %v14189_v26  ;;  %v8795_v28 = vpack.c.bf16 %v7791_v45, %v7791_v45  ;;  %3414 = vmatprep.mubr.bf16.mxu1 %v2512_v39 }
 0x269   : > { %14395 = vst [vmem:[#allocation31_spill] sm:$0xff] %v8795_v28  ;;  %3696 = vmatpush2.bf16.msra.mxu0 %v7733_v33 }
 0x26a   : > { %3385 = vmatpush1.bf16.msra.mxu1 %v7706_v61  ;;  %3697 = vmatprep.subr.bf16.mxu0 %v14189_v26  ;;  %v7735_v61 = vld [vmem:[%s14124_s7 + $0x138] sm:$0xff]  }
 0x26b   : > { %3386 = vmatprep.subr.bf16.mxu1 %v14189_v26 }
 0x26d   : > { %3698 = vmatpush2.bf16.msra.mxu0 %v7734_v42  ;;  %v14405_v42 = vld [vmem:[#allocation8_spill] sm:$0xff] }
 0x26e   : > { %3387 = vmatpush1.bf16.msra.mxu1 %v7707_v46  ;;  %3699 = vmatprep.subr.bf16.mxu0 %v14189_v26  ;;  %v7736_v46 = vld [vmem:[%s14124_s7 + $0xc8] sm:$0xff]  }
 0x26f   : > { %3388 = vmatprep.subr.bf16.mxu1 %v14189_v26 }
 0x271   : > { %3700 = vmatpush2.bf16.msra.mxu0 %v7736_v46 }
 0x272   : > { %3389 = vmatpush1.bf16.msra.mxu1 %v7708_v58  ;;  %v7737_v58 = vld [vmem:[%s14124_s7 + $0xc0] sm:$0xff]   ;;  %3701 = vmatprep.subr.bf16.mxu0 %v14189_v26 }
 0x273   : > { %3390 = vmatprep.subr.bf16.mxu1 %v14189_v26 }
 0x275   : > { %3702 = vmatpush2.bf16.msra.mxu0 %v7737_v58 }
 0x276   : > { %3391 = vmatpush1.bf16.msra.mxu1 %v7710_v1  ;;  %4249 = vmatprep.subr.bf16.mxu0 %v14189_v26  ;;  %v7738_v1 = vld [vmem:[%s14124_s7 + $0x130] sm:$0xff]  }
 0x277   : > { %3392 = vmatprep.subr.bf16.mxu1 %v14189_v26 }
 0x27a   : > { %3393 = vmatpush1.bf16.msra.mxu1 %v7712_v43  ;;  %v7739_v43 = vld [vmem:[%s14124_s7 + $0x128] sm:$0xff]  }
 0x27b   : > { %3394 = vmatprep.subr.bf16.mxu1 %v14189_v26 }
 0x27e   : > { %3395 = vmatpush1.bf16.msra.mxu1 %v7714_v24  ;;  %v7873_v24 = vmov 1966171168  }
 0x27f   : > { %3396 = vmatprep.subr.bf16.mxu1 %v14189_v26 }
 0x282   : > { %3397 = vmatpush1.bf16.msra.mxu1 %v7716_v18  ;;  %v1417_v18 = vunpack.c.l.s4 %v7873_v24  ;;  %v14424_v24 = vld [vmem:[#allocation28_spill] sm:$0xff] }
 0x283   : > { %3398 = vmatprep.subr.bf16.mxu1 %v14189_v26 }
 0x286   : > { %3399 = vmatpush2.bf16.msra.mxu1 %v7718_v9  ;;  %v1419_v9 = vlaneseq }
 0x287   : > { %3400 = vmatprep.subr.bf16.mxu1 %v14189_v26 }
 0x28a   : > { %3401 = vmatpush2.bf16.msra.mxu1 %v7720_v37  ;;  %v1418_v37 = vunpack.c.0.s8 %v1417_v18 }
 0x28b   : > { %3402 = vmatprep.subr.bf16.mxu1 %v14189_v26 }
 0x28e   : > { %3403 = vmatpush2.bf16.msra.mxu1 %v7722_v6  ;;  %v1420_v6 = vshrl.u32 %v1419_v9, 7  ;;  %v14408_v9 = vld [vmem:[#allocation11_spill] sm:$0xff] }
 0x28f   : > { %3404 = vmatprep.subr.bf16.mxu1 %v14189_v26 }
 0x292   : > { %3405 = vmatpush2.bf16.msra.mxu1 %v7724_v49  ;;  %v8824_v49 = vsub.s32 %v1418_v37, %v1420_v6 }
 0x293   : > { %3406 = vmatprep.subr.bf16.mxu1 %v14189_v26 }
 0x294   : > { %14396 = vst [vmem:[#allocation32_spill] sm:$0xff] %v8824_v49 }
 0x296   : > { %3407 = vmatpush2.bf16.msra.mxu1 %v7726_v40 }
 0x297   : > { %3408 = vmatprep.subr.bf16.mxu1 %v14189_v26 }
 0x29a   : > { %3409 = vmatpush2.bf16.msra.mxu1 %v7728_v30  ;;  %v8827_v30 = vsub.s32 0, %v1420_v6  ;;  %v7741_v6 = vld [vmem:[%s14124_s7 + $0x118] sm:$0xff]  }
 0x29b   : > { %3410 = vmatprep.subr.bf16.mxu1 %v14189_v26 }
 0x29c   : > { %14397 = vst [vmem:[#allocation33_spill] sm:$0xff] %v8827_v30 }
 0x29e   : > { %3411 = vmatpush2.bf16.msra.mxu1 %v7730_v62 }
 0x29f   : > { %3412 = vmatprep.subr.bf16.mxu1 %v14189_v26 }
 0x2a2   : > { %3413 = vmatpush2.bf16.msra.mxu1 %v7732_v10  ;;  %v8830_v10 = vld [vmem:[#allocation2 + $0x2] sm:$0xff] }
 0x2a3   : > { %3960 = vmatprep.subr.bf16.mxu1 %v14189_v26  ;;  %14398 = vst [vmem:[#allocation34_spill] sm:$0xff] %v8830_v10  ;;  %v14420_v10 = vld [vmem:[#allocation25_spill] sm:$0xff] }
 0x2a5   : > { %3415 = vmatmul.mubr.bf16.vlgmr.msra.gmra.mxu1 %v8795_v28  ;;  %v14419_v28 = vld [vmem:[#allocation24_spill] sm:$0xff] }
 0x2a6   : > { %3961 = vmatpush1.bf16.msra.mxu1 %v7735_v61 }
 0x2a7   : > { %3962 = vmatprep.subr.bf16.mxu1 %v14189_v26 }
 0x2aa   : > { %3963 = vmatpush1.bf16.msra.mxu1 %v7738_v1  ;;  %v14426_v1 = vld [vmem:[#allocation30_spill] sm:$0xff] }
 0x2ab   : > { %3964 = vmatprep.subr.bf16.mxu1 %v14189_v26 }
 0x2ae   : > { %3965 = vmatpush1.bf16.msra.mxu1 %v7739_v43 }
 0x2af   : > { %3966 = vmatprep.subr.bf16.mxu1 %v14189_v26 }
 0x2b2   : > { %3967 = vmatpush1.bf16.msra.mxu1 %v7740_v48  ;;  %v14401_v48 = vld [vmem:[#allocation3_spill] sm:$0xff] }
 0x2b3   : > { %3968 = vmatprep.subr.bf16.mxu1 %v14189_v26 }
 0x2b6   : > { %3969 = vmatpush1.bf16.msra.mxu1 %v7741_v6 }
 0x2b7   : > { %3970 = vmatprep.subr.bf16.mxu1 %v14423_v19 }
 0x325   : > { %v1411_v40 = vpop.f32.mrf.mxu1 }
 0x326   : > { %v1422_v59 = vrot.slane %v1411_v40, %v8824_v49  ;;  %v14416_v40 = vld [vmem:[#allocation21_spill] sm:$0xff] }
 0x327   : > { %v7428_v11 = vpop.f32.mrf.mxu1 }
 0x328   : > { %v1423_v62 = vcombine.high %v1422_v59, %v1422_v59  ;;  %v1430_v35 = vrot.slane %v1422_v59, %v8824_v49  ;;  %v14404_v11 = vld [vmem:[#allocation6_spill] sm:$0xff]  ;;  %v14422_v59 = vld [vmem:[#allocation27_spill] sm:$0xff] }
 0x32a   : > { %v1437_v39 = vrot.slane %v1423_v62, %v8824_v49  ;;  %v1438_v33 = vcombine.high %v1430_v35, %v1430_v35  ;;  %v8839_v45 = vrot.slane %v1430_v35, %v8827_v30  ;;  %v14406_v62 = vld [vmem:[#allocation10_spill] sm:$0xff]  ;;  %v14407_v35 = vld [vmem:[#allocation9_spill] sm:$0xff] }
 0x32c   : > { %v1439_v61 = vcombine.high %v1437_v39, %v1437_v39  ;;  %v8845_v46 = vrot.slane %v1437_v39, %v8827_v30  ;;  %v8848_v58 = vrot.slane %v1438_v33, %v8827_v30  ;;  %v14402_v39 = vld [vmem:[#allocation5_spill] sm:$0xff]  ;;  %v14403_v33 = vld [vmem:[#allocation4_spill] sm:$0xff]  ;;  %v14428_v49 = vsub.f32 %v8190_v56, %v8839_v45 }
 0x32d   : > { %v14429_v6 = vsub.f32 %v8187_v55, %v8839_v45  ;;  %v14430_v26 = vsub.f32 %v8199_v60, %v8839_v45 }
 0x32e   : > { %v8861_v37 = vrot.slane %v1439_v61, %v8827_v30  ;;  %v14400_v61 = vld [vmem:[#allocation7_spill] sm:$0xff]  ;;  %v14427_v30 = vsub.f32 %v8180_v52, %v8839_v45  ;;  %v8995_v43 = vmul.f32 %v8848_v58, %v14428_v49  ;;  %v14432_v49 = vsub.f32 %v8233_v16, %v8839_v45 }
 0x32f   : > { %v9001_v18 = vmul.f32 %v8848_v58, %v14429_v6  ;;  %v9007_v52 = vmul.f32 %v8848_v58, %v14430_v26  ;;  %v14433_v6 = vsub.f32 %v8236_v17, %v8839_v45  ;;  %v14434_v26 = vsub.f32 %v8254_v27, %v8839_v45 }
 0x330   : > { %v8989_v8 = vmul.f32 %v8848_v58, %v14427_v30  ;;  %v14431_v30 = vsub.f32 %v8213_v4, %v8839_v45  ;;  %v9019_v55 = vmul.f32 %v8848_v58, %v14432_v49  ;;  %v14436_v49 = vsub.f32 %v8270_v38, %v8839_v45 }
 0x331   : > { %v9025_v60 = vmul.f32 %v8848_v58, %v14433_v6  ;;  %v9031_v4 = vmul.f32 %v8848_v58, %v14434_v26  ;;  %v14437_v6 = vsub.f32 %v8278_v47, %v8839_v45  ;;  %v14438_v26 = vsub.f32 %v8284_v57, %v8839_v45 }
 0x332   : > { %v9013_v56 = vmul.f32 %v8848_v58, %v14431_v30  ;;  %v14435_v30 = vsub.f32 %v8265_v34, %v8839_v45  ;;  %v9043_v17 = vmul.f32 %v8848_v58, %v14436_v49  ;;  %v14440_v49 = vsub.f32 %v8296_v5, %v8839_v45 }
 0x333   : > { %v9049_v27 = vmul.f32 %v8848_v58, %v14437_v6  ;;  %v9055_v34 = vmul.f32 %v8848_v58, %v14438_v26  ;;  %v14441_v6 = vsub.f32 %v8308_v14, %v8839_v45  ;;  %v14442_v26 = vsub.f32 %v8320_v23, %v8839_v45 }
 0x334   : > { %v9037_v16 = vmul.f32 %v8848_v58, %v14435_v30  ;;  %v14439_v30 = vsub.f32 %v8290_v0, %v8839_v45  ;;  %v9067_v47 = vmul.f32 %v8848_v58, %v14440_v49  ;;  %v14444_v49 = vsub.f32 %v8338_v36, %v8839_v45 }
 0x335   : > { %v9073_v57 = vmul.f32 %v8848_v58, %v14441_v6  ;;  %v9079_v0 = vmul.f32 %v8848_v58, %v14442_v26  ;;  %v14445_v6 = vsub.f32 %v8356_v51, %v8839_v45  ;;  %v14446_v26 = vsub.f32 %v8364_v2, %v8839_v45 }
 0x336   : > { %v9061_v38 = vmul.f32 %v8848_v58, %v14439_v30  ;;  %v14443_v30 = vsub.f32 %v8332_v31, %v8839_v45  ;;  %v9091_v14 = vmul.f32 %v8848_v58, %v14444_v49  ;;  %v14448_v49 = vsub.f32 %v14400_v61, %v8839_v45 }
 0x337   : > { %v9097_v23 = vmul.f32 %v8848_v58, %v14445_v6  ;;  %v9103_v31 = vmul.f32 %v8848_v58, %v14446_v26  ;;  %v14449_v6 = vsub.f32 %v8425_v41, %v8839_v45  ;;  %v14450_v26 = vsub.f32 %v8446_v53, %v8839_v45 }
 0x338   : > { %v9085_v5 = vmul.f32 %v8848_v58, %v14443_v30  ;;  %v14447_v30 = vsub.f32 %v8381_v22, %v8839_v45  ;;  %v9115_v51 = vmul.f32 %v8848_v58, %v14448_v49  ;;  %v14452_v49 = vsub.f32 %v8482_v20, %v8839_v45 }
 0x339   : > { %v9121_v2 = vmul.f32 %v8848_v58, %v14449_v6  ;;  %v9127_v22 = vmul.f32 %v8848_v58, %v14450_v26  ;;  %v14453_v6 = vsub.f32 %v8514_v13, %v8839_v45  ;;  %v14454_v26 = vsub.f32 %v8537_v54, %v8839_v45 }
 0x33a   : > { %v9109_v36 = vmul.f32 %v8848_v58, %v14447_v30  ;;  %v14451_v30 = vsub.f32 %v8467_v63, %v8839_v45  ;;  %v9139_v41 = vmul.f32 %v8848_v58, %v14452_v49  ;;  %v14456_v49 = vsub.f32 %v8570_v7, %v8839_v45 }
 0x33b   : > { %v9145_v53 = vmul.f32 %v8848_v58, %v14453_v6  ;;  %v9151_v63 = vmul.f32 %v8848_v58, %v14454_v26  ;;  %v14457_v6 = vsub.f32 %v8597_v29, %v8839_v45  ;;  %v14458_v26 = vsub.f32 %v8618_v21, %v8839_v45 }
 0x33c   : > { %v9133_v61 = vmul.f32 %v8848_v58, %v14451_v30  ;;  %v14455_v30 = vsub.f32 %v8558_v50, %v8839_v45  ;;  %v9163_v13 = vmul.f32 %v8848_v58, %v14456_v49  ;;  %v14460_v49 = vsub.f32 %v14402_v39, %v8845_v46 }
 0x33d   : > { %v9169_v54 = vmul.f32 %v8848_v58, %v14457_v6  ;;  %v9175_v50 = vmul.f32 %v8848_v58, %v14458_v26  ;;  %v14461_v6 = vsub.f32 %v14403_v33, %v8845_v46  ;;  %v14462_v45 = vsub.f32 %v14404_v11, %v8845_v46 }
 0x33e   : > { %v9157_v20 = vmul.f32 %v8848_v58, %v14455_v30  ;;  %v14459_v30 = vsub.f32 %v14401_v48, %v8845_v46  ;;  %v9187_v29 = vmul.f32 %v8861_v37, %v14460_v49  ;;  %v14463_v48 = vsub.f32 %v14405_v42, %v8845_v46 }
 0x33f   : > { %v9193_v21 = vmul.f32 %v8861_v37, %v14461_v6  ;;  %v9199_v58 = vmul.f32 %v8861_v37, %v14462_v45  ;;  %v14464_v26 = vsub.f32 %v14406_v62, %v8845_v46  ;;  %v14466_v49 = vsub.f32 %v8428_v25, %v8845_v46 }
 0x340   : > { %v9181_v7 = vmul.f32 %v8861_v37, %v14459_v30  ;;  %v9205_v39 = vmul.f32 %v8861_v37, %v14463_v48  ;;  %v14465_v30 = vsub.f32 %v14407_v35, %v8845_v46  ;;  %v14467_v6 = vsub.f32 %v8440_v3, %v8845_v46 }
 0x341   : > { %v9211_v33 = vmul.f32 %v8861_v37, %v14464_v26  ;;  %v9223_v42 = vmul.f32 %v8861_v37, %v14466_v49  ;;  %v14468_v45 = vsub.f32 %v8461_v44, %v8845_v46  ;;  %v14470_v48 = vsub.f32 %v14408_v9, %v8845_v46 }
 0x342   : > { %v9217_v11 = vmul.f32 %v8861_v37, %v14465_v30  ;;  %v9229_v62 = vmul.f32 %v8861_v37, %v14467_v6  ;;  %v14472_v26 = vsub.f32 %v8470_v12, %v8845_v46  ;;  %v14474_v30 = vld [vmem:[#allocation12_spill] sm:$0xff]  ;;  %v14477_v6 = vld [vmem:[#allocation13_spill] sm:$0xff] }
 0x343   : > { %v9235_v35 = vmul.f32 %v8861_v37, %v14468_v45  ;;  %v9241_v25 = vmul.f32 %v8861_v37, %v14470_v48  ;;  %v14475_v49 = vsub.f32 %v14474_v30, %v8845_v46  ;;  %v14478_v45 = vsub.f32 %v14477_v6, %v8845_v46  ;;  %v14480_v48 = vld [vmem:[#allocation14_spill] sm:$0xff]  ;;  %v14486_v6 = vld [vmem:[#allocation16_spill] sm:$0xff] }
 0x344   : > { %v9247_v3 = vmul.f32 %v8861_v37, %v14472_v26  ;;  %v14483_v26 = vld [vmem:[#allocation15_spill] sm:$0xff] }
 0x345   : > { %14469 = vst [vmem:[#allocation7_spill] sm:$0xff] %v9235_v35  ;;  %14471 = vst [vmem:[#allocation3_spill] sm:$0xff] %v9241_v25  ;;  %v9253_v44 = vmul.f32 %v8861_v37, %v14475_v49  ;;  %v9259_v9 = vmul.f32 %v8861_v37, %v14478_v45  ;;  %v14481_v25 = vsub.f32 %v14480_v48, %v8845_v46  ;;  %v7742_v49 = vld [vmem:[%s14124_s7 + $0x110] sm:$0xff]  }
 0x346   : > { %14473 = vst [vmem:[#allocation5_spill] sm:$0xff] %v9247_v3  ;;  %v14484_v3 = vsub.f32 %v14483_v26, %v8845_v46  ;;  %v14487_v45 = vsub.f32 %v14486_v6, %v8845_v46  ;;  %v14489_v48 = vld [vmem:[#allocation17_spill] sm:$0xff]  ;;  %v14492_v26 = vld [vmem:[#allocation18_spill] sm:$0xff]  ;;  %3971 = vmatpush1.bf16.msra.mxu1 %v7742_v49 }
 0x347   : > { %14476 = vst [vmem:[#allocation4_spill] sm:$0xff] %v9253_v44  ;;  %14479 = vst [vmem:[#allocation6_spill] sm:$0xff] %v9259_v9  ;;  %v9265_v12 = vmul.f32 %v8861_v37, %v14481_v25  ;;  %v14490_v25 = vsub.f32 %v14489_v48, %v8845_v46  ;;  %v14495_v44 = vld [vmem:[#allocation19_spill] sm:$0xff]  ;;  %v14498_v48 = vld [vmem:[#allocation20_spill] sm:$0xff]  ;;  %3972 = vmatprep.subr.bf16.mxu1 %v14423_v19 }
 0x348   : > { %v9271_v30 = vmul.f32 %v8861_v37, %v14484_v3  ;;  %v9280_v9 = vmul.f32 %v8861_v37, %v14487_v45  ;;  %v14493_v3 = vsub.f32 %v14492_v26, %v8845_v46  ;;  %v14496_v35 = vsub.f32 %v14495_v44, %v8845_v46  ;;  %v9303_v45 = vld [vmem:[%s14120_s3] ss:$0 sm:$0xff]  ;;  %v14501_v44 = vld [vmem:[#allocation22_spill] sm:$0xff] }
 0x349   : > { %14482 = vst [vmem:[#allocation8_spill] sm:$0xff] %v9265_v12  ;;  %v9286_v12 = vmul.f32 %v8861_v37, %v14490_v25  ;;  %v14499_v25 = vsub.f32 %v14498_v48, %v8845_v46  ;;  %v14500_v26 = vsub.f32 %v14416_v40, %v8845_v46 }
 0x34a   : > { %14485 = vst [vmem:[#allocation10_spill] sm:$0xff] %v9271_v30  ;;  %14488 = vst [vmem:[#allocation9_spill] sm:$0xff] %v9280_v9  ;;  %v9292_v30 = vmul.f32 %v8861_v37, %v14493_v3  ;;  %v9298_v6 = vmul.f32 %v8861_v37, %v14496_v35  ;;  %v14502_v35 = vsub.f32 %v14501_v44, %v8845_v46 }
 0x34b   : > { %14491 = vst [vmem:[#allocation11_spill] sm:$0xff] %v9286_v12  ;;  %v9309_v12 = vmul.f32 %v8861_v37, %v14499_v25  ;;  %v9315_v3 = vmul.f32 %v8861_v37, %v14500_v26  ;;  %v14506_v25 = vsub.f32 %v14419_v28, %v8845_v46  ;;  %v14507_v26 = vsub.f32 %v14420_v10, %v8845_v46 }
 0x34c   : > { %14494 = vst [vmem:[#allocation21_spill] sm:$0xff] %v9292_v30  ;;  %14497 = vst [vmem:[#allocation24_spill] sm:$0xff] %v9298_v6  ;;  %v9321_v6 = vmul.f32 %v8861_v37, %v14502_v35  ;;  %v14504_v30 = vld [vmem:[#allocation23_spill] sm:$0xff]  ;;  %v14508_v35 = vld [vmem:[#allocation26_spill] sm:$0xff]  ;;  %v14511_v10 = vsub.f32 %v14424_v24, %v8845_v46 }
 0x34d   : > { %v14505_v9 = vsub.f32 %v14504_v30, %v8845_v46  ;;  %v9333_v40 = vmul.f32 %v8861_v37, %v14506_v25  ;;  %v9339_v44 = vmul.f32 %v8861_v37, %v14507_v26  ;;  %v14512_v25 = vsub.f32 %v14425_v15, %v8845_v46 }
 0x34e   : > { %14503 = vst [vmem:[#allocation25_spill] sm:$0xff] %v9321_v6  ;;  %v14509_v6 = vsub.f32 %v14508_v35, %v8845_v46  ;;  %v9358_v49 = vmul.f32 %v8861_v37, %v14511_v10  ;;  %v14514_v35 = vsub.f32 %v8657_v32, %v8845_v46  ;;  %v9384_v15 = vmul.f32 %v9303_v45, %v8995_v43 }
 0x34f   : > { %v9327_v48 = vmul.f32 %v8861_v37, %v14505_v9  ;;  %v14510_v9 = vsub.f32 %v14422_v59, %v8845_v46  ;;  %v14513_v59 = vsub.f32 %v14426_v1, %v8845_v46  ;;  %v9388_v1 = vmul.f32 %v9303_v45, %v9001_v18 }
 0x350   : > { %v9345_v30 = vmul.f32 %v8861_v37, %v14509_v6  ;;  %v9364_v6 = vmul.f32 %v8861_v37, %v14512_v25  ;;  %v9376_v24 = vmul.f32 %v8861_v37, %v14514_v35  ;;  %v9392_v10 = vmul.f32 %v9303_v45, %v9007_v52  ;;  %v14519_v25 = vld [vmem:[#allocation5_spill] sm:$0xff]  ;;  %v14523_v35 = vld [vmem:[#allocation6_spill] sm:$0xff] }
 0x351   : > { %v9351_v28 = vmul.f32 %v8861_v37, %v14510_v9  ;;  %v9370_v26 = vmul.f32 %v8861_v37, %v14513_v59  ;;  %v9380_v9 = vmul.f32 %v9303_v45, %v8989_v8  ;;  %v9396_v32 = vmul.f32 %v9303_v45, %v9013_v56  ;;  %v14521_v59 = vld [vmem:[#allocation4_spill] sm:$0xff] }
 0x352   : > { %v9400_v8 = vmul.f32 %v9303_v45, %v9019_v55  ;;  %v9404_v46 = vmul.f32 %v9303_v45, %v9025_v60  ;;  %v9408_v43 = vmul.f32 %v9303_v45, %v9031_v4  ;;  %v9412_v18 = vmul.f32 %v9303_v45, %v9037_v16 }
 0x353   : > { %v9416_v37 = vmul.f32 %v9303_v45, %v9043_v17  ;;  %v9420_v52 = vmul.f32 %v9303_v45, %v9049_v27  ;;  %v9424_v56 = vmul.f32 %v9303_v45, %v9055_v34  ;;  %v9428_v55 = vmul.f32 %v9303_v45, %v9061_v38 }
 0x354   : > { %v9432_v60 = vmul.f32 %v9303_v45, %v9067_v47  ;;  %v9436_v4 = vmul.f32 %v9303_v45, %v9073_v57  ;;  %v9440_v16 = vmul.f32 %v9303_v45, %v9079_v0  ;;  %v9444_v17 = vmul.f32 %v9303_v45, %v9085_v5 }
 0x355   : > { %v9448_v27 = vmul.f32 %v9303_v45, %v9091_v14  ;;  %v9452_v34 = vmul.f32 %v9303_v45, %v9097_v23  ;;  %v9456_v38 = vmul.f32 %v9303_v45, %v9103_v31  ;;  %v9460_v47 = vmul.f32 %v9303_v45, %v9109_v36 }
 0x356   : > { %v9464_v57 = vmul.f32 %v9303_v45, %v9115_v51  ;;  %v9468_v0 = vmul.f32 %v9303_v45, %v9121_v2  ;;  %v9472_v5 = vmul.f32 %v9303_v45, %v9127_v22  ;;  %v9476_v14 = vmul.f32 %v9303_v45, %v9133_v61 }
 0x357   : > { %v9480_v23 = vmul.f32 %v9303_v45, %v9139_v41  ;;  %v9484_v31 = vmul.f32 %v9303_v45, %v9145_v53  ;;  %v9488_v36 = vmul.f32 %v9303_v45, %v9151_v63  ;;  %v9492_v51 = vmul.f32 %v9303_v45, %v9157_v20 }
 0x358   : > { %v9496_v2 = vmul.f32 %v9303_v45, %v9163_v13  ;;  %v9500_v22 = vmul.f32 %v9303_v45, %v9169_v54  ;;  %v9504_v61 = vmul.f32 %v9303_v45, %v9175_v50  ;;  %v9508_v41 = vmul.f32 %v9303_v45, %v9181_v7 }
 0x359   : > { %v9512_v53 = vmul.f32 %v9303_v45, %v9187_v29  ;;  %v9516_v63 = vmul.f32 %v9303_v45, %v9193_v21  ;;  %v9520_v20 = vmul.f32 %v9303_v45, %v9199_v58  ;;  %v9524_v13 = vmul.f32 %v9303_v45, %v9205_v39  ;;  %v14516_v21 = vld [vmem:[#allocation7_spill] sm:$0xff] }
 0x35a   : > { %v9528_v54 = vmul.f32 %v9303_v45, %v9211_v33  ;;  %v9532_v50 = vmul.f32 %v9303_v45, %v9217_v11  ;;  %v9536_v7 = vmul.f32 %v9303_v45, %v9223_v42  ;;  %v9540_v29 = vmul.f32 %v9303_v45, %v9229_v62  ;;  %v14518_v39 = vld [vmem:[#allocation3_spill] sm:$0xff] }
 0x35b   : > { %v9544_v58 = vmul.f32 %v9303_v45, %v14516_v21  ;;  %v9548_v33 = vmul.f32 %v9303_v45, %v14518_v39  ;;  %v9552_v11 = vmul.f32 %v9303_v45, %v14519_v25  ;;  %v9556_v42 = vmul.f32 %v9303_v45, %v14521_v59  ;;  %v7743_v25 = vld [vmem:[%s14124_s7 + $0x108] sm:$0xff]  }
 0x35c   : > { %14515 = vst [vmem:[#allocation27_spill] sm:$0xff] %v9540_v29  ;;  %v9560_v62 = vmul.f32 %v9303_v45, %v14523_v35  ;;  %v14525_v29 = vld [vmem:[#allocation8_spill] sm:$0xff]  ;;  %3973 = vmatpush1.bf16.msra.mxu1 %v7743_v25 }
 0x35d   : > { %14517 = vst [vmem:[#allocation28_spill] sm:$0xff] %v9544_v58  ;;  %14520 = vst [vmem:[#allocation29_spill] sm:$0xff] %v9552_v11  ;;  %v9564_v21 = vmul.f32 %v9303_v45, %v14525_v29  ;;  %v14527_v58 = vld [vmem:[#allocation10_spill] sm:$0xff]  ;;  %v14529_v11 = vld [vmem:[#allocation9_spill] sm:$0xff]  ;;  %3974 = vmatprep.subr.bf16.mxu1 %v14423_v19 }
 0x35e   : > { %14522 = vst [vmem:[#allocation30_spill] sm:$0xff] %v9556_v42  ;;  %14524 = vst [vmem:[#allocation12_spill] sm:$0xff] %v9560_v62  ;;  %v9568_v39 = vmul.f32 %v9303_v45, %v14527_v58  ;;  %v9575_v59 = vmul.f32 %v9303_v45, %v14529_v11  ;;  %v14530_v42 = vld [vmem:[#allocation11_spill] sm:$0xff]  ;;  %v14532_v62 = vld [vmem:[#allocation21_spill] sm:$0xff]  ;;  %v9596_v11 = vmul.f32 %v9303_v45, %v9309_v12 }
 0x35f   : > { %14526 = vst [vmem:[#allocation13_spill] sm:$0xff] %v9564_v21  ;;  %v9579_v35 = vmul.f32 %v9303_v45, %v14530_v42  ;;  %v9583_v29 = vmul.f32 %v9303_v45, %v14532_v62  ;;  %v14533_v21 = vld [vmem:[#allocation24_spill] sm:$0xff]  ;;  %v9600_v42 = vmul.f32 %v9303_v45, %v9315_v3  ;;  %v9616_v12 = vmul.f32 %v9303_v45, %v9339_v44 }
 0x360   : > { %14528 = vst [vmem:[#allocation14_spill] sm:$0xff] %v9568_v39  ;;  %v9587_v58 = vmul.f32 %v9303_v45, %v14533_v21  ;;  %v9592_v39 = vld [vmem:[%s14121_s4] ss:$0 sm:$0xff]  ;;  %v9608_v21 = vmul.f32 %v9303_v45, %v9327_v48  ;;  %v9620_v3 = vmul.f32 %v9303_v45, %v9345_v30  ;;  %v9629_v48 = vmul.f32 %v9303_v45, %v9358_v49 }
 0x361   : > { %14531 = vst [vmem:[#allocation15_spill] sm:$0xff] %v9579_v35  ;;  %v14535_v35 = vld [vmem:[#allocation25_spill] sm:$0xff]  ;;  %v9637_v44 = vmul.f32 %v9303_v45, %v9370_v26  ;;  %v9641_v30 = vmul.f32 %v9303_v45, %v9376_v24  ;;  %v9649_v49 = vadd.f32 %v9592_v39, %v9384_v15  ;;  %v9657_v26 = vadd.f32 %v9592_v39, %v9392_v10 }
 0x362   : > { %14534 = vst [vmem:[#allocation16_spill] sm:$0xff] %v9587_v58  ;;  %v9604_v62 = vmul.f32 %v9303_v45, %v14535_v35  ;;  %v9612_v58 = vmul.f32 %v9303_v45, %v9333_v40  ;;  %v9624_v35 = vmul.f32 %v9303_v45, %v9351_v28  ;;  %v9633_v40 = vmul.f32 %v9303_v45, %v9364_v6 }
 0x363   : > { %v9645_v28 = vadd.f32 %v9592_v39, %v9380_v9  ;;  %v9653_v6 = vadd.f32 %v9592_v39, %v9388_v1  ;;  %v9661_v45 = vadd.f32 %v9592_v39, %v9396_v32  ;;  %v9665_v24 = vadd.f32 %v9592_v39, %v9400_v8 }
 0x364   : > { %v9669_v9 = vadd.f32 %v9592_v39, %v9404_v46  ;;  %v9673_v15 = vadd.f32 %v9592_v39, %v9408_v43  ;;  %v9677_v1 = vadd.f32 %v9592_v39, %v9412_v18  ;;  %v9681_v10 = vadd.f32 %v9592_v39, %v9416_v37  ;;  %v14547_v25 = vld [vmem:[#allocation28_spill] sm:$0xff] }
 0x365   : > { %v9685_v32 = vadd.f32 %v9592_v39, %v9420_v52  ;;  %v9689_v8 = vadd.f32 %v9592_v39, %v9424_v56  ;;  %v9693_v46 = vadd.f32 %v9592_v39, %v9428_v55  ;;  %v9697_v43 = vadd.f32 %v9592_v39, %v9432_v60 }
 0x366   : > { %v9701_v18 = vadd.f32 %v9592_v39, %v9436_v4  ;;  %v9705_v37 = vadd.f32 %v9592_v39, %v9440_v16  ;;  %v9709_v52 = vadd.f32 %v9592_v39, %v9444_v17  ;;  %v9713_v56 = vadd.f32 %v9592_v39, %v9448_v27 }
 0x367   : > { %14536 = vst [vmem:[#allocation17_spill] sm:$0xff] %v9685_v32  ;;  %14537 = vst [vmem:[#allocation18_spill] sm:$0xff] %v9689_v8  ;;  %v9717_v55 = vadd.f32 %v9592_v39, %v9452_v34  ;;  %v9721_v60 = vadd.f32 %v9592_v39, %v9456_v38  ;;  %v9725_v4 = vadd.f32 %v9592_v39, %v9460_v47 }
 0x368   : > { %14538 = vst [vmem:[#allocation19_spill] sm:$0xff] %v9693_v46  ;;  %14539 = vst [vmem:[#allocation20_spill] sm:$0xff] %v9697_v43  ;;  %v9729_v16 = vadd.f32 %v9592_v39, %v9464_v57  ;;  %v9733_v17 = vadd.f32 %v9592_v39, %v9468_v0  ;;  %v9737_v27 = vadd.f32 %v9592_v39, %v9472_v5 }
 0x369   : > { %14540 = vst [vmem:[#allocation22_spill] sm:$0xff] %v9701_v18  ;;  %14541 = vst [vmem:[#allocation23_spill] sm:$0xff] %v9705_v37  ;;  %v9741_v34 = vadd.f32 %v9592_v39, %v9476_v14  ;;  %v9745_v38 = vadd.f32 %v9592_v39, %v9480_v23  ;;  %v9749_v47 = vadd.f32 %v9592_v39, %v9484_v31 }
 0x36a   : > { %v9753_v57 = vadd.f32 %v9592_v39, %v9488_v36  ;;  %v9757_v0 = vadd.f32 %v9592_v39, %v9492_v51  ;;  %v9761_v5 = vadd.f32 %v9592_v39, %v9496_v2  ;;  %v9765_v14 = vadd.f32 %v9592_v39, %v9500_v22 }
 0x36b   : > { %v9769_v23 = vadd.f32 %v9592_v39, %v9504_v61  ;;  %v9773_v31 = vadd.f32 %v9592_v39, %v9508_v41  ;;  %v9777_v36 = vadd.f32 %v9592_v39, %v9512_v53  ;;  %v9781_v51 = vadd.f32 %v9592_v39, %v9516_v63  ;;  %v14545_v63 = vld [vmem:[#allocation27_spill] sm:$0xff] }
 0x36c   : > { %v9785_v2 = vadd.f32 %v9592_v39, %v9520_v20  ;;  %v9789_v22 = vadd.f32 %v9592_v39, %v9524_v13  ;;  %v9793_v61 = vadd.f32 %v9592_v39, %v9528_v54  ;;  %v9797_v41 = vadd.f32 %v9592_v39, %v9532_v50 }
 0x36d   : > { %v9801_v53 = vadd.f32 %v9592_v39, %v9536_v7  ;;  %v9805_v20 = vadd.f32 %v9592_v39, %v14545_v63  ;;  %v9809_v13 = vadd.f32 %v9592_v39, %v14547_v25  ;;  %v9813_v54 = vadd.f32 %v9592_v39, %v9548_v33 }
 0x36e   : > { %14542 = vst [vmem:[#allocation26_spill] sm:$0xff] %v9793_v61  ;;  %14543 = vst [vmem:[#allocation7_spill] sm:$0xff] %v9797_v41  ;;  %v14549_v61 = vld [vmem:[#allocation29_spill] sm:$0xff]  ;;  %v14550_v41 = vld [vmem:[#allocation30_spill] sm:$0xff] }
 0x36f   : > { %14544 = vst [vmem:[#allocation3_spill] sm:$0xff] %v9801_v53  ;;  %14546 = vst [vmem:[#allocation5_spill] sm:$0xff] %v9805_v20  ;;  %v9817_v50 = vadd.f32 %v9592_v39, %v14549_v61  ;;  %v9821_v7 = vadd.f32 %v9592_v39, %v14550_v41  ;;  %v14552_v53 = vld [vmem:[#allocation12_spill] sm:$0xff]  ;;  %v14553_v20 = vld [vmem:[#allocation13_spill] sm:$0xff]  ;;  %v9840_v41 = vadd.f32 %v9592_v39, %v9575_v59 }
 0x370   : > { %14548 = vst [vmem:[#allocation4_spill] sm:$0xff] %v9809_v13  ;;  %v9825_v63 = vadd.f32 %v9592_v39, %v14552_v53  ;;  %v9829_v25 = vadd.f32 %v9592_v39, %v14553_v20  ;;  %v14555_v13 = vld [vmem:[#allocation14_spill] sm:$0xff]  ;;  %v7744_v61 = vld [vmem:[%s14124_s7 + $0x100] sm:$0xff]   ;;  %v9848_v20 = vadd.f32 %v9592_v39, %v9583_v29  ;;  %v9860_v59 = vadd.f32 %v9592_v39, %v9600_v42 }
 0x371   : > { %14551 = vst [vmem:[#allocation6_spill] sm:$0xff] %v9821_v7  ;;  %v9833_v33 = vadd.f32 %v9592_v39, %v14555_v13  ;;  %v14557_v7 = vld [vmem:[#allocation15_spill] sm:$0xff]  ;;  %v9868_v29 = vadd.f32 %v9592_v39, %v9608_v21  ;;  %3975 = vmatpush1.bf16.msra.mxu1 %v7744_v61  ;;  %v9880_v42 = vadd.f32 %v9592_v39, %v9620_v3  ;;  %v1759_v61 = vmax.f32 %v9769_v23, 0.0 }
 0x372   : > { %14554 = vst [vmem:[#allocation8_spill] sm:$0xff] %v9829_v25  ;;  %v9844_v53 = vadd.f32 %v9592_v39, %v14557_v7  ;;  %v14558_v25 = vld [vmem:[#allocation16_spill] sm:$0xff]  ;;  %v9864_v7 = vadd.f32 %v9592_v39, %v9604_v62  ;;  %v9884_v62 = vadd.f32 %v9592_v39, %v9624_v35  ;;  %3976 = vmatprep.subr.bf16.mxu1 %v14423_v19  ;;  %v14208_v35 = vmax.f32 %v9645_v28, 0.0 }
 0x373   : > { %14556 = vst [vmem:[#allocation10_spill] sm:$0xff] %v9833_v33  ;;  %v9852_v13 = vadd.f32 %v9592_v39, %v14558_v25  ;;  %v9856_v33 = vadd.f32 %v9592_v39, %v9596_v11  ;;  %v9872_v25 = vadd.f32 %v9592_v39, %v9612_v58  ;;  %v9876_v11 = vadd.f32 %v9592_v39, %v9616_v12 }
 0x374   : > { %v9889_v21 = vadd.f32 %v9592_v39, %v9629_v48  ;;  %v9893_v58 = vadd.f32 %v9592_v39, %v9633_v40  ;;  %v9897_v12 = vadd.f32 %v9592_v39, %v9637_v44  ;;  %v9901_v3 = vadd.f32 %v9592_v39, %v9641_v30  ;;  %1870 = vst [vmem:[#allocation2 + $0x19] sm:$0xff] %v14208_v35 }
 0x375   : > { %v14207_v19 = vmax.f32 %v9653_v6, 0.0  ;;  %v14210_v40 = vmax.f32 %v9665_v24, 0.0  ;;  %v14211_v44 = vmax.f32 %v9673_v15, 0.0  ;;  %v14562_v48 = vmax.f32 %v9649_v49, 0.0  ;;  %1901 = vst [vmem:[#allocation2 + $0x189] sm:$0xff] %v1759_v61 }
 0x376   : > { %14559 = vst [vmem:[#allocation9_spill] sm:$0xff] %v9889_v21  ;;  %14560 = vst [vmem:[#allocation11_spill] sm:$0xff] %v9893_v58  ;;  %v14209_v21 = vmax.f32 %v9661_v45, 0.0  ;;  %v14563_v58 = vmax.f32 %v9657_v26, 0.0  ;;  %v14213_v39 = vmax.f32 %v9697_v43, 0.0  ;;  %v14565_v30 = vmax.f32 %v9677_v1, 0.0 }
 0x377   : > { %14561 = vst [vmem:[#allocation21_spill] sm:$0xff] %v9897_v12  ;;  %1871 = vst [vmem:[#allocation2 + $0x21] sm:$0xff] %v14562_v48  ;;  %v14212_v12 = vmax.f32 %v9693_v46, 0.0  ;;  %v14564_v48 = vmax.f32 %v9669_v9, 0.0  ;;  %v1758_v35 = vmax.f32 %v9765_v14, 0.0  ;;  %v14586_v14 = vmax.f32 %v9773_v31, 0.0 }
 0x378   : > { %1872 = vst [vmem:[#allocation2 + $0x31] sm:$0xff] %v14207_v19  ;;  %1873 = vst [vmem:[#allocation2 + $0x39] sm:$0xff] %v14563_v58  ;;  %v14214_v58 = vmax.f32 %v9709_v52, 0.0  ;;  %v14216_v19 = vmax.f32 %v9729_v16, 0.0  ;;  %v14587_v23 = vmax.f32 %v9777_v36, 0.0  ;;  %v14590_v61 = vld [vmem:[#allocation6_spill] sm:$0xff] }
 0x379   : > { %1874 = vst [vmem:[#allocation2 + $0x49] sm:$0xff] %v14209_v21  ;;  %1875 = vst [vmem:[#allocation2 + $0x51] sm:$0xff] %v14210_v40  ;;  %v14566_v21 = vmax.f32 %v9681_v10, 0.0  ;;  %v14567_v40 = vmax.f32 %v9685_v32, 0.0  ;;  %v14593_v46 = vmax.f32 %v9789_v22, 0.0  ;;  %v1791_v32 = vmax.f32 %v9901_v3, 0.0 }
 0x37a   : > { %1876 = vst [vmem:[#allocation2 + $0x61] sm:$0xff] %v14564_v48  ;;  %1877 = vst [vmem:[#allocation2 + $0x69] sm:$0xff] %v14211_v44  ;;  %v14568_v48 = vmax.f32 %v9689_v8, 0.0  ;;  %v14215_v44 = vmax.f32 %v9725_v4, 0.0  ;;  %v14592_v43 = vld [vmem:[#allocation10_spill] sm:$0xff]  ;;  %v14608_v3 = vmax.f32 %v9653_v6, 0.0 }
 0x37b   : > { %1878 = vst [vmem:[#allocation2 + $0x79] sm:$0xff] %v14565_v30  ;;  %1879 = vst [vmem:[#allocation2 + $0x81] sm:$0xff] %v14566_v21  ;;  %v14569_v21 = vmax.f32 %v9701_v18, 0.0  ;;  %v14218_v30 = vmax.f32 %v9741_v34, 0.0  ;;  %v14585_v18 = vld [vmem:[#allocation4_spill] sm:$0xff] }
 0x37c   : > { %1880 = vst [vmem:[#allocation2 + $0x91] sm:$0xff] %v14567_v40  ;;  %1881 = vst [vmem:[#allocation2 + $0x99] sm:$0xff] %v14568_v48  ;;  %v14570_v40 = vmax.f32 %v9705_v37, 0.0  ;;  %v14580_v48 = vld [vmem:[#allocation7_spill] sm:$0xff]  ;;  %v14582_v37 = vmax.f32 %v9757_v0, 0.0 }
 0x37d   : > { %1882 = vst [vmem:[#allocation2 + $0xa9] sm:$0xff] %v14212_v12  ;;  %1883 = vst [vmem:[#allocation2 + $0xb1] sm:$0xff] %v14213_v39  ;;  %v14571_v12 = vmax.f32 %v9713_v56, 0.0  ;;  %v14572_v39 = vmax.f32 %v9717_v55, 0.0  ;;  %v14604_v8 = vld [vmem:[#allocation11_spill] sm:$0xff] }
 0x37e   : > { %1884 = vst [vmem:[#allocation2 + $0xc1] sm:$0xff] %v14569_v21  ;;  %1885 = vst [vmem:[#allocation2 + $0xc9] sm:$0xff] %v14570_v40  ;;  %v14573_v21 = vmax.f32 %v9721_v60, 0.0  ;;  %v14581_v40 = vld [vmem:[#allocation3_spill] sm:$0xff] }
 0x37f   : > { %1886 = vst [vmem:[#allocation2 + $0xd9] sm:$0xff] %v14214_v58  ;;  %1887 = vst [vmem:[#allocation2 + $0xe1] sm:$0xff] %v14571_v12  ;;  %v14574_v12 = vmax.f32 %v9733_v17, 0.0  ;;  %v1775_v58 = vmax.f32 %v14592_v43, 0.0  ;;  %v1779_v43 = vmax.f32 %v9852_v13, 0.0  ;;  %v1783_v13 = vmax.f32 %v9868_v29, 0.0 }
 0x380   : > { %1888 = vst [vmem:[#allocation2 + $0xf1] sm:$0xff] %v14572_v39  ;;  %1889 = vst [vmem:[#allocation2 + $0xf9] sm:$0xff] %v14573_v21  ;;  %v14575_v39 = vmax.f32 %v9737_v27, 0.0  ;;  %v14579_v21 = vld [vmem:[#allocation26_spill] sm:$0xff]  ;;  %v14603_v29 = vld [vmem:[#allocation9_spill] sm:$0xff] }
 0x381   : > { %1890 = vst [vmem:[#allocation2 + $0x109] sm:$0xff] %v14215_v44  ;;  %1891 = vst [vmem:[#allocation2 + $0x111] sm:$0xff] %v14216_v19  ;;  %v14576_v44 = vmax.f32 %v9745_v38, 0.0  ;;  %v14577_v19 = vmax.f32 %v9749_v47, 0.0  ;;  %v2130_v6 = vld [vmem:[#allocation2 + $0x48] sm:$0xff] }
 0x382   : > { %1892 = vst [vmem:[#allocation2 + $0x121] sm:$0xff] %v14574_v12  ;;  %1893 = vst [vmem:[#allocation2 + $0x129] sm:$0xff] %v14575_v39  ;;  %v14578_v12 = vmax.f32 %v9753_v57, 0.0 }
 0x383   : > { %1894 = vst [vmem:[#allocation2 + $0x139] sm:$0xff] %v14218_v30  ;;  %1895 = vst [vmem:[#allocation2 + $0x141] sm:$0xff] %v14576_v44  ;;  %v14583_v30 = vmax.f32 %v9761_v5, 0.0  ;;  %v14591_v44 = vld [vmem:[#allocation8_spill] sm:$0xff] }
 0x384   : > { %1896 = vst [vmem:[#allocation2 + $0x151] sm:$0xff] %v14577_v19  ;;  %1897 = vst [vmem:[#allocation2 + $0x159] sm:$0xff] %v14578_v12  ;;  %v14584_v19 = vld [vmem:[#allocation5_spill] sm:$0xff]  ;;  %v1774_v39 = vmax.f32 %v14591_v44, 0.0  ;;  %v1777_v12 = vmax.f32 %v9844_v53, 0.0  ;;  %v1778_v44 = vmax.f32 %v9848_v20, 0.0 }
 0x385   : > { %1898 = vst [vmem:[#allocation2 + $0x169] sm:$0xff] %v14582_v37  ;;  %1899 = vst [vmem:[#allocation2 + $0x171] sm:$0xff] %v14583_v30  ;;  %v14588_v37 = vmax.f32 %v9781_v51, 0.0  ;;  %v14597_v30 = vmax.f32 %v14584_v19, 0.0  ;;  %v1781_v53 = vmax.f32 %v9860_v59, 0.0  ;;  %v1782_v20 = vmax.f32 %v9864_v7, 0.0 }
 0x386   : > { %1900 = vst [vmem:[#allocation2 + $0x181] sm:$0xff] %v1758_v35  ;;  %1902 = vst [vmem:[#allocation2 + $0x1c9] sm:$0xff] %v14586_v14  ;;  %v14589_v35 = vmax.f32 %v9785_v2, 0.0  ;;  %v14594_v14 = vmax.f32 %v14579_v21, 0.0  ;;  %v1786_v59 = vmax.f32 %v9880_v42, 0.0  ;;  %v1787_v7 = vmax.f32 %v9884_v62, 0.0 }
 0x387   : > { %1903 = vst [vmem:[#allocation2 + $0x1d1] sm:$0xff] %v14587_v23  ;;  %1904 = vst [vmem:[#allocation2 + $0x1e1] sm:$0xff] %v14588_v37  ;;  %v14595_v23 = vmax.f32 %v14580_v48, 0.0  ;;  %v14596_v37 = vmax.f32 %v14581_v40, 0.0  ;;  %v14606_v42 = vmax.f32 %v9645_v28, 0.0  ;;  %v14607_v62 = vmax.f32 %v9649_v49, 0.0 }
 0x388   : > { %1905 = vst [vmem:[#allocation2 + $0x1e9] sm:$0xff] %v14589_v35  ;;  %1906 = vst [vmem:[#allocation2 + $0x1f9] sm:$0xff] %v14593_v46  ;;  %v1776_v35 = vmax.f32 %v9840_v41, 0.0  ;;  %v14598_v46 = vmax.f32 %v14585_v18, 0.0  ;;  %v1780_v41 = vmax.f32 %v9856_v33, 0.0  ;;  %v1785_v33 = vmax.f32 %v9876_v11, 0.0 }
 0x389   : > { %1907 = vst [vmem:[#allocation2 + $0x201] sm:$0xff] %v14594_v14  ;;  %1908 = vst [vmem:[#allocation2 + $0x211] sm:$0xff] %v14595_v23  ;;  %v14599_v14 = vmax.f32 %v9813_v54, 0.0  ;;  %v14600_v23 = vmax.f32 %v9817_v50, 0.0  ;;  %v2129_v11 = vld [vmem:[#allocation2 + $0x38] sm:$0xff] }
 0x38a   : > { %1909 = vst [vmem:[#allocation2 + $0x219] sm:$0xff] %v14596_v37  ;;  %1910 = vst [vmem:[#allocation2 + $0x229] sm:$0xff] %v14597_v30  ;;  %v14601_v37 = vmax.f32 %v14590_v61, 0.0  ;;  %v14602_v30 = vmax.f32 %v9825_v63, 0.0  ;;  %v2064_v49 = vld [vmem:[#allocation2 + $0x1a] sm:$0xff] }
 0x38b   : > { %1911 = vst [vmem:[#allocation2 + $0x231] sm:$0xff] %v14598_v46  ;;  %1912 = vst [vmem:[#allocation2 + $0x241] sm:$0xff] %v14599_v14  ;;  %v2126_v46 = vld [vmem:[#allocation2 + $0x18] sm:$0xff]  ;;  %v2127_v14 = vld [vmem:[#allocation2 + $0x20] sm:$0xff] }
 0x38c   : > { %1913 = vst [vmem:[#allocation2 + $0x249] sm:$0xff] %v14600_v23  ;;  %1914 = vst [vmem:[#allocation2 + $0x259] sm:$0xff] %v14601_v37  ;;  %v1784_v23 = vmax.f32 %v9872_v25, 0.0  ;;  %v1788_v37 = vmax.f32 %v14603_v29, 0.0  ;;  %v2128_v25 = vld [vmem:[#allocation2 + $0x30] sm:$0xff] }
 0x38d   : > { %1915 = vst [vmem:[#allocation2 + $0x261] sm:$0xff] %v14602_v30  ;;  %1916 = vst [vmem:[#allocation2 + $0x271] sm:$0xff] %v1774_v39  ;;  %v1789_v30 = vmax.f32 %v14604_v8, 0.0  ;;  %v14605_v39 = vld [vmem:[#allocation21_spill] sm:$0xff]  ;;  %v2514_v8 = vpack.c.bf16 %v2127_v14, %v2126_v46 }
 0x38e   : > { %1917 = vst [vmem:[#allocation2 + $0x279] sm:$0xff] %v1775_v58  ;;  %1918 = vst [vmem:[#allocation2 + $0x289] sm:$0xff] %v1776_v35  ;;  %v1790_v58 = vmax.f32 %v14605_v39, 0.0  ;;  %v14609_v35 = vmax.f32 %v9657_v26, 0.0  ;;  %v2131_v14 = vld [vmem:[#allocation2 + $0x50] sm:$0xff]  ;;  %v14615_v26 = vmax.f32 %v9717_v55, 0.0 }
 0x38f   : > { %1919 = vst [vmem:[#allocation2 + $0x291] sm:$0xff] %v1777_v12  ;;  %1920 = vst [vmem:[#allocation2 + $0x2a1] sm:$0xff] %v1778_v44  ;;  %v2521_v12 = vpack.c.bf16 %v14607_v62, %v14606_v42  ;;  %3703 = vmatprep.mubr.bf16.mxu0 %v2514_v8  ;;  %v14622_v55 = vmax.f32 %v9745_v38, 0.0  ;;  %v14629_v42 = vmax.f32 %v9661_v45, 0.0  ;;  %v2532_v62 = vpack.c.bf16 %v2131_v14, %v2130_v6  ;;  %v2068_v6 = vld [vmem:[#allocation2 + $0x4a] sm:$0xff]  ;;  %v2134_v14 = vld [vmem:[#allocation2 + $0x78] sm:$0xff] }
 0x390   : > { %1921 = vst [vmem:[#allocation2 + $0x2a9] sm:$0xff] %v1779_v43  ;;  %1922 = vst [vmem:[#allocation2 + $0x2b9] sm:$0xff] %v1780_v41  ;;  %v2530_v44 = vpack.c.bf16 %v14609_v35, %v14608_v3  ;;  %v2523_v43 = vpack.c.bf16 %v2129_v11, %v2128_v25  ;;  %v14610_v41 = vld [vmem:[#allocation35_spill] sm:$0xff]  ;;  %v14625_v25 = vmax.f32 %v9757_v0, 0.0  ;;  %v14627_v11 = vmax.f32 %v9773_v31, 0.0 }
 0x391   : > { %1923 = vst [vmem:[#allocation2 + $0x2c1] sm:$0xff] %v1781_v53  ;;  %1924 = vst [vmem:[#allocation2 + $0x2d1] sm:$0xff] %v1782_v20  ;;  %3422 = vmatprep.mubr.bf16.mxu1 %v2521_v12  ;;  %v14611_v53 = vld [vmem:[#allocation34_spill] sm:$0xff]  ;;  %v2065_v20 = vld [vmem:[#allocation2 + $0x22] sm:$0xff]  ;;  %v14631_v12 = vmax.f32 %v9781_v51, 0.0  ;;  %v14632_v0 = vmax.f32 %v9785_v2, 0.0 }
 0x392   : > { %1925 = vst [vmem:[#allocation2 + $0x2d9] sm:$0xff] %v1783_v13  ;;  %1926 = vst [vmem:[#allocation2 + $0x2e9] sm:$0xff] %v1784_v23  ;;  %3423 = vmatmul.mubr.bf16.gmra.mxu1 %v2514_v8  ;;  %v14612_v28 = vpack.c.bf16 %v14610_v41, %v14611_v53  ;;  %v14613_v13 = vmax.f32 %v9709_v52, 0.0  ;;  %v14616_v23 = vmax.f32 %v9721_v60, 0.0  ;;  %v14619_v52 = vmax.f32 %v9733_v17, 0.0  ;;  %v2066_v41 = vld [vmem:[#allocation2 + $0x32] sm:$0xff] }
 0x393   : > { %1927 = vst [vmem:[#allocation2 + $0x2f1] sm:$0xff] %v1785_v33  ;;  %1928 = vst [vmem:[#allocation2 + $0x301] sm:$0xff] %v1786_v59  ;;  %3430 = vmatprep.mubr.bf16.mxu1 %v2530_v44  ;;  %v14617_v59 = vmax.f32 %v9725_v4, 0.0  ;;  %v14623_v60 = vmax.f32 %v9749_v47, 0.0  ;;  %v14624_v4 = vmax.f32 %v9753_v57, 0.0  ;;  %v14626_v17 = vmax.f32 %v9761_v5, 0.0 }
 0x394   : > { %1929 = vst [vmem:[#allocation2 + $0x309] sm:$0xff] %v1787_v7  ;;  %1930 = vst [vmem:[#allocation2 + $0x319] sm:$0xff] %v1788_v37  ;;  %3704 = vmatmul.mubr.bf16.vlgmr.msra.gmra.mxu0 %v14612_v28  ;;  %v10076_v33 = vpack.c.bf16 %v14616_v23, %v14615_v26  ;;  %v14618_v7 = vmax.f32 %v9729_v16, 0.0  ;;  %v2522_v16 = vpack.c.bf16 %v2065_v20, %v2064_v49  ;;  %v14630_v47 = vmax.f32 %v9665_v24, 0.0  ;;  %v2132_v53 = vld [vmem:[#allocation2 + $0x60] sm:$0xff]  ;;  %v7745_v28 = vld [vmem:[%s14124_s7 + $0x178] sm:$0xff]  }
 0x395   : > { %1931 = vst [vmem:[#allocation2 + $0x321] sm:$0xff] %v1789_v30  ;;  %1932 = vst [vmem:[#allocation2 + $0x331] sm:$0xff] %v1790_v58  ;;  %3711 = vmatprep.mubr.bf16.mxu0 %v2523_v43  ;;  %v14621_v30 = vmax.f32 %v9741_v34, 0.0  ;;  %v10100_v58 = vpack.c.bf16 %v14624_v4, %v14623_v60  ;;  %v14628_v34 = vmax.f32 %v9777_v36, 0.0  ;;  %v10122_v8 = vpack.c.bf16 %v14632_v0, %v14631_v12  ;;  %v2135_v26 = vld [vmem:[#allocation2 + $0x80] sm:$0xff]  ;;  %v2071_v60 = vld [vmem:[#allocation2 + $0x6a] sm:$0xff] }
 0x396   : > { %1933 = vst [vmem:[#allocation2 + $0x339] sm:$0xff] %v1791_v32  ;;  %v14614_v32 = vmax.f32 %v9713_v56, 0.0  ;;  %v10082_v29 = vpack.c.bf16 %v14618_v7, %v14617_v59  ;;  %v14620_v56 = vmax.f32 %v9737_v27, 0.0  ;;  %v10106_v27 = vpack.c.bf16 %v14626_v17, %v14625_v25  ;;  %3977 = vmatpush2.bf16.msra.mxu1 %v7745_v28  ;;  %v2137_v4 = vld [vmem:[#allocation2 + $0x98] sm:$0xff]  ;;  %v14648_v25 = vld [vmem:[#allocation17_spill] sm:$0xff]  ;;  %v2138_v12 = vld [vmem:[#allocation2 + $0xa8] sm:$0xff] }
 0x397   : > { %v10094_v39 = vpack.c.bf16 %v14622_v55, %v14621_v30  ;;  %v10112_v38 = vpack.c.bf16 %v14628_v34, %v14627_v11  ;;  %v2539_v57 = vpack.c.bf16 %v14630_v47, %v14629_v42  ;;  %v14633_v5 = vmax.f32 %v9789_v22, 0.0  ;;  %v7749_v30 = vld [vmem:[%s14124_s7 + $0x168] sm:$0xff]   ;;  %v14650_v11 = vld [vmem:[#allocation18_spill] sm:$0xff]  ;;  %v2139_v0 = vld [vmem:[#allocation2 + $0xb0] sm:$0xff] }
 0x398   : > { %v10070_v46 = vpack.c.bf16 %v14614_v32, %v14613_v13  ;;  %v10088_v37 = vpack.c.bf16 %v14620_v56, %v14619_v52  ;;  %v14634_v31 = vmax.f32 %v14579_v21, 0.0  ;;  %v14635_v45 = vmax.f32 %v14580_v48, 0.0  ;;  %v7747_v13 = vld [vmem:[%s14124_s7 + $0x170] sm:$0xff]   ;;  %v7750_v55 = vld [vmem:[%s14124_s7 + $0x1a8] sm:$0xff]   ;;  %v14656_v28 = vld [vmem:[#allocation22_spill] sm:$0xff] }
 0x399   : > { %v14636_v24 = vmax.f32 %v14581_v40, 0.0  ;;  %v14637_v51 = vmax.f32 %v14584_v19, 0.0  ;;  %v14638_v2 = vmax.f32 %v14585_v18, 0.0  ;;  %v14639_v22 = vmax.f32 %v9813_v54, 0.0  ;;  %v2067_v19 = vld [vmem:[#allocation2 + $0x3a] sm:$0xff]  ;;  %v2133_v18 = vld [vmem:[#allocation2 + $0x68] sm:$0xff] }
 0x39a   : > { %v10128_v3 = vpack.c.bf16 %v14634_v31, %v14633_v5  ;;  %3431 = vmatmul.mubr.bf16.gmra.mxu1 %v2523_v43  ;;  %v14640_v21 = vmax.f32 %v9817_v50, 0.0  ;;  %v14641_v48 = vmax.f32 %v14590_v61, 0.0  ;;  %v14642_v40 = vmax.f32 %v9825_v63, 0.0  ;;  %v7746_v54 = vld [vmem:[%s14124_s7 + $0x1b8] sm:$0xff]   ;;  %v14652_v31 = vld [vmem:[#allocation19_spill] sm:$0xff] }
 0x39b   : > { %v10134_v36 = vpack.c.bf16 %v14636_v24, %v14635_v45  ;;  %v10140_v35 = vpack.c.bf16 %v14638_v2, %v14637_v51  ;;  %3438 = vmatprep.mubr.bf16.mxu1 %v2539_v57  ;;  %v2531_v49 = vpack.c.bf16 %v2067_v19, %v2066_v41  ;;  %v14643_v50 = vmax.f32 %v9669_v9, 0.0  ;;  %4250 = vmatpush1.bf16.msra.mxu0 %v7746_v54  ;;  %v7748_v9 = vld [vmem:[%s14124_s7 + $0x1b0] sm:$0xff]   ;;  %v2072_v57 = vld [vmem:[#allocation2 + $0x7a] sm:$0xff]  ;;  %v14654_v24 = vld [vmem:[#allocation20_spill] sm:$0xff] }
 0x39c   : > { %3712 = vmatmul.mubr.bf16.gmra.mxu0 %v2522_v16  ;;  %v10146_v44 = vpack.c.bf16 %v14640_v21, %v14639_v22  ;;  %v10152_v43 = vpack.c.bf16 %v14642_v40, %v14641_v48  ;;  %v14644_v61 = vmax.f32 %v9673_v15, 0.0  ;;  %v2541_v20 = vpack.c.bf16 %v2133_v18, %v2132_v53  ;;  %v2069_v15 = vld [vmem:[#allocation2 + $0x52] sm:$0xff]  ;;  %v7751_v21 = vld [vmem:[%s14124_s7 + $0x160] sm:$0xff]   ;;  %v2141_v53 = vld [vmem:[#allocation2 + $0xc8] sm:$0xff] }
 0x39d   : > { %3719 = vmatprep.mubr.bf16.mxu0 %v2532_v62  ;;  %v14645_v32 = vmov 0   ;;  %v2540_v23 = vpack.c.bf16 %v2069_v15, %v2068_v6  ;;  %v14646_v59 = vmax.f32 %v9677_v1, 0.0  ;;  %v14647_v7 = vmax.f32 %v9681_v10, 0.0  ;;  %v2070_v1 = vld [vmem:[#allocation2 + $0x62] sm:$0xff]  ;;  %v2136_v10 = vld [vmem:[#allocation2 + $0x90] sm:$0xff]  ;;  %v2075_v41 = vld [vmem:[#allocation2 + $0x9a] sm:$0xff] }
 0x39e   : > { %v2548_v63 = vpack.c.bf16 %v14644_v61, %v14643_v50  ;;  %3978 = vmatprep.subr.bf16.mxu1 %v14645_v32  ;;  %4251 = vmatprep.subr.bf16.mxu0 %v14645_v32  ;;  %v2550_v56 = vpack.c.bf16 %v2135_v26, %v2134_v14  ;;  %v2549_v16 = vpack.c.bf16 %v2071_v60, %v2070_v1  ;;  %v14649_v17 = vmax.f32 %v14648_v25, 0.0  ;;  %v7752_v48 = vld [vmem:[%s14124_s7 + $0x1a0] sm:$0xff]   ;;  %v2074_v40 = vld [vmem:[#allocation2 + $0x92] sm:$0xff]  ;;  %v10206_v26 = vpop.f32.mrf.mxu1  ;;  %v2146_v25 = vld [vmem:[#allocation2 + $0x108] sm:$0xff] }
 0x39f   : > { %3979 = vmatpush2.bf16.msra.mxu1 %v7747_v13  ;;  %4252 = vmatpush1.bf16.msra.mxu0 %v7748_v9  ;;  %v2557_v52 = vpack.c.bf16 %v14647_v7, %v14646_v59  ;;  %v14651_v34 = vmax.f32 %v14650_v11, 0.0  ;;  %v2559_v47 = vpack.c.bf16 %v2137_v4, %v2136_v10  ;;  %v14653_v45 = vmax.f32 %v14652_v31, 0.0  ;;  %v2140_v19 = vld [vmem:[#allocation2 + $0xc0] sm:$0xff]  ;;  %v2077_v13 = vld [vmem:[#allocation2 + $0xb2] sm:$0xff] }
 0x3a0   : > { %3980 = vmatprep.subr.bf16.mxu1 %v14645_v32  ;;  %4253 = vmatprep.subr.bf16.mxu0 %v14645_v32  ;;  %v14655_v51 = vmax.f32 %v14654_v24, 0.0  ;;  %v2568_v22 = vpack.c.bf16 %v2139_v0, %v2138_v12  ;;  %v2567_v18 = vpack.c.bf16 %v2075_v41, %v2074_v40  ;;  %v14658_v54 = vld [vmem:[#allocation23_spill] sm:$0xff]  ;;  %v2142_v9 = vld [vmem:[#allocation2 + $0xd8] sm:$0xff]  ;;  %v3418_v7 = vpop.f32.mrf.mxu1  ;;  %v7756_v12 = vld [vmem:[%s14124_s7 + $0x190] sm:$0xff]  }
 0x3a1   : > { %v2566_v42 = vpack.c.bf16 %v14651_v34, %v14649_v17  ;;  %v14659_v50 = vmax.f32 %v14658_v54, 0.0  ;;  %v2143_v6 = vld [vmem:[#allocation2 + $0xe0] sm:$0xff]  ;;  %v7754_v59 = vld [vmem:[%s14124_s7 + $0x198] sm:$0xff]   ;;  %v2147_v17 = vld [vmem:[#allocation2 + $0x110] sm:$0xff] }
 0x3a2   : > { %3439 = vmatmul.mubr.bf16.gmra.mxu1 %v2532_v62  ;;  %v2073_v62 = vld [vmem:[#allocation2 + $0x82] sm:$0xff]  ;;  %v2575_v2 = vpack.c.bf16 %v14655_v51, %v14653_v45  ;;  %v2586_v14 = vpack.c.bf16 %v2143_v6, %v2142_v9  ;;  %v10216_v1 = vpop.f32.mrf.mxu1  ;;  %v2080_v4 = vld [vmem:[#allocation2 + $0xda] sm:$0xff]  ;;  %v2604_v34 = vpack.c.bf16 %v2147_v17, %v2146_v25  ;;  %v2085_v31 = vld [vmem:[#allocation2 + $0x112] sm:$0xff] }
 0x3a3   : > { %3446 = vmatprep.mubr.bf16.mxu1 %v2548_v63  ;;  %3981 = vmatpush2.bf16.msra.mxu1 %v7749_v30  ;;  %v2558_v5 = vpack.c.bf16 %v2073_v62, %v2072_v57  ;;  %v2577_v63 = vpack.c.bf16 %v2141_v53, %v2140_v19  ;;  %v2144_v30 = vld [vmem:[#allocation2 + $0xf0] sm:$0xff]  ;;  %v2083_v57 = vld [vmem:[#allocation2 + $0xfa] sm:$0xff]  ;;  %v2149_v62 = vld [vmem:[#allocation2 + $0x128] sm:$0xff] }
 0x3a4   : > { %3720 = vmatmul.mubr.bf16.gmra.mxu0 %v2531_v49  ;;  %3982 = vmatprep.subr.bf16.mxu1 %v14645_v32  ;;  %v14657_v49 = vmax.f32 %v14656_v28, 0.0  ;;  %v2150_v45 = vld [vmem:[#allocation2 + $0x138] sm:$0xff]  ;;  %v2151_v24 = vld [vmem:[#allocation2 + $0x140] sm:$0xff]  ;;  %v2152_v40 = vld [vmem:[#allocation2 + $0x150] sm:$0xff] }
 0x3a5   : > { %3727 = vmatprep.mubr.bf16.mxu0 %v2541_v20  ;;  %4254 = vmatpush1.bf16.msra.mxu0 %v7750_v55  ;;  %v2145_v55 = vld [vmem:[#allocation2 + $0xf8] sm:$0xff]  ;;  %v2154_v54 = vld [vmem:[#allocation2 + $0x168] sm:$0xff]  ;;  %v7764_v7 = vld [vmem:[%s14124_s7 + $0x1e0] sm:$0xff]  }
 0x3a6   : > { %4255 = vmatprep.subr.bf16.mxu0 %v14645_v32  ;;  %v2584_v61 = vpack.c.bf16 %v14659_v50, %v14657_v49  ;;  %v2595_v10 = vpack.c.bf16 %v2145_v55, %v2144_v30  ;;  %v2153_v41 = vld [vmem:[#allocation2 + $0x158] sm:$0xff]  ;;  %v2089_v49 = vld [vmem:[#allocation2 + $0x142] sm:$0xff]  ;;  %v2155_v50 = vld [vmem:[#allocation2 + $0x170] sm:$0xff] }
 0x3a7   : > { %3983 = vmatpush2.bf16.msra.mxu1 %v7751_v21  ;;  %v2086_v21 = vld [vmem:[#allocation2 + $0x122] sm:$0xff]  ;;  %v2631_v53 = vpack.c.bf16 %v2153_v41, %v2152_v40  ;;  %v2088_v28 = vld [vmem:[#allocation2 + $0x13a] sm:$0xff]  ;;  %v2030_v9 = vld [vmem:[#allocation2 + $0x1b1] sm:$0xff] }
 0x3a8   : > { %3984 = vmatprep.subr.bf16.mxu1 %v14645_v32  ;;  %v2031_v6 = vld [vmem:[#allocation2 + $0x1b9] sm:$0xff]  ;;  %v2092_v55 = vld [vmem:[#allocation2 + $0x16a] sm:$0xff]  ;;  %v2101_v40 = vld [vmem:[#allocation2 + $0x202] sm:$0xff] }
 0x3a9   : > { %4256 = vmatpush1.bf16.msra.mxu0 %v7752_v48  ;;  %v2087_v48 = vld [vmem:[#allocation2 + $0x12a] sm:$0xff]  ;;  %v7765_v30 = vld [vmem:[%s14124_s7 + $0x1d8] sm:$0xff]  }
 0x3aa   : > { %3447 = vmatmul.mubr.bf16.gmra.mxu1 %v2541_v20  ;;  %4257 = vmatprep.subr.bf16.mxu0 %v14645_v32  ;;  %v2076_v20 = vld [vmem:[#allocation2 + $0xaa] sm:$0xff]  ;;  %v2621_v19 = vpack.c.bf16 %v2087_v48, %v2086_v21  ;;  %v10274_v25 = vld [vmem:[%s14124_s7 + $0x238] sm:$0xff]  }
 0x3ab   : > { %3454 = vmatprep.mubr.bf16.mxu1 %v2557_v52  ;;  %v2576_v15 = vpack.c.bf16 %v2077_v13, %v2076_v20  ;;  %v2078_v52 = vld [vmem:[#allocation2 + $0xc2] sm:$0xff]  ;;  %v2100_v48 = vld [vmem:[#allocation2 + $0x1fa] sm:$0xff] }
 0x3ac   : > { %3728 = vmatmul.mubr.bf16.gmra.mxu0 %v2540_v23  ;;  %v7753_v23 = vld [vmem:[%s14124_s7 + $0x158] sm:$0xff]   ;;  %v7762_v20 = vld [vmem:[%s14124_s7 + $0x140] sm:$0xff]   ;;  %v7763_v13 = vld [vmem:[%s14124_s7 + $0x1e8] sm:$0xff]  }
 0x3ad   : > { %3735 = vmatprep.mubr.bf16.mxu0 %v2550_v56  ;;  %3985 = vmatpush2.bf16.msra.mxu1 %v7753_v23  ;;  %v2156_v23 = vld [vmem:[#allocation2 + $0x180] sm:$0xff]  ;;  %v2166_v41 = vld [vmem:[#allocation2 + $0x228] sm:$0xff] }
 0x3ae   : > { %4258 = vmatpush1.bf16.msra.mxu0 %v7754_v59  ;;  %3986 = vmatprep.subr.bf16.mxu1 %v14645_v32  ;;  %v2157_v59 = vld [vmem:[#allocation2 + $0x188] sm:$0xff] }
 0x3af   : > { %4259 = vmatprep.subr.bf16.mxu0 %v14645_v32 }
 0x3b2   : > { %3455 = vmatmul.mubr.bf16.gmra.mxu1 %v2550_v56  ;;  %v2079_v56 = vld [vmem:[#allocation2 + $0xca] sm:$0xff]  ;;  %4260 = vmatpush1.bf16.msra.mxu0 %v7756_v12 }
 0x3b3   : > { %3462 = vmatprep.mubr.bf16.mxu1 %v2566_v42  ;;  %v2585_v60 = vpack.c.bf16 %v2079_v56, %v2078_v52  ;;  %v7755_v42 = vld [vmem:[%s14124_s7 + $0x150] sm:$0xff]   ;;  %4261 = vmatprep.subr.bf16.mxu0 %v14645_v32  ;;  %v2649_v56 = vpack.c.bf16 %v2157_v59, %v2156_v23  ;;  %v2173_v23 = vld [vmem:[#allocation2 + $0x278] sm:$0xff] }
 0x3b4   : > { %3736 = vmatmul.mubr.bf16.gmra.mxu0 %v2549_v16  ;;  %v2081_v16 = vld [vmem:[#allocation2 + $0xe2] sm:$0xff]  ;;  %3987 = vmatpush2.bf16.msra.mxu1 %v7755_v42  ;;  %v2095_v42 = vld [vmem:[#allocation2 + $0x1ba] sm:$0xff] }
 0x3b5   : > { %3743 = vmatprep.mubr.bf16.mxu0 %v2559_v47  ;;  %v2594_v11 = vpack.c.bf16 %v2081_v16, %v2080_v4  ;;  %3988 = vmatprep.subr.bf16.mxu1 %v14645_v32  ;;  %v7766_v4 = vld [vmem:[%s14124_s7 + $0x1d0] sm:$0xff]  }
 0x3ba   : > { %3463 = vmatmul.mubr.bf16.gmra.mxu1 %v2559_v47  ;;  %v2082_v47 = vld [vmem:[#allocation2 + $0xf2] sm:$0xff] }
 0x3bb   : > { %3470 = vmatprep.mubr.bf16.mxu1 %v2575_v2  ;;  %v2603_v0 = vpack.c.bf16 %v2083_v57, %v2082_v47  ;;  %v2622_v2 = vpack.c.bf16 %v2151_v24, %v2150_v45  ;;  %v7768_v47 = vld [vmem:[%s14124_s7 + $0x1c8] sm:$0xff]   ;;  %v2163_v45 = vld [vmem:[#allocation2 + $0x200] sm:$0xff] }
 0x3bc   : > { %3744 = vmatmul.mubr.bf16.gmra.mxu0 %v2558_v5 }
 0x3bd   : > { %3751 = vmatprep.mubr.bf16.mxu0 %v2568_v22 }
 0x3c2   : > { %3471 = vmatmul.mubr.bf16.gmra.mxu1 %v2568_v22  ;;  %v7757_v22 = vld [vmem:[%s14124_s7 + $0x148] sm:$0xff]  }
 0x3c3   : > { %3478 = vmatprep.mubr.bf16.mxu1 %v2584_v61  ;;  %3989 = vmatpush2.bf16.msra.mxu1 %v7757_v22  ;;  %v7761_v61 = vld [vmem:[%s14124_s7 + $0x1f0] sm:$0xff]  }
 0x3c4   : > { %3752 = vmatmul.mubr.bf16.gmra.mxu0 %v2567_v18  ;;  %3990 = vmatprep.subr.bf16.mxu1 %v14645_v32  ;;  %v7760_v18 = vld [vmem:[%s14124_s7 + $0x1f8] sm:$0xff]   ;;  %v2164_v22 = vld [vmem:[#allocation2 + $0x210] sm:$0xff] }
 0x3c5   : > { %3759 = vmatprep.mubr.bf16.mxu0 %v2577_v63 }
 0x3c7   : > { %3991 = vmatpush2.bf16.msra.mxu1 %v7762_v20 }
 0x3c8   : > { %7429 = vmatprep.subr.bf16.mxu1 %v10274_v25 }
 0x3ca   : > { %3479 = vmatmul.mubr.bf16.gmra.mxu1 %v2577_v63  ;;  %v2630_v63 = vpack.c.bf16 %v2089_v49, %v2088_v28  ;;  %v2168_v28 = vld [vmem:[#allocation2 + $0x240] sm:$0xff]  ;;  %v2169_v49 = vld [vmem:[#allocation2 + $0x248] sm:$0xff] }
 0x3cb   : > { %3486 = vmatprep.mubr.bf16.mxu1 %v10070_v46  ;;  %v3421_v46 = vpop.f32.mrf.mxu1 }
 0x3cc   : > { %3760 = vmatmul.mubr.bf16.gmra.mxu0 %v2576_v15  ;;  %v2090_v15 = vld [vmem:[#allocation2 + $0x152] sm:$0xff]  ;;  %v2158_v46 = vld [vmem:[#allocation2 + $0x1c8] sm:$0xff] }
 0x3cd   : > { %3767 = vmatprep.mubr.bf16.mxu0 %v2586_v14 }
 0x3d2   : > { %3487 = vmatmul.mubr.bf16.gmra.mxu1 %v2586_v14  ;;  %v2091_v14 = vld [vmem:[#allocation2 + $0x15a] sm:$0xff] }
 0x3d3   : > { %3494 = vmatprep.mubr.bf16.mxu1 %v10076_v33  ;;  %v2148_v33 = vld [vmem:[#allocation2 + $0x120] sm:$0xff]  ;;  %v2639_v52 = vpack.c.bf16 %v2091_v14, %v2090_v15  ;;  %v2172_v14 = vld [vmem:[#allocation2 + $0x270] sm:$0xff] }
 0x3d4   : > { %3768 = vmatmul.mubr.bf16.gmra.mxu0 %v2585_v60  ;;  %v2613_v5 = vpack.c.bf16 %v2149_v62, %v2148_v33  ;;  %v2093_v60 = vld [vmem:[#allocation2 + $0x172] sm:$0xff]  ;;  %v2160_v33 = vld [vmem:[#allocation2 + $0x1e0] sm:$0xff]  ;;  %v2161_v62 = vld [vmem:[#allocation2 + $0x1e8] sm:$0xff] }
 0x3d5   : > { %3775 = vmatprep.mubr.bf16.mxu0 %v2595_v10  ;;  %v2648_v16 = vpack.c.bf16 %v2093_v60, %v2092_v55  ;;  %v2667_v12 = vpack.c.bf16 %v2161_v62, %v2160_v33  ;;  %v2047_v15 = vld [vmem:[#allocation2 + $0x279] sm:$0xff]  ;;  %v2174_v55 = vld [vmem:[#allocation2 + $0x288] sm:$0xff] }
 0x3da   : > { %3495 = vmatmul.mubr.bf16.gmra.mxu1 %v2595_v10  ;;  %v2159_v10 = vld [vmem:[#allocation2 + $0x1d0] sm:$0xff] }
 0x3db   : > { %3502 = vmatprep.mubr.bf16.mxu1 %v10082_v29  ;;  %v2084_v29 = vld [vmem:[#allocation2 + $0x10a] sm:$0xff]  ;;  %v2658_v17 = vpack.c.bf16 %v2159_v10, %v2158_v46 }
 0x3dc   : > { %3776 = vmatmul.mubr.bf16.gmra.mxu0 %v2594_v11  ;;  %v2612_v51 = vpack.c.bf16 %v2085_v31, %v2084_v29  ;;  %v14660_v11 = vld [vmem:[#allocation31_spill] sm:$0xff]  ;;  %v2097_v29 = vld [vmem:[#allocation2 + $0x1d2] sm:$0xff] }
 0x3dd   : > { %3783 = vmatprep.mubr.bf16.mxu0 %v2604_v34  ;;  %v2162_v31 = vld [vmem:[#allocation2 + $0x1f8] sm:$0xff] }
 0x3e2   : > { %3503 = vmatmul.mubr.bf16.gmra.mxu1 %v2604_v34  ;;  %v2094_v34 = vld [vmem:[#allocation2 + $0x1b2] sm:$0xff] }
 0x3e3   : > { %3510 = vmatprep.mubr.bf16.mxu1 %v10088_v37  ;;  %v7758_v37 = vld [vmem:[%s14124_s7 + $0x188] sm:$0xff]   ;;  %v2657_v57 = vpack.c.bf16 %v2095_v42, %v2094_v34  ;;  %v10296_v34 = vld [vmem:[%s14125_s8] ss:$0 sm:$0xff] }
 0x3e4   : > { %3784 = vmatmul.mubr.bf16.gmra.mxu0 %v2603_v0  ;;  %v7792_v0 = vld [vmem:[#allocation2] sm:$0xff]  ;;  %v3417_v33 = vadd.f32 %v10296_v34, %v10206_v26 }
 0x3e5   : > { %3791 = vmatprep.mubr.bf16.mxu0 %v2613_v5  ;;  %4262 = vmatpush1.bf16.msra.mxu0 %v7758_v37  ;;  %v2165_v37 = vld [vmem:[#allocation2 + $0x218] sm:$0xff]  ;;  %v2176_v42 = vld [vmem:[#allocation2 + $0x2a0] sm:$0xff] }
 0x3e6   : > { %4263 = vmatprep.subr.bf16.mxu0 %v14645_v32 }
 0x3ea   : > { %3511 = vmatmul.mubr.bf16.gmra.mxu1 %v2613_v5  ;;  %v2096_v5 = vld [vmem:[#allocation2 + $0x1ca] sm:$0xff] }
 0x3eb   : > { %3518 = vmatprep.mubr.bf16.mxu1 %v10094_v39  ;;  %v7759_v39 = vld [vmem:[%s14124_s7 + $0x180] sm:$0xff]   ;;  %v2666_v24 = vpack.c.bf16 %v2097_v29, %v2096_v5 }
 0x3ec   : > { %3792 = vmatmul.mubr.bf16.gmra.mxu0 %v2612_v51  ;;  %v2676_v51 = vpack.c.bf16 %v2163_v45, %v2162_v31  ;;  %v3420_v45 = vadd.f32 %v10296_v34, %v10216_v1 }
 0x3ed   : > { %3799 = vmatprep.mubr.bf16.mxu0 %v2622_v2  ;;  %4264 = vmatpush1.bf16.msra.mxu0 %v7759_v39  ;;  %v2167_v39 = vld [vmem:[#allocation2 + $0x230] sm:$0xff] }
 0x3ee   : > { %4265 = vmatprep.subr.bf16.mxu0 %v14645_v32 }
 0x3f1   : > { %4266 = vmatpush2.bf16.msra.mxu0 %v7760_v18  ;;  %v2103_v18 = vld [vmem:[#allocation2 + $0x21a] sm:$0xff] }
 0x3f2   : > { %3519 = vmatmul.mubr.bf16.gmra.mxu1 %v2622_v2  ;;  %4267 = vmatprep.subr.bf16.mxu0 %v14645_v32  ;;  %v2099_v2 = vld [vmem:[#allocation2 + $0x1ea] sm:$0xff] }
 0x3f3   : > { %3526 = vmatprep.mubr.bf16.mxu1 %v10100_v58  ;;  %v2640_v58 = vpack.c.bf16 %v2155_v50, %v2154_v54  ;;  %v2703_v50 = vpack.c.bf16 %v2169_v49, %v2168_v28 }
 0x3f4   : > { %3800 = vmatmul.mubr.bf16.gmra.mxu0 %v2621_v19  ;;  %v2684_v19 = vpack.c.bf16 %v2101_v40, %v2100_v48 }
 0x3f5   : > { %3807 = vmatprep.mubr.bf16.mxu0 %v2631_v53  ;;  %4268 = vmatpush2.bf16.msra.mxu0 %v7761_v61  ;;  %v2105_v61 = vld [vmem:[#allocation2 + $0x232] sm:$0xff] }
 0x3f6   : > { %4269 = vmatprep.subr.bf16.mxu0 %v14645_v32 }
 0x3f9   : > { %4270 = vmatpush2.bf16.msra.mxu0 %v7763_v13 }
 0x3fa   : > { %3527 = vmatmul.mubr.bf16.gmra.mxu1 %v2631_v53  ;;  %4271 = vmatprep.subr.bf16.mxu0 %v14645_v32  ;;  %v2694_v53 = vpack.c.bf16 %v2167_v39, %v2166_v41 }
 0x3fb   : > { %3534 = vmatprep.mubr.bf16.mxu1 %v10106_v27  ;;  %v2656_v27 = vpack.c.bf16 %v2031_v6, %v2030_v9  ;;  %v2107_v9 = vld [vmem:[#allocation2 + $0x24a] sm:$0xff] }
 0x3fc   : > { %3808 = vmatmul.mubr.bf16.gmra.mxu0 %v2630_v63  ;;  %v2170_v63 = vld [vmem:[#allocation2 + $0x258] sm:$0xff] }
 0x3fd   : > { %3815 = vmatprep.mubr.bf16.mxu0 %v2640_v58  ;;  %4272 = vmatpush2.bf16.msra.mxu0 %v7764_v7  ;;  %v2046_v6 = vld [vmem:[#allocation2 + $0x271] sm:$0xff]  ;;  %v2108_v7 = vld [vmem:[#allocation2 + $0x25a] sm:$0xff] }
 0x3fe   : > { %4273 = vmatprep.subr.bf16.mxu0 %v14645_v32 }
 0x401   : > { %4274 = vmatpush2.bf16.msra.mxu0 %v7765_v30  ;;  %v2049_v30 = vld [vmem:[#allocation2 + $0x291] sm:$0xff] }
 0x402   : > { %3535 = vmatmul.mubr.bf16.gmra.mxu1 %v2640_v58  ;;  %4275 = vmatprep.subr.bf16.mxu0 %v14645_v32  ;;  %v2171_v58 = vld [vmem:[#allocation2 + $0x260] sm:$0xff] }
 0x403   : > { %3542 = vmatprep.mubr.bf16.mxu1 %v2656_v27  ;;  %v2712_v13 = vpack.c.bf16 %v2171_v58, %v2170_v63  ;;  %v2721_v27 = vpack.c.bf16 %v2173_v23, %v2172_v14 }
 0x404   : > { %3816 = vmatmul.mubr.bf16.gmra.mxu0 %v2639_v52  ;;  %v2109_v52 = vld [vmem:[#allocation2 + $0x262] sm:$0xff] }
 0x405   : > { %3823 = vmatprep.mubr.bf16.mxu0 %v2649_v56  ;;  %4276 = vmatpush2.bf16.msra.mxu0 %v7766_v4  ;;  %v2048_v56 = vld [vmem:[#allocation2 + $0x289] sm:$0xff]  ;;  %v2720_v60 = vpack.c.bf16 %v2109_v52, %v2108_v7  ;;  %v2110_v4 = vld [vmem:[#allocation2 + $0x272] sm:$0xff] }
 0x406   : > { %4277 = vmatprep.subr.bf16.mxu0 %v14645_v32  ;;  %v2737_v46 = vpack.c.bf16 %v2049_v30, %v2048_v56 }
 0x409   : > { %4278 = vmatpush2.bf16.msra.mxu0 %v7768_v47  ;;  %v2177_v47 = vld [vmem:[#allocation2 + $0x2a8] sm:$0xff] }
 0x40a   : > { %3543 = vmatmul.mubr.bf16.gmra.mxu1 %v14660_v11  ;;  %4279 = vmatprep.subr.bf16.mxu0 %v14645_v32  ;;  %v2098_v32 = vld [vmem:[#allocation2 + $0x1e2] sm:$0xff] }
 0x40b   : > { %3550 = vmatprep.mubr.bf16.mxu1 %v10112_v38  ;;  %v7769_v38 = vld [vmem:[%s14124_s7 + $0x1c0] sm:$0xff]   ;;  %v2675_v21 = vpack.c.bf16 %v2099_v2, %v2098_v32  ;;  %v2051_v11 = vld [vmem:[#allocation2 + $0x2a9] sm:$0xff] }
 0x40c   : > { %3824 = vmatmul.mubr.bf16.gmra.mxu0 %v2648_v16  ;;  %v2111_v16 = vld [vmem:[#allocation2 + $0x27a] sm:$0xff] }
 0x40d   : > { %3831 = vmatprep.mubr.bf16.mxu0 %v2658_v17  ;;  %4280 = vmatpush2.bf16.msra.mxu0 %v7769_v38  ;;  %v2739_v38 = vpack.c.bf16 %v2177_v47, %v2176_v42  ;;  %v2052_v32 = vld [vmem:[#allocation2 + $0x2b9] sm:$0xff] }
 0x40e   : > { %7509 = vmatprep.subr.mxu0 %v7792_v0 }
 0x412   : > { %3551 = vmatmul.mubr.bf16.gmra.mxu1 %v2658_v17  ;;  %v2050_v17 = vld [vmem:[#allocation2 + $0x2a1] sm:$0xff] }
 0x413   : > { %3558 = vmatprep.mubr.bf16.mxu1 %v10122_v8  ;;  %v2685_v8 = vpack.c.bf16 %v2165_v37, %v2164_v22  ;;  %v2746_v62 = vpack.c.bf16 %v2051_v11, %v2050_v17  ;;  %v2053_v22 = vld [vmem:[#allocation2 + $0x2c1] sm:$0xff]  ;;  %v2178_v37 = vld [vmem:[#allocation2 + $0x2b8] sm:$0xff]  ;;  %v2183_v11 = vld [vmem:[#allocation2 + $0x2f0] sm:$0xff] }
 0x414   : > { %3832 = vmatmul.mubr.bf16.gmra.mxu0 %v2657_v57  ;;  %v2729_v57 = vpack.c.bf16 %v2111_v16, %v2110_v4  ;;  %v2057_v16 = vld [vmem:[#allocation2 + $0x2f1] sm:$0xff]  ;;  %v2182_v17 = vld [vmem:[#allocation2 + $0x2e8] sm:$0xff] }
 0x415   : > { %3839 = vmatprep.mubr.bf16.mxu0 %v2667_v12 }
 0x41a   : > { %3559 = vmatmul.mubr.bf16.gmra.mxu1 %v2667_v12 }
 0x41b   : > { %3566 = vmatprep.mubr.bf16.mxu1 %v10128_v3  ;;  %v2102_v3 = vld [vmem:[#allocation2 + $0x212] sm:$0xff] }
 0x41c   : > { %3840 = vmatmul.mubr.bf16.gmra.mxu0 %v2666_v24  ;;  %v2693_v54 = vpack.c.bf16 %v2103_v18, %v2102_v3  ;;  %v2112_v24 = vld [vmem:[#allocation2 + $0x28a] sm:$0xff] }
 0x41d   : > { %3847 = vmatprep.mubr.bf16.mxu0 %v2676_v51 }
 0x422   : > { %3567 = vmatmul.mubr.bf16.gmra.mxu1 %v2676_v51  ;;  %v2113_v51 = vld [vmem:[#allocation2 + $0x292] sm:$0xff] }
 0x423   : > { %3574 = vmatprep.mubr.bf16.mxu1 %v10134_v36  ;;  %v2104_v36 = vld [vmem:[#allocation2 + $0x22a] sm:$0xff]  ;;  %v2738_v41 = vpack.c.bf16 %v2113_v51, %v2112_v24 }
 0x424   : > { %3848 = vmatmul.mubr.bf16.gmra.mxu0 %v2675_v21  ;;  %v2702_v20 = vpack.c.bf16 %v2105_v61, %v2104_v36  ;;  %v2179_v21 = vld [vmem:[#allocation2 + $0x2c0] sm:$0xff]  ;;  %v2115_v36 = vld [vmem:[#allocation2 + $0x2aa] sm:$0xff] }
 0x425   : > { %3855 = vmatprep.mubr.bf16.mxu0 %v2685_v8  ;;  %v2054_v61 = vld [vmem:[#allocation2 + $0x2d1] sm:$0xff] }
 0x42a   : > { %3575 = vmatmul.mubr.bf16.gmra.mxu1 %v2685_v8 }
 0x42b   : > { %3582 = vmatprep.mubr.bf16.mxu1 %v10140_v35  ;;  %v2106_v35 = vld [vmem:[#allocation2 + $0x242] sm:$0xff] }
 0x42c   : > { %3856 = vmatmul.mubr.bf16.gmra.mxu0 %v2684_v19  ;;  %v2711_v59 = vpack.c.bf16 %v2107_v9, %v2106_v35  ;;  %v2755_v19 = vpack.c.bf16 %v2053_v22, %v2052_v32  ;;  %v2181_v35 = vld [vmem:[#allocation2 + $0x2d8] sm:$0xff] }
 0x42d   : > { %3863 = vmatprep.mubr.bf16.mxu0 %v2694_v53  ;;  %v2118_v32 = vld [vmem:[#allocation2 + $0x2d2] sm:$0xff] }
 0x432   : > { %3583 = vmatmul.mubr.bf16.gmra.mxu1 %v2694_v53  ;;  %v2748_v53 = vpack.c.bf16 %v2179_v21, %v2178_v37  ;;  %v2059_v21 = vld [vmem:[#allocation2 + $0x309] sm:$0xff] }
 0x433   : > { %3590 = vmatprep.mubr.bf16.mxu1 %v10146_v44  ;;  %v2728_v44 = vpack.c.bf16 %v2047_v15, %v2046_v6 }
 0x434   : > { %3864 = vmatmul.mubr.bf16.gmra.mxu0 %v2693_v54 }
 0x435   : > { %3871 = vmatprep.mubr.bf16.mxu0 %v2703_v50 }
 0x43a   : > { %3591 = vmatmul.mubr.bf16.gmra.mxu1 %v2703_v50  ;;  %v2114_v50 = vld [vmem:[#allocation2 + $0x2a2] sm:$0xff] }
 0x43b   : > { %3598 = vmatprep.mubr.bf16.mxu1 %v10152_v43  ;;  %v2175_v43 = vld [vmem:[#allocation2 + $0x290] sm:$0xff]  ;;  %v2747_v14 = vpack.c.bf16 %v2115_v36, %v2114_v50 }
 0x43c   : > { %3872 = vmatmul.mubr.bf16.gmra.mxu0 %v2702_v20  ;;  %v2730_v10 = vpack.c.bf16 %v2175_v43, %v2174_v55  ;;  %v2055_v20 = vld [vmem:[#allocation2 + $0x2d9] sm:$0xff] }
 0x43d   : > { %3879 = vmatprep.mubr.bf16.mxu0 %v2712_v13  ;;  %v2116_v43 = vld [vmem:[#allocation2 + $0x2ba] sm:$0xff] }
 0x442   : > { %3599 = vmatmul.mubr.bf16.gmra.mxu1 %v2712_v13  ;;  %v2180_v13 = vld [vmem:[#allocation2 + $0x2d0] sm:$0xff] }
 0x443   : > { %3606 = vmatprep.mubr.bf16.mxu1 %v2728_v44  ;;  %v2757_v44 = vpack.c.bf16 %v2181_v35, %v2180_v13  ;;  %v2060_v13 = vld [vmem:[#allocation2 + $0x319] sm:$0xff] }
 0x444   : > { %3880 = vmatmul.mubr.bf16.gmra.mxu0 %v2711_v59  ;;  %v2764_v59 = vpack.c.bf16 %v2055_v20, %v2054_v61  ;;  %v2121_v20 = vld [vmem:[#allocation2 + $0x2f2] sm:$0xff] }
 0x445   : > { %3887 = vmatprep.mubr.bf16.mxu0 %v2721_v27 }
 0x44a   : > { %3607 = vmatmul.mubr.bf16.gmra.mxu1 %v2721_v27 }
 0x44b   : > { %3614 = vmatprep.mubr.bf16.mxu1 %v2737_v46  ;;  %v2056_v46 = vld [vmem:[#allocation2 + $0x2e9] sm:$0xff] }
 0x44c   : > { %3888 = vmatmul.mubr.bf16.gmra.mxu0 %v2720_v60  ;;  %v2117_v60 = vld [vmem:[#allocation2 + $0x2c2] sm:$0xff] }
 0x44d   : > { %3895 = vmatprep.mubr.bf16.mxu0 %v2730_v10 }
 0x452   : > { %v3424_v12 = vpop.f32.mrf.mxu1  ;;  %3615 = vmatmul.mubr.bf16.gmra.mxu1 %v2730_v10 }
 0x453   : > { %3622 = vmatprep.mubr.bf16.mxu1 %v2746_v62  ;;  %v3425_v39 = vadd.f32 %v10296_v34, %v3424_v12  ;;  %v2766_v12 = vpack.c.bf16 %v2183_v11, %v2182_v17  ;;  %v2122_v17 = vld [vmem:[#allocation2 + $0x302] sm:$0xff]  ;;  %v2123_v11 = vld [vmem:[#allocation2 + $0x30a] sm:$0xff] }
 0x454   : > { %v3705_v0 = vpop.f32.mrf.mxu0  ;;  %3896 = vmatmul.mubr.bf16.gmra.mxu0 %v2729_v57  ;;  %v3426_v29 = vpop.f32.mrf.mxu1 }
 0x455   : > { %v10300_v5 = vadd.f32 %v3705_v0, %v3417_v33  ;;  %3903 = vmatprep.mubr.bf16.mxu0 %v2739_v38  ;;  %v2756_v33 = vpack.c.bf16 %v2117_v60, %v2116_v43 }
 0x456   : > { %v3707_v31 = vpop.f32.mrf.mxu0  ;;  %v3427_v2 = vpop.f32.mrf.mxu1 }
 0x457   : > { %v3428_v54 = vadd.f32 %v10296_v34, %v3427_v2  ;;  %v2119_v2 = vld [vmem:[#allocation2 + $0x2da] sm:$0xff] }
 0x458   : > { %v3708_v26 = vpop.f32.mrf.mxu0  ;;  %v3429_v48 = vpop.f32.mrf.mxu1 }
 0x459   : > { %v10304_v8 = vadd.f32 %v3708_v26, %v3420_v45  ;;  %v2058_v26 = vld [vmem:[#allocation2 + $0x301] sm:$0xff] }
 0x45a   : > { %v3710_v40 = vpop.f32.mrf.mxu0  ;;  %v3432_v3 = vpop.f32.mrf.mxu1  ;;  %3623 = vmatmul.mubr.bf16.gmra.mxu1 %v2739_v38  ;;  %v2773_v38 = vpack.c.bf16 %v2057_v16, %v2056_v46  ;;  %v2184_v48 = vld [vmem:[#allocation2 + $0x300] sm:$0xff] }
 0x45b   : > { %3630 = vmatprep.mubr.bf16.mxu1 %v2755_v19  ;;  %v3433_v23 = vadd.f32 %v10296_v34, %v3432_v3  ;;  %v2185_v40 = vld [vmem:[#allocation2 + $0x308] sm:$0xff] }
 0x45c   : > { %v3713_v1 = vpop.f32.mrf.mxu0  ;;  %3904 = vmatmul.mubr.bf16.gmra.mxu0 %v2738_v41  ;;  %v3434_v28 = vpop.f32.mrf.mxu1 }
 0x45d   : > { %v10307_v18 = vadd.f32 %v3713_v1, %v3425_v39  ;;  %3911 = vmatprep.mubr.bf16.mxu0 %v2748_v53  ;;  %v2782_v1 = vpack.c.bf16 %v2059_v21, %v2058_v26  ;;  %v2775_v28 = vpack.c.bf16 %v2185_v40, %v2184_v48  ;;  %v2124_v40 = vld [vmem:[#allocation2 + $0x31a] sm:$0xff] }
 0x45e   : > { %v3715_v49 = vpop.f32.mrf.mxu0  ;;  %v3435_v63 = vpop.f32.mrf.mxu1 }
 0x45f   : > { %v3436_v55 = vadd.f32 %v10296_v34, %v3435_v63 }
 0x460   : > { %v3716_v58 = vpop.f32.mrf.mxu0  ;;  %v3437_v6 = vpop.f32.mrf.mxu1 }
 0x461   : > { %v10310_v9 = vadd.f32 %v3716_v58, %v3428_v54  ;;  %v2120_v58 = vld [vmem:[#allocation2 + $0x2ea] sm:$0xff] }
 0x462   : > { %v3718_v15 = vpop.f32.mrf.mxu0  ;;  %v3440_v27 = vpop.f32.mrf.mxu1  ;;  %3631 = vmatmul.mubr.bf16.gmra.mxu1 %v2748_v53  ;;  %v2765_v53 = vpack.c.bf16 %v2119_v2, %v2118_v32 }
 0x463   : > { %3638 = vmatprep.mubr.bf16.mxu1 %v2764_v59  ;;  %v3441_v62 = vadd.f32 %v10296_v34, %v3440_v27  ;;  %v2061_v15 = vld [vmem:[#allocation2 + $0x321] sm:$0xff] }
 0x464   : > { %v3721_v7 = vpop.f32.mrf.mxu0  ;;  %3912 = vmatmul.mubr.bf16.gmra.mxu0 %v2747_v14  ;;  %v3442_v56 = vpop.f32.mrf.mxu1  ;;  %v2186_v14 = vld [vmem:[#allocation2 + $0x318] sm:$0xff] }
 0x465   : > { %v10313_v52 = vadd.f32 %v3721_v7, %v3433_v23  ;;  %3919 = vmatprep.mubr.bf16.mxu0 %v2757_v44  ;;  %v2187_v23 = vld [vmem:[#allocation2 + $0x320] sm:$0xff]  ;;  %v2774_v7 = vpack.c.bf16 %v2121_v20, %v2120_v58 }
 0x466   : > { %v3723_v30 = vpop.f32.mrf.mxu0  ;;  %v3443_v10 = vpop.f32.mrf.mxu1 }
 0x467   : > { %v3444_v51 = vadd.f32 %v10296_v34, %v3443_v10  ;;  %v2791_v30 = vpack.c.bf16 %v2061_v15, %v2060_v13 }
 0x468   : > { %v3724_v4 = vpop.f32.mrf.mxu0  ;;  %v3445_v47 = vpop.f32.mrf.mxu1 }
 0x469   : > { %v10316_v42 = vadd.f32 %v3724_v4, %v3436_v55  ;;  %v2784_v55 = vpack.c.bf16 %v2187_v23, %v2186_v14  ;;  %v2188_v47 = vld [vmem:[#allocation2 + $0x330] sm:$0xff] }
 0x46a   : > { %v3726_v57 = vpop.f32.mrf.mxu0  ;;  %v3448_v0 = vpop.f32.mrf.mxu1  ;;  %3639 = vmatmul.mubr.bf16.gmra.mxu1 %v2757_v44 }
 0x46b   : > { %3646 = vmatprep.mubr.bf16.mxu1 %v2773_v38  ;;  %v3449_v3 = vadd.f32 %v10296_v34, %v3448_v0  ;;  %v2254_v38 = vld [vmem:[#allocation2 + $0x1a] sm:$0xff] }
 0x46c   : > { %v3729_v29 = vpop.f32.mrf.mxu0  ;;  %3920 = vmatmul.mubr.bf16.gmra.mxu0 %v2756_v33  ;;  %v3450_v45 = vpop.f32.mrf.mxu1 }
 0x46d   : > { %v10319_v31 = vadd.f32 %v3729_v29, %v3441_v62  ;;  %3927 = vmatprep.mubr.bf16.mxu0 %v2766_v12  ;;  %v2189_v62 = vld [vmem:[#allocation2 + $0x338] sm:$0xff] }
 0x46e   : > { %v3731_v24 = vpop.f32.mrf.mxu0  ;;  %v3451_v22 = vpop.f32.mrf.mxu1  ;;  %v2793_v32 = vpack.c.bf16 %v2189_v62, %v2188_v47  ;;  %v2385_v47 = vld [vmem:[#allocation2 + $0x49] sm:$0xff] }
 0x46f   : > { %v3452_v63 = vadd.f32 %v10296_v34, %v3451_v22  ;;  %v2783_v24 = vpack.c.bf16 %v2123_v11, %v2122_v17  ;;  %v2259_v11 = vld [vmem:[#allocation2 + $0x52] sm:$0xff] }
 0x470   : > { %v3732_v37 = vpop.f32.mrf.mxu0  ;;  %v3453_v39 = vpop.f32.mrf.mxu1 }
 0x471   : > { %v10322_v41 = vadd.f32 %v3732_v37, %v3444_v51 }
 0x472   : > { %v3734_v19 = vpop.f32.mrf.mxu0  ;;  %v3456_v49 = vpop.f32.mrf.mxu1  ;;  %3647 = vmatmul.mubr.bf16.gmra.mxu1 %v2766_v12  ;;  %v2255_v12 = vld [vmem:[#allocation2 + $0x22] sm:$0xff] }
 0x473   : > { %3654 = vmatprep.mubr.bf16.mxu1 %v2782_v1  ;;  %v3457_v56 = vadd.f32 %v10296_v34, %v3456_v49  ;;  %v2516_v2 = vpack.c.bf16 %v2255_v12, %v2254_v38  ;;  %v2125_v19 = vld [vmem:[#allocation2 + $0x322] sm:$0xff]  ;;  %v2256_v49 = vld [vmem:[#allocation2 + $0x32] sm:$0xff] }
 0x474   : > { %v3737_v54 = vpop.f32.mrf.mxu0  ;;  %3928 = vmatmul.mubr.bf16.gmra.mxu0 %v2765_v53  ;;  %v3458_v36 = vpop.f32.mrf.mxu1  ;;  %v2190_v53 = vld [vmem:[#allocation2 + $0x19] sm:$0xff]  ;;  %v2792_v13 = vpack.c.bf16 %v2125_v19, %v2124_v40  ;;  %v2322_v40 = vld [vmem:[#allocation2 + $0x50] sm:$0xff] }
 0x475   : > { %v10325_v50 = vadd.f32 %v3737_v54, %v3449_v3  ;;  %3935 = vmatprep.mubr.bf16.mxu0 %v2775_v28  ;;  %v2191_v3 = vld [vmem:[#allocation2 + $0x21] sm:$0xff]  ;;  %v7773_v19 = vld [vmem:[%s14124_s7 + $0x218] sm:$0xff]  }
 0x476   : > { %v3739_v61 = vpop.f32.mrf.mxu0  ;;  %v3459_v35 = vpop.f32.mrf.mxu1  ;;  %v2257_v54 = vld [vmem:[#allocation2 + $0x3a] sm:$0xff] }
 0x477   : > { %v3460_v16 = vadd.f32 %v10296_v34, %v3459_v35  ;;  %v2383_v61 = vld [vmem:[#allocation2 + $0x31] sm:$0xff]  ;;  %v2515_v35 = vpack.c.bf16 %v2191_v3, %v2190_v53  ;;  %v2525_v14 = vpack.c.bf16 %v2257_v54, %v2256_v49  ;;  %v2388_v49 = vld [vmem:[#allocation2 + $0x69] sm:$0xff] }
 0x478   : > { %v3740_v6 = vpop.f32.mrf.mxu0  ;;  %v3461_v44 = vpop.f32.mrf.mxu1 }
 0x479   : > { %v10328_v59 = vadd.f32 %v3740_v6, %v3452_v63  ;;  %v2384_v63 = vld [vmem:[#allocation2 + $0x39] sm:$0xff]  ;;  %v7770_v6 = vld [vmem:[%s14124_s7 + $0x230] sm:$0xff]  }
 0x47a   : > { %v3742_v27 = vpop.f32.mrf.mxu0  ;;  %v3464_v43 = vpop.f32.mrf.mxu1  ;;  %3655 = vmatmul.mubr.bf16.gmra.mxu1 %v2775_v28 }
 0x47b   : > { %3662 = vmatprep.mubr.bf16.mxu1 %v2791_v30  ;;  %v3465_v51 = vadd.f32 %v10296_v34, %v3464_v43  ;;  %v2518_v27 = vpack.c.bf16 %v2384_v63, %v2383_v61 }
 0x47c   : > { %v3745_v60 = vpop.f32.mrf.mxu0  ;;  %3936 = vmatmul.mubr.bf16.gmra.mxu0 %v2774_v7  ;;  %v3466_v10 = vpop.f32.mrf.mxu1 }
 0x47d   : > { %v10331_v46 = vadd.f32 %v3745_v60, %v3457_v56  ;;  %3943 = vmatprep.mubr.bf16.mxu0 %v2784_v55  ;;  %v2319_v60 = vld [vmem:[#allocation2 + $0x30] sm:$0xff]  ;;  %v2320_v10 = vld [vmem:[#allocation2 + $0x38] sm:$0xff] }
 0x47e   : > { %v3747_v4 = vpop.f32.mrf.mxu0  ;;  %v3467_v57 = vpop.f32.mrf.mxu1  ;;  %v2517_v38 = vpack.c.bf16 %v2320_v10, %v2319_v60  ;;  %v2263_v10 = vld [vmem:[#allocation2 + $0x82] sm:$0xff] }
 0x47f   : > { %v3468_v39 = vadd.f32 %v10296_v34, %v3467_v57  ;;  %v2258_v4 = vld [vmem:[#allocation2 + $0x4a] sm:$0xff] }
 0x480   : > { %v3748_v33 = vpop.f32.mrf.mxu0  ;;  %v3469_v29 = vpop.f32.mrf.mxu1  ;;  %v2386_v57 = vld [vmem:[#allocation2 + $0x51] sm:$0xff] }
 0x481   : > { %v10334_v0 = vadd.f32 %v3748_v33, %v3460_v16  ;;  %v2534_v29 = vpack.c.bf16 %v2259_v11, %v2258_v4  ;;  %v2389_v4 = vld [vmem:[#allocation2 + $0x79] sm:$0xff] }
 0x482   : > { %v3750_v45 = vpop.f32.mrf.mxu0  ;;  %v3472_v26 = vpop.f32.mrf.mxu1  ;;  %3663 = vmatmul.mubr.bf16.gmra.mxu1 %v2784_v55  ;;  %v7771_v55 = vld [vmem:[%s14124_s7 + $0x228] sm:$0xff]  }
 0x483   : > { %3992 = vmatprep.mubr.bf16.mxu1 %v2516_v2  ;;  %v3473_v15 = vadd.f32 %v10296_v34, %v3472_v26  ;;  %v2527_v45 = vpack.c.bf16 %v2386_v57, %v2385_v47 }
 0x484   : > { %v3753_v22 = vpop.f32.mrf.mxu0  ;;  %3944 = vmatmul.mubr.bf16.gmra.mxu0 %v2783_v24  ;;  %v3474_v21 = vpop.f32.mrf.mxu1  ;;  %v7772_v24 = vld [vmem:[%s14124_s7 + $0x220] sm:$0xff]  }
 0x485   : > { %v10337_v37 = vadd.f32 %v3753_v22, %v3465_v51  ;;  %3951 = vmatprep.mubr.bf16.mxu0 %v2793_v32  ;;  %v2321_v21 = vld [vmem:[#allocation2 + $0x48] sm:$0xff] }
 0x486   : > { %v3755_v48 = vpop.f32.mrf.mxu0  ;;  %v3475_v1 = vpop.f32.mrf.mxu1 }
 0x487   : > { %v3476_v43 = vadd.f32 %v10296_v34, %v3475_v1  ;;  %v2261_v1 = vld [vmem:[#allocation2 + $0x6a] sm:$0xff] }
 0x488   : > { %v3756_v28 = vpop.f32.mrf.mxu0  ;;  %v3477_v58 = vpop.f32.mrf.mxu1 }
 0x489   : > { %v10340_v36 = vadd.f32 %v3756_v28, %v3468_v39  ;;  %v2260_v39 = vld [vmem:[#allocation2 + $0x62] sm:$0xff]  ;;  %v2526_v58 = vpack.c.bf16 %v2322_v40, %v2321_v21  ;;  %v2264_v21 = vld [vmem:[#allocation2 + $0x92] sm:$0xff] }
 0x48a   : > { %v3758_v20 = vpop.f32.mrf.mxu0  ;;  %v3480_v23 = vpop.f32.mrf.mxu1  ;;  %3993 = vmatmul.mubr.bf16.vlgmr.msra.gmra.mxu1 %v2515_v35  ;;  %v2387_v28 = vld [vmem:[#allocation2 + $0x61] sm:$0xff] }
 0x48b   : > { %7430 = vmatpush3.bf16.msra.mxu1 %v10274_v25  ;;  %4000 = vmatprep.mubr.bf16.mxu1 %v2525_v14  ;;  %v3481_v12 = vadd.f32 %v10296_v34, %v3480_v23  ;;  %v2536_v35 = vpack.c.bf16 %v2388_v49, %v2387_v28 }
 0x48c   : > { %v3761_v44 = vpop.f32.mrf.mxu0  ;;  %3952 = vmatmul.mubr.bf16.gmra.mxu0 %v2792_v13  ;;  %v3482_v56 = vpop.f32.mrf.mxu1  ;;  %7431 = vmatprep.subr.bf16.mxu1 %v7770_v6  ;;  %v2543_v13 = vpack.c.bf16 %v2261_v1, %v2260_v39  ;;  %v2265_v39 = vld [vmem:[#allocation2 + $0x9a] sm:$0xff] }
 0x48d   : > { %v10346_v7 = vadd.f32 %v3761_v44, %v3473_v15  ;;  %4281 = vmatprep.mubr.bf16.mxu0 %v2518_v27  ;;  %v2323_v56 = vld [vmem:[#allocation2 + $0x60] sm:$0xff] }
 0x48e   : > { %v3763_v30 = vpop.f32.mrf.mxu0  ;;  %v3483_v16 = vpop.f32.mrf.mxu1 }
 0x48f   : > { %7432 = vmatpush3.bf16.msra.mxu1 %v7770_v6  ;;  %v3484_v48 = vadd.f32 %v10296_v34, %v3483_v16  ;;  %v2324_v30 = vld [vmem:[#allocation2 + $0x68] sm:$0xff] }
 0x490   : > { %v3764_v17 = vpop.f32.mrf.mxu0  ;;  %v3485_v33 = vpop.f32.mrf.mxu1  ;;  %7433 = vmatprep.subr.bf16.mxu1 %v7771_v55  ;;  %v2390_v16 = vld [vmem:[#allocation2 + $0x81] sm:$0xff]  ;;  %v2535_v57 = vpack.c.bf16 %v2324_v30, %v2323_v56  ;;  %v2328_v56 = vld [vmem:[#allocation2 + $0x98] sm:$0xff]  ;;  %v2266_v30 = vld [vmem:[#allocation2 + $0xaa] sm:$0xff] }
 0x491   : > { %v10353_v25 = vadd.f32 %v3764_v17, %v3476_v43 }
 0x492   : > { %v3766_v62 = vpop.f32.mrf.mxu0  ;;  %v3488_v51 = vpop.f32.mrf.mxu1  ;;  %4001 = vmatmul.mubr.bf16.gmra.mxu1 %v2518_v27 }
 0x493   : > { %4008 = vmatprep.mubr.bf16.mxu1 %v2534_v29  ;;  %7434 = vmatpush3.bf16.msra.mxu1 %v7771_v55  ;;  %v3489_v20 = vadd.f32 %v10296_v34, %v3488_v51  ;;  %v2262_v55 = vld [vmem:[#allocation2 + $0x7a] sm:$0xff] }
 0x494   : > { %v3769_v32 = vpop.f32.mrf.mxu0  ;;  %4282 = vmatmul.mubr.bf16.vlgmr.msra.gmra.mxu0 %v2517_v38  ;;  %v3490_v26 = vpop.f32.mrf.mxu1  ;;  %7435 = vmatprep.subr.bf16.mxu1 %v7772_v24  ;;  %v2552_v62 = vpack.c.bf16 %v2263_v10, %v2262_v55  ;;  %v2545_v38 = vpack.c.bf16 %v2390_v16, %v2389_v4  ;;  %v2393_v10 = vld [vmem:[#allocation2 + $0xa9] sm:$0xff]  ;;  %v2394_v4 = vld [vmem:[#allocation2 + $0xb1] sm:$0xff] }
 0x495   : > { %v10359_v2 = vadd.f32 %v3769_v32, %v3481_v12  ;;  %4289 = vmatprep.mubr.bf16.mxu0 %v2527_v45  ;;  %v2325_v26 = vld [vmem:[#allocation2 + $0x78] sm:$0xff] }
 0x496   : > { %v3771_v22 = vpop.f32.mrf.mxu0  ;;  %v3491_v53 = vpop.f32.mrf.mxu1 }
 0x497   : > { %7436 = vmatpush3.bf16.msra.mxu1 %v7772_v24  ;;  %v3492_v27 = vadd.f32 %v10296_v34, %v3491_v53  ;;  %v2326_v22 = vld [vmem:[#allocation2 + $0x80] sm:$0xff] }
 0x498   : > { %v3772_v3 = vpop.f32.mrf.mxu0  ;;  %v3493_v61 = vpop.f32.mrf.mxu1  ;;  %7437 = vmatprep.subr.bf16.mxu1 %v7773_v19  ;;  %v2392_v53 = vld [vmem:[#allocation2 + $0x99] sm:$0xff]  ;;  %v2544_v49 = vpack.c.bf16 %v2326_v22, %v2325_v26  ;;  %v2329_v22 = vld [vmem:[#allocation2 + $0xa8] sm:$0xff] }
 0x499   : > { %v10365_v54 = vadd.f32 %v3772_v3, %v3484_v48  ;;  %v7774_v61 = vld [vmem:[%s14124_s7 + $0x210] sm:$0xff]  }
 0x49a   : > { %v3774_v63 = vpop.f32.mrf.mxu0  ;;  %v3496_v6 = vpop.f32.mrf.mxu1  ;;  %4009 = vmatmul.mubr.bf16.gmra.mxu1 %v2527_v45 }
 0x49b   : > { %4016 = vmatprep.mubr.bf16.mxu1 %v2543_v13  ;;  %7438 = vmatpush3.bf16.msra.mxu1 %v7773_v19  ;;  %v3497_v33 = vadd.f32 %v10296_v34, %v3496_v6  ;;  %v2391_v19 = vld [vmem:[#allocation2 + $0x91] sm:$0xff] }
 0x49c   : > { %v3777_v15 = vpop.f32.mrf.mxu0  ;;  %4290 = vmatmul.mubr.bf16.gmra.mxu0 %v2526_v58  ;;  %v3498_v23 = vpop.f32.mrf.mxu1  ;;  %v2561_v58 = vpack.c.bf16 %v2265_v39, %v2264_v21  ;;  %7439 = vmatprep.subr.bf16.mxu1 %v7774_v61  ;;  %v2330_v21 = vld [vmem:[#allocation2 + $0xb0] sm:$0xff] }
 0x49d   : > { %v10368_v14 = vadd.f32 %v3777_v15, %v3489_v20  ;;  %4297 = vmatprep.mubr.bf16.mxu0 %v2536_v35  ;;  %v2554_v20 = vpack.c.bf16 %v2392_v53, %v2391_v19  ;;  %v2269_v19 = vld [vmem:[#allocation2 + $0xca] sm:$0xff]  ;;  %v2395_v53 = vld [vmem:[#allocation2 + $0xc1] sm:$0xff] }
 0x49e   : > { %v3779_v44 = vpop.f32.mrf.mxu0  ;;  %v3499_v43 = vpop.f32.mrf.mxu1 }
 0x49f   : > { %v3500_v32 = vadd.f32 %v10296_v34, %v3499_v43  ;;  %7440 = vmatpush3.bf16.msra.mxu1 %v7774_v61 }
 0x4a0   : > { %v3780_v60 = vpop.f32.mrf.mxu0  ;;  %v3501_v11 = vpop.f32.mrf.mxu1 }
 0x4a1   : > { %v10371_v17 = vadd.f32 %v3780_v60, %v3492_v27  ;;  %v2327_v27 = vld [vmem:[#allocation2 + $0x90] sm:$0xff] }
 0x4a2   : > { %v3782_v47 = vpop.f32.mrf.mxu0  ;;  %v3504_v12 = vpop.f32.mrf.mxu1  ;;  %4017 = vmatmul.mubr.bf16.gmra.mxu1 %v2536_v35  ;;  %v2267_v60 = vld [vmem:[#allocation2 + $0xb2] sm:$0xff] }
 0x4a3   : > { %4024 = vmatprep.mubr.bf16.mxu1 %v2552_v62  ;;  %v3505_v63 = vadd.f32 %v10296_v34, %v3504_v12  ;;  %v2570_v62 = vpack.c.bf16 %v2267_v60, %v2266_v30  ;;  %v2331_v30 = vld [vmem:[#allocation2 + $0xc0] sm:$0xff] }
 0x4a4   : > { %v3785_v29 = vpop.f32.mrf.mxu0  ;;  %4298 = vmatmul.mubr.bf16.gmra.mxu0 %v2535_v57  ;;  %v3506_v24 = vpop.f32.mrf.mxu1  ;;  %v2553_v57 = vpack.c.bf16 %v2328_v56, %v2327_v27 }
 0x4a5   : > { %v10374_v45 = vadd.f32 %v3785_v29, %v3497_v33  ;;  %4305 = vmatprep.mubr.bf16.mxu0 %v2545_v38 }
 0x4a6   : > { %v3787_v51 = vpop.f32.mrf.mxu0  ;;  %v3507_v48 = vpop.f32.mrf.mxu1 }
 0x4a7   : > { %v3508_v44 = vadd.f32 %v10296_v34, %v3507_v48  ;;  %v2268_v48 = vld [vmem:[#allocation2 + $0xc2] sm:$0xff] }
 0x4a8   : > { %v3788_v40 = vpop.f32.mrf.mxu0  ;;  %v3509_v1 = vpop.f32.mrf.mxu1 }
 0x4a9   : > { %v10377_v3 = vadd.f32 %v3788_v40, %v3500_v32  ;;  %v2396_v1 = vld [vmem:[#allocation2 + $0xc9] sm:$0xff] }
 0x4aa   : > { %v3790_v28 = vpop.f32.mrf.mxu0  ;;  %v3512_v13 = vpop.f32.mrf.mxu1  ;;  %4025 = vmatmul.mubr.bf16.gmra.mxu1 %v2545_v38  ;;  %v2563_v38 = vpack.c.bf16 %v2394_v4, %v2393_v10  ;;  %v2271_v4 = vld [vmem:[#allocation2 + $0xe2] sm:$0xff] }
 0x4ab   : > { %4032 = vmatprep.mubr.bf16.mxu1 %v2561_v58  ;;  %v3513_v33 = vadd.f32 %v10296_v34, %v3512_v13  ;;  %v2572_v13 = vpack.c.bf16 %v2396_v1, %v2395_v53  ;;  %v2272_v53 = vld [vmem:[#allocation2 + $0xf2] sm:$0xff] }
 0x4ac   : > { %v3793_v35 = vpop.f32.mrf.mxu0  ;;  %4306 = vmatmul.mubr.bf16.gmra.mxu0 %v2544_v49  ;;  %v3514_v15 = vpop.f32.mrf.mxu1 }
 0x4ad   : > { %v10383_v6 = vadd.f32 %v3793_v35, %v3505_v63  ;;  %4313 = vmatprep.mubr.bf16.mxu0 %v2554_v20  ;;  %v2562_v63 = vpack.c.bf16 %v2330_v21, %v2329_v22 }
 0x4ae   : > { %v3795_v23 = vpop.f32.mrf.mxu0  ;;  %v3515_v55 = vpop.f32.mrf.mxu1 }
 0x4af   : > { %v3516_v26 = vadd.f32 %v10296_v34, %v3515_v55  ;;  %v2332_v55 = vld [vmem:[#allocation2 + $0xc8] sm:$0xff] }
 0x4b0   : > { %v3796_v43 = vpop.f32.mrf.mxu0  ;;  %v3517_v11 = vpop.f32.mrf.mxu1 }
 0x4b1   : > { %v10386_v16 = vadd.f32 %v3796_v43, %v3508_v44  ;;  %v2270_v43 = vld [vmem:[#allocation2 + $0xda] sm:$0xff] }
 0x4b2   : > { %v3798_v47 = vpop.f32.mrf.mxu0  ;;  %v3520_v12 = vpop.f32.mrf.mxu1  ;;  %4033 = vmatmul.mubr.bf16.gmra.mxu1 %v2554_v20  ;;  %v2579_v20 = vpack.c.bf16 %v2269_v19, %v2268_v48  ;;  %v2397_v11 = vld [vmem:[#allocation2 + $0xd9] sm:$0xff] }
 0x4b3   : > { %4040 = vmatprep.mubr.bf16.mxu1 %v2570_v62  ;;  %v3521_v58 = vadd.f32 %v10296_v34, %v3520_v12  ;;  %v2398_v47 = vld [vmem:[#allocation2 + $0xe1] sm:$0xff] }
 0x4b4   : > { %v3801_v29 = vpop.f32.mrf.mxu0  ;;  %4314 = vmatmul.mubr.bf16.gmra.mxu0 %v2553_v57  ;;  %v3522_v51 = vpop.f32.mrf.mxu1  ;;  %v2334_v19 = vld [vmem:[#allocation2 + $0xe0] sm:$0xff] }
 0x4b5   : > { %v10389_v24 = vadd.f32 %v3801_v29, %v3513_v33  ;;  %4321 = vmatprep.mubr.bf16.mxu0 %v2563_v38  ;;  %v2588_v29 = vpack.c.bf16 %v2271_v4, %v2270_v43  ;;  %v2581_v51 = vpack.c.bf16 %v2398_v47, %v2397_v11  ;;  %v2335_v47 = vld [vmem:[#allocation2 + $0xf0] sm:$0xff] }
 0x4b6   : > { %v3803_v32 = vpop.f32.mrf.mxu0  ;;  %v3523_v40 = vpop.f32.mrf.mxu1 }
 0x4b7   : > { %v3524_v56 = vadd.f32 %v10296_v34, %v3523_v40 }
 0x4b8   : > { %v3804_v39 = vpop.f32.mrf.mxu0  ;;  %v3525_v49 = vpop.f32.mrf.mxu1 }
 0x4b9   : > { %v10392_v28 = vadd.f32 %v3804_v39, %v3516_v26  ;;  %v2333_v39 = vld [vmem:[#allocation2 + $0xd8] sm:$0xff] }
 0x4ba   : > { %v3806_v61 = vpop.f32.mrf.mxu0  ;;  %v3528_v35 = vpop.f32.mrf.mxu1  ;;  %4041 = vmatmul.mubr.bf16.gmra.mxu1 %v2563_v38  ;;  %v2571_v38 = vpack.c.bf16 %v2332_v55, %v2331_v30 }
 0x4bb   : > { %4048 = vmatprep.mubr.bf16.mxu1 %v2579_v20  ;;  %v3529_v12 = vadd.f32 %v10296_v34, %v3528_v35  ;;  %v2273_v61 = vld [vmem:[#allocation2 + $0xfa] sm:$0xff] }
 0x4bc   : > { %v3809_v15 = vpop.f32.mrf.mxu0  ;;  %4322 = vmatmul.mubr.bf16.gmra.mxu0 %v2562_v63  ;;  %v3530_v44 = vpop.f32.mrf.mxu1  ;;  %v2399_v63 = vld [vmem:[#allocation2 + $0xf1] sm:$0xff] }
 0x4bd   : > { %v10395_v23 = vadd.f32 %v3809_v15, %v3521_v58  ;;  %4329 = vmatprep.mubr.bf16.mxu0 %v2572_v13  ;;  %v2400_v58 = vld [vmem:[#allocation2 + $0xf9] sm:$0xff]  ;;  %v2580_v15 = vpack.c.bf16 %v2334_v19, %v2333_v39  ;;  %v7775_v44 = vld [vmem:[%s14124_s7 + $0x208] sm:$0xff]  }
 0x4be   : > { %v3811_v27 = vpop.f32.mrf.mxu0  ;;  %v3531_v60 = vpop.f32.mrf.mxu1  ;;  %v2590_v30 = vpack.c.bf16 %v2400_v58, %v2399_v63  ;;  %7441 = vmatprep.subr.bf16.mxu1 %v7775_v44 }
 0x4bf   : > { %v3532_v40 = vadd.f32 %v10296_v34, %v3531_v60  ;;  %7442 = vmatpush3.bf16.msra.mxu1 %v7775_v44  ;;  %v2276_v44 = vld [vmem:[#allocation2 + $0x122] sm:$0xff] }
 0x4c0   : > { %v3812_v10 = vpop.f32.mrf.mxu0  ;;  %v3533_v33 = vpop.f32.mrf.mxu1 }
 0x4c1   : > { %v10398_v57 = vadd.f32 %v3812_v10, %v3524_v56  ;;  %v2597_v56 = vpack.c.bf16 %v2273_v61, %v2272_v53  ;;  %v2336_v33 = vld [vmem:[#allocation2 + $0xf8] sm:$0xff] }
 0x4c2   : > { %v3814_v62 = vpop.f32.mrf.mxu0  ;;  %v3536_v32 = vpop.f32.mrf.mxu1  ;;  %4049 = vmatmul.mubr.bf16.gmra.mxu1 %v2572_v13 }
 0x4c3   : > { %4056 = vmatprep.mubr.bf16.mxu1 %v2588_v29  ;;  %v3537_v27 = vadd.f32 %v10296_v34, %v3536_v32  ;;  %v2274_v62 = vld [vmem:[#allocation2 + $0x10a] sm:$0xff]  ;;  %v2275_v29 = vld [vmem:[#allocation2 + $0x112] sm:$0xff] }
 0x4c4   : > { %v3817_v26 = vpop.f32.mrf.mxu0  ;;  %4330 = vmatmul.mubr.bf16.gmra.mxu0 %v2571_v38  ;;  %v3538_v21 = vpop.f32.mrf.mxu1  ;;  %v2401_v32 = vld [vmem:[#allocation2 + $0x109] sm:$0xff]  ;;  %v2606_v19 = vpack.c.bf16 %v2275_v29, %v2274_v62 }
 0x4c5   : > { %v10401_v22 = vadd.f32 %v3817_v26, %v3529_v12  ;;  %4337 = vmatprep.mubr.bf16.mxu0 %v2581_v51  ;;  %v2402_v26 = vld [vmem:[#allocation2 + $0x111] sm:$0xff] }
 0x4c6   : > { %v3819_v48 = vpop.f32.mrf.mxu0  ;;  %v3539_v1 = vpop.f32.mrf.mxu1  ;;  %v2599_v53 = vpack.c.bf16 %v2402_v26, %v2401_v32 }
 0x4c7   : > { %v3540_v11 = vadd.f32 %v10296_v34, %v3539_v1 }
 0x4c8   : > { %v3820_v49 = vpop.f32.mrf.mxu0  ;;  %v3541_v13 = vpop.f32.mrf.mxu1 }
 0x4c9   : > { %v10404_v20 = vadd.f32 %v3820_v49, %v3532_v40  ;;  %v2589_v40 = vpack.c.bf16 %v2336_v33, %v2335_v47 }
 0x4ca   : > { %v3822_v35 = vpop.f32.mrf.mxu0  ;;  %v3544_v55 = vpop.f32.mrf.mxu1  ;;  %4057 = vmatmul.mubr.bf16.gmra.mxu1 %v2581_v51 }
 0x4cb   : > { %4064 = vmatprep.mubr.bf16.mxu1 %v2597_v56  ;;  %v3545_v39 = vadd.f32 %v10296_v34, %v3544_v55  ;;  %v2337_v35 = vld [vmem:[#allocation2 + $0x108] sm:$0xff] }
 0x4cc   : > { %v3825_v43 = vpop.f32.mrf.mxu0  ;;  %4338 = vmatmul.mubr.bf16.gmra.mxu0 %v2580_v15  ;;  %v3546_v10 = vpop.f32.mrf.mxu1  ;;  %v2338_v15 = vld [vmem:[#allocation2 + $0x110] sm:$0xff] }
 0x4cd   : > { %v10410_v60 = vadd.f32 %v3825_v43, %v3537_v27  ;;  %4345 = vmatprep.mubr.bf16.mxu0 %v2590_v30  ;;  %v2277_v55 = vld [vmem:[#allocation2 + $0x12a] sm:$0xff]  ;;  %v2403_v43 = vld [vmem:[#allocation2 + $0x121] sm:$0xff]  ;;  %v2598_v47 = vpack.c.bf16 %v2338_v15, %v2337_v35 }
 0x4ce   : > { %v3827_v4 = vpop.f32.mrf.mxu0  ;;  %v3547_v38 = vpop.f32.mrf.mxu1  ;;  %v2404_v10 = vld [vmem:[#allocation2 + $0x129] sm:$0xff]  ;;  %v2615_v62 = vpack.c.bf16 %v2277_v55, %v2276_v44 }
 0x4cf   : > { %v3548_v13 = vadd.f32 %v10296_v34, %v3547_v38 }
 0x4d0   : > { %v3828_v12 = vpop.f32.mrf.mxu0  ;;  %v3549_v21 = vpop.f32.mrf.mxu1 }
 0x4d1   : > { %v10413_v51 = vadd.f32 %v3828_v12, %v3540_v11  ;;  %v2608_v12 = vpack.c.bf16 %v2404_v10, %v2403_v43 }
 0x4d2   : > { %v3830_v48 = vpop.f32.mrf.mxu0  ;;  %v3552_v49 = vpop.f32.mrf.mxu1  ;;  %4065 = vmatmul.mubr.bf16.gmra.mxu1 %v2590_v30 }
 0x4d3   : > { %4072 = vmatprep.mubr.bf16.mxu1 %v2606_v19  ;;  %v3553_v33 = vadd.f32 %v10296_v34, %v3552_v49  ;;  %v2278_v19 = vld [vmem:[#allocation2 + $0x13a] sm:$0xff]  ;;  %v2279_v49 = vld [vmem:[#allocation2 + $0x142] sm:$0xff] }
 0x4d4   : > { %v3833_v1 = vpop.f32.mrf.mxu0  ;;  %4346 = vmatmul.mubr.bf16.gmra.mxu0 %v2589_v40  ;;  %v3554_v63 = vpop.f32.mrf.mxu1  ;;  %v2339_v40 = vld [vmem:[#allocation2 + $0x120] sm:$0xff]  ;;  %v2624_v55 = vpack.c.bf16 %v2279_v49, %v2278_v19 }
 0x4d5   : > { %v10416_v61 = vadd.f32 %v3833_v1, %v3545_v39  ;;  %4353 = vmatprep.mubr.bf16.mxu0 %v2599_v53  ;;  %v2340_v39 = vld [vmem:[#allocation2 + $0x128] sm:$0xff] }
 0x4d6   : > { %v3835_v58 = vpop.f32.mrf.mxu0  ;;  %v3555_v27 = vpop.f32.mrf.mxu1  ;;  %v2607_v44 = vpack.c.bf16 %v2340_v39, %v2339_v40  ;;  %v2407_v40 = vld [vmem:[#allocation2 + $0x151] sm:$0xff]  ;;  %v2408_v39 = vld [vmem:[#allocation2 + $0x159] sm:$0xff] }
 0x4d7   : > { %v3556_v48 = vadd.f32 %v10296_v34, %v3555_v27  ;;  %v2405_v58 = vld [vmem:[#allocation2 + $0x139] sm:$0xff] }
 0x4d8   : > { %v3836_v56 = vpop.f32.mrf.mxu0  ;;  %v3557_v30 = vpop.f32.mrf.mxu1 }
 0x4d9   : > { %v10419_v4 = vadd.f32 %v3836_v56, %v3548_v13  ;;  %v2406_v13 = vld [vmem:[#allocation2 + $0x141] sm:$0xff] }
 0x4da   : > { %v3838_v11 = vpop.f32.mrf.mxu0  ;;  %v3560_v29 = vpop.f32.mrf.mxu1  ;;  %4073 = vmatmul.mubr.bf16.gmra.mxu1 %v2599_v53  ;;  %v2617_v43 = vpack.c.bf16 %v2406_v13, %v2405_v58  ;;  %v7776_v58 = vld [vmem:[%s14124_s7 + $0x200] sm:$0xff]  }
 0x4db   : > { %4080 = vmatprep.mubr.bf16.mxu1 %v2615_v62  ;;  %v3561_v56 = vadd.f32 %v10296_v34, %v3560_v29  ;;  %v2341_v62 = vld [vmem:[#allocation2 + $0x138] sm:$0xff]  ;;  %7443 = vmatprep.subr.bf16.mxu1 %v7776_v58 }
 0x4dc   : > { %v3841_v32 = vpop.f32.mrf.mxu0  ;;  %4354 = vmatmul.mubr.bf16.gmra.mxu0 %v2598_v47  ;;  %v3562_v26 = vpop.f32.mrf.mxu1  ;;  %v2281_v29 = vld [vmem:[#allocation2 + $0x15a] sm:$0xff]  ;;  %7444 = vmatpush3.bf16.msra.mxu1 %v7776_v58 }
 0x4dd   : > { %v10422_v38 = vadd.f32 %v3841_v32, %v3553_v33  ;;  %4361 = vmatprep.mubr.bf16.mxu0 %v2608_v12  ;;  %v2342_v32 = vld [vmem:[#allocation2 + $0x140] sm:$0xff]  ;;  %v2280_v26 = vld [vmem:[#allocation2 + $0x152] sm:$0xff] }
 0x4de   : > { %v3843_v21 = vpop.f32.mrf.mxu0  ;;  %v3563_v1 = vpop.f32.mrf.mxu1  ;;  %v2616_v49 = vpack.c.bf16 %v2342_v32, %v2341_v62  ;;  %v2283_v32 = vld [vmem:[#allocation2 + $0x172] sm:$0xff] }
 0x4df   : > { %v3564_v33 = vadd.f32 %v10296_v34, %v3563_v1  ;;  %v2633_v1 = vpack.c.bf16 %v2281_v29, %v2280_v26  ;;  %v2409_v26 = vld [vmem:[#allocation2 + $0x169] sm:$0xff]  ;;  %v10445_v29 = vld [vmem:[#allocation2] sm:$0xff] }
 0x4e0   : > { %v3844_v63 = vpop.f32.mrf.mxu0  ;;  %v3565_v53 = vpop.f32.mrf.mxu1  ;;  %7629 = vmatprep.subr.mxu1 %v10445_v29 }
 0x4e1   : > { %v10425_v35 = vadd.f32 %v3844_v63, %v3556_v48  ;;  %v2626_v53 = vpack.c.bf16 %v2408_v39, %v2407_v40 }
 0x4e2   : > { %v3846_v15 = vpop.f32.mrf.mxu0  ;;  %v3568_v10 = vpop.f32.mrf.mxu1  ;;  %4081 = vmatmul.mubr.bf16.gmra.mxu1 %v2608_v12 }
 0x4e3   : > { %4088 = vmatprep.mubr.bf16.mxu1 %v2624_v55  ;;  %v3569_v13 = vadd.f32 %v10296_v34, %v3568_v10  ;;  %v2343_v10 = vld [vmem:[#allocation2 + $0x150] sm:$0xff] }
 0x4e4   : > { %v3849_v30 = vpop.f32.mrf.mxu0  ;;  %4362 = vmatmul.mubr.bf16.gmra.mxu0 %v2607_v44  ;;  %v3570_v11 = vpop.f32.mrf.mxu1 }
 0x4e5   : > { %v10428_v27 = vadd.f32 %v3849_v30, %v3561_v56  ;;  %4369 = vmatprep.mubr.bf16.mxu0 %v2617_v43  ;;  %v10442_v11 = vld [vmem:[%s14125_s8] ss:$0 sm:$0xff] }
 0x4e6   : > { %v3851_v47 = vpop.f32.mrf.mxu0  ;;  %v3571_v21 = vpop.f32.mrf.mxu1 }
 0x4e7   : > { %v3572_v34 = vadd.f32 %v10442_v11, %v3571_v21  ;;  %v2344_v47 = vld [vmem:[#allocation2 + $0x158] sm:$0xff] }
 0x4e8   : > { %v3852_v48 = vpop.f32.mrf.mxu0  ;;  %v3573_v12 = vpop.f32.mrf.mxu1 }
 0x4e9   : > { %v10431_v19 = vadd.f32 %v3852_v48, %v3564_v33  ;;  %v2282_v33 = vld [vmem:[#allocation2 + $0x16a] sm:$0xff] }
 0x4ea   : > { %v3854_v63 = vpop.f32.mrf.mxu0  ;;  %v3576_v15 = vpop.f32.mrf.mxu1  ;;  %4089 = vmatmul.mubr.bf16.gmra.mxu1 %v2617_v43  ;;  %v2410_v48 = vld [vmem:[#allocation2 + $0x171] sm:$0xff] }
 0x4eb   : > { %4096 = vmatprep.mubr.bf16.mxu1 %v2633_v1  ;;  %v2625_v63 = vpack.c.bf16 %v2344_v47, %v2343_v10  ;;  %v3577_v21 = vadd.f32 %v10442_v11, %v3576_v15  ;;  %v2285_v15 = vld [vmem:[#allocation2 + $0x18a] sm:$0xff] }
 0x4ec   : > { %v3857_v44 = vpop.f32.mrf.mxu0  ;;  %4370 = vmatmul.mubr.bf16.gmra.mxu0 %v2616_v49  ;;  %v3578_v55 = vpop.f32.mrf.mxu1  ;;  %v2642_v49 = vpack.c.bf16 %v2283_v32, %v2282_v33  ;;  %v2411_v33 = vld [vmem:[#allocation2 + $0x181] sm:$0xff]  ;;  %v2412_v32 = vld [vmem:[#allocation2 + $0x189] sm:$0xff] }
 0x4ed   : > { %v10437_v56 = vadd.f32 %v3857_v44, %v3569_v13  ;;  %4377 = vmatprep.mubr.bf16.mxu0 %v2626_v53  ;;  %v2635_v13 = vpack.c.bf16 %v2410_v48, %v2409_v26 }
 0x4ee   : > { %v3859_v30 = vpop.f32.mrf.mxu0  ;;  %v3579_v43 = vpop.f32.mrf.mxu1 }
 0x4ef   : > { %14661 = vst [vmem:[#allocation24_spill] sm:$0xff] %v10437_v56  ;;  %v2413_v56 = vld [vmem:[#allocation2 + $0x199] sm:$0xff] }
 0x4f0   : > { %v3860_v62 = vpop.f32.mrf.mxu0  ;;  %v3581_v39 = vpop.f32.mrf.mxu1 }
 0x4f1   : > { %v10448_v40 = vadd.f32 %v3860_v62, %v3572_v34  ;;  %v3580_v34 = vadd.f32 %v10442_v11, %v3579_v43  ;;  %v2345_v62 = vld [vmem:[#allocation2 + $0x168] sm:$0xff]  ;;  %v2346_v39 = vld [vmem:[#allocation2 + $0x170] sm:$0xff] }
 0x4f2   : > { %v3862_v12 = vpop.f32.mrf.mxu0  ;;  %v3584_v1 = vpop.f32.mrf.mxu1  ;;  %4097 = vmatmul.mubr.bf16.gmra.mxu1 %v2626_v53 }
 0x4f3   : > { %14662 = vst [vmem:[#allocation25_spill] sm:$0xff] %v10448_v40  ;;  %4104 = vmatprep.mubr.bf16.mxu1 %v2642_v49  ;;  %v2284_v12 = vld [vmem:[#allocation2 + $0x182] sm:$0xff] }
 0x4f4   : > { %v3865_v58 = vpop.f32.mrf.mxu0  ;;  %4378 = vmatmul.mubr.bf16.gmra.mxu0 %v2625_v63  ;;  %v3586_v55 = vpop.f32.mrf.mxu1  ;;  %v2634_v63 = vpack.c.bf16 %v2346_v39, %v2345_v62  ;;  %v2651_v49 = vpack.c.bf16 %v2285_v15, %v2284_v12  ;;  %v2348_v62 = vld [vmem:[#allocation2 + $0x188] sm:$0xff]  ;;  %v2287_v15 = vld [vmem:[#allocation2 + $0x1d2] sm:$0xff] }
 0x4f5   : > { %v10451_v44 = vadd.f32 %v3865_v58, %v3577_v21  ;;  %4385 = vmatprep.mubr.bf16.mxu0 %v2635_v13  ;;  %v3585_v21 = vadd.f32 %v10442_v11, %v3584_v1  ;;  %v2644_v58 = vpack.c.bf16 %v2412_v32, %v2411_v33  ;;  %v2286_v12 = vld [vmem:[#allocation2 + $0x1ca] sm:$0xff] }
 0x4f6   : > { %v3867_v30 = vpop.f32.mrf.mxu0  ;;  %v3587_v10 = vpop.f32.mrf.mxu1 }
 0x4f7   : > { %14663 = vst [vmem:[#allocation27_spill] sm:$0xff] %v10451_v44 }
 0x4f8   : > { %v3868_v47 = vpop.f32.mrf.mxu0  ;;  %v3589_v53 = vpop.f32.mrf.mxu1 }
 0x4f9   : > { %v10454_v26 = vadd.f32 %v3868_v47, %v3580_v34  ;;  %v2414_v34 = vld [vmem:[#allocation2 + $0x1a1] sm:$0xff]  ;;  %v3588_v47 = vadd.f32 %v10442_v11, %v3587_v10 }
 0x4fa   : > { %v3870_v48 = vpop.f32.mrf.mxu0  ;;  %v3592_v55 = vpop.f32.mrf.mxu1  ;;  %4105 = vmatmul.mubr.bf16.gmra.mxu1 %v2635_v13  ;;  %v2347_v53 = vld [vmem:[#allocation2 + $0x180] sm:$0xff]  ;;  %v2653_v13 = vpack.c.bf16 %v2414_v34, %v2413_v56  ;;  %v2223_v56 = vld [vmem:[#allocation2 + $0x1d1] sm:$0xff] }
 0x4fb   : > { %14664 = vst [vmem:[#allocation28_spill] sm:$0xff] %v10454_v26  ;;  %4112 = vmatprep.mubr.bf16.mxu1 %v2651_v49  ;;  %v2288_v34 = vld [vmem:[#allocation2 + $0x1e2] sm:$0xff] }
 0x4fc   : > { %v3873_v30 = vpop.f32.mrf.mxu0  ;;  %4386 = vmatmul.mubr.bf16.gmra.mxu0 %v2634_v63  ;;  %v3594_v44 = vpop.f32.mrf.mxu1  ;;  %v2643_v63 = vpack.c.bf16 %v2348_v62, %v2347_v53  ;;  %v2289_v62 = vld [vmem:[#allocation2 + $0x1ea] sm:$0xff] }
 0x4fd   : > { %v10457_v43 = vadd.f32 %v3873_v30, %v3585_v21  ;;  %4393 = vmatprep.mubr.bf16.mxu0 %v2644_v58  ;;  %v3593_v21 = vadd.f32 %v10442_v11, %v3592_v55  ;;  %v2660_v44 = vpack.c.bf16 %v2287_v15, %v2286_v12  ;;  %v10468_v55 = vpack.c.bf16 %v10445_v29, %v10445_v29  ;;  %v2416_v12 = vld [vmem:[#allocation2 + $0x1e9] sm:$0xff] }
 0x4fe   : > { %v3875_v40 = vpop.f32.mrf.mxu0  ;;  %v3595_v39 = vpop.f32.mrf.mxu1 }
 0x4ff   : > { %14665 = vst [vmem:[#allocation29_spill] sm:$0xff] %v10457_v43 }
 0x500   : > { %v3876_v1 = vpop.f32.mrf.mxu0  ;;  %v3597_v32 = vpop.f32.mrf.mxu1 }
 0x501   : > { %v10460_v33 = vadd.f32 %v3876_v1, %v3588_v47  ;;  %v3596_v47 = vadd.f32 %v10442_v11, %v3595_v39  ;;  %v2222_v1 = vld [vmem:[#allocation2 + $0x1c9] sm:$0xff]  ;;  %v2669_v39 = vpack.c.bf16 %v2289_v62, %v2288_v34  ;;  %v2417_v62 = vld [vmem:[#allocation2 + $0x1f9] sm:$0xff] }
 0x502   : > { %v3878_v48 = vpop.f32.mrf.mxu0  ;;  %v3600_v40 = vpop.f32.mrf.mxu1  ;;  %4113 = vmatmul.mubr.bf16.gmra.mxu1 %v2644_v58  ;;  %v2415_v58 = vld [vmem:[#allocation2 + $0x1e1] sm:$0xff] }
 0x503   : > { %14666 = vst [vmem:[#allocation30_spill] sm:$0xff] %v10460_v33  ;;  %4120 = vmatprep.mubr.bf16.mxu1 %v2660_v44  ;;  %v2291_v34 = vld [vmem:[#allocation2 + $0x202] sm:$0xff] }
 0x504   : > { %v3881_v49 = vpop.f32.mrf.mxu0  ;;  %4394 = vmatmul.mubr.bf16.gmra.mxu0 %v2643_v63  ;;  %v3602_v30 = vpop.f32.mrf.mxu1  ;;  %v2659_v63 = vpack.c.bf16 %v2223_v56, %v2222_v1  ;;  %v2290_v1 = vld [vmem:[#allocation2 + $0x1fa] sm:$0xff] }
 0x505   : > { %v10463_v10 = vadd.f32 %v3881_v49, %v3593_v21  ;;  %4401 = vmatprep.mubr.bf16.mxu0 %v2653_v13  ;;  %v2662_v21 = vpack.c.bf16 %v2416_v12, %v2415_v58  ;;  %v2418_v58 = vld [vmem:[#allocation2 + $0x201] sm:$0xff] }
 0x506   : > { %v3883_v43 = vpop.f32.mrf.mxu0  ;;  %v3603_v32 = vpop.f32.mrf.mxu1 }
 0x507   : > { %14667 = vst [vmem:[#allocation12_spill] sm:$0xff] %v10463_v10  ;;  %v3601_v43 = vadd.f32 %v10442_v11, %v3600_v40 }
 0x508   : > { %v3884_v53 = vpop.f32.mrf.mxu0  ;;  %v3605_v48 = vpop.f32.mrf.mxu1 }
 0x509   : > { %v10470_v15 = vadd.f32 %v3884_v53, %v3596_v47  ;;  %v3604_v47 = vadd.f32 %v10442_v11, %v3603_v32  ;;  %v2351_v53 = vld [vmem:[#allocation2 + $0x1e0] sm:$0xff]  ;;  %v2352_v48 = vld [vmem:[#allocation2 + $0x1e8] sm:$0xff] }
 0x50a   : > { %v3886_v13 = vpop.f32.mrf.mxu0  ;;  %v3608_v44 = vpop.f32.mrf.mxu1  ;;  %4121 = vmatmul.mubr.bf16.gmra.mxu1 %v2659_v63 }
 0x50b   : > { %14668 = vst [vmem:[#allocation13_spill] sm:$0xff] %v10470_v15  ;;  %4128 = vmatprep.mubr.bf16.mxu1 %v2669_v39  ;;  %v3609_v39 = vadd.f32 %v10442_v11, %v3608_v44  ;;  %v2293_v44 = vld [vmem:[#allocation2 + $0x21a] sm:$0xff] }
 0x50c   : > { %v3889_v49 = vpop.f32.mrf.mxu0  ;;  %4402 = vmatmul.mubr.bf16.gmra.mxu0 %v10468_v55  ;;  %v3610_v10 = vpop.f32.mrf.mxu1 }
 0x50d   : > { %v10474_v30 = vadd.f32 %v3889_v49, %v3601_v43  ;;  %4409 = vmatprep.mubr.bf16.mxu0 %v2662_v21  ;;  %v2661_v43 = vpack.c.bf16 %v2352_v48, %v2351_v53  ;;  %v2678_v49 = vpack.c.bf16 %v2291_v34, %v2290_v1  ;;  %v2671_v10 = vpack.c.bf16 %v2418_v58, %v2417_v62  ;;  %v2419_v1 = vld [vmem:[#allocation2 + $0x211] sm:$0xff]  ;;  %v2420_v34 = vld [vmem:[#allocation2 + $0x219] sm:$0xff] }
 0x50e   : > { %v3891_v33 = vpop.f32.mrf.mxu0  ;;  %v3611_v56 = vpop.f32.mrf.mxu1 }
 0x50f   : > { %14669 = vst [vmem:[#allocation14_spill] sm:$0xff] %v10474_v30 }
 0x510   : > { %v3892_v40 = vpop.f32.mrf.mxu0  ;;  %v3613_v13 = vpop.f32.mrf.mxu1 }
 0x511   : > { %v10477_v12 = vadd.f32 %v3892_v40, %v3604_v47  ;;  %v3612_v47 = vadd.f32 %v10442_v11, %v3611_v56  ;;  %v2353_v40 = vld [vmem:[#allocation2 + $0x1f8] sm:$0xff]  ;;  %v2354_v13 = vld [vmem:[#allocation2 + $0x200] sm:$0xff] }
 0x512   : > { %v3894_v63 = vpop.f32.mrf.mxu0  ;;  %v3616_v33 = vpop.f32.mrf.mxu1  ;;  %4129 = vmatmul.mubr.bf16.gmra.mxu1 %v2662_v21 }
 0x513   : > { %14670 = vst [vmem:[#allocation15_spill] sm:$0xff] %v10477_v12  ;;  %4136 = vmatprep.mubr.bf16.mxu1 %v2678_v49  ;;  %v2292_v63 = vld [vmem:[#allocation2 + $0x212] sm:$0xff] }
 0x514   : > { %v3897_v30 = vpop.f32.mrf.mxu0  ;;  %4410 = vmatmul.mubr.bf16.gmra.mxu0 %v2661_v43  ;;  %v3618_v15 = vpop.f32.mrf.mxu1  ;;  %v3617_v43 = vadd.f32 %v10442_v11, %v3616_v33  ;;  %v2295_v33 = vld [vmem:[#allocation2 + $0x232] sm:$0xff] }
 0x515   : > { %v10480_v32 = vadd.f32 %v3897_v30, %v3609_v39  ;;  %4417 = vmatprep.mubr.bf16.mxu0 %v2671_v10  ;;  %v2670_v30 = vpack.c.bf16 %v2354_v13, %v2353_v40  ;;  %v2687_v39 = vpack.c.bf16 %v2293_v44, %v2292_v63  ;;  %v2680_v15 = vpack.c.bf16 %v2420_v34, %v2419_v1  ;;  %v2421_v63 = vld [vmem:[#allocation2 + $0x229] sm:$0xff]  ;;  %v2422_v44 = vld [vmem:[#allocation2 + $0x231] sm:$0xff] }
 0x516   : > { %v3899_v26 = vpop.f32.mrf.mxu0  ;;  %v3619_v53 = vpop.f32.mrf.mxu1 }
 0x517   : > { %14671 = vst [vmem:[#allocation16_spill] sm:$0xff] %v10480_v32 }
 0x518   : > { %v3900_v48 = vpop.f32.mrf.mxu0  ;;  %v3621_v21 = vpop.f32.mrf.mxu1 }
 0x519   : > { %v10483_v62 = vadd.f32 %v3900_v48, %v3612_v47  ;;  %v3620_v47 = vadd.f32 %v10442_v11, %v3619_v53  ;;  %v2355_v48 = vld [vmem:[#allocation2 + $0x210] sm:$0xff]  ;;  %v2356_v21 = vld [vmem:[#allocation2 + $0x218] sm:$0xff] }
 0x51a   : > { %v3902_v58 = vpop.f32.mrf.mxu0  ;;  %v3624_v26 = vpop.f32.mrf.mxu1  ;;  %4137 = vmatmul.mubr.bf16.gmra.mxu1 %v2671_v10 }
 0x51b   : > { %14672 = vst [vmem:[#allocation26_spill] sm:$0xff] %v10483_v62  ;;  %4144 = vmatprep.mubr.bf16.mxu1 %v2687_v39  ;;  %v2294_v58 = vld [vmem:[#allocation2 + $0x22a] sm:$0xff] }
 0x51c   : > { %v3905_v49 = vpop.f32.mrf.mxu0  ;;  %4418 = vmatmul.mubr.bf16.gmra.mxu0 %v2670_v30  ;;  %v3626_v32 = vpop.f32.mrf.mxu1  ;;  %v2679_v30 = vpack.c.bf16 %v2356_v21, %v2355_v48  ;;  %v2696_v39 = vpack.c.bf16 %v2295_v33, %v2294_v58  ;;  %v2423_v58 = vld [vmem:[#allocation2 + $0x241] sm:$0xff]  ;;  %v2424_v33 = vld [vmem:[#allocation2 + $0x249] sm:$0xff] }
 0x51d   : > { %v10486_v56 = vadd.f32 %v3905_v49, %v3617_v43  ;;  %4425 = vmatprep.mubr.bf16.mxu0 %v2680_v15  ;;  %v3625_v43 = vadd.f32 %v10442_v11, %v3624_v26  ;;  %v2689_v32 = vpack.c.bf16 %v2422_v44, %v2421_v63  ;;  %v2297_v26 = vld [vmem:[#allocation2 + $0x24a] sm:$0xff] }
 0x51e   : > { %v3907_v12 = vpop.f32.mrf.mxu0  ;;  %v3627_v40 = vpop.f32.mrf.mxu1 }
 0x51f   : > { %14673 = vst [vmem:[#allocation7_spill] sm:$0xff] %v10486_v56 }
 0x520   : > { %v3908_v13 = vpop.f32.mrf.mxu0  ;;  %v3629_v10 = vpop.f32.mrf.mxu1 }
 0x521   : > { %v10489_v1 = vadd.f32 %v3908_v13, %v3620_v47  ;;  %v3628_v47 = vadd.f32 %v10442_v11, %v3627_v40  ;;  %v2357_v13 = vld [vmem:[#allocation2 + $0x228] sm:$0xff]  ;;  %v2358_v10 = vld [vmem:[#allocation2 + $0x230] sm:$0xff] }
 0x522   : > { %v3910_v34 = vpop.f32.mrf.mxu0  ;;  %v3632_v12 = vpop.f32.mrf.mxu1  ;;  %4145 = vmatmul.mubr.bf16.gmra.mxu1 %v2680_v15 }
 0x523   : > { %14674 = vst [vmem:[#allocation3_spill] sm:$0xff] %v10489_v1  ;;  %4152 = vmatprep.mubr.bf16.mxu1 %v2696_v39  ;;  %v2296_v34 = vld [vmem:[#allocation2 + $0x242] sm:$0xff] }
 0x524   : > { %v3913_v49 = vpop.f32.mrf.mxu0  ;;  %4426 = vmatmul.mubr.bf16.gmra.mxu0 %v2679_v30  ;;  %v3634_v56 = vpop.f32.mrf.mxu1  ;;  %v2688_v30 = vpack.c.bf16 %v2358_v10, %v2357_v13  ;;  %v2705_v39 = vpack.c.bf16 %v2297_v26, %v2296_v34  ;;  %v2425_v34 = vld [vmem:[#allocation2 + $0x259] sm:$0xff]  ;;  %v2426_v26 = vld [vmem:[#allocation2 + $0x261] sm:$0xff] }
 0x525   : > { %v10492_v53 = vadd.f32 %v3913_v49, %v3625_v43  ;;  %4433 = vmatprep.mubr.bf16.mxu0 %v2689_v32  ;;  %v3633_v43 = vadd.f32 %v10442_v11, %v3632_v12  ;;  %v2698_v56 = vpack.c.bf16 %v2424_v33, %v2423_v58  ;;  %v2299_v12 = vld [vmem:[#allocation2 + $0x262] sm:$0xff] }
 0x526   : > { %v3915_v62 = vpop.f32.mrf.mxu0  ;;  %v3635_v48 = vpop.f32.mrf.mxu1 }
 0x527   : > { %14675 = vst [vmem:[#allocation5_spill] sm:$0xff] %v10492_v53 }
 0x528   : > { %v3916_v21 = vpop.f32.mrf.mxu0  ;;  %v3637_v15 = vpop.f32.mrf.mxu1 }
 0x529   : > { %v10495_v63 = vadd.f32 %v3916_v21, %v3628_v47  ;;  %v3636_v47 = vadd.f32 %v10442_v11, %v3635_v48  ;;  %v2359_v21 = vld [vmem:[#allocation2 + $0x240] sm:$0xff]  ;;  %v2360_v15 = vld [vmem:[#allocation2 + $0x248] sm:$0xff] }
 0x52a   : > { %v3918_v44 = vpop.f32.mrf.mxu0  ;;  %v3640_v62 = vpop.f32.mrf.mxu1  ;;  %4153 = vmatmul.mubr.bf16.gmra.mxu1 %v2689_v32 }
 0x52b   : > { %14676 = vst [vmem:[#allocation4_spill] sm:$0xff] %v10495_v63  ;;  %4160 = vmatprep.mubr.bf16.mxu1 %v2705_v39  ;;  %v2298_v44 = vld [vmem:[#allocation2 + $0x25a] sm:$0xff] }
 0x52c   : > { %v3921_v49 = vpop.f32.mrf.mxu0  ;;  %4434 = vmatmul.mubr.bf16.gmra.mxu0 %v2688_v30  ;;  %v3642_v53 = vpop.f32.mrf.mxu1  ;;  %v2697_v30 = vpack.c.bf16 %v2360_v15, %v2359_v21  ;;  %v2714_v39 = vpack.c.bf16 %v2299_v12, %v2298_v44  ;;  %v2427_v44 = vld [vmem:[#allocation2 + $0x271] sm:$0xff]  ;;  %v2428_v12 = vld [vmem:[#allocation2 + $0x279] sm:$0xff] }
 0x52d   : > { %v10498_v40 = vadd.f32 %v3921_v49, %v3633_v43  ;;  %4441 = vmatprep.mubr.bf16.mxu0 %v2698_v56  ;;  %v3641_v43 = vadd.f32 %v10442_v11, %v3640_v62  ;;  %v2707_v53 = vpack.c.bf16 %v2426_v26, %v2425_v34  ;;  %v2301_v62 = vld [vmem:[#allocation2 + $0x27a] sm:$0xff] }
 0x52e   : > { %v3923_v1 = vpop.f32.mrf.mxu0  ;;  %v3643_v13 = vpop.f32.mrf.mxu1 }
 0x52f   : > { %14677 = vst [vmem:[#allocation6_spill] sm:$0xff] %v10498_v40 }
 0x530   : > { %v3924_v10 = vpop.f32.mrf.mxu0  ;;  %v3645_v32 = vpop.f32.mrf.mxu1 }
 0x531   : > { %v10501_v58 = vadd.f32 %v3924_v10, %v3636_v47  ;;  %v3644_v47 = vadd.f32 %v10442_v11, %v3643_v13  ;;  %v2361_v10 = vld [vmem:[#allocation2 + $0x258] sm:$0xff]  ;;  %v2362_v32 = vld [vmem:[#allocation2 + $0x260] sm:$0xff] }
 0x532   : > { %v3926_v33 = vpop.f32.mrf.mxu0  ;;  %v3648_v1 = vpop.f32.mrf.mxu1  ;;  %4161 = vmatmul.mubr.bf16.gmra.mxu1 %v2698_v56 }
 0x533   : > { %14678 = vst [vmem:[#allocation8_spill] sm:$0xff] %v10501_v58  ;;  %4168 = vmatprep.mubr.bf16.mxu1 %v2714_v39  ;;  %v2300_v33 = vld [vmem:[#allocation2 + $0x272] sm:$0xff] }
 0x534   : > { %v3929_v49 = vpop.f32.mrf.mxu0  ;;  %4442 = vmatmul.mubr.bf16.gmra.mxu0 %v2697_v30  ;;  %v3650_v40 = vpop.f32.mrf.mxu1  ;;  %v2706_v30 = vpack.c.bf16 %v2362_v32, %v2361_v10  ;;  %v10510_v39 = vpack.c.bf16 %v2301_v62, %v2300_v33  ;;  %v2364_v10 = vld [vmem:[#allocation2 + $0x278] sm:$0xff]  ;;  %v2302_v32 = vld [vmem:[#allocation2 + $0x28a] sm:$0xff] }
 0x535   : > { %v10504_v48 = vadd.f32 %v3929_v49, %v3641_v43  ;;  %4449 = vmatprep.mubr.bf16.mxu0 %v2707_v53  ;;  %v3649_v43 = vadd.f32 %v10442_v11, %v3648_v1  ;;  %v2303_v62 = vld [vmem:[#allocation2 + $0x292] sm:$0xff] }
 0x536   : > { %v3931_v63 = vpop.f32.mrf.mxu0  ;;  %v3651_v21 = vpop.f32.mrf.mxu1 }
 0x537   : > { %14679 = vst [vmem:[#allocation10_spill] sm:$0xff] %v10504_v48  ;;  %v2716_v63 = vpack.c.bf16 %v2428_v12, %v2427_v44  ;;  %v2429_v44 = vld [vmem:[#allocation2 + $0x289] sm:$0xff]  ;;  %v2430_v12 = vld [vmem:[#allocation2 + $0x291] sm:$0xff] }
 0x538   : > { %v3932_v15 = vpop.f32.mrf.mxu0  ;;  %v3653_v56 = vpop.f32.mrf.mxu1 }
 0x539   : > { %v10507_v34 = vadd.f32 %v3932_v15, %v3644_v47  ;;  %v3652_v15 = vadd.f32 %v10442_v11, %v3651_v21  ;;  %v2363_v56 = vld [vmem:[#allocation2 + $0x270] sm:$0xff] }
 0x53a   : > { %v3934_v26 = vpop.f32.mrf.mxu0  ;;  %v3656_v40 = vpop.f32.mrf.mxu1  ;;  %4169 = vmatmul.mubr.bf16.gmra.mxu1 %v2707_v53 }
 0x53b   : > { %14680 = vst [vmem:[#allocation9_spill] sm:$0xff] %v10507_v34  ;;  %4176 = vmatprep.mubr.bf16.mxu1 %v10510_v39 }
 0x53c   : > { %v3937_v13 = vpop.f32.mrf.mxu0  ;;  %4450 = vmatmul.mubr.bf16.gmra.mxu0 %v2706_v30  ;;  %v3658_v48 = vpop.f32.mrf.mxu1 }
 0x53d   : > { %v10512_v49 = vadd.f32 %v3937_v13, %v3649_v43  ;;  %4457 = vmatprep.mubr.bf16.mxu0 %v2716_v63  ;;  %v2715_v43 = vpack.c.bf16 %v2364_v10, %v2363_v56  ;;  %v3657_v13 = vadd.f32 %v10442_v11, %v3656_v40  ;;  %v2725_v48 = vpack.c.bf16 %v2430_v12, %v2429_v44  ;;  %v2366_v56 = vld [vmem:[#allocation2 + $0x290] sm:$0xff]  ;;  %v2304_v10 = vld [vmem:[#allocation2 + $0x2a2] sm:$0xff] }
 0x53e   : > { %v3939_v47 = vpop.f32.mrf.mxu0  ;;  %v3659_v1 = vpop.f32.mrf.mxu1  ;;  %v2431_v44 = vld [vmem:[#allocation2 + $0x2a1] sm:$0xff]  ;;  %v2432_v12 = vld [vmem:[#allocation2 + $0x2a9] sm:$0xff] }
 0x53f   : > { %14681 = vst [vmem:[#allocation11_spill] sm:$0xff] %v10512_v49  ;;  %v10519_v49 = vpack.c.bf16 %v2303_v62, %v2302_v32  ;;  %v2305_v62 = vld [vmem:[#allocation2 + $0x2aa] sm:$0xff] }
 0x540   : > { %v3940_v33 = vpop.f32.mrf.mxu0  ;;  %v3661_v53 = vpop.f32.mrf.mxu1 }
 0x541   : > { %v10516_v26 = vadd.f32 %v3940_v33, %v3652_v15  ;;  %14683 = vst [vmem:[#allocation35_spill] sm:$0xff] %v10519_v49  ;;  %v3660_v33 = vadd.f32 %v10442_v11, %v3659_v1  ;;  %v2365_v53 = vld [vmem:[#allocation2 + $0x288] sm:$0xff] }
 0x542   : > { %v3942_v30 = vpop.f32.mrf.mxu0  ;;  %v3664_v47 = vpop.f32.mrf.mxu1  ;;  %4177 = vmatmul.mubr.bf16.gmra.mxu1 %v2716_v63 }
 0x543   : > { %14682 = vst [vmem:[#allocation21_spill] sm:$0xff] %v10516_v26  ;;  %4184 = vmatprep.mubr.bf16.mxu1 %v10519_v49 }
 0x544   : > { %v3945_v21 = vpop.f32.mrf.mxu0  ;;  %4458 = vmatmul.mubr.bf16.gmra.mxu0 %v2715_v43  ;;  %v3666_v58 = vpop.f32.mrf.mxu1 }
 0x545   : > { %v10521_v34 = vadd.f32 %v3945_v21, %v3657_v13  ;;  %4465 = vmatprep.mubr.bf16.mxu0 %v2725_v48  ;;  %v2724_v13 = vpack.c.bf16 %v2366_v56, %v2365_v53  ;;  %v3665_v21 = vadd.f32 %v10442_v11, %v3664_v47  ;;  %v2734_v58 = vpack.c.bf16 %v2432_v12, %v2431_v44  ;;  %v2367_v56 = vld [vmem:[#allocation2 + $0x2a0] sm:$0xff]  ;;  %v2368_v47 = vld [vmem:[#allocation2 + $0x2a8] sm:$0xff] }
 0x546   : > { %v3947_v15 = vpop.f32.mrf.mxu0  ;;  %v3667_v40 = vpop.f32.mrf.mxu1  ;;  %v2307_v12 = vld [vmem:[#allocation2 + $0x2c2] sm:$0xff] }
 0x547   : > { %14684 = vst [vmem:[#allocation34_spill] sm:$0xff] %v10521_v34  ;;  %v10528_v34 = vpack.c.bf16 %v2305_v62, %v2304_v10  ;;  %v3668_v53 = vadd.f32 %v10442_v11, %v3667_v40  ;;  %v2306_v10 = vld [vmem:[#allocation2 + $0x2ba] sm:$0xff] }
 0x548   : > { %v3948_v32 = vpop.f32.mrf.mxu0  ;;  %v3669_v63 = vpop.f32.mrf.mxu1 }
 0x549   : > { %v10525_v30 = vadd.f32 %v3948_v32, %v3660_v33  ;;  %v2433_v63 = vld [vmem:[#allocation2 + $0x2b9] sm:$0xff] }
 0x54a   : > { %v3950_v43 = vpop.f32.mrf.mxu0  ;;  %v3994_v1 = vpop.f32.mrf.mxu1  ;;  %4185 = vmatmul.mubr.bf16.gmra.mxu1 %v2725_v48  ;;  %v2434_v48 = vld [vmem:[#allocation2 + $0x2c1] sm:$0xff] }
 0x54b   : > { %v3995_v49 = vadd.f32 %v3994_v1, %v10300_v5  ;;  %4192 = vmatprep.mubr.bf16.mxu1 %v10528_v34  ;;  %v10538_v1 = vpack.c.bf16 %v2307_v12, %v2306_v10  ;;  %v2309_v10 = vld [vmem:[#allocation2 + $0x2da] sm:$0xff]  ;;  %v2435_v12 = vld [vmem:[#allocation2 + $0x2d1] sm:$0xff] }
 0x54c   : > { %v3953_v15 = vpop.f32.mrf.mxu0  ;;  %4466 = vmatmul.mubr.bf16.gmra.mxu0 %v2724_v13  ;;  %v3996_v32 = vpop.f32.mrf.mxu1 }
 0x54d   : > { %v10530_v26 = vadd.f32 %v3953_v15, %v3665_v21  ;;  %4473 = vmatprep.mubr.bf16.mxu0 %v2734_v58  ;;  %v2733_v15 = vpack.c.bf16 %v2368_v47, %v2367_v56 }
 0x54e   : > { %v3955_v33 = vpop.f32.mrf.mxu0  ;;  %v3997_v44 = vpop.f32.mrf.mxu1 }
 0x54f   : > { %14685 = vst [vmem:[#allocation17_spill] sm:$0xff] %v10530_v26  ;;  %v3998_v13 = vadd.f32 %v3997_v44, %v10304_v8  ;;  %v2743_v33 = vpack.c.bf16 %v2434_v48, %v2433_v63  ;;  %v2369_v8 = vld [vmem:[#allocation2 + $0x2b8] sm:$0xff]  ;;  %v2370_v44 = vld [vmem:[#allocation2 + $0x2c0] sm:$0xff] }
 0x550   : > { %v3956_v62 = vpop.f32.mrf.mxu0  ;;  %v3999_v21 = vpop.f32.mrf.mxu1  ;;  %v2436_v63 = vld [vmem:[#allocation2 + $0x2d9] sm:$0xff] }
 0x551   : > { %v10535_v43 = vadd.f32 %v3956_v62, %v3668_v53  ;;  %v2742_v21 = vpack.c.bf16 %v2370_v44, %v2369_v8 }
 0x552   : > { %v3958_v5 = vpop.f32.mrf.mxu0  ;;  %v4002_v32 = vpop.f32.mrf.mxu1  ;;  %4193 = vmatmul.mubr.bf16.gmra.mxu1 %v2734_v58 }
 0x553   : > { %v4003_v40 = vadd.f32 %v4002_v32, %v10307_v18  ;;  %4200 = vmatprep.mubr.bf16.mxu1 %v10538_v1  ;;  %v2308_v5 = vld [vmem:[#allocation2 + $0x2d2] sm:$0xff]  ;;  %v2752_v32 = vpack.c.bf16 %v2436_v63, %v2435_v12 }
 0x554   : > { %v4283_v11 = vpop.f32.mrf.mxu0  ;;  %4474 = vmatmul.mubr.bf16.gmra.mxu0 %v2733_v15  ;;  %v4004_v53 = vpop.f32.mrf.mxu1  ;;  %v10547_v15 = vpack.c.bf16 %v2309_v10, %v2308_v5  ;;  %v2311_v5 = vld [vmem:[#allocation2 + $0x2f2] sm:$0xff]  ;;  %v2437_v10 = vld [vmem:[#allocation2 + $0x2e9] sm:$0xff] }
 0x555   : > { %v10541_v26 = vadd.f32 %v4283_v11, %v3995_v49  ;;  %4481 = vmatprep.mubr.bf16.mxu0 %v2743_v33  ;;  %v2438_v12 = vld [vmem:[#allocation2 + $0x2f1] sm:$0xff] }
 0x556   : > { %v4285_v62 = vpop.f32.mrf.mxu0  ;;  %v4005_v56 = vpop.f32.mrf.mxu1 }
 0x557   : > { %14686 = vst [vmem:[#allocation18_spill] sm:$0xff] %v10541_v26  ;;  %v4006_v58 = vadd.f32 %v4005_v56, %v10310_v9  ;;  %v2371_v56 = vld [vmem:[#allocation2 + $0x2d0] sm:$0xff] }
 0x558   : > { %v4286_v47 = vpop.f32.mrf.mxu0  ;;  %v4007_v18 = vpop.f32.mrf.mxu1 }
 0x559   : > { %v10545_v48 = vadd.f32 %v4286_v47, %v3998_v13  ;;  %v2372_v47 = vld [vmem:[#allocation2 + $0x2d8] sm:$0xff]  ;;  %v2310_v18 = vld [vmem:[#allocation2 + $0x2ea] sm:$0xff] }
 0x55a   : > { %v4288_v49 = vpop.f32.mrf.mxu0  ;;  %v4010_v11 = vpop.f32.mrf.mxu1  ;;  %4201 = vmatmul.mubr.bf16.gmra.mxu1 %v2743_v33 }
 0x55b   : > { %14687 = vst [vmem:[#allocation19_spill] sm:$0xff] %v10545_v48  ;;  %v4011_v62 = vadd.f32 %v4010_v11, %v10313_v52  ;;  %4208 = vmatprep.mubr.bf16.mxu1 %v10547_v15  ;;  %v2751_v49 = vpack.c.bf16 %v2372_v47, %v2371_v56  ;;  %v10559_v11 = vpack.c.bf16 %v2311_v5, %v2310_v18  ;;  %v2373_v47 = vld [vmem:[#allocation2 + $0x2e8] sm:$0xff]  ;;  %v2374_v18 = vld [vmem:[#allocation2 + $0x2f0] sm:$0xff] }
 0x55c   : > { %v4291_v53 = vpop.f32.mrf.mxu0  ;;  %4482 = vmatmul.mubr.bf16.gmra.mxu0 %v2742_v21  ;;  %v4012_v9 = vpop.f32.mrf.mxu1  ;;  %v4844_v21 = vld [vmem:[%s14122_s5 + $0x78] sm:$0xff] }
 0x55d   : > { %v10550_v26 = vadd.f32 %v4291_v53, %v4003_v40  ;;  %4489 = vmatprep.mubr.bf16.mxu0 %v2752_v32  ;;  %v2761_v53 = vpack.c.bf16 %v2438_v12, %v2437_v10  ;;  %7510 = vmatpush3.msra.mxu0 %v4844_v21  ;;  %v2313_v10 = vld [vmem:[#allocation2 + $0x30a] sm:$0xff] }
 0x55e   : > { %v4293_v13 = vpop.f32.mrf.mxu0  ;;  %v4013_v8 = vpop.f32.mrf.mxu1  ;;  %7511 = vmatprep.subr.mxu0 %v10445_v29  ;;  %v2440_v12 = vld [vmem:[#allocation2 + $0x309] sm:$0xff] }
 0x55f   : > { %v4014_v33 = vadd.f32 %v4013_v8, %v10316_v42  ;;  %v2312_v8 = vld [vmem:[#allocation2 + $0x302] sm:$0xff] }
 0x560   : > { %v4294_v44 = vpop.f32.mrf.mxu0  ;;  %v4015_v52 = vpop.f32.mrf.mxu1  ;;  %v10569_v21 = vpack.c.bf16 %v2313_v10, %v2312_v8  ;;  %v2315_v8 = vld [vmem:[#allocation2 + $0x322] sm:$0xff]  ;;  %v2441_v10 = vld [vmem:[#allocation2 + $0x319] sm:$0xff] }
 0x561   : > { %v10554_v63 = vadd.f32 %v4294_v44, %v4006_v58 }
 0x562   : > { %v4296_v40 = vpop.f32.mrf.mxu0  ;;  %v4018_v9 = vpop.f32.mrf.mxu1  ;;  %4209 = vmatmul.mubr.bf16.gmra.mxu1 %v2752_v32  ;;  %v2439_v32 = vld [vmem:[#allocation2 + $0x301] sm:$0xff] }
 0x563   : > { %v4019_v48 = vadd.f32 %v4018_v9, %v10319_v31  ;;  %4216 = vmatprep.mubr.bf16.mxu1 %v10559_v11  ;;  %v2770_v9 = vpack.c.bf16 %v2440_v12, %v2439_v32  ;;  %v2442_v32 = vld [vmem:[#allocation2 + $0x321] sm:$0xff] }
 0x564   : > { %v4299_v13 = vpop.f32.mrf.mxu0  ;;  %4490 = vmatmul.mubr.bf16.gmra.mxu0 %v2751_v49  ;;  %v4020_v58 = vpop.f32.mrf.mxu1  ;;  %v2760_v49 = vpack.c.bf16 %v2374_v18, %v2373_v47 }
 0x565   : > { %v10562_v42 = vadd.f32 %v4299_v13, %v4011_v62  ;;  %4497 = vmatprep.mubr.bf16.mxu0 %v2761_v53 }
 0x566   : > { %v4301_v56 = vpop.f32.mrf.mxu0  ;;  %v4021_v44 = vpop.f32.mrf.mxu1 }
 0x567   : > { %14688 = vst [vmem:[#allocation20_spill] sm:$0xff] %v10562_v42  ;;  %v4022_v52 = vadd.f32 %v4021_v44, %v10322_v41  ;;  %v2375_v44 = vld [vmem:[#allocation2 + $0x300] sm:$0xff] }
 0x568   : > { %v4302_v5 = vpop.f32.mrf.mxu0  ;;  %v4023_v62 = vpop.f32.mrf.mxu1 }
 0x569   : > { %v10567_v31 = vadd.f32 %v4302_v5, %v4014_v33  ;;  %v2376_v5 = vld [vmem:[#allocation2 + $0x308] sm:$0xff]  ;;  %v2314_v62 = vld [vmem:[#allocation2 + $0x31a] sm:$0xff] }
 0x56a   : > { %v4304_v40 = vpop.f32.mrf.mxu0  ;;  %v4026_v13 = vpop.f32.mrf.mxu1  ;;  %4217 = vmatmul.mubr.bf16.gmra.mxu1 %v2761_v53 }
 0x56b   : > { %14689 = vst [vmem:[#allocation22_spill] sm:$0xff] %v10567_v31  ;;  %v4027_v56 = vadd.f32 %v4026_v13, %v10325_v50  ;;  %4224 = vmatprep.mubr.bf16.mxu1 %v10569_v21  ;;  %v2769_v40 = vpack.c.bf16 %v2376_v5, %v2375_v44  ;;  %v10581_v13 = vpack.c.bf16 %v2315_v8, %v2314_v62  ;;  %v2377_v5 = vld [vmem:[#allocation2 + $0x318] sm:$0xff]  ;;  %v2378_v62 = vld [vmem:[#allocation2 + $0x320] sm:$0xff] }
 0x56c   : > { %v4307_v58 = vpop.f32.mrf.mxu0  ;;  %4498 = vmatmul.mubr.bf16.gmra.mxu0 %v2760_v49  ;;  %v4028_v41 = vpop.f32.mrf.mxu1  ;;  %v4843_v49 = vld [vmem:[%s14122_s5 + $0x70] sm:$0xff] }
 0x56d   : > { %v10572_v42 = vadd.f32 %v4307_v58, %v4019_v48  ;;  %4505 = vmatprep.mubr.bf16.mxu0 %v2770_v9  ;;  %v2779_v58 = vpack.c.bf16 %v2442_v32, %v2441_v10  ;;  %7512 = vmatpush3.msra.mxu0 %v4843_v49  ;;  %v2317_v10 = vld [vmem:[#allocation2 + $0x33a] sm:$0xff] }
 0x56e   : > { %v4309_v33 = vpop.f32.mrf.mxu0  ;;  %v4029_v47 = vpop.f32.mrf.mxu1  ;;  %7513 = vmatprep.subr.mxu0 %v10445_v29  ;;  %v2444_v32 = vld [vmem:[#allocation2 + $0x339] sm:$0xff] }
 0x56f   : > { %v4030_v53 = vadd.f32 %v4029_v47, %v10328_v59  ;;  %v2316_v47 = vld [vmem:[#allocation2 + $0x332] sm:$0xff] }
 0x570   : > { %v4310_v18 = vpop.f32.mrf.mxu0  ;;  %v4031_v50 = vpop.f32.mrf.mxu1  ;;  %v10591_v49 = vpack.c.bf16 %v2317_v10, %v2316_v47  ;;  %v2447_v10 = vld [vmem:[#allocation2 + $0x32] sm:$0xff] }
 0x571   : > { %v10576_v12 = vadd.f32 %v4310_v18, %v4022_v52 }
 0x572   : > { %v4312_v48 = vpop.f32.mrf.mxu0  ;;  %v4034_v41 = vpop.f32.mrf.mxu1  ;;  %4225 = vmatmul.mubr.bf16.gmra.mxu1 %v2770_v9  ;;  %v2443_v9 = vld [vmem:[#allocation2 + $0x331] sm:$0xff] }
 0x573   : > { %v4035_v31 = vadd.f32 %v4034_v41, %v10331_v46  ;;  %4232 = vmatprep.mubr.bf16.mxu1 %v10581_v13  ;;  %v2788_v41 = vpack.c.bf16 %v2444_v32, %v2443_v9  ;;  %v2448_v9 = vld [vmem:[#allocation2 + $0x3a] sm:$0xff] }
 0x574   : > { %v4315_v33 = vpop.f32.mrf.mxu0  ;;  %4506 = vmatmul.mubr.bf16.gmra.mxu0 %v2769_v40  ;;  %v4036_v52 = vpop.f32.mrf.mxu1  ;;  %v2778_v40 = vpack.c.bf16 %v2378_v62, %v2377_v5  ;;  %v2380_v5 = vld [vmem:[#allocation2 + $0x338] sm:$0xff] }
 0x575   : > { %v10584_v59 = vadd.f32 %v4315_v33, %v4027_v56  ;;  %4513 = vmatprep.mubr.bf16.mxu0 %v2779_v58 }
 0x576   : > { %v4317_v44 = vpop.f32.mrf.mxu0  ;;  %v4037_v18 = vpop.f32.mrf.mxu1 }
 0x577   : > { %14690 = vst [vmem:[#allocation23_spill] sm:$0xff] %v10584_v59  ;;  %v4038_v50 = vadd.f32 %v4037_v18, %v10334_v0  ;;  %v2445_v18 = vld [vmem:[#allocation2 + $0x349] sm:$0xff] }
 0x578   : > { %v4318_v8 = vpop.f32.mrf.mxu0  ;;  %v4039_v56 = vpop.f32.mrf.mxu1 }
 0x579   : > { %v10589_v46 = vadd.f32 %v4318_v8, %v4030_v53  ;;  %v2446_v8 = vld [vmem:[#allocation2 + $0x351] sm:$0xff] }
 0x57a   : > { %v4320_v48 = vpop.f32.mrf.mxu0  ;;  %v4042_v33 = vpop.f32.mrf.mxu1  ;;  %4233 = vmatmul.mubr.bf16.gmra.mxu1 %v2779_v58  ;;  %v2379_v56 = vld [vmem:[#allocation2 + $0x330] sm:$0xff] }
 0x57b   : > { %14691 = vst [vmem:[#allocation31_spill] sm:$0xff] %v10589_v46  ;;  %v4043_v44 = vadd.f32 %v4042_v33, %v10337_v37  ;;  %4240 = vmatprep.mubr.bf16.mxu1 %v10591_v49  ;;  %v2797_v37 = vpack.c.bf16 %v2446_v8, %v2445_v18  ;;  %v4842_v33 = vld [vmem:[%s14122_s5 + $0x68] sm:$0xff]  ;;  %v2450_v8 = vld [vmem:[#allocation2 + $0x52] sm:$0xff] }
 0x57c   : > { %v4323_v52 = vpop.f32.mrf.mxu0  ;;  %4514 = vmatmul.mubr.bf16.gmra.mxu0 %v2778_v40  ;;  %v4044_v0 = vpop.f32.mrf.mxu1  ;;  %v2787_v40 = vpack.c.bf16 %v2380_v5, %v2379_v56  ;;  %v2449_v18 = vld [vmem:[#allocation2 + $0x4a] sm:$0xff] }
 0x57d   : > { %v10594_v59 = vadd.f32 %v4323_v52, %v4035_v31  ;;  %4521 = vmatprep.mubr.bf16.mxu0 %v2788_v41  ;;  %v2519_v52 = vpack.c.bf16 %v2448_v9, %v2447_v10  ;;  %7514 = vmatpush3.msra.mxu0 %v4842_v33 }
 0x57e   : > { %v4325_v53 = vpop.f32.mrf.mxu0  ;;  %v4045_v62 = vpop.f32.mrf.mxu1  ;;  %7515 = vmatprep.subr.mxu0 %v10445_v29 }
 0x57f   : > { %14692 = vst [vmem:[#allocation36_spill] sm:$0xff] %v10594_v59  ;;  %v4046_v58 = vadd.f32 %v4045_v62, %v10340_v36  ;;  %v2451_v62 = vld [vmem:[#allocation2 + $0x62] sm:$0xff] }
 0x580   : > { %v4326_v47 = vpop.f32.mrf.mxu0  ;;  %v4047_v31 = vpop.f32.mrf.mxu1 }
 0x581   : > { %v10598_v32 = vadd.f32 %v4326_v47, %v4038_v50  ;;  %v2452_v47 = vld [vmem:[#allocation2 + $0x6a] sm:$0xff] }
 0x582   : > { %v4328_v48 = vpop.f32.mrf.mxu0  ;;  %v4050_v0 = vpop.f32.mrf.mxu1  ;;  %4241 = vmatmul.mubr.bf16.gmra.mxu1 %v2788_v41  ;;  %v2537_v31 = vpack.c.bf16 %v2452_v47, %v2451_v62 }
 0x583   : > { %v4051_v46 = vadd.f32 %v4050_v0, %v10346_v7  ;;  %7445 = vmatprep.mubr.bf16.mxu1 %v2519_v52  ;;  %v2453_v52 = vld [vmem:[#allocation2 + $0x7a] sm:$0xff]  ;;  %v2454_v0 = vld [vmem:[#allocation2 + $0x82] sm:$0xff] }
 0x584   : > { %v4331_v53 = vpop.f32.mrf.mxu0  ;;  %4522 = vmatmul.mubr.bf16.gmra.mxu0 %v2787_v40  ;;  %v4052_v36 = vpop.f32.mrf.mxu1 }
 0x585   : > { %v10604_v59 = vadd.f32 %v4331_v53, %v4043_v44  ;;  %4529 = vmatprep.mubr.bf16.mxu0 %v2797_v37  ;;  %v2528_v44 = vpack.c.bf16 %v2450_v8, %v2449_v18  ;;  %v2456_v18 = vld [vmem:[#allocation2 + $0x9a] sm:$0xff] }
 0x586   : > { %v4333_v50 = vpop.f32.mrf.mxu0  ;;  %v4053_v56 = vpop.f32.mrf.mxu1 }
 0x587   : > { %v4054_v41 = vadd.f32 %v4053_v56, %v10353_v25  ;;  %v2455_v50 = vld [vmem:[#allocation2 + $0x92] sm:$0xff] }
 0x588   : > { %v4334_v5 = vpop.f32.mrf.mxu0  ;;  %v4055_v9 = vpop.f32.mrf.mxu1 }
 0x589   : > { %v10608_v10 = vadd.f32 %v4334_v5, %v4046_v58  ;;  %v4841_v5 = vld [vmem:[%s14122_s5 + $0x60] sm:$0xff] }
 0x58a   : > { %v4336_v7 = vpop.f32.mrf.mxu0  ;;  %v4058_v48 = vpop.f32.mrf.mxu1  ;;  %7446 = vmatmul.mubr.bf16.vlgmr.msra.gmra.mxu1 %v2528_v44  ;;  %7516 = vmatpush3.msra.mxu0 %v4841_v5  ;;  %v10622_v9 = vld [vmem:[#allocation2] sm:$0xff] }
 0x58b   : > { %v4059_v40 = vadd.f32 %v4058_v48, %v10359_v2  ;;  %7449 = vmatprep.mubr.bf16.mxu1 %v2537_v31  ;;  %7517 = vmatprep.subr.mxu0 %v10622_v9  ;;  %v2457_v31 = vld [vmem:[#allocation2 + $0xaa] sm:$0xff]  ;;  %v2458_v48 = vld [vmem:[#allocation2 + $0xb2] sm:$0xff] }
 0x58c   : > { %v4339_v37 = vpop.f32.mrf.mxu0  ;;  %4530 = vmatmul.mubr.bf16.gmra.mxu0 %v10468_v55  ;;  %v4060_v25 = vpop.f32.mrf.mxu1 }
 0x58d   : > { %v10612_v33 = vadd.f32 %v4339_v37, %v4051_v46  ;;  %7541 = vmatprep.mubr.msk.f32.mxu0 %vm7871_vm0, %v10445_v29  ;;  %v2546_v46 = vpack.c.bf16 %v2454_v0, %v2453_v52  ;;  %v2555_v29 = vpack.c.bf16 %v2456_v18, %v2455_v50  ;;  %v2460_v52 = vld [vmem:[#allocation2 + $0xca] sm:$0xff]  ;;  %v2564_v18 = vpack.c.bf16 %v2458_v48, %v2457_v31 }
 0x58e   : > { %v4341_v58 = vpop.f32.mrf.mxu0  ;;  %v4061_v53 = vpop.f32.mrf.mxu1 }
 0x58f   : > { %v4062_v8 = vadd.f32 %v4061_v53, %v10365_v54  ;;  %v2459_v58 = vld [vmem:[#allocation2 + $0xc2] sm:$0xff] }
 0x590   : > { %v4342_v36 = vpop.f32.mrf.mxu0  ;;  %v4063_v56 = vpop.f32.mrf.mxu1 }
 0x591   : > { %v10617_v55 = vadd.f32 %v4342_v36, %v4054_v41  ;;  %v2573_v56 = vpack.c.bf16 %v2460_v52, %v2459_v58 }
 0x592   : > { %v4344_v2 = vpop.f32.mrf.mxu0  ;;  %v4066_v62 = vpop.f32.mrf.mxu1  ;;  %7450 = vmatmul.mubr.bf16.gmra.mxu1 %v2546_v46 }
 0x593   : > { %v4067_v54 = vadd.f32 %v4066_v62, %v10368_v14  ;;  %7453 = vmatprep.mubr.bf16.mxu1 %v2555_v29  ;;  %v2461_v62 = vld [vmem:[#allocation2 + $0xda] sm:$0xff] }
 0x594   : > { %v4347_v47 = vpop.f32.mrf.mxu0  ;;  %v4068_v7 = vpop.f32.mrf.mxu1 }
 0x595   : > { %v10626_v41 = vadd.f32 %v4347_v47, %v4059_v40  ;;  %v2462_v47 = vld [vmem:[#allocation2 + $0xe2] sm:$0xff] }
 0x596   : > { %v4349_v44 = vpop.f32.mrf.mxu0  ;;  %v4069_v37 = vpop.f32.mrf.mxu1  ;;  %v2582_v58 = vpack.c.bf16 %v2462_v47, %v2461_v62  ;;  %v2468_v62 = vld [vmem:[#allocation2 + $0x12a] sm:$0xff] }
 0x597   : > { %v4070_v0 = vadd.f32 %v4069_v37, %v10371_v17  ;;  %v2464_v44 = vld [vmem:[#allocation2 + $0xfa] sm:$0xff] }
 0x598   : > { %v4350_v25 = vpop.f32.mrf.mxu0  ;;  %v4071_v36 = vpop.f32.mrf.mxu1 }
 0x599   : > { %v10629_v53 = vadd.f32 %v4350_v25, %v4062_v8  ;;  %v2463_v8 = vld [vmem:[#allocation2 + $0xf2] sm:$0xff] }
 0x59a   : > { %v4352_v50 = vpop.f32.mrf.mxu0  ;;  %v4074_v14 = vpop.f32.mrf.mxu1  ;;  %7454 = vmatmul.mubr.bf16.gmra.mxu1 %v2564_v18 }
 0x59b   : > { %v4075_v2 = vadd.f32 %v4074_v14, %v10374_v45  ;;  %7457 = vmatprep.mubr.bf16.mxu1 %v2573_v56  ;;  %v4840_v45 = vld [vmem:[%s14122_s5 + $0x58] sm:$0xff]  ;;  %v2465_v56 = vld [vmem:[#allocation2 + $0x10a] sm:$0xff] }
 0x59c   : > { %v4355_v40 = vpop.f32.mrf.mxu0  ;;  %v4076_v5 = vpop.f32.mrf.mxu1  ;;  %7518 = vmatpush3.msra.mxu0 %v4840_v45  ;;  %v2466_v14 = vld [vmem:[#allocation2 + $0x112] sm:$0xff] }
 0x59d   : > { %v10632_v46 = vadd.f32 %v4355_v40, %v4067_v54  ;;  %v2591_v54 = vpack.c.bf16 %v2464_v44, %v2463_v8  ;;  %7519 = vmatprep.subr.mxu0 %v10622_v9  ;;  %v2600_v44 = vpack.c.bf16 %v2466_v14, %v2465_v56 }
 0x59e   : > { %v4357_v29 = vpop.f32.mrf.mxu0  ;;  %v4077_v7 = vpop.f32.mrf.mxu1 }
 0x59f   : > { %v4078_v37 = vadd.f32 %v4077_v7, %v10377_v3  ;;  %v2467_v29 = vld [vmem:[#allocation2 + $0x122] sm:$0xff] }
 0x5a0   : > { %v4358_v17 = vpop.f32.mrf.mxu0  ;;  %v4079_v48 = vpop.f32.mrf.mxu1 }
 0x5a1   : > { %v10635_v31 = vadd.f32 %v4358_v17, %v4070_v0  ;;  %v2609_v48 = vpack.c.bf16 %v2468_v62, %v2467_v29 }
 0x5a2   : > { %v4360_v25 = vpop.f32.mrf.mxu0  ;;  %v4082_v52 = vpop.f32.mrf.mxu1  ;;  %7458 = vmatmul.mubr.bf16.gmra.mxu1 %v2582_v58 }
 0x5a3   : > { %v4083_v50 = vadd.f32 %v4082_v52, %v10383_v6  ;;  %7461 = vmatprep.mubr.bf16.mxu1 %v2591_v54  ;;  %v2469_v52 = vld [vmem:[#allocation2 + $0x13a] sm:$0xff] }
 0x5a4   : > { %v4363_v36 = vpop.f32.mrf.mxu0  ;;  %v4084_v3 = vpop.f32.mrf.mxu1 }
 0x5a5   : > { %v10642_v18 = vadd.f32 %v4363_v36, %v4075_v2  ;;  %v2470_v36 = vld [vmem:[#allocation2 + $0x142] sm:$0xff] }
 0x5a6   : > { %v4365_v0 = vpop.f32.mrf.mxu0  ;;  %v4085_v40 = vpop.f32.mrf.mxu1  ;;  %v2618_v29 = vpack.c.bf16 %v2470_v36, %v2469_v52  ;;  %v2476_v52 = vld [vmem:[#allocation2 + $0x18a] sm:$0xff] }
 0x5a7   : > { %v4086_v47 = vadd.f32 %v4085_v40, %v10386_v16  ;;  %v2472_v0 = vld [vmem:[#allocation2 + $0x15a] sm:$0xff] }
 0x5a8   : > { %v4366_v5 = vpop.f32.mrf.mxu0  ;;  %v4087_v17 = vpop.f32.mrf.mxu1 }
 0x5a9   : > { %v10645_v7 = vadd.f32 %v4366_v5, %v4078_v37  ;;  %v2471_v37 = vld [vmem:[#allocation2 + $0x152] sm:$0xff] }
 0x5aa   : > { %v4368_v8 = vpop.f32.mrf.mxu0  ;;  %v4090_v6 = vpop.f32.mrf.mxu1  ;;  %7462 = vmatmul.mubr.bf16.gmra.mxu1 %v2600_v44 }
 0x5ab   : > { %v4091_v25 = vadd.f32 %v4090_v6, %v10389_v24  ;;  %7465 = vmatprep.mubr.bf16.mxu1 %v2609_v48  ;;  %v4839_v24 = vld [vmem:[%s14122_s5 + $0x50] sm:$0xff] }
 0x5ac   : > { %v4371_v2 = vpop.f32.mrf.mxu0  ;;  %v4092_v45 = vpop.f32.mrf.mxu1  ;;  %7520 = vmatpush3.msra.mxu0 %v4839_v24  ;;  %v2473_v48 = vld [vmem:[#allocation2 + $0x16a] sm:$0xff]  ;;  %v2474_v6 = vld [vmem:[#allocation2 + $0x172] sm:$0xff]  ;;  %v2477_v24 = vld [vmem:[#allocation2 + $0x19a] sm:$0xff] }
 0x5ad   : > { %v10648_v58 = vadd.f32 %v4371_v2, %v4083_v50  ;;  %v2627_v50 = vpack.c.bf16 %v2472_v0, %v2471_v37  ;;  %7521 = vmatprep.subr.mxu0 %v10622_v9  ;;  %v2636_v0 = vpack.c.bf16 %v2474_v6, %v2473_v48 }
 0x5ae   : > { %v4373_v54 = vpop.f32.mrf.mxu0  ;;  %v4093_v3 = vpop.f32.mrf.mxu1 }
 0x5af   : > { %v4094_v40 = vadd.f32 %v4093_v3, %v10392_v28  ;;  %v2475_v54 = vld [vmem:[#allocation2 + $0x182] sm:$0xff] }
 0x5b0   : > { %v4374_v16 = vpop.f32.mrf.mxu0  ;;  %v4095_v14 = vpop.f32.mrf.mxu1 }
 0x5b1   : > { %v10651_v56 = vadd.f32 %v4374_v16, %v4086_v47  ;;  %v2645_v14 = vpack.c.bf16 %v2476_v52, %v2475_v54 }
 0x5b2   : > { %v4376_v5 = vpop.f32.mrf.mxu0  ;;  %v4098_v62 = vpop.f32.mrf.mxu1  ;;  %7466 = vmatmul.mubr.bf16.gmra.mxu1 %v2618_v29 }
 0x5b3   : > { %v4099_v8 = vadd.f32 %v4098_v62, %v10395_v23  ;;  %7469 = vmatprep.mubr.bf16.mxu1 %v2627_v50  ;;  %v2478_v50 = vld [vmem:[#allocation2 + $0x1a2] sm:$0xff] }
 0x5b4   : > { %v4379_v17 = vpop.f32.mrf.mxu0  ;;  %v4100_v28 = vpop.f32.mrf.mxu1 }
 0x5b5   : > { %v10658_v44 = vadd.f32 %v4379_v17, %v4091_v25 }
 0x5b6   : > { %v4381_v47 = vpop.f32.mrf.mxu0  ;;  %v4101_v2 = vpop.f32.mrf.mxu1 }
 0x5b7   : > { %v4102_v36 = vadd.f32 %v4101_v2, %v10398_v57  ;;  %v2479_v47 = vld [vmem:[#allocation2 + $0x1e2] sm:$0xff]  ;;  %v2480_v2 = vld [vmem:[#allocation2 + $0x1ea] sm:$0xff] }
 0x5b8   : > { %v4382_v45 = vpop.f32.mrf.mxu0  ;;  %v4103_v16 = vpop.f32.mrf.mxu1 }
 0x5b9   : > { %v10661_v3 = vadd.f32 %v4382_v45, %v4094_v40  ;;  %v2654_v40 = vpack.c.bf16 %v2478_v50, %v2477_v24  ;;  %v2483_v50 = vld [vmem:[#allocation2 + $0x212] sm:$0xff] }
 0x5ba   : > { %v4384_v37 = vpop.f32.mrf.mxu0  ;;  %v4106_v23 = vpop.f32.mrf.mxu1  ;;  %7470 = vmatmul.mubr.bf16.gmra.mxu1 %v2636_v0 }
 0x5bb   : > { %v4107_v5 = vadd.f32 %v4106_v23, %v10401_v22  ;;  %7473 = vmatprep.mubr.bf16.mxu1 %v2645_v14  ;;  %v4838_v22 = vld [vmem:[%s14122_s5 + $0x48] sm:$0xff]  ;;  %v2481_v14 = vld [vmem:[#allocation2 + $0x1fa] sm:$0xff] }
 0x5bc   : > { %v4387_v25 = vpop.f32.mrf.mxu0  ;;  %v4108_v62 = vpop.f32.mrf.mxu1  ;;  %7522 = vmatpush3.msra.mxu0 %v4838_v22  ;;  %v2482_v23 = vld [vmem:[#allocation2 + $0x202] sm:$0xff] }
 0x5bd   : > { %v10664_v29 = vadd.f32 %v4387_v25, %v4099_v8  ;;  %v2663_v8 = vpack.c.bf16 %v2480_v2, %v2479_v47  ;;  %7523 = vmatprep.subr.mxu0 %v10622_v9  ;;  %v2484_v62 = vld [vmem:[#allocation2 + $0x21a] sm:$0xff]  ;;  %v2672_v47 = vpack.c.bf16 %v2482_v23, %v2481_v14 }
 0x5be   : > { %v4389_v17 = vpop.f32.mrf.mxu0  ;;  %v4109_v28 = vpop.f32.mrf.mxu1  ;;  %v2681_v2 = vpack.c.bf16 %v2484_v62, %v2483_v50 }
 0x5bf   : > { %v4110_v48 = vadd.f32 %v4109_v28, %v10404_v20 }
 0x5c0   : > { %v4390_v57 = vpop.f32.mrf.mxu0  ;;  %v4111_v45 = vpop.f32.mrf.mxu1 }
 0x5c1   : > { %v10667_v6 = vadd.f32 %v4390_v57, %v4102_v36 }
 0x5c2   : > { %v4392_v54 = vpop.f32.mrf.mxu0  ;;  %v4114_v52 = vpop.f32.mrf.mxu1  ;;  %7474 = vmatmul.mubr.bf16.gmra.mxu1 %v2654_v40 }
 0x5c3   : > { %v4115_v37 = vadd.f32 %v4114_v52, %v10410_v60  ;;  %7477 = vmatprep.mubr.bf16.mxu1 %v2663_v8  ;;  %v2485_v52 = vld [vmem:[#allocation2 + $0x22a] sm:$0xff] }
 0x5c4   : > { %v4395_v16 = vpop.f32.mrf.mxu0  ;;  %v4116_v20 = vpop.f32.mrf.mxu1 }
 0x5c5   : > { %v10674_v0 = vadd.f32 %v4395_v16, %v4107_v5  ;;  %v2486_v16 = vld [vmem:[#allocation2 + $0x232] sm:$0xff] }
 0x5c6   : > { %v4397_v36 = vpop.f32.mrf.mxu0  ;;  %v4117_v25 = vpop.f32.mrf.mxu1  ;;  %v2690_v50 = vpack.c.bf16 %v2486_v16, %v2485_v52  ;;  %v4837_v52 = vld [vmem:[%s14122_s5 + $0x40] sm:$0xff] }
 0x5c7   : > { %v4118_v17 = vadd.f32 %v4117_v25, %v10413_v51  ;;  %v2488_v36 = vld [vmem:[#allocation2 + $0x24a] sm:$0xff]  ;;  %7524 = vmatpush3.msra.mxu0 %v4837_v52 }
 0x5c8   : > { %v4398_v24 = vpop.f32.mrf.mxu0  ;;  %v4119_v57 = vpop.f32.mrf.mxu1  ;;  %7525 = vmatprep.subr.mxu0 %v10622_v9 }
 0x5c9   : > { %v10677_v28 = vadd.f32 %v4398_v24, %v4110_v48  ;;  %v2487_v48 = vld [vmem:[#allocation2 + $0x242] sm:$0xff] }
 0x5ca   : > { %v4400_v40 = vpop.f32.mrf.mxu0  ;;  %v4122_v60 = vpop.f32.mrf.mxu1  ;;  %7478 = vmatmul.mubr.bf16.gmra.mxu1 %v2672_v47  ;;  %v2699_v62 = vpack.c.bf16 %v2488_v36, %v2487_v48 }
 0x5cb   : > { %v4123_v45 = vadd.f32 %v4122_v60, %v10416_v61  ;;  %7481 = vmatprep.mubr.bf16.mxu1 %v2681_v2  ;;  %v2489_v60 = vld [vmem:[#allocation2 + $0x25a] sm:$0xff] }
 0x5cc   : > { %v4403_v5 = vpop.f32.mrf.mxu0  ;;  %v4124_v22 = vpop.f32.mrf.mxu1 }
 0x5cd   : > { %v10680_v54 = vadd.f32 %v4403_v5, %v4115_v37  ;;  %v2490_v5 = vld [vmem:[#allocation2 + $0x262] sm:$0xff] }
 0x5ce   : > { %v4405_v8 = vpop.f32.mrf.mxu0  ;;  %v4125_v20 = vpop.f32.mrf.mxu1 }
 0x5cf   : > { %v4126_v25 = vadd.f32 %v4125_v20, %v10419_v4 }
 0x5d0   : > { %v4406_v51 = vpop.f32.mrf.mxu0  ;;  %v4127_v23 = vpop.f32.mrf.mxu1 }
 0x5d1   : > { %v10683_v14 = vadd.f32 %v4406_v51, %v4118_v17 }
 0x5d2   : > { %v4408_v24 = vpop.f32.mrf.mxu0  ;;  %v4130_v61 = vpop.f32.mrf.mxu1  ;;  %7482 = vmatmul.mubr.bf16.gmra.mxu1 %v2690_v50 }
 0x5d3   : > { %v4131_v57 = vadd.f32 %v4130_v61, %v10422_v38  ;;  %7485 = vmatprep.mubr.bf16.mxu1 %v2699_v62  ;;  %v2708_v38 = vpack.c.bf16 %v2490_v5, %v2489_v60  ;;  %v14693_v60 = vld [vmem:[#allocation35_spill] sm:$0xff]  ;;  %v14694_v5 = vld [vmem:[#allocation24_spill] sm:$0xff] }
 0x5d4   : > { %v4411_v37 = vpop.f32.mrf.mxu0  ;;  %v4132_v47 = vpop.f32.mrf.mxu1 }
 0x5d5   : > { %v10686_v40 = vadd.f32 %v4411_v37, %v4123_v45 }
 0x5d6   : > { %v4413_v2 = vpop.f32.mrf.mxu0  ;;  %v4133_v22 = vpop.f32.mrf.mxu1 }
 0x5d7   : > { %v4134_v17 = vadd.f32 %v4133_v22, %v10425_v35 }
 0x5d8   : > { %v4414_v4 = vpop.f32.mrf.mxu0  ;;  %v4135_v16 = vpop.f32.mrf.mxu1 }
 0x5d9   : > { %v10689_v8 = vadd.f32 %v4414_v4, %v4126_v25  ;;  %v14695_v16 = vld [vmem:[#allocation25_spill] sm:$0xff] }
 0x5da   : > { %v4416_v20 = vpop.f32.mrf.mxu0  ;;  %v4138_v45 = vpop.f32.mrf.mxu1  ;;  %7486 = vmatmul.mubr.bf16.gmra.mxu1 %v2708_v38 }
 0x5db   : > { %v4139_v48 = vadd.f32 %v4138_v45, %v10428_v27  ;;  %7489 = vmatprep.mubr.bf16.mxu1 %v10510_v39  ;;  %v4836_v20 = vld [vmem:[%s14122_s5 + $0x38] sm:$0xff] }
 0x5dc   : > { %v4419_v51 = vpop.f32.mrf.mxu0  ;;  %v4140_v35 = vpop.f32.mrf.mxu1  ;;  %7526 = vmatpush3.msra.mxu0 %v4836_v20 }
 0x5dd   : > { %v10696_v36 = vadd.f32 %v4419_v51, %v4131_v57  ;;  %7527 = vmatprep.subr.mxu0 %v10622_v9 }
 0x5de   : > { %v4421_v25 = vpop.f32.mrf.mxu0  ;;  %v4141_v23 = vpop.f32.mrf.mxu1 }
 0x5df   : > { %v4142_v50 = vadd.f32 %v4141_v23, %v10431_v19 }
 0x5e0   : > { %v4422_v24 = vpop.f32.mrf.mxu0  ;;  %v4143_v61 = vpop.f32.mrf.mxu1 }
 0x5e1   : > { %v10700_v62 = vadd.f32 %v4422_v24, %v4134_v17 }
 0x5e2   : > { %v4424_v37 = vpop.f32.mrf.mxu0  ;;  %v4146_v47 = vpop.f32.mrf.mxu1  ;;  %7490 = vmatmul.mubr.bf16.gmra.mxu1 %v14693_v60 }
 0x5e3   : > { %v4147_v27 = vadd.f32 %v4146_v47, %v14694_v5  ;;  %7493 = vmatprep.mubr.bf16.mxu1 %v10528_v34  ;;  %v14696_v34 = vld [vmem:[#allocation27_spill] sm:$0xff]  ;;  %v14697_v37 = vld [vmem:[#allocation28_spill] sm:$0xff] }
 0x5e4   : > { %v4427_v2 = vpop.f32.mrf.mxu0  ;;  %v4148_v39 = vpop.f32.mrf.mxu1 }
 0x5e5   : > { %v10704_v57 = vadd.f32 %v4427_v2, %v4139_v48 }
 0x5e6   : > { %v4429_v22 = vpop.f32.mrf.mxu0  ;;  %v4149_v4 = vpop.f32.mrf.mxu1 }
 0x5e7   : > { %v4150_v19 = vadd.f32 %v4149_v4, %v14695_v16 }
 0x5e8   : > { %v4430_v52 = vpop.f32.mrf.mxu0  ;;  %v4151_v38 = vpop.f32.mrf.mxu1 }
 0x5e9   : > { %v10708_v17 = vadd.f32 %v4430_v52, %v4142_v50  ;;  %v14699_v38 = vld [vmem:[#allocation30_spill] sm:$0xff] }
 0x5ea   : > { %v4432_v45 = vpop.f32.mrf.mxu0  ;;  %v4154_v51 = vpop.f32.mrf.mxu1  ;;  %7494 = vmatmul.mubr.bf16.gmra.mxu1 %v10538_v1  ;;  %v14698_v1 = vld [vmem:[#allocation29_spill] sm:$0xff] }
 0x5eb   : > { %v4155_v35 = vadd.f32 %v4154_v51, %v14696_v34  ;;  %7497 = vmatprep.mubr.bf16.mxu1 %v10547_v15  ;;  %v4835_v51 = vld [vmem:[%s14122_s5 + $0x30] sm:$0xff] }
 0x5ec   : > { %v4435_v48 = vpop.f32.mrf.mxu0  ;;  %v4156_v23 = vpop.f32.mrf.mxu1  ;;  %7528 = vmatpush3.msra.mxu0 %v4835_v51 }
 0x5ed   : > { %v10716_v25 = vadd.f32 %v4435_v48, %v4147_v27  ;;  %7529 = vmatprep.subr.mxu0 %v10622_v9 }
 0x5ee   : > { %v4437_v24 = vpop.f32.mrf.mxu0  ;;  %v4157_v50 = vpop.f32.mrf.mxu1 }
 0x5ef   : > { %v4158_v47 = vadd.f32 %v4157_v50, %v14697_v37  ;;  %v2509_v50 = vld [vmem:[#allocation2 + $0x34a] sm:$0xff] }
 0x5f0   : > { %v4438_v61 = vpop.f32.mrf.mxu0  ;;  %v4159_v60 = vpop.f32.mrf.mxu1 }
 0x5f1   : > { %v10720_v2 = vadd.f32 %v4438_v61, %v4150_v19  ;;  %v2510_v61 = vld [vmem:[#allocation2 + $0x352] sm:$0xff] }
 0x5f2   : > { %v4440_v5 = vpop.f32.mrf.mxu0  ;;  %v4162_v39 = vpop.f32.mrf.mxu1  ;;  %7498 = vmatmul.mubr.bf16.gmra.mxu1 %v10559_v11 }
 0x5f3   : > { %v4163_v4 = vadd.f32 %v4162_v39, %v14698_v1  ;;  %7501 = vmatprep.mubr.bf16.mxu1 %v10569_v21  ;;  %v14700_v21 = vld [vmem:[#allocation12_spill] sm:$0xff]  ;;  %v2798_v39 = vpack.c.bf16 %v2510_v61, %v2509_v50 }
 0x5f4   : > { %v4443_v22 = vpop.f32.mrf.mxu0  ;;  %v4164_v15 = vpop.f32.mrf.mxu1  ;;  %v4834_v50 = vld [vmem:[%s14122_s5 + $0x28] sm:$0xff] }
 0x5f5   : > { %v10724_v27 = vadd.f32 %v4443_v22, %v4155_v35  ;;  %v14701_v22 = vld [vmem:[#allocation13_spill] sm:$0xff]  ;;  %7530 = vmatpush3.msra.mxu0 %v4834_v50 }
 0x5f6   : > { %v4445_v52 = vpop.f32.mrf.mxu0  ;;  %v4165_v16 = vpop.f32.mrf.mxu1  ;;  %7531 = vmatprep.subr.mxu0 %v10622_v9 }
 0x5f7   : > { %v4166_v45 = vadd.f32 %v4165_v16, %v14699_v38 }
 0x5f8   : > { %v4446_v20 = vpop.f32.mrf.mxu0  ;;  %v4167_v48 = vpop.f32.mrf.mxu1 }
 0x5f9   : > { %v10728_v19 = vadd.f32 %v4446_v20, %v4158_v47 }
 0x5fa   : > { %v4448_v11 = vpop.f32.mrf.mxu0  ;;  %v4170_v34 = vpop.f32.mrf.mxu1  ;;  %7502 = vmatmul.mubr.bf16.gmra.mxu1 %v10581_v13 }
 0x5fb   : > { %v4171_v23 = vadd.f32 %v4170_v34, %v14700_v21  ;;  %7505 = vmatprep.mubr.bf16.mxu1 %v10591_v49 }
 0x5fc   : > { %v4451_v35 = vpop.f32.mrf.mxu0  ;;  %v4172_v37 = vpop.f32.mrf.mxu1 }
 0x5fd   : > { %v10736_v24 = vadd.f32 %v4451_v35, %v4163_v4  ;;  %v14702_v4 = vld [vmem:[#allocation14_spill] sm:$0xff]  ;;  %v14703_v35 = vld [vmem:[#allocation15_spill] sm:$0xff] }
 0x5fe   : > { %v4453_v47 = vpop.f32.mrf.mxu0  ;;  %v4173_v60 = vpop.f32.mrf.mxu1 }
 0x5ff   : > { %v4174_v1 = vadd.f32 %v4173_v60, %v14701_v22  ;;  %v14704_v60 = vld [vmem:[#allocation16_spill] sm:$0xff] }
 0x600   : > { %v4454_v5 = vpop.f32.mrf.mxu0  ;;  %v4175_v52 = vpop.f32.mrf.mxu1 }
 0x601   : > { %v10740_v15 = vadd.f32 %v4454_v5, %v4166_v45 }
 0x602   : > { %v4456_v16 = vpop.f32.mrf.mxu0  ;;  %v4178_v13 = vpop.f32.mrf.mxu1  ;;  %7506 = vmatmul.mubr.bf16.gmra.mxu1 %v2798_v39 }
 0x603   : > { %v4179_v38 = vadd.f32 %v4178_v13, %v14702_v4  ;;  %7661 = vmatprep.mubr.msk.f32.mxu1 %vm7871_vm0, %v10622_v9  ;;  %v14706_v13 = vld [vmem:[#allocation26_spill] sm:$0xff] }
 0x604   : > { %v4459_v20 = vpop.f32.mrf.mxu0  ;;  %v4180_v49 = vpop.f32.mrf.mxu1 }
 0x605   : > { %v10743_v51 = vadd.f32 %v4459_v20, %v4171_v23 }
 0x606   : > { %v4461_v48 = vpop.f32.mrf.mxu0  ;;  %v4181_v11 = vpop.f32.mrf.mxu1 }
 0x607   : > { %v4182_v21 = vadd.f32 %v4181_v11, %v14703_v35  ;;  %v14708_v35 = vld [vmem:[#allocation7_spill] sm:$0xff] }
 0x608   : > { %v4462_v34 = vpop.f32.mrf.mxu0  ;;  %v4183_v61 = vpop.f32.mrf.mxu1 }
 0x609   : > { %v10748_v45 = vadd.f32 %v4462_v34, %v4174_v1 }
 0x60a   : > { %v4464_v37 = vpop.f32.mrf.mxu0  ;;  %v4186_v23 = vpop.f32.mrf.mxu1 }
 0x60b   : > { %v4187_v5 = vadd.f32 %v4186_v23, %v14704_v60  ;;  %v14710_v60 = vld [vmem:[#allocation3_spill] sm:$0xff] }
 0x60c   : > { %v4467_v47 = vpop.f32.mrf.mxu0  ;;  %v4188_v22 = vpop.f32.mrf.mxu1 }
 0x60d   : > { %v10755_v39 = vadd.f32 %v4467_v47, %v4179_v38 }
 0x60e   : > { %v4469_v52 = vpop.f32.mrf.mxu0  ;;  %v4189_v16 = vpop.f32.mrf.mxu1 }
 0x60f   : > { %14705 = vst [vmem:[#allocation35_spill] sm:$0xff] %v10755_v39  ;;  %v4190_v20 = vadd.f32 %v4189_v16, %v14706_v13  ;;  %v14712_v13 = vld [vmem:[#allocation5_spill] sm:$0xff] }
 0x610   : > { %v4470_v1 = vpop.f32.mrf.mxu0  ;;  %v4191_v49 = vpop.f32.mrf.mxu1 }
 0x611   : > { %v10758_v4 = vadd.f32 %v4470_v1, %v4182_v21 }
 0x612   : > { %v4472_v48 = vpop.f32.mrf.mxu0  ;;  %v4194_v11 = vpop.f32.mrf.mxu1 }
 0x613   : > { %14707 = vst [vmem:[#allocation24_spill] sm:$0xff] %v10758_v4  ;;  %v4195_v50 = vadd.f32 %v4194_v11, %v14708_v35 }
 0x614   : > { %v4475_v34 = vpop.f32.mrf.mxu0  ;;  %v4196_v37 = vpop.f32.mrf.mxu1 }
 0x615   : > { %v10761_v61 = vadd.f32 %v4475_v34, %v4187_v5  ;;  %v4833_v5 = vld [vmem:[%s14122_s5 + $0x20] sm:$0xff]  ;;  %v14714_v37 = vld [vmem:[#allocation4_spill] sm:$0xff] }
 0x616   : > { %v4477_v23 = vpop.f32.mrf.mxu0  ;;  %v4197_v38 = vpop.f32.mrf.mxu1  ;;  %7532 = vmatpush3.msra.mxu0 %v4833_v5 }
 0x617   : > { %14709 = vst [vmem:[#allocation25_spill] sm:$0xff] %v10761_v61  ;;  %v4198_v22 = vadd.f32 %v4197_v38, %v14710_v60  ;;  %7533 = vmatprep.subr.mxu0 %v10622_v9 }
 0x618   : > { %v4478_v47 = vpop.f32.mrf.mxu0  ;;  %v4199_v39 = vpop.f32.mrf.mxu1 }
 0x619   : > { %v10764_v52 = vadd.f32 %v4478_v47, %v4190_v20 }
 0x61a   : > { %v4480_v16 = vpop.f32.mrf.mxu0  ;;  %v4202_v21 = vpop.f32.mrf.mxu1 }
 0x61b   : > { %14711 = vst [vmem:[#allocation27_spill] sm:$0xff] %v10764_v52  ;;  %v4203_v49 = vadd.f32 %v4202_v21, %v14712_v13  ;;  %v14716_v16 = vld [vmem:[#allocation6_spill] sm:$0xff] }
 0x61c   : > { %v4483_v1 = vpop.f32.mrf.mxu0  ;;  %v4204_v11 = vpop.f32.mrf.mxu1 }
 0x61d   : > { %v10767_v48 = vadd.f32 %v4483_v1, %v4195_v50 }
 0x61e   : > { %v4485_v34 = vpop.f32.mrf.mxu0  ;;  %v4205_v35 = vpop.f32.mrf.mxu1 }
 0x61f   : > { %14713 = vst [vmem:[#allocation28_spill] sm:$0xff] %v10767_v48  ;;  %v4206_v39 = vadd.f32 %v4205_v35, %v14714_v37  ;;  %v14718_v48 = vld [vmem:[#allocation8_spill] sm:$0xff] }
 0x620   : > { %v4486_v20 = vpop.f32.mrf.mxu0  ;;  %v4207_v38 = vpop.f32.mrf.mxu1 }
 0x621   : > { %v10774_v23 = vadd.f32 %v4486_v20, %v4198_v22  ;;  %v4832_v22 = vld [vmem:[%s14122_s5 + $0x18] sm:$0xff] }
 0x622   : > { %v4488_v47 = vpop.f32.mrf.mxu0  ;;  %v4210_v60 = vpop.f32.mrf.mxu1  ;;  %7534 = vmatpush3.msra.mxu0 %v4832_v22  ;;  %v14723_v22 = vld [vmem:[#allocation11_spill] sm:$0xff] }
 0x623   : > { %14715 = vst [vmem:[#allocation29_spill] sm:$0xff] %v10774_v23  ;;  %v4211_v21 = vadd.f32 %v4210_v60, %v14716_v16  ;;  %7535 = vmatprep.subr.mxu0 %v10622_v9  ;;  %v14722_v16 = vld [vmem:[#allocation9_spill] sm:$0xff] }
 0x624   : > { %v4491_v50 = vpop.f32.mrf.mxu0  ;;  %v4212_v13 = vpop.f32.mrf.mxu1 }
 0x625   : > { %v10777_v1 = vadd.f32 %v4491_v50, %v4203_v49  ;;  %v14720_v49 = vld [vmem:[#allocation10_spill] sm:$0xff] }
 0x626   : > { %v4493_v11 = vpop.f32.mrf.mxu0  ;;  %v4213_v34 = vpop.f32.mrf.mxu1 }
 0x627   : > { %14717 = vst [vmem:[#allocation30_spill] sm:$0xff] %v10777_v1  ;;  %v4214_v52 = vadd.f32 %v4213_v34, %v14718_v48 }
 0x628   : > { %v4494_v5 = vpop.f32.mrf.mxu0  ;;  %v4215_v4 = vpop.f32.mrf.mxu1 }
 0x629   : > { %v10780_v61 = vadd.f32 %v4494_v5, %v4206_v39 }
 0x62a   : > { %v4496_v35 = vpop.f32.mrf.mxu0  ;;  %v4218_v20 = vpop.f32.mrf.mxu1 }
 0x62b   : > { %14719 = vst [vmem:[#allocation12_spill] sm:$0xff] %v10780_v61  ;;  %v4219_v38 = vadd.f32 %v4218_v20, %v14720_v49  ;;  %v14725_v49 = vld [vmem:[#allocation21_spill] sm:$0xff] }
 0x62c   : > { %v4499_v37 = vpop.f32.mrf.mxu0  ;;  %v4220_v60 = vpop.f32.mrf.mxu1 }
 0x62d   : > { %v10787_v47 = vadd.f32 %v4499_v37, %v4211_v21 }
 0x62e   : > { %v4501_v50 = vpop.f32.mrf.mxu0  ;;  %v4221_v48 = vpop.f32.mrf.mxu1 }
 0x62f   : > { %14721 = vst [vmem:[#allocation13_spill] sm:$0xff] %v10787_v47  ;;  %v4222_v4 = vadd.f32 %v4221_v48, %v14722_v16 }
 0x630   : > { %v4502_v39 = vpop.f32.mrf.mxu0  ;;  %v4223_v11 = vpop.f32.mrf.mxu1 }
 0x631   : > { %v10790_v13 = vadd.f32 %v4502_v39, %v4214_v52  ;;  %v4831_v52 = vld [vmem:[%s14122_s5 + $0x10] sm:$0xff] }
 0x632   : > { %v4504_v34 = vpop.f32.mrf.mxu0  ;;  %v4226_v5 = vpop.f32.mrf.mxu1  ;;  %7536 = vmatpush3.msra.mxu0 %v4831_v52 }
 0x633   : > { %v4227_v61 = vadd.f32 %v4226_v5, %v14723_v22  ;;  %7537 = vmatprep.subr.mxu0 %v10622_v9 }
 0x634   : > { %v4507_v35 = vpop.f32.mrf.mxu0  ;;  %v4228_v23 = vpop.f32.mrf.mxu1 }
 0x635   : > { %v10793_v1 = vadd.f32 %v4507_v35, %v4219_v38  ;;  %v14727_v38 = vld [vmem:[#allocation34_spill] sm:$0xff] }
 0x636   : > { %v4509_v20 = vpop.f32.mrf.mxu0  ;;  %v4229_v21 = vpop.f32.mrf.mxu1 }
 0x637   : > { %14724 = vst [vmem:[#allocation14_spill] sm:$0xff] %v10793_v1  ;;  %v4230_v60 = vadd.f32 %v4229_v21, %v14725_v49 }
 0x638   : > { %v4510_v37 = vpop.f32.mrf.mxu0  ;;  %v4231_v47 = vpop.f32.mrf.mxu1 }
 0x639   : > { %v10796_v50 = vadd.f32 %v4510_v37, %v4222_v4 }
 0x63a   : > { %v4512_v48 = vpop.f32.mrf.mxu0  ;;  %v4234_v39 = vpop.f32.mrf.mxu1 }
 0x63b   : > { %14726 = vst [vmem:[#allocation15_spill] sm:$0xff] %v10796_v50  ;;  %v4235_v23 = vadd.f32 %v4234_v39, %v14727_v38  ;;  %v14728_v48 = vld [vmem:[#allocation17_spill] sm:$0xff] }
 0x63c   : > { %v4515_v16 = vpop.f32.mrf.mxu0  ;;  %v4236_v34 = vpop.f32.mrf.mxu1 }
 0x63d   : > { %v10803_v11 = vadd.f32 %v4515_v16, %v4227_v61 }
 0x63e   : > { %v4517_v5 = vpop.f32.mrf.mxu0  ;;  %v4237_v35 = vpop.f32.mrf.mxu1 }
 0x63f   : > { %v4238_v47 = vadd.f32 %v4237_v35, %v10525_v30 }
 0x640   : > { %v4518_v4 = vpop.f32.mrf.mxu0  ;;  %v4239_v20 = vpop.f32.mrf.mxu1 }
 0x641   : > { %v10806_v22 = vadd.f32 %v4518_v4, %v4230_v60  ;;  %v4830_v60 = vld [vmem:[%s14122_s5 + $0x8] sm:$0xff] }
 0x642   : > { %v4520_v21 = vpop.f32.mrf.mxu0  ;;  %v4242_v37 = vpop.f32.mrf.mxu1  ;;  %7538 = vmatpush3.msra.mxu0 %v4830_v60 }
 0x643   : > { %v4243_v52 = vadd.f32 %v4242_v37, %v14728_v48  ;;  %7539 = vmatprep.subr.mxu0 %v10622_v9 }
 0x644   : > { %v4523_v49 = vpop.f32.mrf.mxu0  ;;  %v4244_v1 = vpop.f32.mrf.mxu1 }
 0x645   : > { %v10809_v50 = vadd.f32 %v4523_v49, %v4235_v23 }
 0x646   : > { %v4525_v39 = vpop.f32.mrf.mxu0  ;;  %v4245_v61 = vpop.f32.mrf.mxu1 }
 0x647   : > { %v4246_v38 = vadd.f32 %v4245_v61, %v10535_v43 }
 0x648   : > { %v4526_v16 = vpop.f32.mrf.mxu0  ;;  %v4247_v5 = vpop.f32.mrf.mxu1 }
 0x649   : > { %v10812_v34 = vadd.f32 %v4526_v16, %v4238_v47  ;;  %v14730_v47 = vld [vmem:[#allocation18_spill] sm:$0xff]  ;;  %v14731_v5 = vld [vmem:[#allocation19_spill] sm:$0xff] }
 0x64a   : > { %v4528_v30 = vpop.f32.mrf.mxu0  ;;  %v7447_v4 = vpop.f32.mrf.mxu1 }
 0x64b   : > { %v10821_v1 = vadd.f32 %v7447_v4, %v10550_v26 }
 0x64c   : > { %v4531_v35 = vpop.f32.mrf.mxu0  ;;  %v4572_v43 = vpop.f32.mrf.mxu1 }
 0x64d   : > { %v10818_v23 = vadd.f32 %v4531_v35, %v4243_v52  ;;  %14729 = vst [vmem:[#allocation16_spill] sm:$0xff] %v10821_v1  ;;  %v10824_v21 = vadd.f32 %v4572_v43, %v14730_v47  ;;  %v4922_v4 = vmul.f32 %v10821_v1, %v10821_v1  ;;  %v14733_v47 = vld [vmem:[#allocation20_spill] sm:$0xff] }
 0x64e   : > { %v4533_v20 = vpop.f32.mrf.mxu0  ;;  %v7448_v49 = vpop.f32.mrf.mxu1 }
 0x64f   : > { %v10829_v39 = vadd.f32 %v7448_v49, %v10554_v63  ;;  %v4920_v26 = vmul.f32 %v10824_v21, %v10824_v21 }
 0x650   : > { %v4534_v37 = vpop.f32.mrf.mxu0  ;;  %v4575_v61 = vpop.f32.mrf.mxu1 }
 0x651   : > { %v10826_v48 = vadd.f32 %v4534_v37, %v4246_v38  ;;  %v10832_v52 = vadd.f32 %v4575_v61, %v14731_v5  ;;  %v4923_v61 = vmul.f32 %v10829_v39, %v10829_v39 }
 0x652   : > { %v4536_v16 = vpop.f32.mrf.mxu0  ;;  %v7451_v30 = vpop.f32.mrf.mxu1 }
 0x653   : > { %14732 = vst [vmem:[#allocation26_spill] sm:$0xff] %v10832_v52  ;;  %v4846_v60 = vadd.f32 %v10832_v52, %v10824_v21  ;;  %v4921_v35 = vmul.f32 %v10832_v52, %v10832_v52  ;;  %v10841_v38 = vadd.f32 %v7451_v30, %v10572_v42 }
 0x654   : > { %v4588_v63 = vpop.f32.mrf.mxu1 }
 0x655   : > { %v4847_v20 = vadd.f32 %v4846_v60, %v10821_v1  ;;  %v4984_v43 = vadd.f32 %v4921_v35, %v4920_v26  ;;  %v10847_v37 = vadd.f32 %v4588_v63, %v14733_v47  ;;  %v14735_v35 = vld [vmem:[#allocation22_spill] sm:$0xff] }
 0x656   : > { %v7452_v49 = vpop.f32.mrf.mxu1 }
 0x657   : > { %14734 = vst [vmem:[#allocation7_spill] sm:$0xff] %v10847_v37  ;;  %v4985_v16 = vadd.f32 %v4984_v43, %v4922_v4  ;;  %v4848_v5 = vadd.f32 %v4847_v20, %v10829_v39  ;;  %v10853_v42 = vadd.f32 %v7452_v49, %v10576_v12  ;;  %v4924_v60 = vmul.f32 %v10847_v37, %v10847_v37  ;;  %v14737_v43 = vld [vmem:[#allocation36_spill] sm:$0xff] }
 0x658   : > { %v4591_v30 = vpop.f32.mrf.mxu1 }
 0x659   : > { %v4849_v52 = vadd.f32 %v4848_v5, %v10847_v37  ;;  %v4986_v26 = vadd.f32 %v4985_v16, %v4923_v61  ;;  %v10859_v63 = vadd.f32 %v4591_v30, %v14735_v35  ;;  %v4829_v5 = vld [vmem:[%s14122_s5] sm:$0xff]  ;;  %v4926_v30 = vmul.f32 %v10841_v38, %v10841_v38 }
 0x65a   : > { %v7455_v47 = vpop.f32.mrf.mxu1  ;;  %v14738_v61 = vld [vmem:[#allocation23_spill] sm:$0xff]  ;;  %7540 = vmatpush3.msra.mxu0 %v4829_v5 }
 0x65b   : > { %14736 = vst [vmem:[#allocation3_spill] sm:$0xff] %v10859_v63  ;;  %v4987_v1 = vadd.f32 %v4986_v26, %v4924_v60  ;;  %v4925_v4 = vmul.f32 %v10859_v63, %v10859_v63  ;;  %v10864_v20 = vadd.f32 %v7455_v47, %v14737_v43  ;;  %v4850_v12 = vadd.f32 %v4849_v52, %v10859_v63  ;;  %v14739_v43 = vld [vmem:[#allocation31_spill] sm:$0xff] }
 0x65c   : > { %v4604_v49 = vpop.f32.mrf.mxu1  ;;  %7544 = vmatprep.subr.mxu0 %v10622_v9 }
 0x65d   : > { %v4988_v37 = vadd.f32 %v4987_v1, %v4925_v4  ;;  %v10871_v16 = vadd.f32 %v4604_v49, %v14738_v61  ;;  %v4851_v52 = vadd.f32 %v4850_v12, %v10841_v38  ;;  %v4927_v1 = vmul.f32 %v10853_v42, %v10853_v42 }
 0x65e   : > { %v7456_v60 = vpop.f32.mrf.mxu1 }
 0x65f   : > { %v10877_v26 = vadd.f32 %v7456_v60, %v10598_v32  ;;  %v4989_v35 = vadd.f32 %v4988_v37, %v4926_v30  ;;  %v4852_v5 = vadd.f32 %v4851_v52, %v10853_v42  ;;  %v4928_v37 = vmul.f32 %v10871_v16, %v10871_v16 }
 0x660   : > { %v4607_v47 = vpop.f32.mrf.mxu1 }
 0x661   : > { %v10881_v63 = vadd.f32 %v4607_v47, %v14739_v43  ;;  %v4990_v9 = vadd.f32 %v4989_v35, %v4927_v1  ;;  %v4853_v60 = vadd.f32 %v4852_v5, %v10871_v16  ;;  %v4930_v5 = vmul.f32 %v10864_v20, %v10864_v20 }
 0x662   : > { %v7459_v4 = vpop.f32.mrf.mxu1 }
 0x663   : > { %v10886_v49 = vadd.f32 %v7459_v4, %v10612_v33  ;;  %v4991_v47 = vadd.f32 %v4990_v9, %v4928_v37  ;;  %v4929_v33 = vmul.f32 %v10881_v63, %v10881_v63  ;;  %v4854_v1 = vadd.f32 %v4853_v60, %v10881_v63 }
 0x664   : > { %v4620_v61 = vpop.f32.mrf.mxu1  ;;  %v4931_v60 = vmul.f32 %v10877_v26, %v10877_v26 }
 0x665   : > { %v10890_v32 = vadd.f32 %v4620_v61, %v10604_v59  ;;  %v4992_v4 = vadd.f32 %v4991_v47, %v4929_v33 }
 0x666   : > { %v7460_v12 = vpop.f32.mrf.mxu1 }
 0x667   : > { %v10895_v30 = vadd.f32 %v7460_v12, %v10617_v55  ;;  %v4993_v12 = vadd.f32 %v4992_v4, %v4930_v5 }
 0x668   : > { %v4623_v43 = vpop.f32.mrf.mxu1 }
 0x669   : > { %v10901_v52 = vadd.f32 %v4623_v43, %v10608_v10  ;;  %v4855_v10 = vadd.f32 %v4854_v1, %v10864_v20  ;;  %v4932_v1 = vmul.f32 %v10890_v32, %v10890_v32 }
 0x66a   : > { %v7463_v35 = vpop.f32.mrf.mxu1 }
 0x66b   : > { %v10904_v59 = vadd.f32 %v7463_v35, %v10632_v46  ;;  %v4856_v33 = vadd.f32 %v4855_v10, %v10877_v26  ;;  %v4994_v35 = vadd.f32 %v4993_v12, %v4931_v60 }
 0x66c   : > { %v4636_v61 = vpop.f32.mrf.mxu1 }
 0x66d   : > { %v10908_v55 = vadd.f32 %v4636_v61, %v10626_v41  ;;  %v4857_v5 = vadd.f32 %v4856_v33, %v10890_v32  ;;  %v4934_v33 = vmul.f32 %v10886_v49, %v10886_v49 }
 0x66e   : > { %v7464_v9 = vpop.f32.mrf.mxu1 }
 0x66f   : > { %14740 = vst [vmem:[#allocation5_spill] sm:$0xff] %v10908_v55  ;;  %v10913_v37 = vadd.f32 %v7464_v9, %v10635_v31  ;;  %v4995_v9 = vadd.f32 %v4994_v35, %v4932_v1  ;;  %v4858_v60 = vadd.f32 %v4857_v5, %v10901_v52  ;;  %v4935_v5 = vmul.f32 %v10895_v30, %v10895_v30 }
 0x670   : > { %v4639_v43 = vpop.f32.mrf.mxu1 }
 0x671   : > { %14741 = vst [vmem:[#allocation4_spill] sm:$0xff] %v10913_v37  ;;  %v10917_v46 = vadd.f32 %v4639_v43, %v10629_v53 }
 0x672   : > { %v7467_v47 = vpop.f32.mrf.mxu1 }
 0x673   : > { %v10922_v41 = vadd.f32 %v7467_v47, %v10648_v58  ;;  %v4933_v58 = vmul.f32 %v10901_v52, %v10901_v52 }
 0x674   : > { %v4652_v61 = vpop.f32.mrf.mxu1 }
 0x675   : > { %v10926_v31 = vadd.f32 %v4652_v61, %v10642_v18  ;;  %v4996_v47 = vadd.f32 %v4995_v9, %v4933_v58 }
 0x676   : > { %v7468_v4 = vpop.f32.mrf.mxu1 }
 0x677   : > { %v10931_v53 = vadd.f32 %v7468_v4, %v10651_v56  ;;  %v4997_v4 = vadd.f32 %v4996_v47, %v4934_v33 }
 0x678   : > { %v4655_v43 = vpop.f32.mrf.mxu1 }
 0x679   : > { %v10937_v10 = vadd.f32 %v4655_v43, %v10645_v7  ;;  %v4859_v7 = vadd.f32 %v4858_v60, %v10886_v49  ;;  %v4936_v60 = vmul.f32 %v10908_v55, %v10908_v55 }
 0x67a   : > { %v7471_v12 = vpop.f32.mrf.mxu1 }
 0x67b   : > { %v10940_v18 = vadd.f32 %v7471_v12, %v10664_v29  ;;  %v4860_v58 = vadd.f32 %v4859_v7, %v10895_v30  ;;  %v4998_v12 = vadd.f32 %v4997_v4, %v4935_v5 }
 0x67c   : > { %v4668_v61 = vpop.f32.mrf.mxu1 }
 0x67d   : > { %v10944_v56 = vadd.f32 %v4668_v61, %v10658_v44  ;;  %v4861_v33 = vadd.f32 %v4860_v58, %v10908_v55 }
 0x67e   : > { %v7472_v35 = vpop.f32.mrf.mxu1 }
 0x67f   : > { %v10949_v1 = vadd.f32 %v7472_v35, %v10667_v6  ;;  %v4999_v35 = vadd.f32 %v4998_v12, %v4936_v60 }
 0x680   : > { %v4671_v43 = vpop.f32.mrf.mxu1 }
 0x681   : > { %v10953_v29 = vadd.f32 %v4671_v43, %v10661_v3 }
 0x682   : > { %v7475_v9 = vpop.f32.mrf.mxu1 }
 0x683   : > { %v10958_v44 = vadd.f32 %v7475_v9, %v10680_v54  ;;  %v4937_v54 = vmul.f32 %v10917_v46, %v10917_v46 }
 0x684   : > { %v4684_v61 = vpop.f32.mrf.mxu1 }
 0x685   : > { %v10962_v6 = vadd.f32 %v4684_v61, %v10674_v0  ;;  %v4862_v0 = vadd.f32 %v4861_v33, %v10917_v46  ;;  %v5000_v5 = vadd.f32 %v4999_v35, %v4937_v54  ;;  %v4938_v61 = vmul.f32 %v10904_v59, %v10904_v59 }
 0x686   : > { %v7476_v47 = vpop.f32.mrf.mxu1  ;;  %v4939_v33 = vmul.f32 %v10913_v37, %v10913_v37 }
 0x687   : > { %v10967_v3 = vadd.f32 %v7476_v47, %v10683_v14  ;;  %v4863_v58 = vadd.f32 %v4862_v0, %v10904_v59  ;;  %v5001_v12 = vadd.f32 %v5000_v5, %v4938_v61 }
 0x688   : > { %v4687_v43 = vpop.f32.mrf.mxu1 }
 0x689   : > { %v10973_v7 = vadd.f32 %v4687_v43, %v10677_v28 }
 0x68a   : > { %v7479_v4 = vpop.f32.mrf.mxu1 }
 0x68b   : > { %v10983_v55 = vadd.f32 %v7479_v4, %v10696_v36  ;;  %v4864_v4 = vadd.f32 %v4863_v58, %v10913_v37 }
 0x68c   : > { %v4700_v9 = vpop.f32.mrf.mxu1 }
 0x68d   : > { %v10979_v47 = vadd.f32 %v4700_v9, %v10686_v40  ;;  %v4954_v5 = vmul.f32 %v10983_v55, %v10983_v55 }
 0x68e   : > { %v7480_v14 = vpop.f32.mrf.mxu1 }
 0x68f   : > { %14742 = vst [vmem:[#allocation6_spill] sm:$0xff] %v10979_v47  ;;  %v4952_v54 = vmul.f32 %v10979_v47, %v10979_v47  ;;  %v10993_v40 = vadd.f32 %v7480_v14, %v10700_v62  ;;  %v4940_v62 = vmul.f32 %v10926_v31, %v10926_v31 }
 0x690   : > { %v4703_v60 = vpop.f32.mrf.mxu1 }
 0x691   : > { %v10986_v28 = vadd.f32 %v4703_v60, %v10689_v8  ;;  %v5002_v8 = vadd.f32 %v5001_v12, %v4939_v33  ;;  %v4865_v12 = vadd.f32 %v4864_v4, %v10926_v31 }
 0x692   : > { %v7483_v35 = vpop.f32.mrf.mxu1 }
 0x693   : > { %14743 = vst [vmem:[#allocation8_spill] sm:$0xff] %v10986_v28  ;;  %v4883_v43 = vadd.f32 %v10986_v28, %v10979_v47  ;;  %v4953_v36 = vmul.f32 %v10986_v28, %v10986_v28  ;;  %v4955_v28 = vmul.f32 %v10993_v40, %v10993_v40  ;;  %v5003_v33 = vadd.f32 %v5002_v8, %v4940_v62 }
 0x694   : > { %v4716_v0 = vpop.f32.mrf.mxu1 }
 0x695   : > { %v4884_v9 = vadd.f32 %v4883_v43, %v10983_v55  ;;  %v5021_v61 = vadd.f32 %v4953_v36, %v4952_v54  ;;  %v11006_v14 = vadd.f32 %v4716_v0, %v10704_v57  ;;  %v4941_v54 = vmul.f32 %v10937_v10, %v10937_v10 }
 0x696   : > { %v7484_v60 = vpop.f32.mrf.mxu1  ;;  %v11018_v0 = vadd.f32 %v7483_v35, %v10716_v25  ;;  %v4942_v35 = vmul.f32 %v10922_v41, %v10922_v41 }
 0x697   : > { %14744 = vst [vmem:[#allocation10_spill] sm:$0xff] %v11006_v14  ;;  %v5022_v47 = vadd.f32 %v5021_v61, %v4954_v5  ;;  %v4885_v58 = vadd.f32 %v4884_v9, %v10993_v40  ;;  %v4956_v57 = vmul.f32 %v11006_v14, %v11006_v14  ;;  %v11024_v4 = vadd.f32 %v7484_v60, %v10720_v2 }
 0x698   : > { %v4719_v37 = vpop.f32.mrf.mxu1  ;;  %v4958_v25 = vmul.f32 %v11018_v0, %v11018_v0 }
 0x699   : > { %v4886_v43 = vadd.f32 %v4885_v58, %v11006_v14  ;;  %v5023_v36 = vadd.f32 %v5022_v47, %v4955_v28  ;;  %v11021_v5 = vadd.f32 %v4719_v37, %v10708_v17  ;;  %v4866_v14 = vadd.f32 %v4865_v12, %v10937_v10 }
 0x69a   : > { %v7487_v9 = vpop.f32.mrf.mxu1  ;;  %v5004_v47 = vadd.f32 %v5003_v33, %v4941_v54  ;;  %v4959_v60 = vmul.f32 %v11024_v4, %v11024_v4 }
 0x69b   : > { %v5024_v61 = vadd.f32 %v5023_v36, %v4956_v57  ;;  %v4887_v8 = vadd.f32 %v4886_v43, %v11021_v5  ;;  %v4957_v62 = vmul.f32 %v11021_v5, %v11021_v5  ;;  %v4867_v54 = vadd.f32 %v4866_v14, %v10922_v41 }
 0x69c   : > { %v4732_v58 = vpop.f32.mrf.mxu1  ;;  %v5005_v57 = vadd.f32 %v5004_v47, %v4942_v35 }
 0x69d   : > { %v4888_v17 = vadd.f32 %v4887_v8, %v11018_v0  ;;  %v5025_v37 = vadd.f32 %v5024_v61, %v4957_v62  ;;  %v11034_v28 = vadd.f32 %v4732_v58, %v10724_v27  ;;  %v11046_v27 = vadd.f32 %v7487_v9, %v10736_v24 }
 0x69e   : > { %v7488_v2 = vpop.f32.mrf.mxu1 }
 0x69f   : > { %v5026_v43 = vadd.f32 %v5025_v37, %v4958_v25  ;;  %v4889_v12 = vadd.f32 %v4888_v17, %v11024_v4  ;;  %14745 = vst [vmem:[#allocation9_spill] sm:$0xff] %v11046_v27  ;;  %v4960_v8 = vmul.f32 %v11034_v28, %v11034_v28  ;;  %v4943_v25 = vmul.f32 %v10931_v53, %v10931_v53 }
 0x6a0   : > { %v4735_v33 = vpop.f32.mrf.mxu1  ;;  %v4868_v17 = vadd.f32 %v4867_v54, %v10931_v53  ;;  %v4962_v35 = vmul.f32 %v11046_v27, %v11046_v27 }
 0x6a1   : > { %v11043_v36 = vadd.f32 %v4735_v33, %v10728_v19  ;;  %v4890_v61 = vadd.f32 %v4889_v12, %v11034_v28  ;;  %v5027_v62 = vadd.f32 %v5026_v43, %v4959_v60  ;;  %v11056_v19 = vadd.f32 %v7488_v2, %v10740_v15 }
 0x6a2   : > { %v7491_v58 = vpop.f32.mrf.mxu1  ;;  %v5006_v37 = vadd.f32 %v5005_v57, %v4943_v25  ;;  %v4944_v15 = vmul.f32 %v10944_v56, %v10944_v56  ;;  %v4945_v25 = vmul.f32 %v10953_v29, %v10953_v29 }
 0x6a3   : > { %v4961_v14 = vmul.f32 %v11043_v36, %v11043_v36  ;;  %v5028_v47 = vadd.f32 %v5027_v62, %v4960_v8  ;;  %14746 = vst [vmem:[#allocation11_spill] sm:$0xff] %v11056_v19  ;;  %v4891_v24 = vadd.f32 %v4890_v61, %v11043_v36  ;;  %v4963_v2 = vmul.f32 %v11056_v19, %v11056_v19 }
 0x6a4   : > { %v4748_v9 = vpop.f32.mrf.mxu1  ;;  %v4869_v8 = vadd.f32 %v4868_v17, %v10944_v56  ;;  %v5007_v62 = vadd.f32 %v5006_v37, %v4944_v15 }
 0x6a5   : > { %v4892_v60 = vadd.f32 %v4891_v24, %v11046_v27  ;;  %v5029_v43 = vadd.f32 %v5028_v47, %v4961_v14  ;;  %v11064_v12 = vadd.f32 %v4748_v9, %v10743_v51  ;;  %v14749_v14 = vld [vmem:[#allocation35_spill] sm:$0xff] }
 0x6a6   : > { %v7492_v33 = vpop.f32.mrf.mxu1  ;;  %v11078_v47 = vadd.f32 %v7491_v58, %v14749_v14  ;;  %v4870_v58 = vadd.f32 %v4869_v8, %v10953_v29  ;;  %v5008_v14 = vadd.f32 %v5007_v62, %v4945_v25 }
 0x6a7   : > { %14747 = vst [vmem:[#allocation21_spill] sm:$0xff] %v11064_v12  ;;  %v5030_v61 = vadd.f32 %v5029_v43, %v4962_v35  ;;  %v4893_v54 = vadd.f32 %v4892_v60, %v11056_v19  ;;  %v4964_v9 = vmul.f32 %v11064_v12, %v11064_v12  ;;  %v14751_v43 = vld [vmem:[#allocation24_spill] sm:$0xff] }
 0x6a8   : > { %v4751_v57 = vpop.f32.mrf.mxu1  ;;  %14750 = vst [vmem:[#allocation17_spill] sm:$0xff] %v11078_v47  ;;  %v11086_v15 = vadd.f32 %v7492_v33, %v14751_v43  ;;  %v4946_v33 = vmul.f32 %v10940_v18, %v10940_v18  ;;  %v4871_v25 = vadd.f32 %v4870_v58, %v10940_v18  ;;  %v14755_v43 = vld [vmem:[#allocation27_spill] sm:$0xff] }
 0x6a9   : > { %v11075_v51 = vadd.f32 %v4751_v57, %v10748_v45  ;;  %v4894_v24 = vadd.f32 %v4893_v54, %v11064_v12  ;;  %v5031_v35 = vadd.f32 %v5030_v61, %v4963_v2  ;;  %v4966_v54 = vmul.f32 %v11078_v47, %v11078_v47  ;;  %v14753_v61 = vld [vmem:[#allocation25_spill] sm:$0xff] }
 0x6aa   : > { %v7495_v60 = vpop.f32.mrf.mxu1  ;;  %14752 = vst [vmem:[#allocation18_spill] sm:$0xff] %v11086_v15 }
 0x6ab   : > { %14748 = vst [vmem:[#allocation34_spill] sm:$0xff] %v11075_v51  ;;  %v4965_v17 = vmul.f32 %v11075_v51, %v11075_v51  ;;  %v5032_v37 = vadd.f32 %v5031_v35, %v4964_v9  ;;  %v4895_v45 = vadd.f32 %v4894_v24, %v11075_v51  ;;  %v4967_v24 = vmul.f32 %v11086_v15, %v11086_v15 }
 0x6ac   : > { %v4764_v57 = vpop.f32.mrf.mxu1  ;;  %v5009_v35 = vadd.f32 %v5008_v14, %v4946_v33 }
 0x6ad   : > { %v4896_v12 = vadd.f32 %v4895_v45, %v11078_v47  ;;  %v5033_v2 = vadd.f32 %v5032_v37, %v4965_v17  ;;  %v11094_v19 = vadd.f32 %v4764_v57, %v14753_v61  ;;  %v14756_v17 = vld [vmem:[#allocation28_spill] sm:$0xff] }
 0x6ae   : > { %v7496_v27 = vpop.f32.mrf.mxu1  ;;  %v11106_v37 = vadd.f32 %v7495_v60, %v14756_v17  ;;  %v14760_v17 = vld [vmem:[#allocation30_spill] sm:$0xff] }
 0x6af   : > { %14754 = vst [vmem:[#allocation19_spill] sm:$0xff] %v11094_v19  ;;  %v5034_v9 = vadd.f32 %v5033_v2, %v4966_v54  ;;  %v4897_v8 = vadd.f32 %v4896_v12, %v11086_v15  ;;  %v4968_v61 = vmul.f32 %v11094_v19, %v11094_v19  ;;  %v4947_v12 = vmul.f32 %v10949_v1, %v10949_v1  ;;  %v14758_v54 = vld [vmem:[#allocation29_spill] sm:$0xff] }
 0x6b0   : > { %v4767_v62 = vpop.f32.mrf.mxu1  ;;  %14757 = vst [vmem:[#allocation20_spill] sm:$0xff] %v11106_v37  ;;  %v11116_v2 = vadd.f32 %v7496_v27, %v14758_v54  ;;  %v4948_v27 = vmul.f32 %v10962_v6, %v10962_v6 }
 0x6b1   : > { %v11103_v45 = vadd.f32 %v4767_v62, %v14755_v43  ;;  %v4898_v57 = vadd.f32 %v4897_v8, %v11094_v19  ;;  %v5035_v47 = vadd.f32 %v5034_v9, %v4967_v24  ;;  %v4872_v8 = vadd.f32 %v4871_v25, %v10949_v1 }
 0x6b2   : > { %v7499_v51 = vpop.f32.mrf.mxu1  ;;  %14759 = vst [vmem:[#allocation22_spill] sm:$0xff] %v11116_v2  ;;  %v5010_v62 = vadd.f32 %v5009_v35, %v4947_v12  ;;  %v4970_v24 = vmul.f32 %v11106_v37, %v11106_v37 }
 0x6b3   : > { %v4969_v58 = vmul.f32 %v11103_v45, %v11103_v45  ;;  %v5036_v14 = vadd.f32 %v5035_v47, %v4968_v61  ;;  %v4899_v60 = vadd.f32 %v4898_v57, %v11103_v45  ;;  %v4971_v47 = vmul.f32 %v11116_v2, %v11116_v2 }
 0x6b4   : > { %v4780_v33 = vpop.f32.mrf.mxu1  ;;  %v4873_v61 = vadd.f32 %v4872_v8, %v10962_v6  ;;  %v5011_v12 = vadd.f32 %v5010_v62, %v4948_v27 }
 0x6b5   : > { %v4900_v9 = vadd.f32 %v4899_v60, %v11106_v37  ;;  %v5037_v43 = vadd.f32 %v5036_v14, %v4969_v58  ;;  %v11124_v19 = vadd.f32 %v4780_v33, %v14760_v17  ;;  %v4949_v58 = vmul.f32 %v10973_v7, %v10973_v7  ;;  %v14762_v14 = vld [vmem:[#allocation12_spill] sm:$0xff]  ;;  %v14764_v60 = vld [vmem:[#allocation13_spill] sm:$0xff] }
 0x6b6   : > { %v7500_v15 = vpop.f32.mrf.mxu1  ;;  %v11138_v33 = vadd.f32 %v7499_v51, %v14764_v60  ;;  %v4874_v51 = vadd.f32 %v4873_v61, %v10973_v7 }
 0x6b7   : > { %14761 = vst [vmem:[#allocation36_spill] sm:$0xff] %v11124_v19  ;;  %v5038_v57 = vadd.f32 %v5037_v43, %v4970_v24  ;;  %v4901_v25 = vadd.f32 %v4900_v9, %v11116_v2  ;;  %v4972_v24 = vmul.f32 %v11124_v19, %v11124_v19  ;;  %v11146_v27 = vadd.f32 %v7500_v15, %v10790_v13 }
 0x6b8   : > { %v4783_v35 = vpop.f32.mrf.mxu1  ;;  %14765 = vst [vmem:[#allocation31_spill] sm:$0xff] %v11138_v33  ;;  %v5012_v60 = vadd.f32 %v5011_v12, %v4949_v58  ;;  %v4950_v13 = vmul.f32 %v10958_v44, %v10958_v44  ;;  %v4875_v58 = vadd.f32 %v4874_v51, %v10958_v44 }
 0x6b9   : > { %v11135_v54 = vadd.f32 %v4783_v35, %v14762_v14  ;;  %v4902_v17 = vadd.f32 %v4901_v25, %v11124_v19  ;;  %v5039_v43 = vadd.f32 %v5038_v57, %v4971_v47  ;;  %14766 = vst [vmem:[#allocation35_spill] sm:$0xff] %v11146_v27  ;;  %v4974_v25 = vmul.f32 %v11138_v33, %v11138_v33  ;;  %v14767_v57 = vld [vmem:[#allocation14_spill] sm:$0xff] }
 0x6ba   : > { %v7503_v9 = vpop.f32.mrf.mxu1  ;;  %v4975_v15 = vmul.f32 %v11146_v27, %v11146_v27 }
 0x6bb   : > { %14763 = vst [vmem:[#allocation23_spill] sm:$0xff] %v11135_v54  ;;  %v4973_v8 = vmul.f32 %v11135_v54, %v11135_v54  ;;  %v5040_v62 = vadd.f32 %v5039_v43, %v4972_v24  ;;  %v4903_v35 = vadd.f32 %v4902_v17, %v11135_v54  ;;  %v5013_v24 = vadd.f32 %v5012_v60, %v4950_v13  ;;  %v14769_v43 = vld [vmem:[#allocation15_spill] sm:$0xff] }
 0x6bc   : > { %v4796_v14 = vpop.f32.mrf.mxu1 }
 0x6bd   : > { %v4904_v19 = vadd.f32 %v4903_v35, %v11138_v33  ;;  %v5041_v47 = vadd.f32 %v5040_v62, %v4973_v8  ;;  %v11154_v2 = vadd.f32 %v4796_v14, %v14767_v57  ;;  %v11166_v8 = vadd.f32 %v7503_v9, %v10803_v11 }
 0x6be   : > { %v7504_v37 = vpop.f32.mrf.mxu1 }
 0x6bf   : > { %14768 = vst [vmem:[#allocation24_spill] sm:$0xff] %v11154_v2  ;;  %v5042_v17 = vadd.f32 %v5041_v47, %v4974_v25  ;;  %v4905_v61 = vadd.f32 %v4904_v19, %v11146_v27  ;;  %14771 = vst [vmem:[#allocation27_spill] sm:$0xff] %v11166_v8  ;;  %v4976_v14 = vmul.f32 %v11154_v2, %v11154_v2 }
 0x6c0   : > { %v4799_v12 = vpop.f32.mrf.mxu1  ;;  %v4951_v19 = vmul.f32 %v10967_v3, %v10967_v3  ;;  %v11176_v25 = vadd.f32 %v7504_v37, %v10806_v22  ;;  %v4876_v47 = vadd.f32 %v4875_v58, %v10967_v3 }
 0x6c1   : > { %v11163_v35 = vadd.f32 %v4799_v12, %v14769_v43  ;;  %v4906_v62 = vadd.f32 %v4905_v61, %v11154_v2  ;;  %v5043_v57 = vadd.f32 %v5042_v17, %v4975_v15  ;;  %v4978_v15 = vmul.f32 %v11166_v8, %v11166_v8 }
 0x6c2   : > { %v7507_v33 = vpop.f32.mrf.mxu1  ;;  %14772 = vst [vmem:[#allocation28_spill] sm:$0xff] %v11176_v25  ;;  %v5014_v13 = vadd.f32 %v5013_v24, %v4951_v19  ;;  %v4979_v22 = vmul.f32 %v11176_v25, %v11176_v25 }
 0x6c3   : > { %14770 = vst [vmem:[#allocation25_spill] sm:$0xff] %v11163_v35  ;;  %v4977_v51 = vmul.f32 %v11163_v35, %v11163_v35  ;;  %v5044_v60 = vadd.f32 %v5043_v57, %v4976_v14  ;;  %v4907_v11 = vadd.f32 %v4906_v62, %v11163_v35  ;;  %v4877_v57 = vrot.slane %v4876_v47, 4 }
 0x6c4   : > { %v4812_v9 = vpop.f32.mrf.mxu1  ;;  %v5015_v58 = vrot.slane %v5014_v13, 4  ;;  %v11193_v19 = vadd.f32 %v7507_v33, %v10818_v23 }
 0x6c5   : > { %v4908_v17 = vadd.f32 %v4907_v11, %v11166_v8  ;;  %v5045_v61 = vadd.f32 %v5044_v60, %v4977_v51  ;;  %v11184_v12 = vadd.f32 %v4812_v9, %v10809_v50 }
 0x6c6   : > { %v7508_v43 = vpop.f32.mrf.mxu1  ;;  %14775 = vst [vmem:[#allocation12_spill] sm:$0xff] %v11193_v19  ;;  %v4982_v23 = vmul.f32 %v11193_v19, %v11193_v19 }
 0x6c7   : > { %14773 = vst [vmem:[#allocation29_spill] sm:$0xff] %v11184_v12  ;;  %v5046_v37 = vadd.f32 %v5045_v61, %v4978_v15  ;;  %v4909_v62 = vadd.f32 %v4908_v17, %v11176_v25  ;;  %v4980_v50 = vmul.f32 %v11184_v12, %v11184_v12  ;;  %v11201_v15 = vadd.f32 %v7508_v43, %v10826_v48 }
 0x6c8   : > { %v4815_v14 = vpop.f32.mrf.mxu1  ;;  %v5016_v61 = vadd.f32 %v5015_v58, %v5014_v13 }
 0x6c9   : > { %v11190_v24 = vadd.f32 %v4815_v14, %v10812_v34  ;;  %v4910_v51 = vadd.f32 %v4909_v62, %v11184_v12  ;;  %v5047_v60 = vadd.f32 %v5046_v37, %v4979_v22  ;;  %14776 = vst [vmem:[#allocation13_spill] sm:$0xff] %v11201_v15  ;;  %v4878_v34 = vadd.f32 %v4877_v57, %v4876_v47 }
 0x6ca   : > { %v4983_v22 = vmul.f32 %v11201_v15, %v11201_v15 }
 0x6cb   : > { %14774 = vst [vmem:[#allocation30_spill] sm:$0xff] %v11190_v24  ;;  %v4981_v11 = vmul.f32 %v11190_v24, %v11190_v24  ;;  %v5048_v9 = vadd.f32 %v5047_v60, %v4980_v50  ;;  %v4911_v17 = vadd.f32 %v4910_v51, %v11190_v24  ;;  %v4879_v50 = vrot.slane %v4878_v34, 2 }
 0x6cc   : > { %v5017_v60 = vrot.slane %v5016_v61, 2 }
 0x6cd   : > { %v4912_v33 = vadd.f32 %v4911_v17, %v11193_v19  ;;  %v5049_v62 = vadd.f32 %v5048_v9, %v4981_v11  ;;  %v4880_v47 = vadd.f32 %v4879_v50, %v4878_v34 }
 0x6ce   : > { %v5018_v13 = vadd.f32 %v5017_v60, %v5016_v61  ;;  %v11213_v61 = vld [vmem:[#allocation2] sm:$0xff]  ;;  %v7778_v60 = vld [vmem:[%s14128_s11 + $0x30] sm:$0xff]  }
 0x6cf   : > { %v4913_v37 = vadd.f32 %v4912_v33, %v11201_v15  ;;  %v5050_v14 = vadd.f32 %v5049_v62, %v4982_v23  ;;  %v4881_v17 = vrot.slane %v4880_v47, 1  ;;  %14777 = vst [vmem:[#allocation14_spill] sm:$0xff] %v11213_v61 }
 0x6d0   : > { %v5019_v11 = vrot.slane %v5018_v13, 1 }
 0x6d1   : > { %v4914_v48 = vrot.slane %v4913_v37, 4  ;;  %v5051_v43 = vadd.f32 %v5050_v14, %v4983_v22  ;;  %v4882_v33 = vadd.f32 %v4881_v17, %v4880_v47  ;;  %v7781_v47 = vld [vmem:[%s14128_s11 + $0x18] sm:$0xff]  }
 0x6d2   : > { %v5020_v23 = vadd.f32 %v5019_v11, %v5018_v13  ;;  %v7782_v13 = vld [vmem:[%s14128_s11 + $0x10] sm:$0xff]   ;;  %v14778_v11 = vld [vmem:[#allocation32_spill] sm:$0xff] }
 0x6d3   : > { %v4915_v12 = vadd.f32 %v4914_v48, %v4913_v37  ;;  %v5052_v51 = vrot.slane %v5051_v43, 4 }
 0x6d5   : > { %v4916_v57 = vrot.slane %v4915_v12, 2  ;;  %v5053_v58 = vadd.f32 %v5052_v51, %v5051_v43  ;;  %v7779_v43 = vld [vmem:[%s14128_s11 + $0x28] sm:$0xff]   ;;  %v7780_v51 = vld [vmem:[%s14128_s11 + $0x20] sm:$0xff]  }
 0x6d7   : > { %v4917_v24 = vadd.f32 %v4916_v57, %v4915_v12  ;;  %v5054_v25 = vrot.slane %v5053_v58, 2  ;;  %v7783_v57 = vld [vmem:[%s14128_s11 + $0x8] sm:$0xff]  }
 0x6d9   : > { %v4918_v9 = vrot.slane %v4917_v24, 1  ;;  %v5055_v19 = vadd.f32 %v5054_v25, %v5053_v58  ;;  %v4845_v25 = vld [vmem:[%s14123_s6] sm:$0xf] }
 0x6da   : > { %v7784_v58 = vld [vmem:[%s14128_s11] sm:$0xff]  }
 0x6db   : > { %v4919_v8 = vadd.f32 %v4918_v9, %v4917_v24  ;;  %v5056_v35 = vrot.slane %v5055_v19, 1 }
 0x6dd   : > { %v5057_v62 = vadd.f32 %v5056_v35, %v5055_v19  ;;  %v5060_v15 = vsel %vm1247_vm1, %v4919_v8, %v4882_v33  ;;  %v7777_v35 = vld [vmem:[%s14128_s11 + $0x38] sm:$0xff]  }
 0x6df   : > { %v5064_v22 = vsel %vm1252_vm2, %v5057_v62, %v5020_v23 }
 0x6e0   : > { %v5066_v34 = vsel %vm1255_vm3, %v5060_v15, %v5064_v22 }
 0x6e1   : > { %7542 = vmatmul.mubr.f32.vlgmr.msra.gmra.mxu0 %v5066_v34 }
 0x6e2   : > { %7546 = vmatprep.mubr.msk.f32.mxu0 %vm7871_vm0, %v11213_v61  ;;  %7545 = vmatpush3.msk.msra.mxu0 %vm1341_vm4, %v4845_v25  ;;  %v14779_v25 = vld [vmem:[#allocation33_spill] sm:$0xff]  ;;  %v14807_v61 = vld [vmem:[#allocation12_spill] sm:$0xff] }
 0x6e3   : > { %7549 = vmatprep.subr.bf16.mxu0 %v7777_v35 }
 0x7a1   : > { %v5133_v8 = vpop.f32.mrf.mxu0 }
 0x7a2   : > { %v5137_v12 = vmul.f32 0.001953125, %v5133_v8 }
 0x7a3   : > { %v7543_v24 = vpop.f32.mrf.mxu0 }
 0x7a4   : > { %v5138_v19 = vmul.f32 %v5137_v12, %v5137_v12 }
 0x7a6   : > { %v5140_v15 = vrot.slane %v5138_v19, 6 }
 0x7a8   : > { %v5142_v37 = vsub.f32 %v5137_v12, %v5140_v15  ;;  %v14781_v15 = vld [vmem:[#allocation26_spill] sm:$0xff] }
 0x7aa   : > { %v5143_v14 = vadd.f32 1e-05, %v5142_v37 }
 0x7ac   : > { %7787 = vrsqrt.f32 %v5143_v14  ;;  %v14782_v14 = vld [vmem:[#allocation16_spill] sm:$0xff] }
 0x7b9   : > { %v7788_v50 = vpop.eup %7787 }
 0x7ba   : > { %v5145_v48 = vsel %vm1255_vm3, %v5137_v12, %v7788_v50 }
 0x7bb   : > { %7547 = vmatmul.mubr.msk.f32.vlgmr.msra.gmra.mxu0 %vm1337_vm5, %v5145_v48  ;;  %v14808_v48 = vld [vmem:[#allocation13_spill] sm:$0xff] }
 0x7bc   : > { %7550 = vmatpush3.bf16.msra.mxu0 %v7777_v35 }
 0x7bd   : > { %7551 = vmatprep.subr.bf16.mxu0 %v7778_v60 }
 0x7c0   : > { %7552 = vmatpush3.bf16.msra.mxu0 %v7778_v60 }
 0x7c1   : > { %7553 = vmatprep.subr.bf16.mxu0 %v7779_v43 }
 0x7c4   : > { %7554 = vmatpush3.bf16.msra.mxu0 %v7779_v43  ;;  %v14784_v43 = vld [vmem:[#allocation7_spill] sm:$0xff] }
 0x7c5   : > { %7555 = vmatprep.subr.bf16.mxu0 %v7780_v51 }
 0x7c8   : > { %7556 = vmatpush3.bf16.msra.mxu0 %v7780_v51  ;;  %v14792_v51 = vld [vmem:[#allocation11_spill] sm:$0xff] }
 0x7c9   : > { %7557 = vmatprep.subr.bf16.mxu0 %v7781_v47 }
 0x7cc   : > { %7558 = vmatpush3.bf16.msra.mxu0 %v7781_v47  ;;  %v14785_v47 = vld [vmem:[#allocation3_spill] sm:$0xff] }
 0x7cd   : > { %7559 = vmatprep.subr.bf16.mxu0 %v7782_v13 }
 0x7d0   : > { %7560 = vmatpush3.bf16.msra.mxu0 %v7782_v13 }
 0x7d1   : > { %7561 = vmatprep.subr.bf16.mxu0 %v7783_v57 }
 0x7d4   : > { %7562 = vmatpush3.bf16.msra.mxu0 %v7783_v57  ;;  %v14795_v57 = vld [vmem:[#allocation17_spill] sm:$0xff] }
 0x7d5   : > { %7563 = vmatprep.subr.bf16.mxu0 %v7784_v58 }
 0x7d8   : > { %7564 = vmatpush3.bf16.msra.mxu0 %v7784_v58  ;;  %v14802_v58 = vld [vmem:[#allocation25_spill] sm:$0xff] }
 0x87b   : > { %v5218_v17 = vpop.f32.mrf.mxu0 }
 0x87c   : > { %v5229_v9 = vrot.slane %v5218_v17, %v14778_v11  ;;  %v14803_v17 = vld [vmem:[#allocation27_spill] sm:$0xff] }
 0x87d   : > { %v7548_v33 = vpop.f32.mrf.mxu0 }
 0x87e   : > { %v5230_v23 = vcombine.high %v5229_v9, %v5229_v9  ;;  %v5237_v62 = vrot.slane %v5229_v9, %v14778_v11  ;;  %v14786_v9 = vld [vmem:[#allocation5_spill] sm:$0xff]  ;;  %v14804_v33 = vld [vmem:[#allocation28_spill] sm:$0xff] }
 0x880   : > { %v5244_v22 = vrot.slane %v5230_v23, %v14778_v11  ;;  %v5245_v34 = vcombine.high %v5237_v62, %v5237_v62  ;;  %v11251_v35 = vrot.slane %v5237_v62, %v14779_v25  ;;  %v14787_v62 = vld [vmem:[#allocation4_spill] sm:$0xff]  ;;  %v14788_v23 = vld [vmem:[#allocation6_spill] sm:$0xff] }
 0x882   : > { %v5246_v8 = vcombine.high %v5244_v22, %v5244_v22  ;;  %v11254_v12 = vrot.slane %v5244_v22, %v14779_v25  ;;  %v11257_v24 = vrot.slane %v5245_v34, %v14779_v25  ;;  %v14791_v34 = vld [vmem:[#allocation9_spill] sm:$0xff]  ;;  %v14797_v22 = vld [vmem:[#allocation19_spill] sm:$0xff]  ;;  %v14809_v50 = vsub.f32 %v10824_v21, %v11251_v35 }
 0x883   : > { %v14810_v19 = vsub.f32 %v14781_v15, %v11251_v35  ;;  %v14811_v11 = vsub.f32 %v14782_v14, %v11251_v35  ;;  %v14813_v21 = vsub.f32 %v14784_v43, %v11251_v35  ;;  %v14817_v43 = vsub.f32 %v10871_v16, %v11251_v35 }
 0x884   : > { %14780 = vst [vmem:[#allocation15_spill] sm:$0xff] %v11254_v12  ;;  %v11266_v60 = vrot.slane %v5246_v8, %v14779_v25  ;;  %v14790_v8 = vld [vmem:[#allocation10_spill] sm:$0xff]  ;;  %v14805_v25 = vld [vmem:[#allocation29_spill] sm:$0xff]  ;;  %v5319_v27 = vsub.f32 %v14807_v61, %v11254_v12  ;;  %v5320_v2 = vsub.f32 %v14808_v48, %v11254_v12  ;;  %v11394_v37 = vmul.f32 %v11257_v24, %v14809_v50 }
 0x885   : > { %v11400_v54 = vmul.f32 %v11257_v24, %v14810_v19  ;;  %v5333_v61 = vmul.f32 %v11257_v24, %v14811_v11  ;;  %v14812_v48 = vsub.f32 %v10829_v39, %v11251_v35  ;;  %v11414_v50 = vmul.f32 %v11257_v24, %v14813_v21 }
 0x886   : > { %14783 = vst [vmem:[#allocation26_spill] sm:$0xff] %v11266_v60  ;;  %v14814_v19 = vsub.f32 %v14785_v47, %v11251_v35  ;;  %v14815_v11 = vsub.f32 %v10841_v38, %v11251_v35  ;;  %v14816_v39 = vsub.f32 %v10853_v42, %v11251_v35  ;;  %v11434_v21 = vmul.f32 %v11257_v24, %v14817_v43 }
 0x887   : > { %v5334_v13 = vmul.f32 %v11257_v24, %v14812_v48  ;;  %v14818_v47 = vsub.f32 %v10881_v63, %v11251_v35  ;;  %v14819_v38 = vsub.f32 %v10864_v20, %v11251_v35  ;;  %v14820_v42 = vsub.f32 %v10877_v26, %v11251_v35 }
 0x888   : > { %v11420_v15 = vmul.f32 %v11257_v24, %v14814_v19  ;;  %v5337_v14 = vmul.f32 %v11257_v24, %v14815_v11  ;;  %v5338_v48 = vmul.f32 %v11257_v24, %v14816_v39  ;;  %v14821_v16 = vsub.f32 %v10890_v32, %v11251_v35 }
 0x889   : > { %v11440_v19 = vmul.f32 %v11257_v24, %v14818_v47  ;;  %v5341_v11 = vmul.f32 %v11257_v24, %v14819_v38  ;;  %v11450_v39 = vmul.f32 %v11257_v24, %v14820_v42  ;;  %v14822_v63 = vsub.f32 %v10901_v52, %v11251_v35 }
 0x88a   : > { %v11456_v43 = vmul.f32 %v11257_v24, %v14821_v16  ;;  %v14823_v20 = vsub.f32 %v10886_v49, %v11251_v35  ;;  %v14824_v38 = vsub.f32 %v10895_v30, %v11251_v35  ;;  %v14825_v42 = vsub.f32 %v14786_v9, %v11251_v35 }
 0x88b   : > { %v11462_v47 = vmul.f32 %v11257_v24, %v14822_v63  ;;  %v14826_v16 = vsub.f32 %v10917_v46, %v11251_v35  ;;  %v14827_v63 = vsub.f32 %v10904_v59, %v11251_v35 }
 0x88c   : > { %v11468_v26 = vmul.f32 %v11257_v24, %v14823_v20  ;;  %v11474_v32 = vmul.f32 %v11257_v24, %v14824_v38  ;;  %v11480_v52 = vmul.f32 %v11257_v24, %v14825_v42  ;;  %v14828_v20 = vsub.f32 %v14787_v62, %v11251_v35 }
 0x88d   : > { %v11486_v49 = vmul.f32 %v11257_v24, %v14826_v16  ;;  %v11492_v30 = vmul.f32 %v11257_v24, %v14827_v63  ;;  %v14829_v38 = vsub.f32 %v10926_v31, %v11251_v35  ;;  %v14830_v42 = vsub.f32 %v10937_v10, %v11251_v35 }
 0x88e   : > { %v11498_v9 = vmul.f32 %v11257_v24, %v14828_v20  ;;  %v14831_v16 = vsub.f32 %v10922_v41, %v11251_v35  ;;  %v14832_v63 = vsub.f32 %v10931_v53, %v11251_v35  ;;  %v14833_v20 = vsub.f32 %v10944_v56, %v11251_v35 }
 0x88f   : > { %v11504_v46 = vmul.f32 %v11257_v24, %v14829_v38  ;;  %v11510_v59 = vmul.f32 %v11257_v24, %v14830_v42  ;;  %v14834_v38 = vsub.f32 %v10953_v29, %v11251_v35  ;;  %v14835_v42 = vsub.f32 %v10940_v18, %v11251_v35 }
 0x890   : > { %v11516_v62 = vmul.f32 %v11257_v24, %v14831_v16  ;;  %v11522_v31 = vmul.f32 %v11257_v24, %v14832_v63  ;;  %v11528_v10 = vmul.f32 %v11257_v24, %v14833_v20  ;;  %v14836_v16 = vsub.f32 %v10949_v1, %v11251_v35 }
 0x891   : > { %v11534_v41 = vmul.f32 %v11257_v24, %v14834_v38  ;;  %v11540_v53 = vmul.f32 %v11257_v24, %v14835_v42  ;;  %v14837_v63 = vsub.f32 %v10962_v6, %v11251_v35  ;;  %v14838_v20 = vsub.f32 %v10973_v7, %v11251_v35 }
 0x892   : > { %v11546_v56 = vmul.f32 %v11257_v24, %v14836_v16  ;;  %v14839_v38 = vsub.f32 %v10958_v44, %v11251_v35  ;;  %v14841_v42 = vsub.f32 %v10967_v3, %v11251_v35  ;;  %v14843_v16 = vsub.f32 %v14788_v23, %v11254_v12 }
 0x893   : > { %v11552_v29 = vmul.f32 %v11257_v24, %v14837_v63  ;;  %v11558_v18 = vmul.f32 %v11257_v24, %v14838_v20  ;;  %v14845_v63 = vsub.f32 %v10983_v55, %v11254_v12  ;;  %v14846_v20 = vsub.f32 %v10993_v40, %v11254_v12 }
 0x894   : > { %v11564_v1 = vmul.f32 %v11257_v24, %v14839_v38  ;;  %v11570_v6 = vmul.f32 %v11257_v24, %v14841_v42  ;;  %v11576_v7 = vmul.f32 %v11266_v60, %v14843_v16  ;;  %v14847_v35 = vsub.f32 %v14790_v8, %v11254_v12 }
 0x895   : > { %v11582_v44 = vmul.f32 %v11266_v60, %v14845_v63  ;;  %v11588_v3 = vmul.f32 %v11266_v60, %v14846_v20  ;;  %v5393_v23 = vmul.f32 %v11266_v60, %v5319_v27  ;;  %v5394_v38 = vmul.f32 %v11266_v60, %v5320_v2  ;;  %v11625_v27 = vld [vmem:[%s14126_s9] ss:$0 sm:$0xff] }
 0x896   : > { %14840 = vst [vmem:[#allocation16_spill] sm:$0xff] %v11564_v1  ;;  %14842 = vst [vmem:[#allocation7_spill] sm:$0xff] %v11570_v6  ;;  %v11594_v24 = vmul.f32 %v11266_v60, %v14847_v35  ;;  %v14848_v55 = vsub.f32 %v11021_v5, %v11254_v12  ;;  %v14849_v40 = vsub.f32 %v11018_v0, %v11254_v12 }
 0x897   : > { %14844 = vst [vmem:[#allocation3_spill] sm:$0xff] %v11576_v7  ;;  %v14850_v8 = vsub.f32 %v11024_v4, %v11254_v12  ;;  %v14851_v2 = vsub.f32 %v11034_v28, %v11254_v12  ;;  %v14852_v0 = vsub.f32 %v11043_v36, %v11254_v12  ;;  %v14853_v4 = vsub.f32 %v14791_v34, %v11254_v12 }
 0x898   : > { %v11602_v42 = vmul.f32 %v11266_v60, %v14848_v55  ;;  %v11608_v16 = vmul.f32 %v11266_v60, %v14849_v40  ;;  %v14854_v28 = vsub.f32 %v14792_v51, %v11254_v12  ;;  %v14855_v40 = vld [vmem:[#allocation21_spill] sm:$0xff] }
 0x899   : > { %v11614_v63 = vmul.f32 %v11266_v60, %v14850_v8  ;;  %v11620_v5 = vmul.f32 %v11266_v60, %v14851_v2  ;;  %v11631_v20 = vmul.f32 %v11266_v60, %v14852_v0  ;;  %v11637_v35 = vmul.f32 %v11266_v60, %v14853_v4  ;;  %v14858_v2 = vld [vmem:[#allocation34_spill] sm:$0xff] }
 0x89a   : > { %v11643_v55 = vmul.f32 %v11266_v60, %v14854_v28  ;;  %v14856_v8 = vsub.f32 %v14855_v40, %v11254_v12  ;;  %v14859_v0 = vsub.f32 %v14858_v2, %v11254_v12  ;;  %v14861_v4 = vsub.f32 %v14795_v57, %v11254_v12  ;;  %v14862_v28 = vld [vmem:[#allocation18_spill] sm:$0xff] }
 0x89b   : > { %v14863_v7 = vsub.f32 %v14862_v28, %v11254_v12 }
 0x89c   : > { %v11649_v36 = vmul.f32 %v11266_v60, %v14856_v8  ;;  %v11655_v34 = vmul.f32 %v11266_v60, %v14859_v0  ;;  %v11661_v51 = vmul.f32 %v11266_v60, %v14861_v4  ;;  %v14864_v8 = vsub.f32 %v14797_v22, %v11254_v12  ;;  %v14868_v4 = vld [vmem:[#allocation20_spill] sm:$0xff] }
 0x89d   : > { %v11667_v40 = vmul.f32 %v11266_v60, %v14863_v7  ;;  %v14866_v0 = vsub.f32 %v11103_v45, %v11254_v12  ;;  %v14869_v6 = vsub.f32 %v14868_v4, %v11254_v12  ;;  %v14870_v7 = vld [vmem:[#allocation22_spill] sm:$0xff] }
 0x89e   : > { %14857 = vst [vmem:[#allocation5_spill] sm:$0xff] %v11649_v36  ;;  %14860 = vst [vmem:[#allocation4_spill] sm:$0xff] %v11655_v34  ;;  %v11673_v2 = vmul.f32 %v11266_v60, %v14864_v8  ;;  %v14871_v1 = vsub.f32 %v14870_v7, %v11254_v12  ;;  %v14872_v8 = vld [vmem:[#allocation36_spill] sm:$0xff]  ;;  %v5404_v36 = vmul.f32 %v11625_v27, %v5334_v13 }
 0x89f   : > { %v11679_v57 = vmul.f32 %v11266_v60, %v14866_v0  ;;  %v11685_v28 = vmul.f32 %v11266_v60, %v14869_v6  ;;  %v14875_v0 = vld [vmem:[#allocation23_spill] sm:$0xff]  ;;  %v14885_v13 = vsub.f32 %v14802_v58, %v11254_v12 }
 0x8a0   : > { %14865 = vst [vmem:[#allocation6_spill] sm:$0xff] %v11673_v2  ;;  %v11691_v22 = vmul.f32 %v11266_v60, %v14871_v1  ;;  %v14873_v2 = vsub.f32 %v14872_v8, %v11254_v12  ;;  %v14878_v6 = vld [vmem:[#allocation31_spill] sm:$0xff]  ;;  %v5403_v1 = vmul.f32 %v11625_v27, %v5333_v61 }
 0x8a1   : > { %14867 = vst [vmem:[#allocation10_spill] sm:$0xff] %v11679_v57  ;;  %v14876_v57 = vsub.f32 %v14875_v0, %v11254_v12  ;;  %v14879_v34 = vsub.f32 %v14878_v6, %v11254_v12  ;;  %v14880_v8 = vld [vmem:[#allocation35_spill] sm:$0xff]  ;;  %v11734_v61 = vmul.f32 %v11266_v60, %v14885_v13  ;;  %v14891_v13 = vld [vmem:[#allocation30_spill] sm:$0xff] }
 0x8a2   : > { %v11697_v45 = vmul.f32 %v11266_v60, %v14873_v2  ;;  %v11716_v2 = vld [vmem:[%s14127_s10] ss:$0 sm:$0xff]  ;;  %v14881_v0 = vsub.f32 %v14880_v8, %v11254_v12 }
 0x8a3   : > { %v11703_v4 = vmul.f32 %v11266_v60, %v14876_v57  ;;  %v11709_v7 = vmul.f32 %v11266_v60, %v14879_v34  ;;  %14886 = vst [vmem:[#allocation19_spill] sm:$0xff] %v11734_v61  ;;  %v14892_v61 = vsub.f32 %v14891_v13, %v11254_v12 }
 0x8a4   : > { %14874 = vst [vmem:[#allocation9_spill] sm:$0xff] %v11697_v45  ;;  %v11722_v57 = vmul.f32 %v11266_v60, %v14881_v0  ;;  %v14887_v45 = vsub.f32 %v14803_v17, %v11254_v12  ;;  %v14888_v0 = vsub.f32 %v14804_v33, %v11254_v12  ;;  %v5411_v33 = vmul.f32 %v11625_v27, %v5341_v11 }
 0x8a5   : > { %14877 = vst [vmem:[#allocation11_spill] sm:$0xff] %v11703_v4  ;;  %v14882_v4 = vld [vmem:[#allocation24_spill] sm:$0xff]  ;;  %v11758_v17 = vmul.f32 %v11266_v60, %v14892_v61  ;;  %v5401_v61 = vmul.f32 %v11625_v27, %v11394_v37  ;;  %v5415_v11 = vmul.f32 %v11625_v27, %v11468_v26 }
 0x8a6   : > { %v14883_v6 = vsub.f32 %v14882_v4, %v11254_v12  ;;  %v11740_v8 = vmul.f32 %v11266_v60, %v14887_v45  ;;  %v11746_v4 = vmul.f32 %v11266_v60, %v14888_v0  ;;  %v5407_v45 = vmul.f32 %v11625_v27, %v5337_v14 }
 0x8a7   : > { %v11764_v0 = vmul.f32 %v11625_v27, %v5393_v23  ;;  %v5402_v14 = vmul.f32 %v11625_v27, %v11400_v54  ;;  %v5405_v23 = vmul.f32 %v11625_v27, %v11414_v50  ;;  %v5471_v13 = vadd.f32 %v11716_v2, %v5401_v61 }
 0x8a8   : > { %v11728_v34 = vmul.f32 %v11266_v60, %v14883_v6  ;;  %v14889_v6 = vsub.f32 %v14805_v25, %v11254_v12  ;;  %v11767_v25 = vmul.f32 %v11625_v27, %v5394_v38  ;;  %v5406_v38 = vmul.f32 %v11625_v27, %v11420_v15 }
 0x8a9   : > { %v5472_v37 = vadd.f32 %v11716_v2, %v5402_v14  ;;  %v5416_v54 = vmul.f32 %v11625_v27, %v11474_v32  ;;  %v5475_v26 = vadd.f32 %v11716_v2, %v5405_v23  ;;  %v5420_v50 = vmul.f32 %v11625_v27, %v11498_v9 }
 0x8aa   : > { %14884 = vst [vmem:[#allocation17_spill] sm:$0xff] %v11728_v34  ;;  %v11752_v58 = vmul.f32 %v11266_v60, %v14889_v6  ;;  %v5408_v34 = vmul.f32 %v11625_v27, %v5338_v48  ;;  %v5473_v6 = vadd.f32 %v11716_v2, %v5403_v1  ;;  %v5412_v48 = vmul.f32 %v11625_v27, %v11450_v39 }
 0x8ab   : > { %v5419_v39 = vmul.f32 %v11625_v27, %v11492_v30  ;;  %v5476_v60 = vadd.f32 %v11716_v2, %v5406_v38  ;;  %v5535_v15 = vmax.f32 %v5471_v13, 0.0  ;;  %v5539_v14 = vmax.f32 %v5475_v26, 0.0 }
 0x8ac   : > { %14890 = vst [vmem:[#allocation25_spill] sm:$0xff] %v11752_v58  ;;  %v5474_v58 = vadd.f32 %v11716_v2, %v5404_v36  ;;  %v5537_v1 = vmax.f32 %v5473_v6, 0.0  ;;  %v5536_v6 = vmax.f32 %v5472_v37, 0.0  ;;  %v5410_v32 = vmul.f32 %v11625_v27, %v11440_v19 }
 0x8ad   : > { %v5540_v12 = vmax.f32 %v5476_v60, 0.0  ;;  %v5423_v30 = vmul.f32 %v11625_v27, %v11516_v62  ;;  %v5424_v23 = vmul.f32 %v11625_v27, %v11522_v31  ;;  %v11803_v9 = vmul.f32 %v11625_v27, %v11540_v53 }
 0x8ae   : > { %v5538_v36 = vmax.f32 %v5474_v58, 0.0  ;;  %v5409_v58 = vmul.f32 %v11625_v27, %v11434_v21  ;;  %v5599_v38 = vpack.c.bf16 %v5536_v6, %v5535_v15  ;;  %v11807_v21 = vmul.f32 %v11625_v27, %v11546_v56 }
 0x8af   : > { %v11811_v60 = vmul.f32 %v11625_v27, %v11582_v44  ;;  %v5477_v19 = vadd.f32 %v11716_v2, %v5407_v45  ;;  %v5478_v62 = vadd.f32 %v11716_v2, %v5408_v34  ;;  %v11817_v31 = vmul.f32 %v11625_v27, %v11588_v3 }
 0x8b0   : > { %v5600_v61 = vpack.c.bf16 %v5538_v36, %v5537_v1  ;;  %7565 = vmatprep.mubr.bf16.mxu0 %v5599_v38  ;;  %v5601_v53 = vpack.c.bf16 %v5540_v12, %v5539_v14  ;;  %v5479_v1 = vadd.f32 %v11716_v2, %v5409_v58  ;;  %v5480_v36 = vadd.f32 %v11716_v2, %v5410_v32 }
 0x8b1   : > { %v11823_v56 = vmul.f32 %v11625_v27, %v11608_v16  ;;  %v11827_v44 = vmul.f32 %v11625_v27, %v11614_v63  ;;  %v5413_v34 = vmul.f32 %v11625_v27, %v11456_v43  ;;  %v5414_v3 = vmul.f32 %v11625_v27, %v11462_v47 }
 0x8b2   : > { %7566 = vmatmul.mubr.bf16.vlgmr.msra.gmra.mxu0 %v5600_v61  ;;  %v11835_v12 = vmul.f32 %v11625_v27, %v11637_v35  ;;  %v11839_v45 = vmul.f32 %v11625_v27, %v11643_v55  ;;  %v5417_v16 = vmul.f32 %v11625_v27, %v11480_v52  ;;  %v5418_v63 = vmul.f32 %v11625_v27, %v11486_v49 }
 0x8b3   : > { %7569 = vmatprep.mubr.bf16.mxu0 %v5601_v53  ;;  %v11847_v43 = vmul.f32 %v11625_v27, %v11661_v51  ;;  %v5541_v47 = vmax.f32 %v5477_v19, 0.0  ;;  %v5542_v13 = vmax.f32 %v5478_v62, 0.0  ;;  %v5481_v35 = vadd.f32 %v11716_v2, %v5411_v33 }
 0x8b4   : > { %v5543_v37 = vmax.f32 %v5479_v1, 0.0  ;;  %v5544_v26 = vmax.f32 %v5480_v36, 0.0  ;;  %v5482_v55 = vadd.f32 %v11716_v2, %v5412_v48  ;;  %v5485_v15 = vadd.f32 %v11716_v2, %v5415_v11 }
 0x8b5   : > { %v5483_v6 = vadd.f32 %v11716_v2, %v5413_v34  ;;  %v5484_v52 = vadd.f32 %v11716_v2, %v5414_v3  ;;  %v5421_v49 = vmul.f32 %v11625_v27, %v11504_v46  ;;  %v5422_v51 = vmul.f32 %v11625_v27, %v11510_v59 }
 0x8b6   : > { %v11860_v58 = vmul.f32 %v11625_v27, %v11667_v40  ;;  %v5486_v33 = vadd.f32 %v11716_v2, %v5416_v54  ;;  %v5487_v48 = vadd.f32 %v11716_v2, %v5417_v16  ;;  %v5488_v11 = vadd.f32 %v11716_v2, %v5418_v63 }
 0x8b7   : > { %v11867_v61 = vmul.f32 %v11625_v27, %v11685_v28  ;;  %v5602_v14 = vpack.c.bf16 %v5542_v13, %v5541_v47  ;;  %v5489_v46 = vadd.f32 %v11716_v2, %v5419_v39  ;;  %v5490_v32 = vadd.f32 %v11716_v2, %v5420_v50 }
 0x8b8   : > { %v5603_v59 = vpack.c.bf16 %v5544_v26, %v5543_v37  ;;  %v5545_v38 = vmax.f32 %v5481_v35, 0.0  ;;  %v5546_v19 = vmax.f32 %v5482_v55, 0.0  ;;  %v5549_v40 = vmax.f32 %v5485_v15, 0.0 }
 0x8b9   : > { %v5547_v62 = vmax.f32 %v5483_v6, 0.0  ;;  %v5548_v54 = vmax.f32 %v5484_v52, 0.0  ;;  %v5491_v53 = vadd.f32 %v11716_v2, %v5421_v49  ;;  %v5492_v1 = vadd.f32 %v11716_v2, %v5422_v51 }
 0x8ba   : > { %7570 = vmatmul.mubr.bf16.gmra.mxu0 %v5602_v14  ;;  %v5550_v36 = vmax.f32 %v5486_v33, 0.0  ;;  %v5551_v28 = vmax.f32 %v5487_v48, 0.0  ;;  %v5552_v34 = vmax.f32 %v5488_v11, 0.0  ;;  %v5425_v39 = vmul.f32 %v11625_v27, %v11528_v10 }
 0x8bb   : > { %7573 = vmatprep.mubr.bf16.mxu0 %v5603_v59  ;;  %v5553_v3 = vmax.f32 %v5489_v46, 0.0  ;;  %v5554_v50 = vmax.f32 %v5490_v32, 0.0  ;;  %v11876_v16 = vadd.f32 %v11716_v2, %v5423_v30  ;;  %v11879_v63 = vadd.f32 %v11716_v2, %v5424_v23 }
 0x8bc   : > { %v11883_v47 = vmul.f32 %v11625_v27, %v11691_v22  ;;  %v11887_v13 = vmul.f32 %v11625_v27, %v11709_v7  ;;  %v11891_v35 = vmul.f32 %v11625_v27, %v11722_v57  ;;  %v5426_v10 = vmul.f32 %v11625_v27, %v11534_v41 }
 0x8bd   : > { %v11897_v30 = vmul.f32 %v11625_v27, %v11740_v8  ;;  %v11901_v23 = vmul.f32 %v11625_v27, %v11746_v4  ;;  %v5555_v22 = vmax.f32 %v5491_v53, 0.0  ;;  %v5556_v37 = vmax.f32 %v5492_v1, 0.0 }
 0x8be   : > { %v5604_v26 = vpack.c.bf16 %v5546_v19, %v5545_v38  ;;  %v5605_v7 = vpack.c.bf16 %v5548_v54, %v5547_v62  ;;  %v5606_v55 = vpack.c.bf16 %v5550_v36, %v5549_v40  ;;  %v11904_v15 = vadd.f32 %v11716_v2, %v5425_v39  ;;  %v14894_v39 = vld [vmem:[#allocation4_spill] sm:$0xff] }
 0x8bf   : > { %v5607_v57 = vpack.c.bf16 %v5552_v34, %v5551_v28  ;;  %v11906_v6 = vpack.c.bf16 %v5554_v50, %v5553_v3  ;;  %v5557_v41 = vmax.f32 %v11876_v16, 0.0  ;;  %v5558_v8 = vmax.f32 %v11879_v63, 0.0  ;;  %v14893_v34 = vld [vmem:[#allocation5_spill] sm:$0xff] }
 0x8c0   : > { %v11911_v52 = vadd.f32 %v11716_v2, %v5426_v10  ;;  %v11915_v4 = vadd.f32 %v11716_v2, %v11803_v9  ;;  %v5505_v49 = vadd.f32 %v11716_v2, %v11811_v60  ;;  %v5506_v51 = vadd.f32 %v11716_v2, %v11817_v31 }
 0x8c1   : > { %v11921_v33 = vpack.c.bf16 %v5556_v37, %v5555_v22  ;;  %v11925_v48 = vmul.f32 %v11625_v27, %v11552_v29  ;;  %v5437_v11 = vmul.f32 %v11625_v27, %v11594_v24  ;;  %v5438_v9 = vmul.f32 %v11625_v27, %v11602_v42 }
 0x8c2   : > { %7574 = vmatmul.mubr.bf16.gmra.mxu0 %v5604_v26  ;;  %v5559_v14 = vmax.f32 %v11904_v15, 0.0  ;;  %v11934_v60 = vmul.f32 %v11625_v27, %v11558_v18  ;;  %v5569_v31 = vmax.f32 %v5505_v49, 0.0  ;;  %v5570_v46 = vmax.f32 %v5506_v51, 0.0 }
 0x8c3   : > { %7577 = vmatprep.mubr.bf16.mxu0 %v5605_v7  ;;  %v5507_v32 = vadd.f32 %v11716_v2, %v5437_v11  ;;  %v5508_v29 = vadd.f32 %v11716_v2, %v5438_v9  ;;  %v5509_v59 = vadd.f32 %v11716_v2, %v11823_v56  ;;  %v5510_v24 = vadd.f32 %v11716_v2, %v11827_v44  ;;  %v14895_v11 = vld [vmem:[#allocation6_spill] sm:$0xff] }
 0x8c4   : > { %v5560_v42 = vmax.f32 %v11911_v52, 0.0  ;;  %v11943_v38 = vpack.c.bf16 %v5570_v46, %v5569_v31  ;;  %v5441_v18 = vmul.f32 %v11625_v27, %v11620_v5  ;;  %v5442_v19 = vmul.f32 %v11625_v27, %v11631_v20  ;;  %v14896_v31 = vld [vmem:[#allocation10_spill] sm:$0xff] }
 0x8c5   : > { %v5571_v40 = vmax.f32 %v5507_v32, 0.0  ;;  %v5572_v62 = vmax.f32 %v5508_v29, 0.0  ;;  %v5573_v54 = vmax.f32 %v5509_v59, 0.0  ;;  %v5574_v53 = vmax.f32 %v5510_v24, 0.0 }
 0x8c6   : > { %v5511_v1 = vadd.f32 %v11716_v2, %v5441_v18  ;;  %v5512_v56 = vadd.f32 %v11716_v2, %v5442_v19  ;;  %v5513_v44 = vadd.f32 %v11716_v2, %v11835_v12  ;;  %v5514_v36 = vadd.f32 %v11716_v2, %v11839_v45 }
 0x8c7   : > { %v11955_v28 = vpack.c.bf16 %v5572_v62, %v5571_v40  ;;  %v11957_v5 = vpack.c.bf16 %v5574_v53, %v5573_v54  ;;  %v5445_v20 = vmul.f32 %v11625_v27, %v14893_v34  ;;  %v5446_v3 = vmul.f32 %v11625_v27, %v14894_v39  ;;  %v14897_v40 = vld [vmem:[#allocation9_spill] sm:$0xff]  ;;  %v14898_v54 = vld [vmem:[#allocation11_spill] sm:$0xff] }
 0x8c8   : > { %v5575_v50 = vmax.f32 %v5511_v1, 0.0  ;;  %v5576_v10 = vmax.f32 %v5512_v56, 0.0  ;;  %v5577_v22 = vmax.f32 %v5513_v44, 0.0  ;;  %v5578_v37 = vmax.f32 %v5514_v36, 0.0 }
 0x8c9   : > { %v5515_v12 = vadd.f32 %v11716_v2, %v5445_v20  ;;  %v5516_v26 = vadd.f32 %v11716_v2, %v5446_v3  ;;  %v5517_v45 = vadd.f32 %v11716_v2, %v11847_v43  ;;  %v5518_v7 = vadd.f32 %v11716_v2, %v11860_v58 }
 0x8ca   : > { %7578 = vmatmul.mubr.bf16.gmra.mxu0 %v5606_v55  ;;  %v11969_v49 = vpack.c.bf16 %v5576_v10, %v5575_v50  ;;  %v11971_v51 = vpack.c.bf16 %v5578_v37, %v5577_v22  ;;  %v5449_v9 = vmul.f32 %v11625_v27, %v14895_v11  ;;  %v5450_v55 = vmul.f32 %v11625_v27, %v14896_v31  ;;  %v14899_v50 = vld [vmem:[#allocation17_spill] sm:$0xff]  ;;  %v14900_v22 = vld [vmem:[#allocation19_spill] sm:$0xff] }
 0x8cb   : > { %7581 = vmatprep.mubr.bf16.mxu0 %v5607_v57  ;;  %v5579_v46 = vmax.f32 %v5515_v12, 0.0  ;;  %v5580_v32 = vmax.f32 %v5516_v26, 0.0  ;;  %v5581_v29 = vmax.f32 %v5517_v45, 0.0  ;;  %v5582_v59 = vmax.f32 %v5518_v7, 0.0 }
 0x8cc   : > { %v5519_v43 = vadd.f32 %v11716_v2, %v5449_v9  ;;  %v5520_v24 = vadd.f32 %v11716_v2, %v5450_v55  ;;  %v5521_v58 = vadd.f32 %v11716_v2, %v11867_v61  ;;  %v5522_v57 = vadd.f32 %v11716_v2, %v11883_v47 }
 0x8cd   : > { %v11983_v18 = vpack.c.bf16 %v5580_v32, %v5579_v46  ;;  %v11985_v19 = vpack.c.bf16 %v5582_v59, %v5581_v29  ;;  %v5453_v62 = vmul.f32 %v11625_v27, %v14897_v40  ;;  %v5454_v53 = vmul.f32 %v11625_v27, %v14898_v54 }
 0x8ce   : > { %v5583_v1 = vmax.f32 %v5519_v43, 0.0  ;;  %v5584_v56 = vmax.f32 %v5520_v24, 0.0  ;;  %v5585_v44 = vmax.f32 %v5521_v58, 0.0  ;;  %v5586_v36 = vmax.f32 %v5522_v57, 0.0 }
 0x8cf   : > { %v5523_v34 = vadd.f32 %v11716_v2, %v5453_v62  ;;  %v5524_v61 = vadd.f32 %v11716_v2, %v5454_v53  ;;  %v5525_v47 = vadd.f32 %v11716_v2, %v11887_v13  ;;  %v5526_v20 = vadd.f32 %v11716_v2, %v11891_v35 }
 0x8d0   : > { %v11997_v39 = vpack.c.bf16 %v5584_v56, %v5583_v1  ;;  %v11999_v3 = vpack.c.bf16 %v5586_v36, %v5585_v44  ;;  %v5457_v10 = vmul.f32 %v11625_v27, %v14899_v50  ;;  %v5458_v37 = vmul.f32 %v11625_v27, %v14900_v22  ;;  %v14902_v44 = vld [vmem:[#allocation8_spill] sm:$0xff]  ;;  %v14903_v36 = vld [vmem:[#allocation15_spill] sm:$0xff] }
 0x8d1   : > { %v5587_v12 = vmax.f32 %v5523_v34, 0.0  ;;  %v5588_v26 = vmax.f32 %v5524_v61, 0.0  ;;  %v5589_v45 = vmax.f32 %v5525_v47, 0.0  ;;  %v5590_v7 = vmax.f32 %v5526_v20, 0.0  ;;  %v14905_v34 = vld [vmem:[#allocation26_spill] sm:$0xff]  ;;  %v14907_v20 = vld [vmem:[#allocation7_spill] sm:$0xff] }
 0x8d2   : > { %7582 = vmatmul.mubr.bf16.gmra.mxu0 %v11906_v6  ;;  %v5527_v13 = vadd.f32 %v11716_v2, %v5457_v10  ;;  %v5528_v35 = vadd.f32 %v11716_v2, %v5458_v37  ;;  %v5529_v11 = vadd.f32 %v11716_v2, %v11897_v30  ;;  %v5530_v9 = vadd.f32 %v11716_v2, %v11901_v23  ;;  %v14901_v6 = vld [vmem:[#allocation25_spill] sm:$0xff]  ;;  %v14908_v10 = vld [vmem:[#allocation3_spill] sm:$0xff] }
 0x8d3   : > { %7585 = vmatprep.mubr.bf16.mxu0 %v11921_v33  ;;  %v12013_v31 = vpack.c.bf16 %v5588_v26, %v5587_v12  ;;  %v12015_v55 = vpack.c.bf16 %v5590_v7, %v5589_v45  ;;  %v5461_v46 = vmul.f32 %v11625_v27, %v14901_v6  ;;  %v5462_v33 = vmul.f32 %v11625_v27, %v11758_v17 }
 0x8d4   : > { %v5591_v32 = vmax.f32 %v5527_v13, 0.0  ;;  %v5592_v29 = vmax.f32 %v5528_v35, 0.0  ;;  %v5593_v59 = vmax.f32 %v5529_v11, 0.0  ;;  %v5594_v43 = vmax.f32 %v5530_v9, 0.0 }
 0x8d5   : > { %v5531_v24 = vadd.f32 %v11716_v2, %v5461_v46  ;;  %v5532_v30 = vadd.f32 %v11716_v2, %v5462_v33  ;;  %v5533_v23 = vadd.f32 %v11716_v2, %v11764_v0  ;;  %v5534_v58 = vadd.f32 %v11716_v2, %v11767_v25  ;;  %v5996_v46 = vld [vmem:[%s14132_s15 + $0x18] sm:$0xff] }
 0x8d6   : > { %v5610_v57 = vpack.c.bf16 %v5558_v8, %v5557_v41  ;;  %v5498_v17 = vadd.f32 %v11716_v2, %v11807_v21  ;;  %v5627_v40 = vpack.c.bf16 %v5592_v29, %v5591_v32  ;;  %v5628_v62 = vpack.c.bf16 %v5594_v43, %v5593_v59  ;;  %v14906_v8 = vld [vmem:[#allocation16_spill] sm:$0xff]  ;;  %v12123_v29 = vld [vmem:[%s14129_s12] ss:$0 sm:$0xff] }
 0x8d7   : > { %v5595_v54 = vmax.f32 %v5531_v24, 0.0  ;;  %v5596_v53 = vmax.f32 %v5532_v30, 0.0  ;;  %v5597_v1 = vmax.f32 %v5533_v23, 0.0  ;;  %v5598_v56 = vmax.f32 %v5534_v58, 0.0 }
 0x8d8   : > { %v14904_v0 = vsub.f32 %v14902_v44, %v14903_v36  ;;  %v5611_v25 = vpack.c.bf16 %v5560_v42, %v5559_v14  ;;  %v5499_v16 = vadd.f32 %v11716_v2, %v11925_v48  ;;  %v5500_v21 = vadd.f32 %v11716_v2, %v11934_v60 }
 0x8d9   : > { %v5629_v63 = vpack.c.bf16 %v5596_v53, %v5595_v54  ;;  %v5630_v41 = vpack.c.bf16 %v5598_v56, %v5597_v1  ;;  %v5431_v47 = vmul.f32 %v11625_v27, %v14906_v8  ;;  %v5432_v50 = vmul.f32 %v11625_v27, %v14907_v20 }
 0x8da   : > { %v5364_v61 = vmul.f32 %v14905_v34, %v14904_v0  ;;  %7586 = vmatmul.mubr.bf16.gmra.mxu0 %v5610_v57  ;;  %v5561_v15 = vmax.f32 %v11915_v4, 0.0  ;;  %v5562_v52 = vmax.f32 %v5498_v17, 0.0  ;;  %v5563_v14 = vmax.f32 %v5499_v16, 0.0 }
 0x8db   : > { %7589 = vmatprep.mubr.bf16.mxu0 %v5611_v25  ;;  %v5564_v42 = vmax.f32 %v5500_v21, 0.0  ;;  %v5433_v48 = vmul.f32 %v11625_v27, %v14908_v10  ;;  %v5501_v37 = vadd.f32 %v11716_v2, %v5431_v47  ;;  %v5502_v12 = vadd.f32 %v11716_v2, %v5432_v50 }
 0x8dc   : > { %v5434_v60 = vmul.f32 %v11625_v27, %v5364_v61  ;;  %v5612_v22 = vpack.c.bf16 %v5562_v52, %v5561_v15  ;;  %v6008_v27 = vld [vmem:[%s14132_s15 + $0x78] sm:$0xff] }
 0x8dd   : > { %v5613_v26 = vpack.c.bf16 %v5564_v42, %v5563_v14  ;;  %v5503_v45 = vadd.f32 %v11716_v2, %v5433_v48  ;;  %v5565_v4 = vmax.f32 %v5501_v37, 0.0  ;;  %v5566_v13 = vmax.f32 %v5502_v12, 0.0  ;;  %7630 = vmatpush3.msra.mxu1 %v6008_v27  ;;  %v5995_v14 = vld [vmem:[%s14132_s15 + $0x10] sm:$0xff]  ;;  %v5994_v42 = vld [vmem:[%s14132_s15 + $0x8] sm:$0xff]  ;;  %v12175_v37 = vld [vmem:[#allocation2] sm:$0xff] }
 0x8de   : > { %v5504_v7 = vadd.f32 %v11716_v2, %v5434_v60  ;;  %v14909_v2 = vld [vmem:[#allocation14_spill] sm:$0xff]  ;;  %v5993_v12 = vld [vmem:[%s14132_s15] sm:$0xff] }
 0x8df   : > { %v5567_v35 = vmax.f32 %v5503_v45, 0.0  ;;  %v5614_v9 = vpack.c.bf16 %v5566_v13, %v5565_v4  ;;  %7631 = vmatprep.subr.mxu1 %v14909_v2 }
 0x8e0   : > { %v5568_v11 = vmax.f32 %v5504_v7, 0.0 }
 0x8e2   : > { %7590 = vmatmul.mubr.bf16.gmra.mxu0 %v5612_v22  ;;  %v5615_v6 = vpack.c.bf16 %v5568_v11, %v5567_v35 }
 0x8e3   : > { %7593 = vmatprep.mubr.bf16.mxu0 %v5613_v26 }
 0x8ea   : > { %7594 = vmatmul.mubr.bf16.gmra.mxu0 %v5614_v9 }
 0x8eb   : > { %7597 = vmatprep.mubr.bf16.mxu0 %v5615_v6 }
 0x8f2   : > { %7598 = vmatmul.mubr.bf16.gmra.mxu0 %v11943_v38  ;;  %v6007_v38 = vld [vmem:[%s14132_s15 + $0x70] sm:$0xff] }
 0x8f3   : > { %7601 = vmatprep.mubr.bf16.mxu0 %v11955_v28  ;;  %7632 = vmatpush3.msra.mxu1 %v6007_v38  ;;  %v6006_v28 = vld [vmem:[%s14132_s15 + $0x68] sm:$0xff] }
 0x8f4   : > { %7633 = vmatprep.subr.mxu1 %v14909_v2 }
 0x8f5   : > { %7634 = vmatpush3.msra.mxu1 %v6006_v28 }
 0x8f6   : > { %7635 = vmatprep.subr.mxu1 %v14909_v2 }
 0x8fa   : > { %7602 = vmatmul.mubr.bf16.gmra.mxu0 %v11957_v5  ;;  %v6005_v5 = vld [vmem:[%s14132_s15 + $0x60] sm:$0xff] }
 0x8fb   : > { %7605 = vmatprep.mubr.bf16.mxu0 %v11969_v49  ;;  %7636 = vmatpush3.msra.mxu1 %v6005_v5  ;;  %v6004_v49 = vld [vmem:[%s14132_s15 + $0x58] sm:$0xff] }
 0x8fc   : > { %7637 = vmatprep.subr.mxu1 %v14909_v2 }
 0x8fd   : > { %7638 = vmatpush3.msra.mxu1 %v6004_v49 }
 0x8fe   : > { %7639 = vmatprep.subr.mxu1 %v14909_v2 }
 0x902   : > { %7606 = vmatmul.mubr.bf16.gmra.mxu0 %v11971_v51  ;;  %v6003_v51 = vld [vmem:[%s14132_s15 + $0x50] sm:$0xff] }
 0x903   : > { %7609 = vmatprep.mubr.bf16.mxu0 %v11983_v18  ;;  %v6002_v18 = vld [vmem:[%s14132_s15 + $0x48] sm:$0xff]  ;;  %7640 = vmatpush3.msra.mxu1 %v6003_v51 }
 0x904   : > { %7641 = vmatprep.subr.mxu1 %v14909_v2 }
 0x905   : > { %7642 = vmatpush3.msra.mxu1 %v6002_v18 }
 0x906   : > { %7643 = vmatprep.subr.mxu1 %v14909_v2 }
 0x90a   : > { %7610 = vmatmul.mubr.bf16.gmra.mxu0 %v11985_v19  ;;  %v6001_v19 = vld [vmem:[%s14132_s15 + $0x40] sm:$0xff] }
 0x90b   : > { %7613 = vmatprep.mubr.bf16.mxu0 %v11997_v39  ;;  %7644 = vmatpush3.msra.mxu1 %v6001_v19  ;;  %v6000_v39 = vld [vmem:[%s14132_s15 + $0x38] sm:$0xff] }
 0x90c   : > { %7645 = vmatprep.subr.mxu1 %v14909_v2 }
 0x90d   : > { %7646 = vmatpush3.msra.mxu1 %v6000_v39 }
 0x90e   : > { %7647 = vmatprep.subr.mxu1 %v14909_v2 }
 0x912   : > { %7614 = vmatmul.mubr.bf16.gmra.mxu0 %v11999_v3  ;;  %v5999_v3 = vld [vmem:[%s14132_s15 + $0x30] sm:$0xff] }
 0x913   : > { %7617 = vmatprep.mubr.bf16.mxu0 %v12013_v31  ;;  %7648 = vmatpush3.msra.mxu1 %v5999_v3  ;;  %v5998_v31 = vld [vmem:[%s14132_s15 + $0x28] sm:$0xff] }
 0x914   : > { %7649 = vmatprep.subr.mxu1 %v14909_v2 }
 0x915   : > { %7650 = vmatpush3.msra.mxu1 %v5998_v31 }
 0x916   : > { %7651 = vmatprep.subr.mxu1 %v14909_v2 }
 0x91a   : > { %7618 = vmatmul.mubr.bf16.gmra.mxu0 %v12015_v55  ;;  %v5997_v55 = vld [vmem:[%s14132_s15 + $0x20] sm:$0xff] }
 0x91b   : > { %7621 = vmatprep.mubr.bf16.mxu0 %v5627_v40  ;;  %7652 = vmatpush3.msra.mxu1 %v5997_v55 }
 0x91c   : > { %7653 = vmatprep.subr.mxu1 %v14909_v2 }
 0x91d   : > { %7654 = vmatpush3.msra.mxu1 %v5996_v46 }
 0x91e   : > { %7655 = vmatprep.subr.mxu1 %v14909_v2 }
 0x91f   : > { %7656 = vmatpush3.msra.mxu1 %v5995_v14 }
 0x920   : > { %7657 = vmatprep.subr.mxu1 %v12175_v37 }
 0x921   : > { %7658 = vmatpush3.msra.mxu1 %v5994_v42 }
 0x922   : > { %7622 = vmatmul.mubr.bf16.gmra.mxu0 %v5628_v62  ;;  %7659 = vmatprep.subr.mxu1 %v12175_v37 }
 0x923   : > { %7625 = vmatprep.mubr.bf16.mxu0 %v5629_v63  ;;  %7660 = vmatpush3.msra.mxu1 %v5993_v12 }
 0x924   : > { %7664 = vmatprep.subr.mxu1 %v12175_v37 }
 0x92a   : > { %7626 = vmatmul.mubr.bf16.gmra.mxu0 %v5630_v41 }
 0x972   : > { %v7567_v33 = vpop.f32.mrf.mxu0 }
 0x973   : > { %v12129_v30 = vadd.f32 %v7567_v33, %v12123_v29 }
 0x974   : > { %v5736_v32 = vpop.f32.mrf.mxu0 }
 0x975   : > { %v12126_v43 = vadd.f32 %v12123_v29, %v5736_v32  ;;  %v6086_v53 = vmul.f32 %v12129_v30, %v12129_v30 }
 0x976   : > { %v7568_v59 = vpop.f32.mrf.mxu0 }
 0x977   : > { %v6084_v57 = vmul.f32 %v12126_v43, %v12126_v43  ;;  %v12137_v17 = vadd.f32 %v7568_v59, %v12123_v29 }
 0x978   : > { %v5739_v24 = vpop.f32.mrf.mxu0 }
 0x979   : > { %v12132_v23 = vadd.f32 %v12123_v29, %v5739_v24  ;;  %v6087_v0 = vmul.f32 %v12137_v17, %v12137_v17 }
 0x97a   : > { %v7571_v58 = vpop.f32.mrf.mxu0 }
 0x97b   : > { %v6010_v40 = vadd.f32 %v12132_v23, %v12126_v43  ;;  %v6085_v62 = vmul.f32 %v12132_v23, %v12132_v23  ;;  %v12159_v8 = vadd.f32 %v7571_v58, %v12123_v29 }
 0x97c   : > { %v5752_v54 = vpop.f32.mrf.mxu0 }
 0x97d   : > { %v6011_v1 = vadd.f32 %v6010_v40, %v12129_v30  ;;  %v6148_v56 = vadd.f32 %v6085_v62, %v6084_v57  ;;  %v12147_v44 = vadd.f32 %v12123_v29, %v5752_v54  ;;  %v6090_v48 = vmul.f32 %v12159_v8, %v12159_v8 }
 0x97e   : > { %v7572_v36 = vpop.f32.mrf.mxu0 }
 0x97f   : > { %v6149_v34 = vadd.f32 %v6148_v56, %v6086_v53  ;;  %v6012_v61 = vadd.f32 %v6011_v1, %v12137_v17  ;;  %v6088_v21 = vmul.f32 %v12147_v44, %v12147_v44  ;;  %v12173_v60 = vadd.f32 %v7572_v36, %v12123_v29 }
 0x980   : > { %v5755_v25 = vpop.f32.mrf.mxu0 }
 0x981   : > { %v6013_v16 = vadd.f32 %v6012_v61, %v12147_v44  ;;  %v6150_v63 = vadd.f32 %v6149_v34, %v6087_v0  ;;  %v12156_v41 = vadd.f32 %v12123_v29, %v5755_v25  ;;  %v6091_v4 = vmul.f32 %v12173_v60, %v12173_v60 }
 0x982   : > { %v7575_v47 = vpop.f32.mrf.mxu0 }
 0x983   : > { %v6151_v20 = vadd.f32 %v6150_v63, %v6088_v21  ;;  %v6089_v50 = vmul.f32 %v12156_v41, %v12156_v41  ;;  %v6014_v15 = vadd.f32 %v6013_v16, %v12156_v41  ;;  %v12199_v18 = vadd.f32 %v7575_v47, %v12123_v29 }
 0x984   : > { %v5768_v52 = vpop.f32.mrf.mxu0 }
 0x985   : > { %v6152_v10 = vadd.f32 %v6151_v20, %v6089_v50  ;;  %v6015_v26 = vadd.f32 %v6014_v15, %v12159_v8  ;;  %v12186_v13 = vadd.f32 %v12123_v29, %v5768_v52  ;;  %v6094_v55 = vmul.f32 %v12199_v18, %v12199_v18 }
 0x986   : > { %v7576_v22 = vpop.f32.mrf.mxu0 }
 0x987   : > { %v6153_v45 = vadd.f32 %v6152_v10, %v6090_v48  ;;  %v6016_v11 = vadd.f32 %v6015_v26, %v12173_v60  ;;  %v6092_v2 = vmul.f32 %v12186_v13, %v12186_v13  ;;  %v12205_v46 = vadd.f32 %v7576_v22, %v12123_v29 }
 0x988   : > { %v5771_v7 = vpop.f32.mrf.mxu0 }
 0x989   : > { %v6154_v9 = vadd.f32 %v6153_v45, %v6091_v4  ;;  %v12191_v6 = vadd.f32 %v12123_v29, %v5771_v7  ;;  %v6017_v28 = vadd.f32 %v6016_v11, %v12186_v13  ;;  %v6095_v58 = vmul.f32 %v12205_v46, %v12205_v46 }
 0x98a   : > { %v7579_v35 = vpop.f32.mrf.mxu0 }
 0x98b   : > { %v6155_v5 = vadd.f32 %v6154_v9, %v6092_v2  ;;  %v6093_v49 = vmul.f32 %v12191_v6, %v12191_v6  ;;  %v6018_v39 = vadd.f32 %v6017_v28, %v12191_v6  ;;  %v12227_v16 = vadd.f32 %v7579_v35, %v12123_v29 }
 0x98c   : > { %v5784_v27 = vpop.f32.mrf.mxu0 }
 0x98d   : > { %v6156_v3 = vadd.f32 %v6155_v5, %v6093_v49  ;;  %v6019_v32 = vadd.f32 %v6018_v39, %v12199_v18  ;;  %v12211_v57 = vadd.f32 %v12123_v29, %v5784_v27  ;;  %v6098_v50 = vmul.f32 %v12227_v16, %v12227_v16 }
 0x98e   : > { %v7580_v38 = vpop.f32.mrf.mxu0 }
 0x98f   : > { %v6157_v59 = vadd.f32 %v6156_v3, %v6094_v55  ;;  %v6020_v62 = vadd.f32 %v6019_v32, %v12205_v46  ;;  %v6096_v56 = vmul.f32 %v12211_v57, %v12211_v57  ;;  %v12237_v15 = vadd.f32 %v7580_v38, %v12123_v29 }
 0x990   : > { %v5787_v51 = vpop.f32.mrf.mxu0 }
 0x991   : > { %v6158_v54 = vadd.f32 %v6157_v59, %v6095_v58  ;;  %v12217_v53 = vadd.f32 %v12123_v29, %v5787_v51  ;;  %v6021_v0 = vadd.f32 %v6020_v62, %v12211_v57  ;;  %v6099_v48 = vmul.f32 %v12237_v15, %v12237_v15 }
 0x992   : > { %v7583_v19 = vpop.f32.mrf.mxu0 }
 0x993   : > { %v6159_v34 = vadd.f32 %v6158_v54, %v6096_v56  ;;  %v6097_v61 = vmul.f32 %v12217_v53, %v12217_v53  ;;  %v6022_v63 = vadd.f32 %v6021_v0, %v12217_v53  ;;  %v12267_v28 = vadd.f32 %v7583_v19, %v12123_v29 }
 0x994   : > { %v5800_v31 = vpop.f32.mrf.mxu0 }
 0x995   : > { %v6160_v47 = vadd.f32 %v6159_v34, %v6097_v61  ;;  %v6023_v14 = vadd.f32 %v6022_v63, %v12227_v16  ;;  %v12247_v22 = vadd.f32 %v12123_v29, %v5800_v31  ;;  %v6102_v3 = vmul.f32 %v12267_v28, %v12267_v28 }
 0x996   : > { %v7584_v33 = vpop.f32.mrf.mxu0 }
 0x997   : > { %v6161_v42 = vadd.f32 %v6160_v47, %v6098_v50  ;;  %v6024_v26 = vadd.f32 %v6023_v14, %v12237_v15  ;;  %v6100_v35 = vmul.f32 %v12247_v22, %v12247_v22  ;;  %v12273_v31 = vadd.f32 %v7584_v33, %v12123_v29 }
 0x998   : > { %v5803_v24 = vpop.f32.mrf.mxu0 }
 0x999   : > { %v6162_v45 = vadd.f32 %v6161_v42, %v6099_v48  ;;  %v12253_v7 = vadd.f32 %v12123_v29, %v5803_v24  ;;  %v6025_v9 = vadd.f32 %v6024_v26, %v12247_v22  ;;  %v6103_v54 = vmul.f32 %v12273_v31, %v12273_v31 }
 0x99a   : > { %v12213_v40 = vpop.f32.mrf.mxu0 }
 0x99b   : > { %v6163_v27 = vadd.f32 %v6162_v45, %v6100_v35  ;;  %v6101_v2 = vmul.f32 %v12253_v7, %v12253_v7  ;;  %v6026_v49 = vadd.f32 %v6025_v9, %v12253_v7 }
 0x99c   : > { %v5816_v1 = vpop.f32.mrf.mxu0 }
 0x99d   : > { %v6164_v51 = vadd.f32 %v6163_v27, %v6101_v2  ;;  %v6027_v59 = vadd.f32 %v6026_v49, %v12267_v28  ;;  %v12288_v33 = vadd.f32 %v12123_v29, %v5816_v1 }
 0x99e   : > { %v12221_v36 = vpop.f32.mrf.mxu0 }
 0x99f   : > { %v6165_v24 = vadd.f32 %v6164_v51, %v6102_v3  ;;  %v6028_v47 = vadd.f32 %v6027_v59, %v12273_v31  ;;  %v6104_v45 = vmul.f32 %v12288_v33, %v12288_v33 }
 0x9a0   : > { %v5819_v25 = vpop.f32.mrf.mxu0 }
 0x9a1   : > { %v6166_v50 = vadd.f32 %v6165_v24, %v6103_v54  ;;  %v12301_v1 = vadd.f32 %v12123_v29, %v5819_v25 }
 0x9a2   : > { %v12229_v21 = vpop.f32.mrf.mxu0 }
 0x9a3   : > { %v6167_v49 = vadd.f32 %v6166_v50, %v6104_v45 }
 0x9a4   : > { %v12232_v20 = vpop.f32.mrf.mxu0 }
 0x9a6   : > { %v12239_v52 = vpop.f32.mrf.mxu0 }
 0x9a8   : > { %v12242_v10 = vpop.f32.mrf.mxu0 }
 0x9aa   : > { %v12249_v12 = vpop.f32.mrf.mxu0 }
 0x9ac   : > { %v12255_v4 = vpop.f32.mrf.mxu0 }
 0x9ae   : > { %v12259_v11 = vpop.f32.mrf.mxu0 }
 0x9b0   : > { %v12264_v38 = vpop.f32.mrf.mxu0 }
 0x9b2   : > { %v7599_v5 = vpop.f32.mrf.mxu0 }
 0x9b3   : > { %v12280_v58 = vadd.f32 %v7599_v5, %v12123_v29  ;;  %v6029_v5 = vadd.f32 %v6028_v47, %v12288_v33 }
 0x9b4   : > { %v5864_v39 = vpop.f32.mrf.mxu0 }
 0x9b5   : > { %v12276_v32 = vadd.f32 %v12123_v29, %v5864_v39  ;;  %v6118_v42 = vmul.f32 %v12280_v58, %v12280_v58  ;;  %v6105_v39 = vmul.f32 %v12301_v1, %v12301_v1 }
 0x9b6   : > { %v7600_v55 = vpop.f32.mrf.mxu0 }
 0x9b7   : > { %v6116_v0 = vmul.f32 %v12276_v32, %v12276_v32  ;;  %v12293_v34 = vadd.f32 %v7600_v55, %v12123_v29 }
 0x9b8   : > { %v5867_v19 = vpop.f32.mrf.mxu0 }
 0x9b9   : > { %v12283_v62 = vadd.f32 %v12123_v29, %v5867_v19  ;;  %v6119_v27 = vmul.f32 %v12293_v34, %v12293_v34 }
 0x9ba   : > { %v7603_v56 = vpop.f32.mrf.mxu0 }
 0x9bb   : > { %v6047_v61 = vadd.f32 %v12283_v62, %v12276_v32  ;;  %v6117_v63 = vmul.f32 %v12283_v62, %v12283_v62  ;;  %v12321_v24 = vadd.f32 %v7603_v56, %v12123_v29  ;;  %v6030_v56 = vadd.f32 %v6029_v5, %v12301_v1 }
 0x9bc   : > { %v5880_v14 = vpop.f32.mrf.mxu0 }
 0x9bd   : > { %v6048_v48 = vadd.f32 %v6047_v61, %v12280_v58  ;;  %v6185_v26 = vadd.f32 %v6117_v63, %v6116_v0  ;;  %v12309_v35 = vadd.f32 %v12123_v29, %v5880_v14  ;;  %14911 = vst [vmem:[#allocation28_spill] sm:$0xff] %v12321_v24  ;;  %v12328_v0 = vadd.f32 %v12213_v40, %v12123_v29 }
 0x9be   : > { %v7604_v9 = vpop.f32.mrf.mxu0 }
 0x9bf   : > { %14910 = vst [vmem:[#allocation27_spill] sm:$0xff] %v12309_v35  ;;  %v6186_v2 = vadd.f32 %v6185_v26, %v6118_v42  ;;  %v6049_v25 = vadd.f32 %v6048_v48, %v12293_v34  ;;  %v6120_v55 = vmul.f32 %v12309_v35, %v12309_v35  ;;  %v12331_v63 = vadd.f32 %v7604_v9, %v12123_v29 }
 0x9c0   : > { %v5883_v51 = vpop.f32.mrf.mxu0  ;;  %v6168_v42 = vadd.f32 %v6167_v49, %v6105_v39  ;;  %v6122_v48 = vmul.f32 %v12321_v24, %v12321_v24  ;;  %v6031_v39 = vadd.f32 %v6030_v56, %v12328_v0  ;;  %v12366_v56 = vadd.f32 %v12123_v29, %v12232_v20 }
 0x9c1   : > { %v6050_v3 = vadd.f32 %v6049_v25, %v12309_v35  ;;  %v6187_v59 = vadd.f32 %v6186_v2, %v6119_v27  ;;  %v12324_v19 = vadd.f32 %v12123_v29, %v5883_v51  ;;  %14913 = vst [vmem:[#allocation12_spill] sm:$0xff] %v12331_v63  ;;  %v6106_v27 = vmul.f32 %v12328_v0, %v12328_v0 }
 0x9c2   : > { %v7607_v54 = vpop.f32.mrf.mxu0  ;;  %v12347_v2 = vadd.f32 %v12221_v36, %v12123_v29  ;;  %v6123_v25 = vmul.f32 %v12331_v63, %v12331_v63 }
 0x9c3   : > { %14912 = vst [vmem:[#allocation29_spill] sm:$0xff] %v12324_v19  ;;  %v6188_v61 = vadd.f32 %v6187_v59, %v6120_v55  ;;  %v6051_v47 = vadd.f32 %v6050_v3, %v12324_v19  ;;  %v6121_v50 = vmul.f32 %v12324_v19, %v12324_v19  ;;  %v6169_v3 = vadd.f32 %v6168_v42, %v6106_v27 }
 0x9c4   : > { %v5896_v14 = vpop.f32.mrf.mxu0  ;;  %v12357_v59 = vadd.f32 %v7607_v54, %v12123_v29  ;;  %v6032_v27 = vadd.f32 %v6031_v39, %v12347_v2 }
 0x9c5   : > { %v6052_v26 = vadd.f32 %v6051_v47, %v12321_v24  ;;  %v6189_v40 = vadd.f32 %v6188_v61, %v6121_v50  ;;  %v12341_v45 = vadd.f32 %v12123_v29, %v5896_v14  ;;  %v6107_v14 = vmul.f32 %v12347_v2, %v12347_v2 }
 0x9c6   : > { %v7608_v9 = vpop.f32.mrf.mxu0  ;;  %14916 = vst [vmem:[#allocation34_spill] sm:$0xff] %v12357_v59  ;;  %v6126_v20 = vmul.f32 %v12357_v59, %v12357_v59 }
 0x9c7   : > { %14914 = vst [vmem:[#allocation13_spill] sm:$0xff] %v12341_v45  ;;  %v6190_v5 = vadd.f32 %v6189_v40, %v6122_v48  ;;  %v6053_v49 = vadd.f32 %v6052_v26, %v12331_v63  ;;  %v6124_v36 = vmul.f32 %v12341_v45, %v12341_v45  ;;  %v12371_v54 = vadd.f32 %v7608_v9, %v12123_v29 }
 0x9c8   : > { %v5899_v51 = vpop.f32.mrf.mxu0 }
 0x9c9   : > { %v12354_v55 = vadd.f32 %v12123_v29, %v5899_v51  ;;  %v6054_v61 = vadd.f32 %v6053_v49, %v12341_v45  ;;  %v6191_v47 = vadd.f32 %v6190_v5, %v6123_v25  ;;  %14917 = vst [vmem:[#allocation18_spill] sm:$0xff] %v12371_v54  ;;  %v6170_v25 = vadd.f32 %v6169_v3, %v6107_v14 }
 0x9ca   : > { %v7611_v50 = vpop.f32.mrf.mxu0  ;;  %v12377_v5 = vadd.f32 %v12123_v29, %v12242_v10  ;;  %v6127_v39 = vmul.f32 %v12371_v54, %v12371_v54  ;;  %v6033_v14 = vadd.f32 %v6032_v27, %v12366_v56  ;;  %v12404_v27 = vadd.f32 %v12229_v21, %v12123_v29 }
 0x9cb   : > { %14915 = vst [vmem:[#allocation21_spill] sm:$0xff] %v12354_v55  ;;  %v6125_v42 = vmul.f32 %v12354_v55, %v12354_v55  ;;  %v6192_v48 = vadd.f32 %v6191_v47, %v6124_v36  ;;  %v6055_v26 = vadd.f32 %v6054_v61, %v12354_v55  ;;  %v6108_v61 = vmul.f32 %v12366_v56, %v12366_v56 }
 0x9cc   : > { %v5912_v40 = vpop.f32.mrf.mxu0 }
 0x9cd   : > { %v6056_v49 = vadd.f32 %v6055_v26, %v12357_v59  ;;  %v6193_v51 = vadd.f32 %v6192_v48, %v6125_v42  ;;  %v12383_v36 = vadd.f32 %v12123_v29, %v5912_v40  ;;  %v6171_v55 = vadd.f32 %v6170_v25, %v6108_v61 }
 0x9ce   : > { %v7612_v9 = vpop.f32.mrf.mxu0  ;;  %v6109_v42 = vmul.f32 %v12377_v5, %v12377_v5  ;;  %v12397_v26 = vadd.f32 %v7611_v50, %v12123_v29 }
 0x9cf   : > { %14918 = vst [vmem:[#allocation20_spill] sm:$0xff] %v12383_v36  ;;  %v6194_v3 = vadd.f32 %v6193_v51, %v6126_v20  ;;  %v6057_v10 = vadd.f32 %v6056_v49, %v12371_v54  ;;  %v6128_v20 = vmul.f32 %v12383_v36, %v12383_v36 }
 0x9d0   : > { %v5915_v47 = vpop.f32.mrf.mxu0  ;;  %14920 = vst [vmem:[#allocation36_spill] sm:$0xff] %v12397_v26  ;;  %v6172_v59 = vadd.f32 %v6171_v55, %v6109_v42 }
 0x9d1   : > { %v12394_v48 = vadd.f32 %v12123_v29, %v5915_v47  ;;  %v6058_v40 = vadd.f32 %v6057_v10, %v12383_v36  ;;  %v6195_v51 = vadd.f32 %v6194_v3, %v6127_v39  ;;  %v12409_v47 = vadd.f32 %v7612_v9, %v12123_v29 }
 0x9d2   : > { %v7615_v49 = vpop.f32.mrf.mxu0  ;;  %v6034_v10 = vadd.f32 %v6033_v14, %v12377_v5  ;;  %v6130_v39 = vmul.f32 %v12397_v26, %v12397_v26  ;;  %v6110_v9 = vmul.f32 %v12404_v27, %v12404_v27 }
 0x9d3   : > { %14919 = vst [vmem:[#allocation22_spill] sm:$0xff] %v12394_v48  ;;  %v6129_v25 = vmul.f32 %v12394_v48, %v12394_v48  ;;  %v6196_v61 = vadd.f32 %v6195_v51, %v6128_v20  ;;  %14921 = vst [vmem:[#allocation23_spill] sm:$0xff] %v12409_v47  ;;  %v6059_v50 = vadd.f32 %v6058_v40, %v12394_v48 }
 0x9d4   : > { %v5928_v54 = vpop.f32.mrf.mxu0  ;;  %v12423_v40 = vadd.f32 %v12239_v52, %v12123_v29  ;;  %v6131_v55 = vmul.f32 %v12409_v47, %v12409_v47  ;;  %v6035_v51 = vadd.f32 %v6034_v10, %v12404_v27  ;;  %v12442_v10 = vadd.f32 %v12123_v29, %v12255_v4 }
 0x9d5   : > { %v6060_v3 = vadd.f32 %v6059_v50, %v12397_v26  ;;  %v6197_v21 = vadd.f32 %v6196_v61, %v6129_v25  ;;  %v12417_v36 = vadd.f32 %v12123_v29, %v5928_v54  ;;  %v6173_v25 = vadd.f32 %v6172_v59, %v6110_v9 }
 0x9d6   : > { %v7616_v45 = vpop.f32.mrf.mxu0  ;;  %v12433_v61 = vadd.f32 %v7615_v49, %v12123_v29 }
 0x9d7   : > { %14922 = vst [vmem:[#allocation31_spill] sm:$0xff] %v12417_v36  ;;  %v6198_v14 = vadd.f32 %v6197_v21, %v6130_v39  ;;  %v6061_v42 = vadd.f32 %v6060_v3, %v12409_v47  ;;  %v6132_v52 = vmul.f32 %v12417_v36, %v12417_v36  ;;  %v6111_v39 = vmul.f32 %v12423_v40, %v12423_v40 }
 0x9d8   : > { %v5931_v20 = vpop.f32.mrf.mxu0  ;;  %14924 = vst [vmem:[#allocation24_spill] sm:$0xff] %v12433_v61  ;;  %v12447_v49 = vadd.f32 %v7616_v45, %v12123_v29  ;;  %v6134_v4 = vmul.f32 %v12433_v61, %v12433_v61 }
 0x9d9   : > { %v12430_v54 = vadd.f32 %v12123_v29, %v5931_v20  ;;  %v6062_v50 = vadd.f32 %v6061_v42, %v12417_v36  ;;  %v6199_v26 = vadd.f32 %v6198_v14, %v6131_v55  ;;  %v6036_v55 = vadd.f32 %v6035_v51, %v12423_v40 }
 0x9da   : > { %v7619_v48 = vpop.f32.mrf.mxu0  ;;  %14925 = vst [vmem:[#allocation30_spill] sm:$0xff] %v12447_v49  ;;  %v6174_v14 = vadd.f32 %v6173_v25, %v6111_v39  ;;  %v12453_v42 = vadd.f32 %v12123_v29, %v12264_v38  ;;  %v6135_v51 = vmul.f32 %v12447_v49, %v12447_v49 }
 0x9db   : > { %14923 = vst [vmem:[#allocation35_spill] sm:$0xff] %v12430_v54  ;;  %v6133_v59 = vmul.f32 %v12430_v54, %v12430_v54  ;;  %v6200_v3 = vadd.f32 %v6199_v26, %v6132_v52  ;;  %v6063_v21 = vadd.f32 %v6062_v50, %v12430_v54  ;;  %v6112_v50 = vmul.f32 %v12442_v10, %v12442_v10 }
 0x9dc   : > { %v5944_v9 = vpop.f32.mrf.mxu0  ;;  %v6037_v39 = vadd.f32 %v6036_v55, %v12442_v10  ;;  %v12480_v55 = vadd.f32 %v12249_v12, %v12123_v29 }
 0x9dd   : > { %v6064_v20 = vadd.f32 %v6063_v21, %v12433_v61  ;;  %v6201_v36 = vadd.f32 %v6200_v3, %v6133_v59  ;;  %v12459_v26 = vadd.f32 %v12123_v29, %v5944_v9  ;;  %v6175_v54 = vadd.f32 %v6174_v14, %v6112_v50 }
 0x9de   : > { %v7620_v45 = vpop.f32.mrf.mxu0  ;;  %v6113_v59 = vmul.f32 %v12453_v42, %v12453_v42  ;;  %v12473_v21 = vadd.f32 %v7619_v48, %v12123_v29 }
 0x9df   : > { %14926 = vst [vmem:[#allocation5_spill] sm:$0xff] %v12459_v26  ;;  %v6202_v25 = vadd.f32 %v6201_v36, %v6134_v4  ;;  %v6065_v38 = vadd.f32 %v6064_v20, %v12447_v49  ;;  %v6136_v36 = vmul.f32 %v12459_v26, %v12459_v26 }
 0x9e0   : > { %v5947_v52 = vpop.f32.mrf.mxu0  ;;  %14928 = vst [vmem:[#allocation6_spill] sm:$0xff] %v12473_v21  ;;  %v6176_v61 = vadd.f32 %v6175_v54, %v6113_v59 }
 0x9e1   : > { %v12470_v3 = vadd.f32 %v12123_v29, %v5947_v52  ;;  %v6066_v9 = vadd.f32 %v6065_v38, %v12459_v26  ;;  %v6203_v4 = vadd.f32 %v6202_v25, %v6135_v51  ;;  %v12485_v52 = vadd.f32 %v7620_v45, %v12123_v29 }
 0x9e2   : > { %v7623_v20 = vpop.f32.mrf.mxu0  ;;  %v6038_v38 = vadd.f32 %v6037_v39, %v12453_v42  ;;  %v6138_v51 = vmul.f32 %v12473_v21, %v12473_v21  ;;  %v6114_v45 = vmul.f32 %v12480_v55, %v12480_v55 }
 0x9e3   : > { %14927 = vst [vmem:[#allocation4_spill] sm:$0xff] %v12470_v3  ;;  %v6137_v14 = vmul.f32 %v12470_v3, %v12470_v3  ;;  %v6204_v50 = vadd.f32 %v6203_v4, %v6136_v36  ;;  %14929 = vst [vmem:[#allocation10_spill] sm:$0xff] %v12485_v52  ;;  %v6067_v48 = vadd.f32 %v6066_v9, %v12470_v3 }
 0x9e4   : > { %v5960_v49 = vpop.f32.mrf.mxu0  ;;  %v12499_v9 = vadd.f32 %v12259_v11, %v12123_v29  ;;  %v6139_v54 = vmul.f32 %v12485_v52, %v12485_v52  ;;  %v6039_v4 = vadd.f32 %v6038_v38, %v12480_v55 }
 0x9e5   : > { %v6068_v25 = vadd.f32 %v6067_v48, %v12473_v21  ;;  %v6205_v12 = vadd.f32 %v6204_v50, %v6137_v14  ;;  %v12493_v26 = vadd.f32 %v12123_v29, %v5960_v49  ;;  %v6177_v14 = vadd.f32 %v6176_v61, %v6114_v45 }
 0x9e6   : > { %v7624_v47 = vpop.f32.mrf.mxu0  ;;  %v12509_v50 = vadd.f32 %v7623_v20, %v12123_v29  ;;  %v6040_v45 = vadd.f32 %v6039_v4, %v12499_v9 }
 0x9e7   : > { %14930 = vst [vmem:[#allocation9_spill] sm:$0xff] %v12493_v26  ;;  %v6206_v39 = vadd.f32 %v6205_v12, %v6138_v51  ;;  %v6069_v59 = vadd.f32 %v6068_v25, %v12485_v52  ;;  %v6140_v11 = vmul.f32 %v12493_v26, %v12493_v26  ;;  %v6115_v51 = vmul.f32 %v12499_v9, %v12499_v9 }
 0x9e8   : > { %v5963_v36 = vpop.f32.mrf.mxu0  ;;  %14932 = vst [vmem:[#allocation17_spill] sm:$0xff] %v12509_v50  ;;  %v12519_v25 = vadd.f32 %v7624_v47, %v12123_v29 }
 0x9e9   : > { %v12506_v49 = vadd.f32 %v12123_v29, %v5963_v36  ;;  %v6070_v48 = vadd.f32 %v6069_v59, %v12493_v26  ;;  %v6207_v21 = vadd.f32 %v6206_v39, %v6139_v54  ;;  %v6178_v59 = vadd.f32 %v6177_v14, %v6115_v51 }
 0x9ea   : > { %v7627_v3 = vpop.f32.mrf.mxu0  ;;  %14933 = vst [vmem:[#allocation19_spill] sm:$0xff] %v12519_v25  ;;  %v6142_v54 = vmul.f32 %v12509_v50, %v12509_v50  ;;  %v6143_v47 = vmul.f32 %v12519_v25, %v12519_v25 }
 0x9eb   : > { %14931 = vst [vmem:[#allocation11_spill] sm:$0xff] %v12506_v49  ;;  %v6141_v38 = vmul.f32 %v12506_v49, %v12506_v49  ;;  %v6208_v61 = vadd.f32 %v6207_v21, %v6140_v11  ;;  %v6071_v20 = vadd.f32 %v6070_v48, %v12506_v49  ;;  %v6041_v49 = vrot.slane %v6040_v45, 4 }
 0x9ec   : > { %v5976_v12 = vpop.f32.mrf.mxu0  ;;  %v6179_v4 = vrot.slane %v6178_v59, 4  ;;  %v12536_v51 = vadd.f32 %v7627_v3, %v12123_v29 }
 0x9ed   : > { %v6072_v39 = vadd.f32 %v6071_v20, %v12509_v50  ;;  %v6209_v36 = vadd.f32 %v6208_v61, %v6141_v38  ;;  %v12527_v26 = vadd.f32 %v12123_v29, %v5976_v12 }
 0x9ee   : > { %v7628_v52 = vpop.f32.mrf.mxu0  ;;  %14936 = vst [vmem:[#allocation15_spill] sm:$0xff] %v12536_v51  ;;  %v6146_v3 = vmul.f32 %v12536_v51, %v12536_v51 }
 0x9ef   : > { %14934 = vst [vmem:[#allocation25_spill] sm:$0xff] %v12527_v26  ;;  %v6210_v21 = vadd.f32 %v6209_v36, %v6142_v54  ;;  %v6073_v48 = vadd.f32 %v6072_v39, %v12519_v25  ;;  %v6144_v61 = vmul.f32 %v12527_v26, %v12527_v26  ;;  %v12544_v39 = vadd.f32 %v7628_v52, %v12123_v29 }
 0x9f0   : > { %v5979_v11 = vpop.f32.mrf.mxu0  ;;  %v6180_v25 = vadd.f32 %v6179_v4, %v6178_v59 }
 0x9f1   : > { %v12533_v14 = vadd.f32 %v12123_v29, %v5979_v11  ;;  %v6074_v38 = vadd.f32 %v6073_v48, %v12527_v26  ;;  %v6211_v20 = vadd.f32 %v6210_v21, %v6143_v47  ;;  %14937 = vst [vmem:[#allocation26_spill] sm:$0xff] %v12544_v39  ;;  %v6042_v11 = vadd.f32 %v6041_v49, %v6040_v45 }
 0x9f2   : > { %v6147_v47 = vmul.f32 %v12544_v39, %v12544_v39 }
 0x9f3   : > { %14935 = vst [vmem:[#allocation8_spill] sm:$0xff] %v12533_v14  ;;  %v6145_v12 = vmul.f32 %v12533_v14, %v12533_v14  ;;  %v6212_v54 = vadd.f32 %v6211_v20, %v6144_v61  ;;  %v6075_v36 = vadd.f32 %v6074_v38, %v12533_v14  ;;  %v6043_v61 = vrot.slane %v6042_v11, 2 }
 0x9f4   : > { %v6181_v20 = vrot.slane %v6180_v25, 2 }
 0x9f5   : > { %v6076_v48 = vadd.f32 %v6075_v36, %v12536_v51  ;;  %v6213_v50 = vadd.f32 %v6212_v54, %v6145_v12  ;;  %v6044_v49 = vadd.f32 %v6043_v61, %v6042_v11  ;;  %v14938_v61 = vld [vmem:[#allocation32_spill] sm:$0xff] }
 0x9f6   : > { %v6182_v45 = vadd.f32 %v6181_v20, %v6180_v25 }
 0x9f7   : > { %v6077_v21 = vadd.f32 %v6076_v48, %v12544_v39  ;;  %v6214_v26 = vadd.f32 %v6213_v50, %v6146_v3  ;;  %v6045_v36 = vrot.slane %v6044_v49, 1 }
 0x9f8   : > { %v6183_v12 = vrot.slane %v6182_v45, 1 }
 0x9f9   : > { %v6078_v29 = vrot.slane %v6077_v21, 4  ;;  %v6215_v52 = vadd.f32 %v6214_v26, %v6147_v47  ;;  %v6046_v48 = vadd.f32 %v6045_v36, %v6044_v49  ;;  %v14968_v36 = vld [vmem:[#allocation26_spill] sm:$0xff] }
 0x9fa   : > { %v6184_v50 = vadd.f32 %v6183_v12, %v6182_v45  ;;  %v14939_v45 = vld [vmem:[#allocation33_spill] sm:$0xff] }
 0x9fb   : > { %v6079_v63 = vadd.f32 %v6078_v29, %v6077_v21  ;;  %v6216_v38 = vrot.slane %v6215_v52, 4 }
 0x9fd   : > { %v6080_v59 = vrot.slane %v6079_v63, 2  ;;  %v6217_v4 = vadd.f32 %v6216_v38, %v6215_v52 }
 0x9ff   : > { %v6081_v14 = vadd.f32 %v6080_v59, %v6079_v63  ;;  %v6218_v24 = vrot.slane %v6217_v4, 2  ;;  %v6009_v63 = vld [vmem:[%s14133_s16] sm:$0xf] }
 0xa01   : > { %v6082_v54 = vrot.slane %v6081_v14, 1  ;;  %v6219_v51 = vadd.f32 %v6218_v24, %v6217_v4  ;;  %v14962_v4 = vld [vmem:[#allocation17_spill] sm:$0xff] }
 0xa03   : > { %v6083_v19 = vadd.f32 %v6082_v54, %v6081_v14  ;;  %v6220_v35 = vrot.slane %v6219_v51, 1  ;;  %v14967_v54 = vld [vmem:[#allocation15_spill] sm:$0xff] }
 0xa05   : > { %v6221_v3 = vadd.f32 %v6220_v35, %v6219_v51  ;;  %v6224_v39 = vsel %vm1247_vm1, %v6083_v19, %v6046_v48  ;;  %v14966_v48 = vld [vmem:[#allocation8_spill] sm:$0xff] }
 0xa07   : > { %v6228_v26 = vsel %vm1252_vm2, %v6221_v3, %v6184_v50  ;;  %v14958_v50 = vld [vmem:[#allocation6_spill] sm:$0xff] }
 0xa08   : > { %v6230_v11 = vsel %vm1255_vm3, %v6224_v39, %v6228_v26 }
 0xa09   : > { %7662 = vmatmul.mubr.f32.vlgmr.msra.gmra.mxu1 %v6230_v11 }
 0xa0a   : > { %7666 = vmatprep.mubr.msk.f32.mxu1 %vm7871_vm0, %v12175_v37  ;;  %7665 = vmatpush3.msk.msra.mxu1 %vm1341_vm4, %v6009_v63 }
 0xac9   : > { %v6297_v24 = vpop.f32.mrf.mxu1 }
 0xaca   : > { %v6302_v25 = vmul.f32 0.00048828125, %v6297_v24 }
 0xacb   : > { %v7663_v14 = vpop.f32.mrf.mxu1 }
 0xacc   : > { %v6303_v35 = vmul.f32 %v6302_v25, %v6302_v25 }
 0xace   : > { %v6305_v51 = vrot.slane %v6303_v35, 6  ;;  %v14964_v35 = vld [vmem:[#allocation25_spill] sm:$0xff] }
 0xad0   : > { %v6307_v19 = vsub.f32 %v6302_v25, %v6305_v51 }
 0xad2   : > { %v6308_v47 = vadd.f32 1e-05, %v6307_v19  ;;  %v14948_v19 = vld [vmem:[#allocation20_spill] sm:$0xff] }
 0xad4   : > { %7789 = vrsqrt.f32 %v6308_v47  ;;  %v14947_v47 = vld [vmem:[#allocation18_spill] sm:$0xff] }
 0xae1   : > { %v7790_v21 = vpop.eup %7789 }
 0xae2   : > { %v6310_v39 = vsel %vm1255_vm3, %v6302_v25, %v7790_v21  ;;  %v14946_v21 = vld [vmem:[#allocation34_spill] sm:$0xff] }
 0xae3   : > { %7667 = vmatmul.mubr.msk.f32.vlgmr.msra.gmra.mxu1 %vm1337_vm5, %v6310_v39  ;;  %v14940_v39 = vld [vmem:[#allocation27_spill] sm:$0xff] }
 0xba3   : > { %v6383_v37 = vpop.f32.mrf.mxu1 }
 0xba4   : > { %v6394_v20 = vrot.slane %v6383_v37, %v14938_v61  ;;  %v14941_v37 = vld [vmem:[#allocation29_spill] sm:$0xff] }
 0xba5   : > { %v7668_v29 = vpop.f32.mrf.mxu1 }
 0xba6   : > { %v6395_v52 = vcombine.high %v6394_v20, %v6394_v20  ;;  %v12566_v38 = vrot.slane %v6394_v20, %v14938_v61  ;;  %v14943_v20 = vld [vmem:[#allocation12_spill] sm:$0xff]  ;;  %v14944_v29 = vld [vmem:[#allocation13_spill] sm:$0xff] }
 0xba8   : > { %v12569_v49 = vrot.slane %v6395_v52, %v14938_v61  ;;  %v12573_v59 = vrot.slane %v12566_v38, %v14939_v45  ;;  %v14942_v61 = vld [vmem:[#allocation28_spill] sm:$0xff]  ;;  %v14945_v52 = vld [vmem:[#allocation21_spill] sm:$0xff]  ;;  %v14965_v14 = vcombine.high %v12566_v38, %v12566_v38 }
 0xbaa   : > { %v12581_v12 = vrot.slane %v12569_v49, %v14939_v45  ;;  %v6489_v25 = vrot.slane %v14965_v14, %v14939_v45  ;;  %v14969_v26 = vcombine.high %v12569_v49, %v12569_v49  ;;  %v14970_v3 = vsub.f32 %v12126_v43, %v12573_v59 }
 0xbab   : > { %v14971_v14 = vsub.f32 %v12132_v23, %v12573_v59  ;;  %v14972_v63 = vsub.f32 %v12129_v30, %v12573_v59  ;;  %v14973_v49 = vsub.f32 %v12137_v17, %v12573_v59  ;;  %v14974_v43 = vsub.f32 %v12147_v44, %v12573_v59 }
 0xbac   : > { %v12719_v51 = vrot.slane %v14969_v26, %v14939_v45  ;;  %v12724_v38 = vmul.f32 %v6489_v25, %v14970_v3  ;;  %v14975_v23 = vsub.f32 %v12156_v41, %v12573_v59  ;;  %v14976_v30 = vsub.f32 %v12159_v8, %v12573_v59 }
 0xbad   : > { %v12729_v24 = vmul.f32 %v6489_v25, %v14971_v14  ;;  %v12734_v11 = vmul.f32 %v6489_v25, %v14972_v63  ;;  %v12739_v45 = vmul.f32 %v6489_v25, %v14973_v49  ;;  %v12744_v3 = vmul.f32 %v6489_v25, %v14974_v43 }
 0xbae   : > { %v12749_v26 = vmul.f32 %v6489_v25, %v14975_v23  ;;  %v12754_v63 = vmul.f32 %v6489_v25, %v14976_v30  ;;  %v14977_v17 = vsub.f32 %v12173_v60, %v12573_v59  ;;  %v14978_v44 = vsub.f32 %v12186_v13, %v12573_v59 }
 0xbaf   : > { %v14979_v41 = vsub.f32 %v12191_v6, %v12573_v59  ;;  %v14980_v8 = vsub.f32 %v12199_v18, %v12573_v59  ;;  %v14981_v60 = vsub.f32 %v12205_v46, %v12573_v59  ;;  %v14982_v13 = vsub.f32 %v12211_v57, %v12573_v59 }
 0xbb0   : > { %v12759_v14 = vmul.f32 %v6489_v25, %v14977_v17  ;;  %v12764_v49 = vmul.f32 %v6489_v25, %v14978_v44  ;;  %v14983_v6 = vsub.f32 %v12217_v53, %v12573_v59  ;;  %v14984_v18 = vsub.f32 %v12227_v16, %v12573_v59 }
 0xbb1   : > { %v12769_v43 = vmul.f32 %v6489_v25, %v14979_v41  ;;  %v12774_v23 = vmul.f32 %v6489_v25, %v14980_v8  ;;  %v12779_v30 = vmul.f32 %v6489_v25, %v14981_v60  ;;  %v12784_v17 = vmul.f32 %v6489_v25, %v14982_v13 }
 0xbb2   : > { %v12789_v44 = vmul.f32 %v6489_v25, %v14983_v6  ;;  %v12794_v41 = vmul.f32 %v6489_v25, %v14984_v18  ;;  %v14985_v46 = vsub.f32 %v12237_v15, %v12573_v59  ;;  %v14986_v57 = vsub.f32 %v12247_v22, %v12573_v59 }
 0xbb3   : > { %v14987_v53 = vsub.f32 %v12253_v7, %v12573_v59  ;;  %v14988_v16 = vsub.f32 %v12267_v28, %v12573_v59  ;;  %v14989_v15 = vsub.f32 %v12273_v31, %v12573_v59  ;;  %v14990_v22 = vsub.f32 %v12288_v33, %v12573_v59 }
 0xbb4   : > { %v12799_v8 = vmul.f32 %v6489_v25, %v14985_v46  ;;  %v12804_v60 = vmul.f32 %v6489_v25, %v14986_v57  ;;  %v14991_v7 = vsub.f32 %v12301_v1, %v12573_v59  ;;  %v14992_v28 = vsub.f32 %v12328_v0, %v12573_v59 }
 0xbb5   : > { %v12809_v13 = vmul.f32 %v6489_v25, %v14987_v53  ;;  %v12814_v6 = vmul.f32 %v6489_v25, %v14988_v16  ;;  %v12819_v18 = vmul.f32 %v6489_v25, %v14989_v15  ;;  %v12824_v46 = vmul.f32 %v6489_v25, %v14990_v22 }
 0xbb6   : > { %v12829_v57 = vmul.f32 %v6489_v25, %v14991_v7  ;;  %v12834_v53 = vmul.f32 %v6489_v25, %v14992_v28  ;;  %v14993_v31 = vsub.f32 %v12347_v2, %v12573_v59  ;;  %v14994_v33 = vsub.f32 %v12366_v56, %v12573_v59 }
 0xbb7   : > { %v14995_v1 = vsub.f32 %v12377_v5, %v12573_v59  ;;  %v14996_v0 = vsub.f32 %v12404_v27, %v12573_v59  ;;  %v14997_v2 = vsub.f32 %v12423_v40, %v12573_v59  ;;  %v14998_v56 = vsub.f32 %v12442_v10, %v12573_v59 }
 0xbb8   : > { %v12839_v16 = vmul.f32 %v6489_v25, %v14993_v31  ;;  %v12844_v15 = vmul.f32 %v6489_v25, %v14994_v33  ;;  %v14999_v5 = vsub.f32 %v12453_v42, %v12573_v59  ;;  %v15000_v27 = vsub.f32 %v12480_v55, %v12573_v59 }
 0xbb9   : > { %v12849_v22 = vmul.f32 %v6489_v25, %v14995_v1  ;;  %v12854_v7 = vmul.f32 %v6489_v25, %v14996_v0  ;;  %v12859_v28 = vmul.f32 %v6489_v25, %v14997_v2  ;;  %v12864_v31 = vmul.f32 %v6489_v25, %v14998_v56 }
 0xbba   : > { %v12869_v33 = vmul.f32 %v6489_v25, %v14999_v5  ;;  %v12874_v1 = vmul.f32 %v6489_v25, %v15000_v27  ;;  %v15001_v40 = vsub.f32 %v12499_v9, %v12573_v59  ;;  %v15002_v10 = vsub.f32 %v12276_v32, %v12581_v12 }
 0xbbb   : > { %v15003_v42 = vsub.f32 %v12283_v62, %v12581_v12  ;;  %v15004_v55 = vsub.f32 %v12280_v58, %v12581_v12  ;;  %v15005_v9 = vsub.f32 %v12293_v34, %v12581_v12  ;;  %v15006_v59 = vsub.f32 %v14940_v39, %v12581_v12 }
 0xbbc   : > { %v12879_v0 = vmul.f32 %v6489_v25, %v15001_v40  ;;  %v12885_v2 = vmul.f32 %v12719_v51, %v15002_v10  ;;  %v15007_v25 = vsub.f32 %v14941_v37, %v12581_v12  ;;  %v15008_v27 = vsub.f32 %v14942_v61, %v12581_v12 }
 0xbbd   : > { %v12891_v56 = vmul.f32 %v12719_v51, %v15003_v42  ;;  %v12897_v5 = vmul.f32 %v12719_v51, %v15004_v55  ;;  %v12903_v32 = vmul.f32 %v12719_v51, %v15005_v9  ;;  %v12909_v62 = vmul.f32 %v12719_v51, %v15006_v59 }
 0xbbe   : > { %v12915_v58 = vmul.f32 %v12719_v51, %v15007_v25  ;;  %v12921_v34 = vmul.f32 %v12719_v51, %v15008_v27  ;;  %v15009_v40 = vsub.f32 %v14943_v20, %v12581_v12  ;;  %v15010_v10 = vsub.f32 %v14944_v29, %v12581_v12  ;;  %v15015_v25 = vld [vmem:[#allocation22_spill] sm:$0xff] }
 0xbbf   : > { %v15011_v42 = vsub.f32 %v14945_v52, %v12581_v12  ;;  %v15012_v55 = vsub.f32 %v14946_v21, %v12581_v12  ;;  %v15013_v9 = vsub.f32 %v14947_v47, %v12581_v12  ;;  %v15014_v59 = vsub.f32 %v14948_v19, %v12581_v12 }
 0xbc0   : > { %v12927_v39 = vmul.f32 %v12719_v51, %v15009_v40  ;;  %v12933_v37 = vmul.f32 %v12719_v51, %v15010_v10  ;;  %v15016_v27 = vsub.f32 %v15015_v25, %v12581_v12  ;;  %v15018_v40 = vld [vmem:[#allocation36_spill] sm:$0xff] }
 0xbc1   : > { %v12939_v61 = vmul.f32 %v12719_v51, %v15011_v42  ;;  %v12945_v20 = vmul.f32 %v12719_v51, %v15012_v55  ;;  %v12951_v29 = vmul.f32 %v12719_v51, %v15013_v9  ;;  %v12957_v52 = vmul.f32 %v12719_v51, %v15014_v59  ;;  %v15021_v42 = vld [vmem:[#allocation23_spill] sm:$0xff] }
 0xbc2   : > { %v12963_v21 = vmul.f32 %v12719_v51, %v15016_v27  ;;  %v15019_v10 = vsub.f32 %v15018_v40, %v12581_v12  ;;  %v15022_v55 = vsub.f32 %v15021_v42, %v12581_v12  ;;  %v15024_v9 = vld [vmem:[#allocation31_spill] sm:$0xff] }
 0xbc3   : > { %v15025_v59 = vsub.f32 %v15024_v9, %v12581_v12  ;;  %v15027_v27 = vld [vmem:[#allocation35_spill] sm:$0xff] }
 0xbc4   : > { %15017 = vst [vmem:[#allocation16_spill] sm:$0xff] %v12963_v21  ;;  %v12969_v47 = vmul.f32 %v12719_v51, %v15019_v10  ;;  %v12975_v19 = vmul.f32 %v12719_v51, %v15022_v55  ;;  %v15028_v21 = vsub.f32 %v15027_v27, %v12581_v12  ;;  %v15030_v10 = vld [vmem:[#allocation24_spill] sm:$0xff]  ;;  %v15033_v55 = vld [vmem:[#allocation30_spill] sm:$0xff]  ;;  %v15036_v27 = vld [vmem:[#allocation5_spill] sm:$0xff] }
 0xbc5   : > { %v12981_v25 = vmul.f32 %v12719_v51, %v15025_v59  ;;  %v13004_v59 = vld [vmem:[%s14130_s13] ss:$0 sm:$0xff] }
 0xbc6   : > { %15020 = vst [vmem:[#allocation7_spill] sm:$0xff] %v12969_v47  ;;  %15023 = vst [vmem:[#allocation3_spill] sm:$0xff] %v12975_v19  ;;  %v12987_v40 = vmul.f32 %v12719_v51, %v15028_v21  ;;  %v15031_v47 = vsub.f32 %v15030_v10, %v12581_v12  ;;  %v15034_v19 = vsub.f32 %v15033_v55, %v12581_v12  ;;  %v15039_v10 = vld [vmem:[#allocation4_spill] sm:$0xff] }
 0xbc7   : > { %15026 = vst [vmem:[#allocation14_spill] sm:$0xff] %v12981_v25  ;;  %v15037_v21 = vsub.f32 %v15036_v27, %v12581_v12 }
 0xbc8   : > { %15029 = vst [vmem:[#allocation32_spill] sm:$0xff] %v12987_v40  ;;  %v12993_v42 = vmul.f32 %v12719_v51, %v15031_v47  ;;  %v12999_v9 = vmul.f32 %v12719_v51, %v15034_v19  ;;  %v15040_v47 = vsub.f32 %v15039_v10, %v12581_v12  ;;  %v15042_v19 = vsub.f32 %v14958_v50, %v12581_v12 }
 0xbc9   : > { %v13010_v40 = vmul.f32 %v12719_v51, %v15037_v21  ;;  %v15046_v21 = vld [vmem:[#allocation9_spill] sm:$0xff] }
 0xbca   : > { %15032 = vst [vmem:[#allocation33_spill] sm:$0xff] %v12993_v42  ;;  %15035 = vst [vmem:[#allocation27_spill] sm:$0xff] %v12999_v9  ;;  %v13016_v42 = vmul.f32 %v12719_v51, %v15040_v47  ;;  %v13022_v55 = vmul.f32 %v12719_v51, %v15042_v19  ;;  %v15043_v9 = vld [vmem:[#allocation10_spill] sm:$0xff]  ;;  %v15048_v47 = vld [vmem:[#allocation11_spill] sm:$0xff]  ;;  %v15050_v19 = vsub.f32 %v14962_v4, %v12581_v12 }
 0xbcb   : > { %15038 = vst [vmem:[#allocation29_spill] sm:$0xff] %v13010_v40  ;;  %v15044_v25 = vsub.f32 %v15043_v9, %v12581_v12  ;;  %v15047_v40 = vsub.f32 %v15046_v21, %v12581_v12 }
 0xbcc   : > { %15041 = vst [vmem:[#allocation28_spill] sm:$0xff] %v13016_v42  ;;  %v15049_v42 = vsub.f32 %v15048_v47, %v12581_v12  ;;  %v13046_v9 = vmul.f32 %v12719_v51, %v15050_v19  ;;  %v15055_v19 = vsub.f32 %v14967_v54, %v12581_v12  ;;  %v13088_v54 = vmul.f32 %v13004_v59, %v12734_v11 }
 0xbcd   : > { %v13028_v27 = vmul.f32 %v12719_v51, %v15044_v25  ;;  %v13034_v10 = vmul.f32 %v12719_v51, %v15047_v40  ;;  %v15051_v25 = vld [vmem:[#allocation19_spill] sm:$0xff]  ;;  %v15053_v40 = vsub.f32 %v14964_v35, %v12581_v12  ;;  %v13108_v11 = vmul.f32 %v13004_v59, %v12759_v14 }
 0xbce   : > { %v13040_v50 = vmul.f32 %v12719_v51, %v15049_v42  ;;  %v15054_v42 = vsub.f32 %v14966_v48, %v12581_v12  ;;  %v13084_v48 = vmul.f32 %v13004_v59, %v12729_v24  ;;  %v13104_v24 = vmul.f32 %v13004_v59, %v12754_v63 }
 0xbcf   : > { %15045 = vst [vmem:[#allocation12_spill] sm:$0xff] %v13028_v27  ;;  %v15052_v27 = vsub.f32 %v15051_v25, %v12581_v12  ;;  %v13058_v47 = vmul.f32 %v12719_v51, %v15053_v40  ;;  %v13070_v25 = vmul.f32 %v12719_v51, %v15055_v19  ;;  %v13080_v40 = vmul.f32 %v13004_v59, %v12724_v38  ;;  %v15062_v19 = vld [vmem:[#allocation3_spill] sm:$0xff] }
 0xbd0   : > { %v13064_v4 = vmul.f32 %v12719_v51, %v15054_v42  ;;  %v13092_v42 = vmul.f32 %v13004_v59, %v12739_v45  ;;  %v13116_v38 = vmul.f32 %v13004_v59, %v12769_v43  ;;  %v13120_v45 = vmul.f32 %v13004_v59, %v12774_v23 }
 0xbd1   : > { %v13052_v21 = vmul.f32 %v12719_v51, %v15052_v27  ;;  %v15056_v27 = vsub.f32 %v14968_v36, %v12581_v12  ;;  %v13096_v36 = vmul.f32 %v13004_v59, %v12744_v3  ;;  %v13100_v12 = vmul.f32 %v13004_v59, %v12749_v26 }
 0xbd2   : > { %v13124_v3 = vmul.f32 %v13004_v59, %v12779_v30  ;;  %v13128_v26 = vmul.f32 %v13004_v59, %v12784_v17  ;;  %v13132_v63 = vmul.f32 %v13004_v59, %v12789_v44  ;;  %v13136_v14 = vmul.f32 %v13004_v59, %v12794_v41 }
 0xbd3   : > { %v13076_v35 = vmul.f32 %v12719_v51, %v15056_v27  ;;  %v13112_v51 = vmul.f32 %v13004_v59, %v12764_v49  ;;  %v13140_v49 = vmul.f32 %v13004_v59, %v12799_v8  ;;  %v13144_v43 = vmul.f32 %v13004_v59, %v12804_v60  ;;  %v15064_v27 = vld [vmem:[#allocation14_spill] sm:$0xff] }
 0xbd4   : > { %v13148_v23 = vmul.f32 %v13004_v59, %v12809_v13  ;;  %v13152_v30 = vmul.f32 %v13004_v59, %v12814_v6  ;;  %v13156_v17 = vmul.f32 %v13004_v59, %v12819_v18  ;;  %v13160_v44 = vmul.f32 %v13004_v59, %v12824_v46 }
 0xbd5   : > { %v13164_v41 = vmul.f32 %v13004_v59, %v12829_v57  ;;  %v13168_v8 = vmul.f32 %v13004_v59, %v12834_v53  ;;  %v13172_v60 = vmul.f32 %v13004_v59, %v12839_v16  ;;  %v13176_v13 = vmul.f32 %v13004_v59, %v12844_v15 }
 0xbd6   : > { %v13180_v6 = vmul.f32 %v13004_v59, %v12849_v22  ;;  %v13184_v18 = vmul.f32 %v13004_v59, %v12854_v7  ;;  %v13188_v46 = vmul.f32 %v13004_v59, %v12859_v28  ;;  %v13192_v57 = vmul.f32 %v13004_v59, %v12864_v31 }
 0xbd7   : > { %v13196_v53 = vmul.f32 %v13004_v59, %v12869_v33  ;;  %v13200_v16 = vmul.f32 %v13004_v59, %v12874_v1  ;;  %v13204_v15 = vmul.f32 %v13004_v59, %v12879_v0  ;;  %v13208_v22 = vmul.f32 %v13004_v59, %v12885_v2 }
 0xbd8   : > { %v13212_v7 = vmul.f32 %v13004_v59, %v12891_v56  ;;  %v13216_v28 = vmul.f32 %v13004_v59, %v12897_v5  ;;  %v13220_v31 = vmul.f32 %v13004_v59, %v12903_v32  ;;  %v13224_v33 = vmul.f32 %v13004_v59, %v12909_v62 }
 0xbd9   : > { %v13228_v1 = vmul.f32 %v13004_v59, %v12915_v58  ;;  %v13232_v0 = vmul.f32 %v13004_v59, %v12921_v34  ;;  %v13236_v2 = vmul.f32 %v13004_v59, %v12927_v39  ;;  %v13240_v56 = vmul.f32 %v13004_v59, %v12933_v37  ;;  %v15059_v34 = vld [vmem:[#allocation16_spill] sm:$0xff]  ;;  %v15061_v37 = vld [vmem:[#allocation7_spill] sm:$0xff] }
 0xbda   : > { %v13244_v5 = vmul.f32 %v13004_v59, %v12939_v61  ;;  %v13248_v32 = vmul.f32 %v13004_v59, %v12945_v20  ;;  %v13252_v62 = vmul.f32 %v13004_v59, %v12951_v29  ;;  %v13256_v58 = vmul.f32 %v13004_v59, %v12957_v52 }
 0xbdb   : > { %v13260_v39 = vmul.f32 %v13004_v59, %v15059_v34  ;;  %v13264_v61 = vmul.f32 %v13004_v59, %v15061_v37  ;;  %v13268_v20 = vmul.f32 %v13004_v59, %v15062_v19  ;;  %v13272_v29 = vmul.f32 %v13004_v59, %v15064_v27  ;;  %v13289_v19 = vld [vmem:[%s14131_s14] ss:$0 sm:$0xff] }
 0xbdc   : > { %15057 = vst [vmem:[#allocation13_spill] sm:$0xff] %v13252_v62  ;;  %15058 = vst [vmem:[#allocation21_spill] sm:$0xff] %v13256_v58  ;;  %v15066_v62 = vld [vmem:[#allocation32_spill] sm:$0xff]  ;;  %v15067_v58 = vld [vmem:[#allocation33_spill] sm:$0xff] }
 0xbdd   : > { %15060 = vst [vmem:[#allocation34_spill] sm:$0xff] %v13260_v39  ;;  %15063 = vst [vmem:[#allocation18_spill] sm:$0xff] %v13268_v20  ;;  %v13276_v52 = vmul.f32 %v13004_v59, %v15066_v62  ;;  %v13280_v34 = vmul.f32 %v13004_v59, %v15067_v58  ;;  %v15069_v39 = vld [vmem:[#allocation27_spill] sm:$0xff]  ;;  %v15071_v20 = vld [vmem:[#allocation29_spill] sm:$0xff]  ;;  %v13301_v58 = vmul.f32 %v13004_v59, %v13022_v55 }
 0xbde   : > { %15065 = vst [vmem:[#allocation20_spill] sm:$0xff] %v13272_v29  ;;  %v13284_v37 = vmul.f32 %v13004_v59, %v15069_v39  ;;  %v13293_v27 = vmul.f32 %v13004_v59, %v15071_v20  ;;  %v15072_v29 = vld [vmem:[#allocation28_spill] sm:$0xff]  ;;  %v13313_v20 = vmul.f32 %v13004_v59, %v13040_v50  ;;  %v13321_v55 = vmul.f32 %v13004_v59, %v13052_v21 }
 0xbdf   : > { %15068 = vst [vmem:[#allocation6_spill] sm:$0xff] %v13280_v34  ;;  %v13297_v62 = vmul.f32 %v13004_v59, %v15072_v29  ;;  %v15073_v34 = vld [vmem:[#allocation12_spill] sm:$0xff]  ;;  %v13317_v29 = vmul.f32 %v13004_v59, %v13046_v9  ;;  %v13333_v50 = vmul.f32 %v13004_v59, %v13070_v25  ;;  %v13337_v9 = vmul.f32 %v13004_v59, %v13076_v35 }
 0xbe0   : > { %15070 = vst [vmem:[#allocation17_spill] sm:$0xff] %v13284_v37  ;;  %v13305_v39 = vmul.f32 %v13004_v59, %v15073_v34  ;;  %v13309_v37 = vmul.f32 %v13004_v59, %v13034_v10  ;;  %v13325_v34 = vmul.f32 %v13004_v59, %v13058_v47  ;;  %v13329_v10 = vmul.f32 %v13004_v59, %v13064_v4 }
 0xbe1   : > { %v13341_v21 = vadd.f32 %v13289_v19, %v13080_v40  ;;  %v13345_v47 = vadd.f32 %v13289_v19, %v13084_v48  ;;  %v13349_v4 = vadd.f32 %v13289_v19, %v13088_v54  ;;  %v13353_v25 = vadd.f32 %v13289_v19, %v13092_v42 }
 0xbe2   : > { %v13357_v59 = vadd.f32 %v13289_v19, %v13096_v36  ;;  %v13361_v35 = vadd.f32 %v13289_v19, %v13100_v12  ;;  %v13365_v40 = vadd.f32 %v13289_v19, %v13104_v24  ;;  %v13369_v48 = vadd.f32 %v13289_v19, %v13108_v11 }
 0xbe3   : > { %v13373_v54 = vadd.f32 %v13289_v19, %v13112_v51  ;;  %v13377_v42 = vadd.f32 %v13289_v19, %v13116_v38  ;;  %v13381_v36 = vadd.f32 %v13289_v19, %v13120_v45  ;;  %v13385_v12 = vadd.f32 %v13289_v19, %v13124_v3 }
 0xbe4   : > { %v13389_v24 = vadd.f32 %v13289_v19, %v13128_v26  ;;  %v13393_v11 = vadd.f32 %v13289_v19, %v13132_v63  ;;  %v13397_v51 = vadd.f32 %v13289_v19, %v13136_v14  ;;  %v13401_v38 = vadd.f32 %v13289_v19, %v13140_v49 }
 0xbe5   : > { %v13405_v45 = vadd.f32 %v13289_v19, %v13144_v43  ;;  %v13409_v3 = vadd.f32 %v13289_v19, %v13148_v23  ;;  %v13413_v26 = vadd.f32 %v13289_v19, %v13152_v30  ;;  %v13417_v63 = vadd.f32 %v13289_v19, %v13156_v17 }
 0xbe6   : > { %v13421_v14 = vadd.f32 %v13289_v19, %v13160_v44  ;;  %v13425_v49 = vadd.f32 %v13289_v19, %v13164_v41  ;;  %v13429_v43 = vadd.f32 %v13289_v19, %v13168_v8  ;;  %v13433_v23 = vadd.f32 %v13289_v19, %v13172_v60 }
 0xbe7   : > { %v13437_v30 = vadd.f32 %v13289_v19, %v13176_v13  ;;  %v13441_v17 = vadd.f32 %v13289_v19, %v13180_v6  ;;  %v13445_v44 = vadd.f32 %v13289_v19, %v13184_v18  ;;  %v13449_v41 = vadd.f32 %v13289_v19, %v13188_v46 }
 0xbe8   : > { %v13453_v8 = vadd.f32 %v13289_v19, %v13192_v57  ;;  %v13457_v60 = vadd.f32 %v13289_v19, %v13196_v53  ;;  %v13461_v13 = vadd.f32 %v13289_v19, %v13200_v16  ;;  %v13465_v6 = vadd.f32 %v13289_v19, %v13204_v15 }
 0xbe9   : > { %v13469_v18 = vadd.f32 %v13289_v19, %v13208_v22  ;;  %v13473_v46 = vadd.f32 %v13289_v19, %v13212_v7  ;;  %v13477_v57 = vadd.f32 %v13289_v19, %v13216_v28  ;;  %v13481_v53 = vadd.f32 %v13289_v19, %v13220_v31 }
 0xbea   : > { %15074 = vst [vmem:[#allocation25_spill] sm:$0xff] %v13453_v8  ;;  %15075 = vst [vmem:[#allocation8_spill] sm:$0xff] %v13461_v13  ;;  %v13485_v16 = vadd.f32 %v13289_v19, %v13224_v33  ;;  %v13489_v15 = vadd.f32 %v13289_v19, %v13228_v1  ;;  %v13493_v22 = vadd.f32 %v13289_v19, %v13232_v0  ;;  %v15083_v1 = vld [vmem:[#allocation13_spill] sm:$0xff] }
 0xbeb   : > { %15076 = vst [vmem:[#allocation15_spill] sm:$0xff] %v13465_v6  ;;  %15077 = vst [vmem:[#allocation26_spill] sm:$0xff] %v13473_v46  ;;  %v13497_v7 = vadd.f32 %v13289_v19, %v13236_v2  ;;  %v13501_v28 = vadd.f32 %v13289_v19, %v13240_v56  ;;  %v13505_v31 = vadd.f32 %v13289_v19, %v13244_v5 }
 0xbec   : > { %15078 = vst [vmem:[#allocation22_spill] sm:$0xff] %v13477_v57  ;;  %15079 = vst [vmem:[#allocation36_spill] sm:$0xff] %v13493_v22  ;;  %v13509_v33 = vadd.f32 %v13289_v19, %v13248_v32  ;;  %v13513_v0 = vadd.f32 %v13289_v19, %v15083_v1  ;;  %v15084_v22 = vld [vmem:[#allocation21_spill] sm:$0xff]  ;;  %v13525_v5 = vadd.f32 %v13289_v19, %v13264_v61 }
 0xbed   : > { %15080 = vst [vmem:[#allocation23_spill] sm:$0xff] %v13497_v7  ;;  %15081 = vst [vmem:[#allocation31_spill] sm:$0xff] %v13505_v31  ;;  %v13517_v2 = vadd.f32 %v13289_v19, %v15084_v22  ;;  %v15086_v7 = vld [vmem:[#allocation34_spill] sm:$0xff]  ;;  %v13537_v22 = vadd.f32 %v13289_v19, %v13276_v52  ;;  %v13557_v52 = vadd.f32 %v13289_v19, %v13301_v58 }
 0xbee   : > { %15082 = vst [vmem:[#allocation35_spill] sm:$0xff] %v13509_v33  ;;  %v13521_v56 = vadd.f32 %v13289_v19, %v15086_v7  ;;  %v15088_v31 = vld [vmem:[#allocation18_spill] sm:$0xff]  ;;  %v15089_v33 = vld [vmem:[#allocation20_spill] sm:$0xff]  ;;  %v13577_v58 = vadd.f32 %v13289_v19, %v13321_v55 }
 0xbef   : > { %15085 = vst [vmem:[#allocation24_spill] sm:$0xff] %v13517_v2  ;;  %v13529_v32 = vadd.f32 %v13289_v19, %v15088_v31  ;;  %v13533_v1 = vadd.f32 %v13289_v19, %v15089_v33  ;;  %v15090_v2 = vld [vmem:[#allocation6_spill] sm:$0xff]  ;;  %v13549_v31 = vadd.f32 %v13289_v19, %v13293_v27  ;;  %v13553_v33 = vadd.f32 %v13289_v19, %v13297_v62 }
 0xbf0   : > { %15087 = vst [vmem:[#allocation30_spill] sm:$0xff] %v13521_v56  ;;  %v13541_v7 = vadd.f32 %v13289_v19, %v15090_v2  ;;  %v15091_v56 = vld [vmem:[#allocation17_spill] sm:$0xff]  ;;  %v13561_v2 = vadd.f32 %v13289_v19, %v13305_v39  ;;  %v13569_v27 = vadd.f32 %v13289_v19, %v13313_v20  ;;  %v13573_v62 = vadd.f32 %v13289_v19, %v13317_v29 }
 0xbf1   : > { %v13545_v61 = vadd.f32 %v13289_v19, %v15091_v56  ;;  %15093 = vst [vmem:[#allocation4_spill] sm:$0xff] %v13549_v31  ;;  %15094 = vst [vmem:[#allocation10_spill] sm:$0xff] %v13553_v33  ;;  %v13565_v56 = vadd.f32 %v13289_v19, %v13309_v37  ;;  %v13581_v39 = vadd.f32 %v13289_v19, %v13325_v34  ;;  %v15108_v55 = vmov %v13577_v58  ;;  %v7800_v34 = vld [vmem:[%s7989_s23 + $0x10] sm:$0xff]  ;;  %v7801_v33 = vld [vmem:[%s7989_s23 + $0x18] sm:$0xff] }
 0xbf2   : > { %15095 = vst [vmem:[#allocation9_spill] sm:$0xff] %v13561_v2  ;;  %15096 = vst [vmem:[#allocation11_spill] sm:$0xff] %v13573_v62  ;;  %v13585_v37 = vadd.f32 %v13289_v19, %v13329_v10  ;;  %v13589_v20 = vadd.f32 %v13289_v19, %v13333_v50  ;;  %v13593_v29 = vadd.f32 %v13289_v19, %v13337_v9  ;;  %v7798_v2 = vld [vmem:[%s7989_s23] sm:$0xff]  ;;  %v7799_v9 = vld [vmem:[%s7989_s23 + $0x8] sm:$0xff]  ;;  %v15115_v50 = vmax.f32 %v13353_v25, 0.0 }
 0xbf3   : > { %15092 = vst [vmem:[#allocation5_spill] sm:$0xff] %v13545_v61  ;;  %15097 = vst [vmem:[#allocation19_spill] sm:$0xff] %v13577_v58  ;;  %v15101_v62 = vld [vmem:[#allocation36_spill] sm:$0xff]  ;;  %v15109_v61 = vmov %v13581_v39 }
 0xbf4   : > { %15098 = vst [vmem:[#allocation16_spill] sm:$0xff] %v13581_v39  ;;  %15099 = vst [vmem:[#allocation7_spill] sm:$0xff] %v13585_v37  ;;  %v15102_v8 = vld [vmem:[#allocation23_spill] sm:$0xff]  ;;  %v15113_v37 = vmax.f32 %v13345_v47, 0.0  ;;  %v15114_v39 = vmax.f32 %v13349_v4, 0.0 }
 0xbf5   : > { %15100 = vst [vmem:[#allocation3_spill] sm:$0xff] %v13589_v20  ;;  %v15103_v13 = vld [vmem:[#allocation31_spill] sm:$0xff]  ;;  %v15112_v20 = vmax.f32 %v13341_v21, 0.0  ;;  %v13677_v21 = vadd.f32 %v7801_v33, %v15115_v50  ;;  %v7805_v33 = vld [vmem:[%s7989_s23 + $0x38] sm:$0xff]  ;;  %v15119_v50 = vmax.f32 %v13369_v48, 0.0 }
 0xbf6   : > { %v15104_v6 = vld [vmem:[#allocation35_spill] sm:$0xff]  ;;  %v15105_v46 = vld [vmem:[#allocation24_spill] sm:$0xff]  ;;  %v13667_v58 = vadd.f32 %v7799_v9, %v15113_v37  ;;  %v13672_v10 = vadd.f32 %v7800_v34, %v15114_v39  ;;  %v15117_v9 = vmax.f32 %v13361_v35, 0.0  ;;  %v7804_v39 = vld [vmem:[%s7989_s23 + $0x30] sm:$0xff]  ;;  %v15118_v34 = vmax.f32 %v13365_v40, 0.0 }
 0xbf7   : > { %v15106_v57 = vld [vmem:[#allocation30_spill] sm:$0xff]  ;;  %v13662_v19 = vadd.f32 %v7798_v2, %v15112_v20  ;;  %v7802_v2 = vld [vmem:[%s7989_s23 + $0x20] sm:$0xff]  ;;  %v15116_v20 = vmax.f32 %v13357_v59, 0.0  ;;  %v7803_v37 = vld [vmem:[%s7989_s23 + $0x28] sm:$0xff]  ;;  %v13697_v59 = vadd.f32 %v7805_v33, %v15119_v50  ;;  %v15123_v50 = vmax.f32 %v13385_v12, 0.0 }
 0xbf8   : > { %v13687_v4 = vadd.f32 %v7803_v37, %v15117_v9  ;;  %v13692_v25 = vadd.f32 %v7804_v39, %v15118_v34  ;;  %v7807_v37 = vld [vmem:[%s7989_s23 + $0x48] sm:$0xff]  ;;  %v15121_v9 = vmax.f32 %v13377_v42, 0.0  ;;  %v7808_v39 = vld [vmem:[%s7989_s23 + $0x50] sm:$0xff]  ;;  %v15122_v34 = vmax.f32 %v13381_v36, 0.0  ;;  %v7809_v33 = vld [vmem:[%s7989_s23 + $0x58] sm:$0xff] }
 0xbf9   : > { %v13682_v47 = vadd.f32 %v7802_v2, %v15116_v20  ;;  %v7806_v2 = vld [vmem:[%s7989_s23 + $0x40] sm:$0xff]  ;;  %v15120_v20 = vmax.f32 %v13373_v54, 0.0  ;;  %v13717_v54 = vadd.f32 %v7809_v33, %v15123_v50  ;;  %v7813_v33 = vld [vmem:[%s7989_s23 + $0x78] sm:$0xff]  ;;  %v15127_v50 = vmax.f32 %v13401_v38, 0.0 }
 0xbfa   : > { %v13707_v40 = vadd.f32 %v7807_v37, %v15121_v9  ;;  %v13712_v48 = vadd.f32 %v7808_v39, %v15122_v34  ;;  %v7811_v37 = vld [vmem:[%s7989_s23 + $0x68] sm:$0xff]  ;;  %v15125_v9 = vmax.f32 %v13393_v11, 0.0  ;;  %v7812_v39 = vld [vmem:[%s7989_s23 + $0x70] sm:$0xff]  ;;  %v15126_v34 = vmax.f32 %v13397_v51, 0.0 }
 0xbfb   : > { %v15110_v31 = vld [vmem:[#allocation7_spill] sm:$0xff]  ;;  %v13702_v35 = vadd.f32 %v7806_v2, %v15120_v20  ;;  %v15124_v20 = vmax.f32 %v13389_v24, 0.0  ;;  %v13737_v24 = vadd.f32 %v7813_v33, %v15127_v50  ;;  %v7817_v33 = vld [vmem:[%s7989_s23 + $0x98] sm:$0xff]  ;;  %v15131_v50 = vmax.f32 %v13417_v63, 0.0 }
 0xbfc   : > { %v7810_v2 = vld [vmem:[%s7989_s23 + $0x60] sm:$0xff]  ;;  %v13727_v36 = vadd.f32 %v7811_v37, %v15125_v9  ;;  %v13732_v12 = vadd.f32 %v7812_v39, %v15126_v34  ;;  %v7815_v37 = vld [vmem:[%s7989_s23 + $0x88] sm:$0xff]  ;;  %v15129_v9 = vmax.f32 %v13409_v3, 0.0  ;;  %v7816_v39 = vld [vmem:[%s7989_s23 + $0x90] sm:$0xff]  ;;  %v15130_v34 = vmax.f32 %v13413_v26, 0.0 }
 0xbfd   : > { %v13722_v42 = vadd.f32 %v7810_v2, %v15124_v20  ;;  %v7814_v2 = vld [vmem:[%s7989_s23 + $0x80] sm:$0xff]  ;;  %v15128_v20 = vmax.f32 %v13405_v45, 0.0  ;;  %v13757_v45 = vadd.f32 %v7817_v33, %v15131_v50  ;;  %v7821_v33 = vld [vmem:[%s7989_s23 + $0xb8] sm:$0xff]  ;;  %v15135_v50 = vmax.f32 %v13433_v23, 0.0 }
 0xbfe   : > { %v13747_v51 = vadd.f32 %v7815_v37, %v15129_v9  ;;  %v13752_v38 = vadd.f32 %v7816_v39, %v15130_v34  ;;  %v7819_v37 = vld [vmem:[%s7989_s23 + $0xa8] sm:$0xff]  ;;  %v15133_v9 = vmax.f32 %v13425_v49, 0.0  ;;  %v7820_v39 = vld [vmem:[%s7989_s23 + $0xb0] sm:$0xff]  ;;  %v15134_v34 = vmax.f32 %v13429_v43, 0.0 }
 0xbff   : > { %v13742_v11 = vadd.f32 %v7814_v2, %v15128_v20  ;;  %v7818_v2 = vld [vmem:[%s7989_s23 + $0xa0] sm:$0xff]  ;;  %v15132_v20 = vmax.f32 %v13421_v14, 0.0  ;;  %v13777_v14 = vadd.f32 %v7821_v33, %v15135_v50  ;;  %v7825_v33 = vld [vmem:[%s7989_s23 + $0xd8] sm:$0xff]  ;;  %v15141_v50 = vmax.f32 %v13449_v41, 0.0 }
 0xc00   : > { %v13767_v26 = vadd.f32 %v7819_v37, %v15133_v9  ;;  %v13772_v63 = vadd.f32 %v7820_v39, %v15134_v34  ;;  %v7823_v37 = vld [vmem:[%s7989_s23 + $0xc8] sm:$0xff]  ;;  %v15138_v9 = vmax.f32 %v13441_v17, 0.0  ;;  %v7824_v39 = vld [vmem:[%s7989_s23 + $0xd0] sm:$0xff]  ;;  %v15139_v34 = vmax.f32 %v13445_v44, 0.0 }
 0xc01   : > { %v13762_v3 = vadd.f32 %v7818_v2, %v15132_v20  ;;  %v7822_v2 = vld [vmem:[%s7989_s23 + $0xc0] sm:$0xff]  ;;  %v15136_v20 = vmax.f32 %v13437_v30, 0.0  ;;  %v13797_v30 = vadd.f32 %v7825_v33, %v15141_v50  ;;  %v7829_v33 = vld [vmem:[%s7989_s23 + $0xf8] sm:$0xff] }
 0xc02   : > { %v13787_v43 = vadd.f32 %v7823_v37, %v15138_v9  ;;  %v13792_v23 = vadd.f32 %v7824_v39, %v15139_v34  ;;  %v7827_v37 = vld [vmem:[%s7989_s23 + $0xe8] sm:$0xff]  ;;  %v15145_v9 = vmax.f32 %v13457_v60, 0.0  ;;  %v7828_v39 = vld [vmem:[%s7989_s23 + $0xf0] sm:$0xff]  ;;  %v15150_v50 = vld [vmem:[#allocation15_spill] sm:$0xff] }
 0xc03   : > { %v13782_v49 = vadd.f32 %v7822_v2, %v15136_v20  ;;  %15142 = vst [vmem:[#allocation33_spill] sm:$0xff] %v13797_v30  ;;  %v7826_v2 = vld [vmem:[%s7989_s23 + $0xe0] sm:$0xff]  ;;  %v15143_v20 = vld [vmem:[#allocation25_spill] sm:$0xff]  ;;  %v15147_v34 = vld [vmem:[#allocation8_spill] sm:$0xff]  ;;  %v15151_v30 = vmax.f32 %v15150_v50, 0.0 }
 0xc04   : > { %15140 = vst [vmem:[#allocation32_spill] sm:$0xff] %v13792_v23  ;;  %v13807_v44 = vadd.f32 %v7827_v37, %v15145_v9  ;;  %v15148_v23 = vmax.f32 %v15147_v34, 0.0  ;;  %v7831_v37 = vld [vmem:[%s7989_s23 + $0x108] sm:$0xff]  ;;  %v15153_v9 = vld [vmem:[#allocation26_spill] sm:$0xff] }
 0xc05   : > { %15137 = vst [vmem:[#allocation14_spill] sm:$0xff] %v13782_v49  ;;  %v15144_v49 = vmax.f32 %v15143_v20, 0.0  ;;  %v13817_v20 = vadd.f32 %v7829_v33, %v15151_v30  ;;  %v7833_v30 = vld [vmem:[%s7989_s23 + $0x118] sm:$0xff]  ;;  %v15157_v33 = vmax.f32 %v13481_v53, 0.0 }
 0xc06   : > { %15146 = vst [vmem:[#allocation27_spill] sm:$0xff] %v13807_v44  ;;  %v13812_v41 = vadd.f32 %v7828_v39, %v15148_v23  ;;  %v15154_v44 = vmax.f32 %v15153_v9, 0.0  ;;  %v7832_v23 = vld [vmem:[%s7989_s23 + $0x110] sm:$0xff]  ;;  %v15155_v39 = vld [vmem:[#allocation22_spill] sm:$0xff] }
 0xc07   : > { %v13802_v17 = vadd.f32 %v7826_v2, %v15144_v49  ;;  %v7830_v49 = vld [vmem:[%s7989_s23 + $0x100] sm:$0xff]  ;;  %v15152_v2 = vmax.f32 %v13469_v18, 0.0  ;;  %v13837_v18 = vadd.f32 %v7833_v30, %v15157_v33  ;;  %v7837_v30 = vld [vmem:[%s7989_s23 + $0x138] sm:$0xff]  ;;  %v15161_v33 = vmax.f32 %v15102_v8, 0.0 }
 0xc08   : > { %15149 = vst [vmem:[#allocation29_spill] sm:$0xff] %v13812_v41  ;;  %v13827_v34 = vadd.f32 %v7831_v37, %v15154_v44  ;;  %v15156_v41 = vmax.f32 %v15155_v39, 0.0  ;;  %v7835_v44 = vld [vmem:[%s7989_s23 + $0x128] sm:$0xff]  ;;  %v15159_v37 = vmax.f32 %v13489_v15, 0.0 }
 0xc09   : > { %v13822_v60 = vadd.f32 %v7830_v49, %v15152_v2  ;;  %v7834_v49 = vld [vmem:[%s7989_s23 + $0x120] sm:$0xff]  ;;  %v15158_v2 = vmax.f32 %v13485_v16, 0.0  ;;  %v13857_v16 = vadd.f32 %v7837_v30, %v15161_v33  ;;  %v7841_v30 = vld [vmem:[%s7989_s23 + $0x158] sm:$0xff]  ;;  %v15165_v33 = vmax.f32 %v13513_v0, 0.0 }
 0xc0a   : > { %v13832_v50 = vadd.f32 %v7832_v23, %v15156_v41  ;;  %v13847_v39 = vadd.f32 %v7835_v44, %v15159_v37  ;;  %v7836_v41 = vld [vmem:[%s7989_s23 + $0x130] sm:$0xff]  ;;  %v15160_v23 = vmax.f32 %v15101_v62, 0.0  ;;  %v7839_v44 = vld [vmem:[%s7989_s23 + $0x148] sm:$0xff]  ;;  %v15163_v37 = vmax.f32 %v15103_v13, 0.0 }
 0xc0b   : > { %v13842_v9 = vadd.f32 %v7834_v49, %v15158_v2  ;;  %v7838_v49 = vld [vmem:[%s7989_s23 + $0x140] sm:$0xff]  ;;  %v15162_v2 = vmax.f32 %v13501_v28, 0.0  ;;  %v13877_v28 = vadd.f32 %v7841_v30, %v15165_v33  ;;  %v7845_v30 = vld [vmem:[%s7989_s23 + $0x178] sm:$0xff]  ;;  %v15169_v33 = vmax.f32 %v13529_v32, 0.0 }
 0xc0c   : > { %v13852_v53 = vadd.f32 %v7836_v41, %v15160_v23  ;;  %v13867_v62 = vadd.f32 %v7839_v44, %v15163_v37  ;;  %v7840_v41 = vld [vmem:[%s7989_s23 + $0x150] sm:$0xff]  ;;  %v15164_v23 = vmax.f32 %v15104_v6, 0.0  ;;  %v7843_v44 = vld [vmem:[%s7989_s23 + $0x168] sm:$0xff]  ;;  %v15167_v37 = vmax.f32 %v15106_v57, 0.0 }
 0xc0d   : > { %v13862_v15 = vadd.f32 %v7838_v49, %v15162_v2  ;;  %v7842_v49 = vld [vmem:[%s7989_s23 + $0x160] sm:$0xff]  ;;  %v15166_v2 = vmax.f32 %v15105_v46, 0.0  ;;  %v13897_v46 = vadd.f32 %v7845_v30, %v15169_v33  ;;  %v7849_v30 = vld [vmem:[%s7989_s23 + $0x198] sm:$0xff]  ;;  %v15176_v33 = vld [vmem:[#allocation5_spill] sm:$0xff] }
 0xc0e   : > { %v13872_v8 = vadd.f32 %v7840_v41, %v15164_v23  ;;  %v13887_v6 = vadd.f32 %v7843_v44, %v15167_v37  ;;  %v7844_v41 = vld [vmem:[%s7989_s23 + $0x170] sm:$0xff]  ;;  %v15168_v23 = vmax.f32 %v13525_v5, 0.0  ;;  %v7847_v44 = vld [vmem:[%s7989_s23 + $0x188] sm:$0xff]  ;;  %v15173_v37 = vmax.f32 %v13537_v22, 0.0 }
 0xc0f   : > { %v13882_v13 = vadd.f32 %v7842_v49, %v15166_v2  ;;  %15170 = vst [vmem:[#allocation28_spill] sm:$0xff] %v13897_v46  ;;  %v7846_v49 = vld [vmem:[%s7989_s23 + $0x180] sm:$0xff]  ;;  %v15171_v2 = vmax.f32 %v13533_v1, 0.0  ;;  %v15177_v46 = vmax.f32 %v15176_v33, 0.0 }
 0xc10   : > { %v13892_v0 = vadd.f32 %v7844_v41, %v15168_v23  ;;  %v13907_v5 = vadd.f32 %v7847_v44, %v15173_v37  ;;  %v7848_v41 = vld [vmem:[%s7989_s23 + $0x190] sm:$0xff]  ;;  %v15175_v23 = vmax.f32 %v13541_v7, 0.0  ;;  %v7851_v44 = vld [vmem:[%s7989_s23 + $0x1a8] sm:$0xff]  ;;  %v15182_v37 = vld [vmem:[#allocation10_spill] sm:$0xff] }
 0xc11   : > { %v13902_v57 = vadd.f32 %v7846_v49, %v15171_v2  ;;  %v13917_v1 = vadd.f32 %v7849_v30, %v15177_v46  ;;  %v7850_v49 = vld [vmem:[%s7989_s23 + $0x1a0] sm:$0xff]  ;;  %v15179_v2 = vld [vmem:[#allocation4_spill] sm:$0xff]  ;;  %v7853_v46 = vld [vmem:[%s7989_s23 + $0x1b8] sm:$0xff] }
 0xc12   : > { %15174 = vst [vmem:[#allocation13_spill] sm:$0xff] %v13907_v5  ;;  %v13912_v32 = vadd.f32 %v7848_v41, %v15175_v23  ;;  %v15183_v5 = vmax.f32 %v15182_v37, 0.0  ;;  %v7852_v41 = vld [vmem:[%s7989_s23 + $0x1b0] sm:$0xff]  ;;  %v15185_v23 = vmax.f32 %v13557_v52, 0.0 }
 0xc13   : > { %15172 = vst [vmem:[#allocation12_spill] sm:$0xff] %v13902_v57  ;;  %15178 = vst [vmem:[#allocation21_spill] sm:$0xff] %v13917_v1  ;;  %v15180_v57 = vmax.f32 %v15179_v2, 0.0  ;;  %v15187_v30 = vld [vmem:[#allocation9_spill] sm:$0xff] }
 0xc14   : > { %v13927_v7 = vadd.f32 %v7851_v44, %v15183_v5  ;;  %v13932_v33 = vadd.f32 %v7852_v41, %v15185_v23  ;;  %v15188_v1 = vmax.f32 %v15187_v30, 0.0  ;;  %v7855_v5 = vld [vmem:[%s7989_s23 + $0x1c8] sm:$0xff]  ;;  %v15190_v44 = vmax.f32 %v13569_v27, 0.0  ;;  %v7856_v52 = vld [vmem:[%s7989_s23 + $0x1d0] sm:$0xff]  ;;  %v15191_v41 = vld [vmem:[#allocation11_spill] sm:$0xff] }
 0xc15   : > { %v13922_v22 = vadd.f32 %v7850_v49, %v15180_v57  ;;  %v7854_v57 = vld [vmem:[%s7989_s23 + $0x1c0] sm:$0xff]  ;;  %v15189_v49 = vmax.f32 %v13565_v56, 0.0  ;;  %v15192_v23 = vmax.f32 %v15191_v41, 0.0  ;;  %v15194_v27 = vmax.f32 %v15109_v61, 0.0  ;;  %v7861_v41 = vld [vmem:[%s7989_s23 + $0x1f8] sm:$0xff] }
 0xc16   : > { %15184 = vst [vmem:[#allocation18_spill] sm:$0xff] %v13927_v7  ;;  %15186 = vst [vmem:[#allocation20_spill] sm:$0xff] %v13932_v33  ;;  %v13937_v2 = vadd.f32 %v7853_v46, %v15188_v1  ;;  %v13947_v37 = vadd.f32 %v7855_v5, %v15190_v44  ;;  %v7857_v7 = vld [vmem:[%s7989_s23 + $0x1d8] sm:$0xff]  ;;  %v15193_v1 = vmax.f32 %v15108_v55, 0.0  ;;  %v7858_v56 = vld [vmem:[%s7989_s23 + $0x1e0] sm:$0xff]  ;;  %v6828_v61 = vmax.f32 %v13662_v19, 0.0 }
 0xc17   : > { %15181 = vst [vmem:[#allocation34_spill] sm:$0xff] %v13922_v22  ;;  %v13942_v22 = vadd.f32 %v7854_v57, %v15189_v49  ;;  %v13952_v33 = vadd.f32 %v7856_v52, %v15192_v23  ;;  %v13969_v30 = vadd.f32 %v7858_v56, %v15194_v27  ;;  %v7859_v57 = vld [vmem:[%s7989_s23 + $0x1e8] sm:$0xff]  ;;  %v15195_v49 = vmax.f32 %v15110_v31, 0.0  ;;  %v7860_v44 = vld [vmem:[%s7989_s23 + $0x1f0] sm:$0xff]  ;;  %v15196_v55 = vld [vmem:[#allocation3_spill] sm:$0xff] }
 0xc18   : > { %v13957_v46 = vadd.f32 %v7857_v7, %v15193_v1  ;;  %v15197_v7 = vmax.f32 %v15196_v55, 0.0  ;;  %v15198_v23 = vmax.f32 %v13593_v29, 0.0  ;;  %v6829_v31 = vmax.f32 %v13667_v58, 0.0  ;;  %6892 = vst [vmem:[%s13964_s30] sm:$0xff] %v6828_v61  ;;  %v15201_v55 = vld [vmem:[#allocation33_spill] sm:$0xff] }
 0xc19   : > { %v13974_v5 = vadd.f32 %v7859_v57, %v15195_v49  ;;  %v6830_v56 = vmax.f32 %v13672_v10, 0.0  ;;  %v6831_v27 = vmax.f32 %v13677_v21, 0.0  ;;  %v6832_v57 = vmax.f32 %v13682_v47, 0.0 }
 0xc1a   : > { %v13979_v52 = vadd.f32 %v7860_v44, %v15197_v7  ;;  %v13984_v1 = vadd.f32 %v7861_v41, %v15198_v23  ;;  %v6833_v49 = vmax.f32 %v13687_v4, 0.0  ;;  %v6834_v29 = vmax.f32 %v13692_v25, 0.0  ;;  %6893 = vst [vmem:[%s13964_s30 + $0x8] sm:$0xff] %v6829_v31  ;;  %v15203_v41 = vld [vmem:[#allocation29_spill] sm:$0xff] }
 0xc1b   : > { %v6835_v44 = vmax.f32 %v13697_v59, 0.0  ;;  %v6836_v19 = vmax.f32 %v13702_v35, 0.0  ;;  %v6837_v58 = vmax.f32 %v13707_v40, 0.0  ;;  %v6838_v10 = vmax.f32 %v13712_v48, 0.0  ;;  %6894 = vst [vmem:[%s13964_s30 + $0x10] sm:$0xff] %v6830_v56  ;;  %6895 = vst [vmem:[%s13964_s30 + $0x18] sm:$0xff] %v6831_v27 }
 0xc1c   : > { %v6839_v21 = vmax.f32 %v13717_v54, 0.0  ;;  %v6840_v47 = vmax.f32 %v13722_v42, 0.0  ;;  %v6841_v4 = vmax.f32 %v13727_v36, 0.0  ;;  %v6842_v25 = vmax.f32 %v13732_v12, 0.0  ;;  %6896 = vst [vmem:[%s13964_s30 + $0x20] sm:$0xff] %v6832_v57  ;;  %6897 = vst [vmem:[%s13964_s30 + $0x28] sm:$0xff] %v6833_v49 }
 0xc1d   : > { %v6843_v59 = vmax.f32 %v13737_v24, 0.0  ;;  %6898 = vst [vmem:[%s13964_s30 + $0x30] sm:$0xff] %v6834_v29  ;;  %6899 = vst [vmem:[%s13964_s30 + $0x38] sm:$0xff] %v6835_v44  ;;  %v6844_v35 = vmax.f32 %v13742_v11, 0.0  ;;  %v6845_v40 = vmax.f32 %v13747_v51, 0.0  ;;  %v6846_v48 = vmax.f32 %v13752_v38, 0.0 }
 0xc1e   : > { %v6847_v54 = vmax.f32 %v13757_v45, 0.0  ;;  %6900 = vst [vmem:[%s13964_s30 + $0x40] sm:$0xff] %v6836_v19  ;;  %6901 = vst [vmem:[%s13964_s30 + $0x48] sm:$0xff] %v6837_v58  ;;  %v6848_v42 = vmax.f32 %v13762_v3, 0.0  ;;  %v6849_v36 = vmax.f32 %v13767_v26, 0.0  ;;  %v6850_v12 = vmax.f32 %v13772_v63, 0.0 }
 0xc1f   : > { %6902 = vst [vmem:[%s13964_s30 + $0x50] sm:$0xff] %v6838_v10  ;;  %6903 = vst [vmem:[%s13964_s30 + $0x58] sm:$0xff] %v6839_v21  ;;  %v6851_v24 = vmax.f32 %v13777_v14, 0.0  ;;  %v15199_v11 = vld [vmem:[#allocation14_spill] sm:$0xff]  ;;  %v6853_v38 = vmax.f32 %v13787_v43, 0.0  ;;  %v15200_v45 = vld [vmem:[#allocation32_spill] sm:$0xff] }
 0xc20   : > { %6904 = vst [vmem:[%s13964_s30 + $0x60] sm:$0xff] %v6840_v47  ;;  %6905 = vst [vmem:[%s13964_s30 + $0x68] sm:$0xff] %v6841_v4  ;;  %v6852_v51 = vmax.f32 %v15199_v11, 0.0  ;;  %v6854_v3 = vmax.f32 %v15200_v45, 0.0  ;;  %v6855_v26 = vmax.f32 %v15201_v55, 0.0  ;;  %v6856_v63 = vmax.f32 %v13802_v17, 0.0 }
 0xc21   : > { %6906 = vst [vmem:[%s13964_s30 + $0x70] sm:$0xff] %v6842_v25  ;;  %6907 = vst [vmem:[%s13964_s30 + $0x78] sm:$0xff] %v6843_v59  ;;  %v15202_v14 = vld [vmem:[#allocation27_spill] sm:$0xff]  ;;  %v6858_v23 = vmax.f32 %v15203_v41, 0.0  ;;  %v6859_v43 = vmax.f32 %v13817_v20, 0.0  ;;  %v6860_v61 = vmax.f32 %v13822_v60, 0.0 }
 0xc22   : > { %6908 = vst [vmem:[%s13964_s30 + $0x80] sm:$0xff] %v6844_v35  ;;  %6909 = vst [vmem:[%s13964_s30 + $0x88] sm:$0xff] %v6845_v40  ;;  %v6857_v7 = vmax.f32 %v15202_v14, 0.0  ;;  %v6861_v31 = vmax.f32 %v13827_v34, 0.0  ;;  %v6862_v17 = vmax.f32 %v13832_v50, 0.0  ;;  %v6863_v56 = vmax.f32 %v13837_v18, 0.0 }
 0xc23   : > { %6910 = vst [vmem:[%s13964_s30 + $0x90] sm:$0xff] %v6846_v48  ;;  %6911 = vst [vmem:[%s13964_s30 + $0x98] sm:$0xff] %v6847_v54  ;;  %v6864_v20 = vmax.f32 %v13842_v9, 0.0  ;;  %v6865_v27 = vmax.f32 %v13847_v39, 0.0  ;;  %v6866_v60 = vmax.f32 %v13852_v53, 0.0  ;;  %v6867_v34 = vmax.f32 %v13857_v16, 0.0 }
 0xc24   : > { %6912 = vst [vmem:[%s13964_s30 + $0xa0] sm:$0xff] %v6848_v42  ;;  %6913 = vst [vmem:[%s13964_s30 + $0xa8] sm:$0xff] %v6849_v36  ;;  %v6868_v50 = vmax.f32 %v13862_v15, 0.0  ;;  %v6869_v18 = vmax.f32 %v13867_v62, 0.0  ;;  %v6870_v9 = vmax.f32 %v13872_v8, 0.0  ;;  %v6871_v39 = vmax.f32 %v13877_v28, 0.0 }
 0xc25   : > { %6914 = vst [vmem:[%s13964_s30 + $0xb0] sm:$0xff] %v6850_v12  ;;  %6915 = vst [vmem:[%s13964_s30 + $0xb8] sm:$0xff] %v6851_v24  ;;  %v6872_v53 = vmax.f32 %v13882_v13, 0.0  ;;  %v6873_v16 = vmax.f32 %v13887_v6, 0.0  ;;  %v6874_v15 = vmax.f32 %v13892_v0, 0.0  ;;  %v15204_v57 = vld [vmem:[#allocation28_spill] sm:$0xff] }
 0xc26   : > { %6916 = vst [vmem:[%s13964_s30 + $0xc0] sm:$0xff] %v6852_v51  ;;  %6917 = vst [vmem:[%s13964_s30 + $0xc8] sm:$0xff] %v6853_v38  ;;  %v6875_v62 = vmax.f32 %v15204_v57, 0.0  ;;  %v15205_v8 = vld [vmem:[#allocation12_spill] sm:$0xff]  ;;  %v15206_v49 = vld [vmem:[#allocation13_spill] sm:$0xff]  ;;  %v6878_v13 = vmax.f32 %v13912_v32, 0.0 }
 0xc27   : > { %6918 = vst [vmem:[%s13964_s30 + $0xd0] sm:$0xff] %v6854_v3  ;;  %6919 = vst [vmem:[%s13964_s30 + $0xd8] sm:$0xff] %v6855_v26  ;;  %v6876_v28 = vmax.f32 %v15205_v8, 0.0  ;;  %v6877_v29 = vmax.f32 %v15206_v49, 0.0  ;;  %v15207_v44 = vld [vmem:[#allocation21_spill] sm:$0xff]  ;;  %v15208_v0 = vld [vmem:[#allocation34_spill] sm:$0xff] }
 0xc28   : > { %6920 = vst [vmem:[%s13964_s30 + $0xe0] sm:$0xff] %v6856_v63  ;;  %6921 = vst [vmem:[%s13964_s30 + $0xe8] sm:$0xff] %v6857_v7  ;;  %v6879_v6 = vmax.f32 %v15207_v44, 0.0  ;;  %v6880_v19 = vmax.f32 %v15208_v0, 0.0  ;;  %v15209_v58 = vld [vmem:[#allocation18_spill] sm:$0xff]  ;;  %v15210_v21 = vld [vmem:[#allocation20_spill] sm:$0xff] }
 0xc29   : > { %6922 = vst [vmem:[%s13964_s30 + $0xf0] sm:$0xff] %v6858_v23  ;;  %6923 = vst [vmem:[%s13964_s30 + $0xf8] sm:$0xff] %v6859_v43  ;;  %v6881_v10 = vmax.f32 %v15209_v58, 0.0  ;;  %v6882_v47 = vmax.f32 %v15210_v21, 0.0  ;;  %v6883_v4 = vmax.f32 %v13937_v2, 0.0  ;;  %v6884_v32 = vmax.f32 %v13942_v22, 0.0 }
 0xc2a   : > { %6924 = vst [vmem:[%s13964_s30 + $0x100] sm:$0xff] %v6860_v61  ;;  %6925 = vst [vmem:[%s13964_s30 + $0x108] sm:$0xff] %v6861_v31  ;;  %v6885_v25 = vmax.f32 %v13947_v37, 0.0  ;;  %v6886_v59 = vmax.f32 %v13952_v33, 0.0  ;;  %v6887_v35 = vmax.f32 %v13957_v46, 0.0  ;;  %v6888_v22 = vmax.f32 %v13969_v30, 0.0 }
 0xc2b   : > { %6926 = vst [vmem:[%s13964_s30 + $0x110] sm:$0xff] %v6862_v17  ;;  %6927 = vst [vmem:[%s13964_s30 + $0x118] sm:$0xff] %v6863_v56  ;;  %v6889_v2 = vmax.f32 %v13974_v5, 0.0  ;;  %v6890_v37 = vmax.f32 %v13979_v52, 0.0  ;;  %v6891_v33 = vmax.f32 %v13984_v1, 0.0 }
 0xc2c   : > { %6928 = vst [vmem:[%s13964_s30 + $0x120] sm:$0xff] %v6864_v20  ;;  %6929 = vst [vmem:[%s13964_s30 + $0x128] sm:$0xff] %v6865_v27 }
 0xc2d   : > { %6930 = vst [vmem:[%s13964_s30 + $0x130] sm:$0xff] %v6866_v60  ;;  %6931 = vst [vmem:[%s13964_s30 + $0x138] sm:$0xff] %v6867_v34 }
 0xc2e   : > { %6932 = vst [vmem:[%s13964_s30 + $0x140] sm:$0xff] %v6868_v50  ;;  %6933 = vst [vmem:[%s13964_s30 + $0x148] sm:$0xff] %v6869_v18 }
 0xc2f   : > { %6934 = vst [vmem:[%s13964_s30 + $0x150] sm:$0xff] %v6870_v9  ;;  %6935 = vst [vmem:[%s13964_s30 + $0x158] sm:$0xff] %v6871_v39 }
 0xc30   : > { %6936 = vst [vmem:[%s13964_s30 + $0x160] sm:$0xff] %v6872_v53  ;;  %6937 = vst [vmem:[%s13964_s30 + $0x168] sm:$0xff] %v6873_v16 }
 0xc31   : > { %6938 = vst [vmem:[%s13964_s30 + $0x170] sm:$0xff] %v6874_v15  ;;  %6939 = vst [vmem:[%s13964_s30 + $0x178] sm:$0xff] %v6875_v62 }
 0xc32   : > { %6940 = vst [vmem:[%s13964_s30 + $0x180] sm:$0xff] %v6876_v28  ;;  %6941 = vst [vmem:[%s13964_s30 + $0x188] sm:$0xff] %v6877_v29 }
 0xc33   : > { %6942 = vst [vmem:[%s13964_s30 + $0x190] sm:$0xff] %v6878_v13  ;;  %6943 = vst [vmem:[%s13964_s30 + $0x198] sm:$0xff] %v6879_v6 }
 0xc34   : > { %6944 = vst [vmem:[%s13964_s30 + $0x1a0] sm:$0xff] %v6880_v19  ;;  %6945 = vst [vmem:[%s13964_s30 + $0x1a8] sm:$0xff] %v6881_v10 }
 0xc35   : > { %6946 = vst [vmem:[%s13964_s30 + $0x1b0] sm:$0xff] %v6882_v47  ;;  %6947 = vst [vmem:[%s13964_s30 + $0x1b8] sm:$0xff] %v6883_v4 }
 0xc36   : > { %6948 = vst [vmem:[%s13964_s30 + $0x1c0] sm:$0xff] %v6884_v32  ;;  %6949 = vst [vmem:[%s13964_s30 + $0x1c8] sm:$0xff] %v6885_v25 }
 0xc37   : > { %6950 = vst [vmem:[%s13964_s30 + $0x1d0] sm:$0xff] %v6886_v59  ;;  %6951 = vst [vmem:[%s13964_s30 + $0x1d8] sm:$0xff] %v6887_v35 }
 0xc38   : > { %6952 = vst [vmem:[%s13964_s30 + $0x1e0] sm:$0xff] %v6888_v22  ;;  %6953 = vst [vmem:[%s13964_s30 + $0x1e8] sm:$0xff] %v6889_v2 }
 0xc39   : > { %6954 = vst [vmem:[%s13964_s30 + $0x1f0] sm:$0xff] %v6890_v37  ;;  %6955 = vst [vmem:[%s13964_s30 + $0x1f8] sm:$0xff] %v6891_v33 }
 0xc3a PF: > { %s27_s24 = sadd.s32 1, %s7868_s24  }
 0xc3b   : > { %p24_p4 = scmp.ge.s32.totalorder %s27_s24, 4  }
 0xc3d   :  { %26 = sbr.rel (!%p24_p4) target bundleno = 3 (0x3), region = 121 }

</bundles_post_ra>
